<compile_context>
chip_gen: v5e
topology: v5e:2x2
jax: 0.10.0
libtpu: 0.0.40
codegen_flags: <defaults>
</compile_context>

<pallas_src>
import functools

import jax
import jax.numpy as jnp
from jax.experimental import pallas as pl
from jax.experimental.pallas import tpu as pltpu


# ---------------------------------------------------------------------------
# Layer configuration (mirrors WaveDiscriminatorBlock.__init__)
# ---------------------------------------------------------------------------
LAYER_CFGS = [
    dict(cin=1,    cout=16,   k=15, stride=1, pad=7,  groups=1,   reflect=True,  act=True),
    dict(cin=16,   cout=64,   k=41, stride=4, pad=20, groups=4,   reflect=False, act=True),
    dict(cin=64,   cout=256,  k=41, stride=4, pad=20, groups=16,  reflect=False, act=True),
    dict(cin=256,  cout=1024, k=41, stride=4, pad=20, groups=64,  reflect=False, act=True),
    dict(cin=1024, cout=1024, k=41, stride=4, pad=20, groups=256, reflect=False, act=True),
    dict(cin=1024, cout=1024, k=5,  stride=1, pad=2,  groups=1,   reflect=False, act=True),
    dict(cin=1024, cout=1,    k=3,  stride=1, pad=1,  groups=1,   reflect=False, act=False),
]

LEAKY_SLOPE = 0.2
MATMUL_DTYPE = jnp.bfloat16     # MXU-native matmul inputs; accumulation stays f32
BLOCK_BUDGET = 6 << 20          # target bytes for one M-block's inputs+outputs
WEIGHT_BUDGET = 4 << 20         # target bytes for one weight slab


def _largest_divisor(n, cap, multiple_of=1):
    """Largest divisor of n that is <= cap and a multiple of `multiple_of`."""
    for d in range(min(n, int(cap)), 0, -1):
        if n % d == 0 and d % multiple_of == 0:
            return d
    return None


def _vmem_limit_bytes(needed):
    """Per-call VMEM limit: what the blocks need, clamped to the device."""
    try:
        cap = int(pltpu.get_tpu_info().vmem_capacity_bytes)
    except Exception:
        cap = 64 << 20                       # v7x per-core worst case
    cap = max((cap * 3) // 4, 48 << 20)      # headroom; never below 48 MiB
    return int(min(max(needed, 32 << 20), cap))


# ---------------------------------------------------------------------------
# Pallas kernel: one lane-dense output block of a (grouped) conv as a matmul.
#   p_ref: (1, m_blk, Kcb)  bf16  im2col patches for this channel block
#   w_ref: (1, Kcb, n_blk)  bf16  (block-diagonal) weight slab
#   b_ref: (1, n_blk)       f32   bias
#   o_ref: (m_blk, n_blk)   f32   output tile (single store, bias+act fused)
# ---------------------------------------------------------------------------
def _conv_block_kernel(p_ref, w_ref, b_ref, o_ref, *, apply_act, slope):
    y = jnp.dot(p_ref[0], w_ref[0], preferred_element_type=jnp.float32)
    y = y + b_ref[...]
    if apply_act:
        y = jnp.where(y >= 0, y, slope * y)
    o_ref[...] = y


def _conv_call(patches, wbd, bias, *, apply_act):
    """patches: (Gp, M, Kcb); wbd: (n_cb, Kcb, n_blk); bias: (1, n_cb*n_blk)."""
    Gp, M, Kcb = patches.shape
    n_cb, Kcb_w, n_blk = wbd.shape
    assert Kcb_w == Kcb and Gp in (1, n_cb)
    assert bias.shape == (1, n_cb * n_blk)

    itemsize = patches.dtype.itemsize
    row_bytes = Kcb * itemsize + n_blk * 4
    cap_rows = max(8, min(512, BLOCK_BUDGET // row_bytes))
    if M <= cap_rows:
        m_blk = M
    else:
        m_blk = _largest_divisor(M, cap_rows, multiple_of=8) or M
    n_m = M // m_blk

    if Gp == 1:                               # patches shared by all channel blocks
        p_index = lambda cb, m: (0, m, 0)
    else:                                     # one patch slab per channel block
        p_index = lambda cb, m: (cb, m, 0)

    needed = 2 * (m_blk * Kcb * itemsize
                  + Kcb * n_blk * wbd.dtype.itemsize
                  + m_blk * n_blk * 4
                  + n_blk * 4) + (8 << 20)

    kernel = functools.partial(_conv_block_kernel, apply_act=apply_act,
                               slope=LEAKY_SLOPE)
    return pl.pallas_call(
        kernel,
        out_shape=jax.ShapeDtypeStruct((M, n_cb * n_blk), jnp.float32),
        grid_spec=pltpu.PrefetchScalarGridSpec(
            num_scalar_prefetch=0,
            grid=(n_cb, n_m),                 # m inner -> weight slab stays resident
            in_specs=[
                pl.BlockSpec((1, m_blk, Kcb), p_index),
                pl.BlockSpec((1, Kcb, n_blk), lambda cb, m: (cb, 0, 0)),
                pl.BlockSpec((1, n_blk),      lambda cb, m: (0, cb)),
            ],
            out_specs=pl.BlockSpec((m_blk, n_blk), lambda cb, m: (m, cb)),
        ),
        compiler_params=pltpu.CompilerParams(
            dimension_semantics=("parallel", "parallel"),
            vmem_limit_bytes=_vmem_limit_bytes(needed),
        ),
    )(patches, wbd, bias)


# ---------------------------------------------------------------------------
# Wrapper glue: weight_norm, im2col, group -> lane-dense block packing.
# ---------------------------------------------------------------------------
def effective_weight(v, g):
    """weight_norm forward: w = g * v / ||v||, norm over (in, k) per out-channel."""
    norm = jnp.sqrt(jnp.sum(v * v, axis=(1, 2), keepdims=True))
    return (g[:, None, None] / norm) * v


def _layer_forward(x_nlc, v, g, b, cfg):
    """x_nlc: (B, L, C_in) f32 -> (B, l_out, C_out) f32."""
    B, L, C_in = x_nlc.shape
    K, stride, pad, G = cfg["k"], cfg["stride"], cfg["pad"], cfg["groups"]
    C_out = cfg["cout"]
    Cg_in, Cg_out = C_in // G, C_out // G

    w = effective_weight(v, g)                          # (C_out, Cg_in, K) f32

    mode = "reflect" if cfg["reflect"] else "constant"
    xp = jnp.pad(x_nlc, ((0, 0), (pad, pad), (0, 0)), mode=mode)
    l_out = (L + 2 * pad - K) // stride + 1
    M = B * l_out

    # im2col: fold the K taps into the contraction, (k, ci)-ordered.
    # TODO(synk): fold taps in-kernel for the stride-1 tail layers (K-fold HBM).
    taps = [xp[:, k: k + stride * (l_out - 1) + 1: stride, :] for k in range(K)]
    cols = jnp.stack(taps, axis=2)                      # (B, l_out, K, C_in)

    if Cg_out <= 128:
        # Grouped / narrow-output path (layers 0-4, 6): pack gb whole groups
        # into one lane-dense output block with a block-diagonal weight slab.
        gb = _largest_divisor(G, max(1, 128 // Cg_out))
        n_cb = G // gb
        Kc = K * Cg_in
        Kcb = gb * Kc
        n_blk = gb * Cg_out

        patches = cols.reshape(B, l_out, K, n_cb, gb, Cg_in)
        patches = jnp.transpose(patches, (3, 0, 1, 4, 2, 5))
        patches = patches.reshape(n_cb, M, Kcb)         # contraction = (g, k, ci)

        wg = w.reshape(n_cb, gb, Cg_out, Cg_in, K)
        wg = jnp.transpose(wg, (0, 1, 4, 3, 2)).reshape(n_cb, gb, Kc, Cg_out)
        wbd = jnp.einsum("cgkn,gh->cgkhn", wg, jnp.eye(gb, dtype=wg.dtype))
        wbd = wbd.reshape(n_cb, Kcb, n_blk)             # block-diagonal slab
        bias = b.reshape(1, C_out)

        if C_out == 1:                                  # final layer: lane-pad 1->128
            n_blk = 128
            wbd = jnp.pad(wbd, ((0, 0), (0, 0), (0, n_blk - 1)))
            bias = jnp.pad(bias, ((0, 0), (0, n_blk - 1)))
    else:
        # Dense wide-output path (layer 5, G=1): tile the output channels.
        Kcb = K * C_in
        n_blk = (_largest_divisor(C_out, max(128, WEIGHT_BUDGET // (Kcb * 2)),
                                  multiple_of=128)
                 or _largest_divisor(C_out, C_out, multiple_of=128)
                 or C_out)
        n_cb = C_out // n_blk
        patches = cols.reshape(1, M, Kcb)               # contraction = (k, ci)
        wflat = jnp.transpose(w, (2, 1, 0)).reshape(Kcb, C_out)
        wbd = jnp.transpose(wflat.reshape(Kcb, n_cb, n_blk), (1, 0, 2))
        bias = b.reshape(1, C_out)

    y = _conv_call(patches.astype(MATMUL_DTYPE), wbd.astype(MATMUL_DTYPE),
                   bias.astype(jnp.float32), apply_act=cfg["act"])
    return y[:, :C_out].reshape(B, l_out, C_out)


def wave_discriminator_block(x_ncl, params):
    """Forward pass. x_ncl: (B, 1, L) f32. Returns list of 7 NCL feature maps."""
    x = jnp.transpose(x_ncl, (0, 2, 1))                 # NCL -> NLC (channels on lanes)
    feature_map = []
    for (v, g, b), cfg in zip(params, LAYER_CFGS):
        x = _layer_forward(x, v, g, b, cfg)
        feature_map.append(jnp.transpose(x, (0, 2, 1)))  # back to NCL for parity
    return feature_map


wave_discriminator_block_jit = jax.jit(wave_discriminator_block)


# ---------------------------------------------------------------------------
# Pure-JAX f32 reference (lax.conv_general_dilated) for correctness checking
# ---------------------------------------------------------------------------
def reference_forward(x_ncl, params):
    feats = []
    x = x_ncl
    for (v, g, b), cfg in zip(params, LAYER_CFGS):
        w = effective_weight(v, g)
        if cfg["reflect"]:
            xin = jnp.pad(x, ((0, 0), (0, 0), (cfg["pad"], cfg["pad"])),
                          mode="reflect")
            pads = [(0, 0)]
        else:
            xin = x
            pads = [(cfg["pad"], cfg["pad"])]
        y = jax.lax.conv_general_dilated(
            xin, w, window_strides=(cfg["stride"],), padding=pads,
            dimension_numbers=("NCH", "OIH", "NCH"),
            feature_group_count=cfg["groups"])
        y = y + b[None, :, None]
        if cfg["act"]:
            y = jnp.where(y >= 0, y, LEAKY_SLOPE * y)
        feats.append(y)
        x = y
    return feats


# ---------------------------------------------------------------------------
if __name__ == "__main__":
    key = jax.random.PRNGKey(0)

    # Deterministic synthetic (v, g, bias) parameters for each weight-normed conv.
    params = []
    for cfg in LAYER_CFGS:
        key, kv, kg, kb = jax.random.split(key, 4)
        cg_in = cfg["cin"] // cfg["groups"]
        fan_in = cg_in * cfg["k"]
        v = jax.random.normal(kv, (cfg["cout"], cg_in, cfg["k"]),
                              jnp.float32) / jnp.sqrt(float(fan_in))
        g = jax.random.uniform(kg, (cfg["cout"],), jnp.float32, 0.5, 1.5)
        b = jax.random.normal(kb, (cfg["cout"],), jnp.float32) * 0.05
        params.append((v, g, b))

    # Input: (batch=2, channels=1, seq=512) -- 512 divisible by 256, so every
    # stride-4 stage gives an integer length (512, 128, 32, 8, 2, 2, 2).
    B, L = 2, 512
    key, kx = jax.random.split(key)
    x = jax.random.normal(kx, (B, 1, L), jnp.float32)

    feats = jax.block_until_ready(wave_discriminator_block_jit(x, params))

    # Correctness check against the pure f32 lax reference (kernel uses bf16
    # matmul inputs with f32 accumulation, hence the scaled tolerance).
    ref = jax.block_until_ready(reference_forward(x, params))
    for i, (f, r) in enumerate(zip(feats, ref)):
        assert f.shape == r.shape, (i, f.shape, r.shape)
        scale = float(jnp.max(jnp.abs(r)))
        err = float(jnp.max(jnp.abs(f - r)))
        tol = 8e-2 * scale + 1e-2
        if not err <= tol:
            raise AssertionError(f"layer {i}: max abs err {err} (tol {tol})")

    print("KERNEL_OK")
</pallas_src>

<mosaic_0001>
module attributes {stable_mosaic.version = 11 : i64} {
  func.func @_conv_block_kernel(%arg0: i32, %arg1: i32, %arg2: memref<1x512x15xbf16, #tpu.memory_space<vmem>>, %arg3: memref<1x15x16xbf16, #tpu.memory_space<vmem>>, %arg4: memref<1x16xf32, #tpu.memory_space<vmem>>, %arg5: memref<512x16xf32, #tpu.memory_space<vmem>>) attributes {dimension_semantics = [#tpu.dimension_semantics<parallel>, #tpu.dimension_semantics<parallel>], iteration_bounds = array<i64: 1, 2>, scalar_prefetch = 0 : i64, scratch_operands = 0 : i64, tpu.core_type = #tpu.core_type<tc>, window_params = [{transform_indices = @transform_0, window_bounds = array<i64: 1, 512, 15>}, {transform_indices = @transform_1, window_bounds = array<i64: 1, 15, 16>}, {transform_indices = @transform_2, window_bounds = array<i64: 1, 16>}, {transform_indices = @transform_3, window_bounds = array<i64: 512, 16>}]} {
    %c0 = arith.constant 0 : index
    %c0_0 = arith.constant 0 : index
    %c0_1 = arith.constant 0 : index
    %0 = vector.load %arg2[%c0, %c0_0, %c0_1] : memref<1x512x15xbf16, #tpu.memory_space<vmem>>, vector<1x512x15xbf16>
    %1 = vector.shape_cast %0 : vector<1x512x15xbf16> to vector<512x15xbf16>
    %c0_2 = arith.constant 0 : index
    %c0_3 = arith.constant 0 : index
    %c0_4 = arith.constant 0 : index
    %2 = vector.load %arg3[%c0_2, %c0_3, %c0_4] : memref<1x15x16xbf16, #tpu.memory_space<vmem>>, vector<1x15x16xbf16>
    %3 = vector.shape_cast %2 : vector<1x15x16xbf16> to vector<15x16xbf16>
    %cst = arith.constant dense<0.000000e+00> : vector<512x16xf32>
    %4 = tpu.matmul %1, %3, %cst {dimension_numbers = #tpu.dot_dimension_numbers<[1], [0], [0], [1], [0, 0, 1, 1], [], []>} : vector<512x15xbf16>, vector<15x16xbf16>, vector<512x16xf32> -> vector<512x16xf32>
    %c0_5 = arith.constant 0 : index
    %c0_6 = arith.constant 0 : index
    %5 = vector.load %arg4[%c0_5, %c0_6] : memref<1x16xf32, #tpu.memory_space<vmem>>, vector<1x16xf32>
    %6 = vector.broadcast %5 : vector<1x16xf32> to vector<512x16xf32>
    %7 = arith.addf %4, %6 : vector<512x16xf32>
    %cst_7 = arith.constant 0.000000e+00 : f32
    %8 = vector.broadcast %cst_7 : f32 to vector<512x16xf32>
    %9 = arith.cmpf oge, %7, %8 : vector<512x16xf32>
    %cst_8 = arith.constant 2.000000e-01 : f32
    %10 = vector.broadcast %cst_8 : f32 to vector<512x16xf32>
    %11 = arith.mulf %10, %7 : vector<512x16xf32>
    %12 = arith.select %9, %7, %11 : vector<512x16xi1>, vector<512x16xf32>
    %c0_9 = arith.constant 0 : index
    %c0_10 = arith.constant 0 : index
    %13 = vector.load %arg5[%c0_9, %c0_10] : memref<512x16xf32, #tpu.memory_space<vmem>>, vector<512x16xf32>
    tpu.vector_store %arg5[%c0_9, %c0_10], %12 {strides = array<i32>} : memref<512x16xf32, #tpu.memory_space<vmem>>, vector<512x16xf32>,
    return
  }
  func.func @transform_0(%arg0: i32, %arg1: i32) -> (i32, i32, i32) {
    %c0_i32 = arith.constant 0 : i32
    %c0_i32_0 = arith.constant 0 : i32
    %c0_i32_1 = arith.constant 0 : i32
    return %c0_i32, %arg1, %c0_i32_0 : i32, i32, i32
  }
  func.func @transform_1(%arg0: i32, %arg1: i32) -> (i32, i32, i32) {
    %c0_i32 = arith.constant 0 : i32
    %c0_i32_0 = arith.constant 0 : i32
    %c0_i32_1 = arith.constant 0 : i32
    return %arg0, %c0_i32, %c0_i32_0 : i32, i32, i32
  }
  func.func @transform_2(%arg0: i32, %arg1: i32) -> (i32, i32) {
    %c0_i32 = arith.constant 0 : i32
    %c0_i32_0 = arith.constant 0 : i32
    return %c0_i32, %arg0 : i32, i32
  }
  func.func @transform_3(%arg0: i32, %arg1: i32) -> (i32, i32) {
    %c0_i32 = arith.constant 0 : i32
    return %arg1, %arg0 : i32, i32
  }
}

module attributes {stable_mosaic.version = 11 : i64} {
  func.func @_conv_block_kernel(%arg0: i32, %arg1: i32, %arg2: memref<1x256x656xbf16, #tpu.memory_space<vmem>>, %arg3: memref<1x656x64xbf16, #tpu.memory_space<vmem>>, %arg4: memref<1x64xf32, #tpu.memory_space<vmem>>, %arg5: memref<256x64xf32, #tpu.memory_space<vmem>>) attributes {dimension_semantics = [#tpu.dimension_semantics<parallel>, #tpu.dimension_semantics<parallel>], iteration_bounds = array<i64: 1, 1>, scalar_prefetch = 0 : i64, scratch_operands = 0 : i64, tpu.core_type = #tpu.core_type<tc>, window_params = [{transform_indices = @transform_0, window_bounds = array<i64: 1, 256, 656>}, {transform_indices = @transform_1, window_bounds = array<i64: 1, 656, 64>}, {transform_indices = @transform_2, window_bounds = array<i64: 1, 64>}, {transform_indices = @transform_3, window_bounds = array<i64: 256, 64>}]} {
    %c0 = arith.constant 0 : index
    %c0_0 = arith.constant 0 : index
    %c0_1 = arith.constant 0 : index
    %0 = vector.load %arg2[%c0, %c0_0, %c0_1] : memref<1x256x656xbf16, #tpu.memory_space<vmem>>, vector<1x256x656xbf16>
    %1 = vector.shape_cast %0 : vector<1x256x656xbf16> to vector<256x656xbf16>
    %c0_2 = arith.constant 0 : index
    %c0_3 = arith.constant 0 : index
    %c0_4 = arith.constant 0 : index
    %2 = vector.load %arg3[%c0_2, %c0_3, %c0_4] : memref<1x656x64xbf16, #tpu.memory_space<vmem>>, vector<1x656x64xbf16>
    %3 = vector.shape_cast %2 : vector<1x656x64xbf16> to vector<656x64xbf16>
    %cst = arith.constant dense<0.000000e+00> : vector<256x64xf32>
    %4 = tpu.matmul %1, %3, %cst {dimension_numbers = #tpu.dot_dimension_numbers<[1], [0], [0], [1], [0, 0, 1, 1], [], []>} : vector<256x656xbf16>, vector<656x64xbf16>, vector<256x64xf32> -> vector<256x64xf32>
    %c0_5 = arith.constant 0 : index
    %c0_6 = arith.constant 0 : index
    %5 = vector.load %arg4[%c0_5, %c0_6] : memref<1x64xf32, #tpu.memory_space<vmem>>, vector<1x64xf32>
    %6 = vector.broadcast %5 : vector<1x64xf32> to vector<256x64xf32>
    %7 = arith.addf %4, %6 : vector<256x64xf32>
    %cst_7 = arith.constant 0.000000e+00 : f32
    %8 = vector.broadcast %cst_7 : f32 to vector<256x64xf32>
    %9 = arith.cmpf oge, %7, %8 : vector<256x64xf32>
    %cst_8 = arith.constant 2.000000e-01 : f32
    %10 = vector.broadcast %cst_8 : f32 to vector<256x64xf32>
    %11 = arith.mulf %10, %7 : vector<256x64xf32>
    %12 = arith.select %9, %7, %11 : vector<256x64xi1>, vector<256x64xf32>
    %c0_9 = arith.constant 0 : index
    %c0_10 = arith.constant 0 : index
    %13 = vector.load %arg5[%c0_9, %c0_10] : memref<256x64xf32, #tpu.memory_space<vmem>>, vector<256x64xf32>
    tpu.vector_store %arg5[%c0_9, %c0_10], %12 {strides = array<i32>} : memref<256x64xf32, #tpu.memory_space<vmem>>, vector<256x64xf32>,
    return
  }
  func.func @transform_0(%arg0: i32, %arg1: i32) -> (i32, i32, i32) {
    %c0_i32 = arith.constant 0 : i32
    %c0_i32_0 = arith.constant 0 : i32
    %c0_i32_1 = arith.constant 0 : i32
    return %c0_i32, %arg1, %c0_i32_0 : i32, i32, i32
  }
  func.func @transform_1(%arg0: i32, %arg1: i32) -> (i32, i32, i32) {
    %c0_i32 = arith.constant 0 : i32
    %c0_i32_0 = arith.constant 0 : i32
    %c0_i32_1 = arith.constant 0 : i32
    return %arg0, %c0_i32, %c0_i32_0 : i32, i32, i32
  }
  func.func @transform_2(%arg0: i32, %arg1: i32) -> (i32, i32) {
    %c0_i32 = arith.constant 0 : i32
    %c0_i32_0 = arith.constant 0 : i32
    return %c0_i32, %arg0 : i32, i32
  }
  func.func @transform_3(%arg0: i32, %arg1: i32) -> (i32, i32) {
    %c0_i32 = arith.constant 0 : i32
    return %arg1, %arg0 : i32, i32
  }
}

module attributes {stable_mosaic.version = 11 : i64} {
  func.func @_conv_block_kernel(%arg0: i32, %arg1: i32, %arg2: memref<1x64x1312xbf16, #tpu.memory_space<vmem>>, %arg3: memref<1x1312x128xbf16, #tpu.memory_space<vmem>>, %arg4: memref<1x128xf32, #tpu.memory_space<vmem>>, %arg5: memref<64x128xf32, #tpu.memory_space<vmem>>) attributes {dimension_semantics = [#tpu.dimension_semantics<parallel>, #tpu.dimension_semantics<parallel>], iteration_bounds = array<i64: 2, 1>, scalar_prefetch = 0 : i64, scratch_operands = 0 : i64, tpu.core_type = #tpu.core_type<tc>, window_params = [{transform_indices = @transform_0, window_bounds = array<i64: 1, 64, 1312>}, {transform_indices = @transform_1, window_bounds = array<i64: 1, 1312, 128>}, {transform_indices = @transform_2, window_bounds = array<i64: 1, 128>}, {transform_indices = @transform_3, window_bounds = array<i64: 64, 128>}]} {
    %c0 = arith.constant 0 : index
    %c0_0 = arith.constant 0 : index
    %c0_1 = arith.constant 0 : index
    %0 = vector.load %arg2[%c0, %c0_0, %c0_1] : memref<1x64x1312xbf16, #tpu.memory_space<vmem>>, vector<1x64x1312xbf16>
    %1 = vector.shape_cast %0 : vector<1x64x1312xbf16> to vector<64x1312xbf16>
    %c0_2 = arith.constant 0 : index
    %c0_3 = arith.constant 0 : index
    %c0_4 = arith.constant 0 : index
    %2 = vector.load %arg3[%c0_2, %c0_3, %c0_4] : memref<1x1312x128xbf16, #tpu.memory_space<vmem>>, vector<1x1312x128xbf16>
    %3 = vector.shape_cast %2 : vector<1x1312x128xbf16> to vector<1312x128xbf16>
    %cst = arith.constant dense<0.000000e+00> : vector<64x128xf32>
    %4 = tpu.matmul %1, %3, %cst {dimension_numbers = #tpu.dot_dimension_numbers<[1], [0], [0], [1], [0, 0, 1, 1], [], []>} : vector<64x1312xbf16>, vector<1312x128xbf16>, vector<64x128xf32> -> vector<64x128xf32>
    %c0_5 = arith.constant 0 : index
    %c0_6 = arith.constant 0 : index
    %5 = vector.load %arg4[%c0_5, %c0_6] : memref<1x128xf32, #tpu.memory_space<vmem>>, vector<1x128xf32>
    %6 = vector.broadcast %5 : vector<1x128xf32> to vector<64x128xf32>
    %7 = arith.addf %4, %6 : vector<64x128xf32>
    %cst_7 = arith.constant 0.000000e+00 : f32
    %8 = vector.broadcast %cst_7 : f32 to vector<64x128xf32>
    %9 = arith.cmpf oge, %7, %8 : vector<64x128xf32>
    %cst_8 = arith.constant 2.000000e-01 : f32
    %10 = vector.broadcast %cst_8 : f32 to vector<64x128xf32>
    %11 = arith.mulf %10, %7 : vector<64x128xf32>
    %12 = arith.select %9, %7, %11 : vector<64x128xi1>, vector<64x128xf32>
    %c0_9 = arith.constant 0 : index
    %c0_10 = arith.constant 0 : index
    %13 = vector.load %arg5[%c0_9, %c0_10] : memref<64x128xf32, #tpu.memory_space<vmem>>, vector<64x128xf32>
    tpu.vector_store %arg5[%c0_9, %c0_10], %12 {strides = array<i32>} : memref<64x128xf32, #tpu.memory_space<vmem>>, vector<64x128xf32>,
    return
  }
  func.func @transform_0(%arg0: i32, %arg1: i32) -> (i32, i32, i32) {
    %c0_i32 = arith.constant 0 : i32
    %c0_i32_0 = arith.constant 0 : i32
    return %arg0, %arg1, %c0_i32 : i32, i32, i32
  }
  func.func @transform_1(%arg0: i32, %arg1: i32) -> (i32, i32, i32) {
    %c0_i32 = arith.constant 0 : i32
    %c0_i32_0 = arith.constant 0 : i32
    %c0_i32_1 = arith.constant 0 : i32
    return %arg0, %c0_i32, %c0_i32_0 : i32, i32, i32
  }
  func.func @transform_2(%arg0: i32, %arg1: i32) -> (i32, i32) {
    %c0_i32 = arith.constant 0 : i32
    %c0_i32_0 = arith.constant 0 : i32
    return %c0_i32, %arg0 : i32, i32
  }
  func.func @transform_3(%arg0: i32, %arg1: i32) -> (i32, i32) {
    %c0_i32 = arith.constant 0 : i32
    return %arg1, %arg0 : i32, i32
  }
}

module attributes {stable_mosaic.version = 11 : i64} {
  func.func @_conv_block_kernel(%arg0: i32, %arg1: i32, %arg2: memref<1x16x1312xbf16, #tpu.memory_space<vmem>>, %arg3: memref<1x1312x128xbf16, #tpu.memory_space<vmem>>, %arg4: memref<1x128xf32, #tpu.memory_space<vmem>>, %arg5: memref<16x128xf32, #tpu.memory_space<vmem>>) attributes {dimension_semantics = [#tpu.dimension_semantics<parallel>, #tpu.dimension_semantics<parallel>], iteration_bounds = array<i64: 8, 1>, scalar_prefetch = 0 : i64, scratch_operands = 0 : i64, tpu.core_type = #tpu.core_type<tc>, window_params = [{transform_indices = @transform_0, window_bounds = array<i64: 1, 16, 1312>}, {transform_indices = @transform_1, window_bounds = array<i64: 1, 1312, 128>}, {transform_indices = @transform_2, window_bounds = array<i64: 1, 128>}, {transform_indices = @transform_3, window_bounds = array<i64: 16, 128>}]} {
    %c0 = arith.constant 0 : index
    %c0_0 = arith.constant 0 : index
    %c0_1 = arith.constant 0 : index
    %0 = vector.load %arg2[%c0, %c0_0, %c0_1] : memref<1x16x1312xbf16, #tpu.memory_space<vmem>>, vector<1x16x1312xbf16>
    %1 = vector.shape_cast %0 : vector<1x16x1312xbf16> to vector<16x1312xbf16>
    %c0_2 = arith.constant 0 : index
    %c0_3 = arith.constant 0 : index
    %c0_4 = arith.constant 0 : index
    %2 = vector.load %arg3[%c0_2, %c0_3, %c0_4] : memref<1x1312x128xbf16, #tpu.memory_space<vmem>>, vector<1x1312x128xbf16>
    %3 = vector.shape_cast %2 : vector<1x1312x128xbf16> to vector<1312x128xbf16>
    %cst = arith.constant dense<0.000000e+00> : vector<16x128xf32>
    %4 = tpu.matmul %1, %3, %cst {dimension_numbers = #tpu.dot_dimension_numbers<[1], [0], [0], [1], [0, 0, 1, 1], [], []>} : vector<16x1312xbf16>, vector<1312x128xbf16>, vector<16x128xf32> -> vector<16x128xf32>
    %c0_5 = arith.constant 0 : index
    %c0_6 = arith.constant 0 : index
    %5 = vector.load %arg4[%c0_5, %c0_6] : memref<1x128xf32, #tpu.memory_space<vmem>>, vector<1x128xf32>
    %6 = vector.broadcast %5 : vector<1x128xf32> to vector<16x128xf32>
    %7 = arith.addf %4, %6 : vector<16x128xf32>
    %cst_7 = arith.constant 0.000000e+00 : f32
    %8 = vector.broadcast %cst_7 : f32 to vector<16x128xf32>
    %9 = arith.cmpf oge, %7, %8 : vector<16x128xf32>
    %cst_8 = arith.constant 2.000000e-01 : f32
    %10 = vector.broadcast %cst_8 : f32 to vector<16x128xf32>
    %11 = arith.mulf %10, %7 : vector<16x128xf32>
    %12 = arith.select %9, %7, %11 : vector<16x128xi1>, vector<16x128xf32>
    %c0_9 = arith.constant 0 : index
    %c0_10 = arith.constant 0 : index
    %13 = vector.load %arg5[%c0_9, %c0_10] : memref<16x128xf32, #tpu.memory_space<vmem>>, vector<16x128xf32>
    tpu.vector_store %arg5[%c0_9, %c0_10], %12 {strides = array<i32>} : memref<16x128xf32, #tpu.memory_space<vmem>>, vector<16x128xf32>,
    return
  }
  func.func @transform_0(%arg0: i32, %arg1: i32) -> (i32, i32, i32) {
    %c0_i32 = arith.constant 0 : i32
    %c0_i32_0 = arith.constant 0 : i32
    return %arg0, %arg1, %c0_i32 : i32, i32, i32
  }
  func.func @transform_1(%arg0: i32, %arg1: i32) -> (i32, i32, i32) {
    %c0_i32 = arith.constant 0 : i32
    %c0_i32_0 = arith.constant 0 : i32
    %c0_i32_1 = arith.constant 0 : i32
    return %arg0, %c0_i32, %c0_i32_0 : i32, i32, i32
  }
  func.func @transform_2(%arg0: i32, %arg1: i32) -> (i32, i32) {
    %c0_i32 = arith.constant 0 : i32
    %c0_i32_0 = arith.constant 0 : i32
    return %c0_i32, %arg0 : i32, i32
  }
  func.func @transform_3(%arg0: i32, %arg1: i32) -> (i32, i32) {
    %c0_i32 = arith.constant 0 : i32
    return %arg1, %arg0 : i32, i32
  }
}

module attributes {stable_mosaic.version = 11 : i64} {
  func.func @_conv_block_kernel(%arg0: i32, %arg1: i32, %arg2: memref<1x4x5248xbf16, #tpu.memory_space<vmem>>, %arg3: memref<1x5248x128xbf16, #tpu.memory_space<vmem>>, %arg4: memref<1x128xf32, #tpu.memory_space<vmem>>, %arg5: memref<4x128xf32, #tpu.memory_space<vmem>>) attributes {dimension_semantics = [#tpu.dimension_semantics<parallel>, #tpu.dimension_semantics<parallel>], iteration_bounds = array<i64: 8, 1>, scalar_prefetch = 0 : i64, scratch_operands = 0 : i64, tpu.core_type = #tpu.core_type<tc>, window_params = [{transform_indices = @transform_0, window_bounds = array<i64: 1, 4, 5248>}, {transform_indices = @transform_1, window_bounds = array<i64: 1, 5248, 128>}, {transform_indices = @transform_2, window_bounds = array<i64: 1, 128>}, {transform_indices = @transform_3, window_bounds = array<i64: 4, 128>}]} {
    %c0 = arith.constant 0 : index
    %c0_0 = arith.constant 0 : index
    %c0_1 = arith.constant 0 : index
    %0 = vector.load %arg2[%c0, %c0_0, %c0_1] : memref<1x4x5248xbf16, #tpu.memory_space<vmem>>, vector<1x4x5248xbf16>
    %1 = vector.shape_cast %0 : vector<1x4x5248xbf16> to vector<4x5248xbf16>
    %c0_2 = arith.constant 0 : index
    %c0_3 = arith.constant 0 : index
    %c0_4 = arith.constant 0 : index
    %2 = vector.load %arg3[%c0_2, %c0_3, %c0_4] : memref<1x5248x128xbf16, #tpu.memory_space<vmem>>, vector<1x5248x128xbf16>
    %3 = vector.shape_cast %2 : vector<1x5248x128xbf16> to vector<5248x128xbf16>
    %cst = arith.constant dense<0.000000e+00> : vector<4x128xf32>
    %4 = tpu.matmul %1, %3, %cst {dimension_numbers = #tpu.dot_dimension_numbers<[1], [0], [0], [1], [0, 0, 1, 1], [], []>} : vector<4x5248xbf16>, vector<5248x128xbf16>, vector<4x128xf32> -> vector<4x128xf32>
    %c0_5 = arith.constant 0 : index
    %c0_6 = arith.constant 0 : index
    %5 = vector.load %arg4[%c0_5, %c0_6] : memref<1x128xf32, #tpu.memory_space<vmem>>, vector<1x128xf32>
    %6 = vector.broadcast %5 : vector<1x128xf32> to vector<4x128xf32>
    %7 = arith.addf %4, %6 : vector<4x128xf32>
    %cst_7 = arith.constant 0.000000e+00 : f32
    %8 = vector.broadcast %cst_7 : f32 to vector<4x128xf32>
    %9 = arith.cmpf oge, %7, %8 : vector<4x128xf32>
    %cst_8 = arith.constant 2.000000e-01 : f32
    %10 = vector.broadcast %cst_8 : f32 to vector<4x128xf32>
    %11 = arith.mulf %10, %7 : vector<4x128xf32>
    %12 = arith.select %9, %7, %11 : vector<4x128xi1>, vector<4x128xf32>
    %c0_9 = arith.constant 0 : index
    %c0_10 = arith.constant 0 : index
    %13 = vector.load %arg5[%c0_9, %c0_10] : memref<4x128xf32, #tpu.memory_space<vmem>>, vector<4x128xf32>
    tpu.vector_store %arg5[%c0_9, %c0_10], %12 {strides = array<i32>} : memref<4x128xf32, #tpu.memory_space<vmem>>, vector<4x128xf32>,
    return
  }
  func.func @transform_0(%arg0: i32, %arg1: i32) -> (i32, i32, i32) {
    %c0_i32 = arith.constant 0 : i32
    %c0_i32_0 = arith.constant 0 : i32
    return %arg0, %arg1, %c0_i32 : i32, i32, i32
  }
  func.func @transform_1(%arg0: i32, %arg1: i32) -> (i32, i32, i32) {
    %c0_i32 = arith.constant 0 : i32
    %c0_i32_0 = arith.constant 0 : i32
    %c0_i32_1 = arith.constant 0 : i32
    return %arg0, %c0_i32, %c0_i32_0 : i32, i32, i32
  }
  func.func @transform_2(%arg0: i32, %arg1: i32) -> (i32, i32) {
    %c0_i32 = arith.constant 0 : i32
    %c0_i32_0 = arith.constant 0 : i32
    return %c0_i32, %arg0 : i32, i32
  }
  func.func @transform_3(%arg0: i32, %arg1: i32) -> (i32, i32) {
    %c0_i32 = arith.constant 0 : i32
    return %arg1, %arg0 : i32, i32
  }
}

module attributes {stable_mosaic.version = 11 : i64} {
  func.func @_conv_block_kernel(%arg0: i32, %arg1: i32, %arg2: memref<1x4x5120xbf16, #tpu.memory_space<vmem>>, %arg3: memref<1x5120x256xbf16, #tpu.memory_space<vmem>>, %arg4: memref<1x256xf32, #tpu.memory_space<vmem>>, %arg5: memref<4x256xf32, #tpu.memory_space<vmem>>) attributes {dimension_semantics = [#tpu.dimension_semantics<parallel>, #tpu.dimension_semantics<parallel>], iteration_bounds = array<i64: 4, 1>, scalar_prefetch = 0 : i64, scratch_operands = 0 : i64, tpu.core_type = #tpu.core_type<tc>, window_params = [{transform_indices = @transform_0, window_bounds = array<i64: 1, 4, 5120>}, {transform_indices = @transform_1, window_bounds = array<i64: 1, 5120, 256>}, {transform_indices = @transform_2, window_bounds = array<i64: 1, 256>}, {transform_indices = @transform_3, window_bounds = array<i64: 4, 256>}]} {
    %c0 = arith.constant 0 : index
    %c0_0 = arith.constant 0 : index
    %c0_1 = arith.constant 0 : index
    %0 = vector.load %arg2[%c0, %c0_0, %c0_1] : memref<1x4x5120xbf16, #tpu.memory_space<vmem>>, vector<1x4x5120xbf16>
    %1 = vector.shape_cast %0 : vector<1x4x5120xbf16> to vector<4x5120xbf16>
    %c0_2 = arith.constant 0 : index
    %c0_3 = arith.constant 0 : index
    %c0_4 = arith.constant 0 : index
    %2 = vector.load %arg3[%c0_2, %c0_3, %c0_4] : memref<1x5120x256xbf16, #tpu.memory_space<vmem>>, vector<1x5120x256xbf16>
    %3 = vector.shape_cast %2 : vector<1x5120x256xbf16> to vector<5120x256xbf16>
    %cst = arith.constant dense<0.000000e+00> : vector<4x256xf32>
    %4 = tpu.matmul %1, %3, %cst {dimension_numbers = #tpu.dot_dimension_numbers<[1], [0], [0], [1], [0, 0, 1, 1], [], []>} : vector<4x5120xbf16>, vector<5120x256xbf16>, vector<4x256xf32> -> vector<4x256xf32>
    %c0_5 = arith.constant 0 : index
    %c0_6 = arith.constant 0 : index
    %5 = vector.load %arg4[%c0_5, %c0_6] : memref<1x256xf32, #tpu.memory_space<vmem>>, vector<1x256xf32>
    %6 = vector.broadcast %5 : vector<1x256xf32> to vector<4x256xf32>
    %7 = arith.addf %4, %6 : vector<4x256xf32>
    %cst_7 = arith.constant 0.000000e+00 : f32
    %8 = vector.broadcast %cst_7 : f32 to vector<4x256xf32>
    %9 = arith.cmpf oge, %7, %8 : vector<4x256xf32>
    %cst_8 = arith.constant 2.000000e-01 : f32
    %10 = vector.broadcast %cst_8 : f32 to vector<4x256xf32>
    %11 = arith.mulf %10, %7 : vector<4x256xf32>
    %12 = arith.select %9, %7, %11 : vector<4x256xi1>, vector<4x256xf32>
    %c0_9 = arith.constant 0 : index
    %c0_10 = arith.constant 0 : index
    %13 = vector.load %arg5[%c0_9, %c0_10] : memref<4x256xf32, #tpu.memory_space<vmem>>, vector<4x256xf32>
    tpu.vector_store %arg5[%c0_9, %c0_10], %12 {strides = array<i32>} : memref<4x256xf32, #tpu.memory_space<vmem>>, vector<4x256xf32>,
    return
  }
  func.func @transform_0(%arg0: i32, %arg1: i32) -> (i32, i32, i32) {
    %c0_i32 = arith.constant 0 : i32
    %c0_i32_0 = arith.constant 0 : i32
    %c0_i32_1 = arith.constant 0 : i32
    return %c0_i32, %arg1, %c0_i32_0 : i32, i32, i32
  }
  func.func @transform_1(%arg0: i32, %arg1: i32) -> (i32, i32, i32) {
    %c0_i32 = arith.constant 0 : i32
    %c0_i32_0 = arith.constant 0 : i32
    %c0_i32_1 = arith.constant 0 : i32
    return %arg0, %c0_i32, %c0_i32_0 : i32, i32, i32
  }
  func.func @transform_2(%arg0: i32, %arg1: i32) -> (i32, i32) {
    %c0_i32 = arith.constant 0 : i32
    %c0_i32_0 = arith.constant 0 : i32
    return %c0_i32, %arg0 : i32, i32
  }
  func.func @transform_3(%arg0: i32, %arg1: i32) -> (i32, i32) {
    %c0_i32 = arith.constant 0 : i32
    return %arg1, %arg0 : i32, i32
  }
}

module attributes {stable_mosaic.version = 11 : i64} {
  func.func @_conv_block_kernel(%arg0: i32, %arg1: i32, %arg2: memref<1x4x3072xbf16, #tpu.memory_space<vmem>>, %arg3: memref<1x3072x128xbf16, #tpu.memory_space<vmem>>, %arg4: memref<1x128xf32, #tpu.memory_space<vmem>>, %arg5: memref<4x128xf32, #tpu.memory_space<vmem>>) attributes {dimension_semantics = [#tpu.dimension_semantics<parallel>, #tpu.dimension_semantics<parallel>], iteration_bounds = array<i64: 1, 1>, scalar_prefetch = 0 : i64, scratch_operands = 0 : i64, tpu.core_type = #tpu.core_type<tc>, window_params = [{transform_indices = @transform_0, window_bounds = array<i64: 1, 4, 3072>}, {transform_indices = @transform_1, window_bounds = array<i64: 1, 3072, 128>}, {transform_indices = @transform_2, window_bounds = array<i64: 1, 128>}, {transform_indices = @transform_3, window_bounds = array<i64: 4, 128>}]} {
    %c0 = arith.constant 0 : index
    %c0_0 = arith.constant 0 : index
    %c0_1 = arith.constant 0 : index
    %0 = vector.load %arg2[%c0, %c0_0, %c0_1] : memref<1x4x3072xbf16, #tpu.memory_space<vmem>>, vector<1x4x3072xbf16>
    %1 = vector.shape_cast %0 : vector<1x4x3072xbf16> to vector<4x3072xbf16>
    %c0_2 = arith.constant 0 : index
    %c0_3 = arith.constant 0 : index
    %c0_4 = arith.constant 0 : index
    %2 = vector.load %arg3[%c0_2, %c0_3, %c0_4] : memref<1x3072x128xbf16, #tpu.memory_space<vmem>>, vector<1x3072x128xbf16>
    %3 = vector.shape_cast %2 : vector<1x3072x128xbf16> to vector<3072x128xbf16>
    %cst = arith.constant dense<0.000000e+00> : vector<4x128xf32>
    %4 = tpu.matmul %1, %3, %cst {dimension_numbers = #tpu.dot_dimension_numbers<[1], [0], [0], [1], [0, 0, 1, 1], [], []>} : vector<4x3072xbf16>, vector<3072x128xbf16>, vector<4x128xf32> -> vector<4x128xf32>
    %c0_5 = arith.constant 0 : index
    %c0_6 = arith.constant 0 : index
    %5 = vector.load %arg4[%c0_5, %c0_6] : memref<1x128xf32, #tpu.memory_space<vmem>>, vector<1x128xf32>
    %6 = vector.broadcast %5 : vector<1x128xf32> to vector<4x128xf32>
    %7 = arith.addf %4, %6 : vector<4x128xf32>
    %c0_7 = arith.constant 0 : index
    %c0_8 = arith.constant 0 : index
    %8 = vector.load %arg5[%c0_7, %c0_8] : memref<4x128xf32, #tpu.memory_space<vmem>>, vector<4x128xf32>
    tpu.vector_store %arg5[%c0_7, %c0_8], %7 {strides = array<i32>} : memref<4x128xf32, #tpu.memory_space<vmem>>, vector<4x128xf32>,
    return
  }
  func.func @transform_0(%arg0: i32, %arg1: i32) -> (i32, i32, i32) {
    %c0_i32 = arith.constant 0 : i32
    %c0_i32_0 = arith.constant 0 : i32
    %c0_i32_1 = arith.constant 0 : i32
    return %c0_i32, %arg1, %c0_i32_0 : i32, i32, i32
  }
  func.func @transform_1(%arg0: i32, %arg1: i32) -> (i32, i32, i32) {
    %c0_i32 = arith.constant 0 : i32
    %c0_i32_0 = arith.constant 0 : i32
    %c0_i32_1 = arith.constant 0 : i32
    return %arg0, %c0_i32, %c0_i32_0 : i32, i32, i32
  }
  func.func @transform_2(%arg0: i32, %arg1: i32) -> (i32, i32) {
    %c0_i32 = arith.constant 0 : i32
    %c0_i32_0 = arith.constant 0 : i32
    return %c0_i32, %arg0 : i32, i32
  }
  func.func @transform_3(%arg0: i32, %arg1: i32) -> (i32, i32) {
    %c0_i32 = arith.constant 0 : i32
    return %arg1, %arg0 : i32, i32
  }
}

</mosaic_0001>

<bundles_post_ra>
// kernel: wave_discriminator_block.7
= control target key start
LH: loop header
LB: loop body
LE: loop exit
PB: predicated region body
PF: predicated region fallthrough
CT: control target
= control target key end

     0   :  { %8 = vsyncpa [#allocation3], 0  ;;  %s1435_s12 = smov 0   ;;  %s1437_s13 = smov 0   ;;  %s1741_s0 = inlined_call_operand.vmem [shape: bf16[1,1024,15], index: 0, kind: input, shape index: {}]   ;;  %s1742_s1 = inlined_call_operand.vmem [shape: bf16[1,15,16], index: 1, kind: input, shape index: {}]   ;;  %s1743_s2 = inlined_call_operand.hbm [shape: f32[1,16], index: 2, kind: input, shape index: {}]   ;;  %s1744_s3 = inlined_call_operand.vmem [shape: f32[1024,16], index: 3, kind: output, shape index: {}]  }
   0x1   :  { %s1439_s14 = smov 0  }
   0x2 LB: > { %s1104_s15 = sadd.s32 4294967295, %s1411_s14   ;;  %s23_s16 = sadd.s32 1, %s1407_s13  ;;  %s1411_s14 = sphi %s1439_s14, %s14_s14   ;;  %s1407_s13 = sphi %s1437_s13, %s1746_s13   ;;  %s1403_s12 = sphi %s1435_s12, %s1745_s12  }
   0x3   : > { %p24_p0 = scmp.ge.s32.totalorder %s23_s16, 2  ;;  %p1106_p1 = scmp.ge.s32.totalorder %s1411_s14, 1 }
   0x4   : > { %p137_p2 = scmp.lt.s32.totalorder %s1411_s14, 3  ;;  %p1326_p4 = scmp.eq.s32.totalorder %s1104_s15, 0 }
   0x5   : > { %s1748_s16 = smov (%p24_p0, %s23_s16), 0  ;;  %s158_s19 = sshll.u32 %s1743_s2, 4  ;;  %s159_s19 = int_to_ptr.hbm [resolvable:$true] %s158_s19 }
   0x6   : > { %p138_p3 = pnand %p1106_p1, %p137_p2  ;;  %s1413_s20 = smov [#allocation2]  }
   0x7   : > { %s160_s21 = sshll.u32 %s1413_s20, 4  ;;  %s161_s21 = int_to_ptr.vmem [resolvable:$true] %s160_s21 }
   0x8   : > { %p1322_p5 = pneg %p138_p3  ;;  %182 = sbr.rel (%p138_p3) target bundleno = 282 (0x11a), region = 32 }
   0xa   : > { %p1323_p6 = pnand %p1326_p4, %p1322_p5 }
   0xc   : > { %1325 = dma.hbm_to_vmem [thread:$0]  (!%p1323_p6), %s159_s19, 16, %s161_s21, [#allocation3]  }
   0xd   : > { %1398 = dma.done.wait (%p1326_p4), [#allocation3], 16  }
   0xe   : > { %1400 = vsyncadd (%p1326_p4), [#allocation3], 4294967280  ;;  %vm568_vm0 = vcmask 1046528   ;;  %s1112_s22 = sshll.u32 %s1403_s12, 6  ;;  %vm569_vm1 = vcmask 1047552   ;;  %v1414_v0 = vmov 65535  }
   0xf   : > { %p216_p7 = scmp.lt.s32.totalorder %s1112_s22, 127  ;;  %v570_v1 = vsel %vm568_vm0, 4294967295, %v1414_v0  ;;  %v1314_v3 = vld [vmem:[%s1742_s1] sm:$0xff]  ;;  %vm471_vm2 = vcmask 121856   ;;  %vm936_vm3 = vcmask 130048  }
  0x10   : > { %v571_v2 = vsel %vm569_vm1, %v570_v1, 0  ;;  %v1532_v37 = vld [vmem:[#allocation2] ss:$0 sm:$0xff] }
  0x11   : > { %s1750_s22 = smov (!%p216_p7, %s1112_s22), 127  ;;  %v573_v4 = vand.u32 %v1314_v3, %v571_v2 }
  0x12   : > { %s1113_s23 = sshll.u32 %s1750_s22, 2  ;;  %s1115_s29 = sshll.u32 %s1750_s22, 3 }
  0x13   : > { %s1466_s28 = scalar_lea.vmem %s1741_s0, %s1113_s23  ;;  %582 = vmatpush.bf16.msra.mxu0 %v573_v4  ;;  %1315 = vmatpush.bf16.msra.mxu1 %v573_v4  ;;  %s1540_s5 = scalar_lea.vmem %s1744_s3, %s1115_s29 }
  0x14   : > { %v1282_v5 = vld [vmem:[%s1466_s28] sm:$0xff]  ;;  %1316 = vmatpush.bf16.msra.mxu2 %v573_v4  ;;  %1317 = vmatpush.bf16.msra.mxu3 %v573_v4  ;;  %v1283_v9 = vld [vmem:[%s1466_s28 + $0x8] sm:$0xff]  ;;  %v1284_v13 = vld [vmem:[%s1466_s28 + $0x10] sm:$0xff] }
  0x15   : > { %v1290_v6 = vld [vmem:[%s1466_s28 + $0x40] sm:$0xff]  ;;  %v1291_v10 = vld [vmem:[%s1466_s28 + $0x48] sm:$0xff]  ;;  %v1292_v14 = vld [vmem:[%s1466_s28 + $0x50] sm:$0xff] }
  0x16   : > { %v1298_v7 = vld [vmem:[%s1466_s28 + $0x80] sm:$0xff]  ;;  %1248 = vmatmul.msk.bf16.vlgmr.msra.gmra.mxu0 %vm471_vm2, %v1282_v5  ;;  %1256 = vmatmul.msk.bf16.vlgmr.msra.gmra.mxu1 %vm471_vm2, %v1290_v6  ;;  %v1299_v11 = vld [vmem:[%s1466_s28 + $0x88] sm:$0xff]  ;;  %v1300_v15 = vld [vmem:[%s1466_s28 + $0x90] sm:$0xff] }
  0x17   : > { %v1306_v8 = vld [vmem:[%s1466_s28 + $0xc0] sm:$0xff]  ;;  %1264 = vmatmul.msk.bf16.vlgmr.msra.gmra.mxu2 %vm471_vm2, %v1298_v7  ;;  %v1307_v12 = vld [vmem:[%s1466_s28 + $0xc8] sm:$0xff]  ;;  %v1308_v16 = vld [vmem:[%s1466_s28 + $0xd0] sm:$0xff] }
  0x18   : > { %1272 = vmatmul.msk.bf16.vlgmr.msra.gmra.mxu3 %vm471_vm2, %v1306_v8  ;;  %v1285_v17 = vld [vmem:[%s1466_s28 + $0x18] sm:$0xff]  ;;  %v1286_v21 = vld [vmem:[%s1466_s28 + $0x20] sm:$0xff]  ;;  %v1287_v25 = vld [vmem:[%s1466_s28 + $0x28] sm:$0xff] }
  0x19   : > { %v1293_v18 = vld [vmem:[%s1466_s28 + $0x58] sm:$0xff]  ;;  %v1294_v22 = vld [vmem:[%s1466_s28 + $0x60] sm:$0xff]  ;;  %v1295_v26 = vld [vmem:[%s1466_s28 + $0x68] sm:$0xff] }
  0x1a   : > { %v1301_v19 = vld [vmem:[%s1466_s28 + $0x98] sm:$0xff]  ;;  %v1302_v23 = vld [vmem:[%s1466_s28 + $0xa0] sm:$0xff]  ;;  %v1303_v27 = vld [vmem:[%s1466_s28 + $0xa8] sm:$0xff] }
  0x1b   : > { %v1309_v20 = vld [vmem:[%s1466_s28 + $0xd8] sm:$0xff]  ;;  %v1310_v24 = vld [vmem:[%s1466_s28 + $0xe0] sm:$0xff]  ;;  %v1311_v28 = vld [vmem:[%s1466_s28 + $0xe8] sm:$0xff] }
  0x1c   : > { %v1288_v29 = vld [vmem:[%s1466_s28 + $0x30] sm:$0xff]  ;;  %v1289_v33 = vld [vmem:[%s1466_s28 + $0x38] sm:$0xff] }
  0x1d   : > { %v1296_v30 = vld [vmem:[%s1466_s28 + $0x70] sm:$0xff]  ;;  %v1297_v34 = vld [vmem:[%s1466_s28 + $0x78] sm:$0xff] }
  0x1e   : > { %v1304_v31 = vld [vmem:[%s1466_s28 + $0xb0] sm:$0xff]  ;;  %v1305_v35 = vld [vmem:[%s1466_s28 + $0xb8] sm:$0xff] }
  0x1f   : > { %v1312_v32 = vld [vmem:[%s1466_s28 + $0xf0] sm:$0xff]  ;;  %v1313_v36 = vld [vmem:[%s1466_s28 + $0xf8] sm:$0xff] }
  0x26   : > { %1249 = vmatmul.msk.bf16.gmra.mxu0 %vm471_vm2, %v1283_v9  ;;  %1257 = vmatmul.msk.bf16.gmra.mxu1 %vm471_vm2, %v1291_v10 }
  0x27   : > { %1265 = vmatmul.msk.bf16.gmra.mxu2 %vm471_vm2, %v1299_v11 }
  0x28   : > { %1273 = vmatmul.msk.bf16.gmra.mxu3 %vm471_vm2, %v1307_v12 }
  0x36   : > { %1250 = vmatmul.msk.bf16.gmra.mxu0 %vm471_vm2, %v1284_v13  ;;  %1258 = vmatmul.msk.bf16.gmra.mxu1 %vm471_vm2, %v1292_v14 }
  0x37   : > { %1266 = vmatmul.msk.bf16.gmra.mxu2 %vm471_vm2, %v1300_v15 }
  0x38   : > { %1274 = vmatmul.msk.bf16.gmra.mxu3 %vm471_vm2, %v1308_v16 }
  0x46   : > { %1251 = vmatmul.msk.bf16.gmra.mxu0 %vm471_vm2, %v1285_v17  ;;  %1259 = vmatmul.msk.bf16.gmra.mxu1 %vm471_vm2, %v1293_v18 }
  0x47   : > { %1267 = vmatmul.msk.bf16.gmra.mxu2 %vm471_vm2, %v1301_v19 }
  0x48   : > { %1275 = vmatmul.msk.bf16.gmra.mxu3 %vm471_vm2, %v1309_v20 }
  0x56   : > { %1252 = vmatmul.msk.bf16.gmra.mxu0 %vm471_vm2, %v1286_v21  ;;  %1260 = vmatmul.msk.bf16.gmra.mxu1 %vm471_vm2, %v1294_v22 }
  0x57   : > { %1268 = vmatmul.msk.bf16.gmra.mxu2 %vm471_vm2, %v1302_v23 }
  0x58   : > { %1276 = vmatmul.msk.bf16.gmra.mxu3 %vm471_vm2, %v1310_v24 }
  0x66   : > { %1253 = vmatmul.msk.bf16.gmra.mxu0 %vm471_vm2, %v1287_v25  ;;  %1261 = vmatmul.msk.bf16.gmra.mxu1 %vm471_vm2, %v1295_v26 }
  0x67   : > { %1269 = vmatmul.msk.bf16.gmra.mxu2 %vm471_vm2, %v1303_v27 }
  0x68   : > { %1277 = vmatmul.msk.bf16.gmra.mxu3 %vm471_vm2, %v1311_v28 }
  0x76   : > { %1254 = vmatmul.msk.bf16.gmra.mxu0 %vm471_vm2, %v1288_v29  ;;  %1262 = vmatmul.msk.bf16.gmra.mxu1 %vm471_vm2, %v1296_v30 }
  0x77   : > { %1270 = vmatmul.msk.bf16.gmra.mxu2 %vm471_vm2, %v1304_v31 }
  0x78   : > { %1278 = vmatmul.msk.bf16.gmra.mxu3 %vm471_vm2, %v1312_v32 }
  0x86   : > { %1255 = vmatmul.msk.bf16.gmra.mxu0 %vm471_vm2, %v1289_v33  ;;  %1263 = vmatmul.msk.bf16.gmra.mxu1 %vm471_vm2, %v1297_v34 }
  0x87   : > { %1271 = vmatmul.msk.bf16.gmra.mxu2 %vm471_vm2, %v1305_v35 }
  0x88   : > { %1279 = vmatmul.msk.bf16.gmra.mxu3 %vm471_vm2, %v1313_v36 }
  0x93   : > { %v584_v38 = vpop.f32.mrf.mxu0  ;;  %v624_v39 = vpop.f32.mrf.mxu1 }
  0x94   : > { %v585_v40 = vadd.f32 %v1532_v37, %v584_v38  ;;  %v625_v41 = vadd.f32 %v1532_v37, %v624_v39 }
  0x96   : > { %vm744_vm4 = vcmp.ge.f32.partialorder %v585_v40, 0.0  ;;  %v808_v42 = vmul.f32 0.2, %v585_v40  ;;  %vm760_vm5 = vcmp.ge.f32.partialorder %v625_v41, 0.0  ;;  %v824_v43 = vmul.f32 0.2, %v625_v41 }
  0x98   : > { %v872_v44 = vsel %vm744_vm4, %v585_v40, %v808_v42  ;;  %v888_v45 = vsel %vm760_vm5, %v625_v41, %v824_v43 }
  0x99   : > { %937 = vst.msk [vmem:[%s1540_s5] sm:$0xff] %vm936_vm3, %v872_v44 }
  0x9a   : > { %953 = vst.msk [vmem:[%s1540_s5 + $0x80] sm:$0xff] %vm936_vm3, %v888_v45  ;;  %v664_v46 = vpop.f32.mrf.mxu2 }
  0x9b   : > { %v704_v47 = vpop.f32.mrf.mxu3  ;;  %v665_v48 = vadd.f32 %v1532_v37, %v664_v46  ;;  %v586_v50 = vpop.f32.mrf.mxu0 }
  0x9c   : > { %v705_v49 = vadd.f32 %v1532_v37, %v704_v47  ;;  %v626_v51 = vpop.f32.mrf.mxu1  ;;  %v587_v52 = vadd.f32 %v1532_v37, %v586_v50 }
  0x9d   : > { %v627_v53 = vadd.f32 %v1532_v37, %v626_v51  ;;  %vm776_vm6 = vcmp.ge.f32.partialorder %v665_v48, 0.0  ;;  %v840_v54 = vmul.f32 0.2, %v665_v48 }
  0x9e   : > { %vm792_vm7 = vcmp.ge.f32.partialorder %v705_v49, 0.0  ;;  %v856_v55 = vmul.f32 0.2, %v705_v49  ;;  %vm745_vm8 = vcmp.ge.f32.partialorder %v587_v52, 0.0  ;;  %v809_v56 = vmul.f32 0.2, %v587_v52 }
  0x9f   : > { %vm761_vm9 = vcmp.ge.f32.partialorder %v627_v53, 0.0  ;;  %v825_v57 = vmul.f32 0.2, %v627_v53  ;;  %v904_v58 = vsel %vm776_vm6, %v665_v48, %v840_v54 }
  0xa0   : > { %v920_v59 = vsel %vm792_vm7, %v705_v49, %v856_v55  ;;  %969 = vst.msk [vmem:[%s1540_s5 + $0x100] sm:$0xff] %vm936_vm3, %v904_v58  ;;  %v873_v60 = vsel %vm745_vm8, %v587_v52, %v809_v56 }
  0xa1   : > { %v889_v61 = vsel %vm761_vm9, %v627_v53, %v825_v57  ;;  %985 = vst.msk [vmem:[%s1540_s5 + $0x180] sm:$0xff] %vm936_vm3, %v920_v59 }
  0xa2   : > { %938 = vst.msk [vmem:[%s1540_s5 + $0x8] sm:$0xff] %vm936_vm3, %v873_v60  ;;  %v666_v62 = vpop.f32.mrf.mxu2 }
  0xa3   : > { %v706_v63 = vpop.f32.mrf.mxu3  ;;  %954 = vst.msk [vmem:[%s1540_s5 + $0x88] sm:$0xff] %vm936_vm3, %v889_v61  ;;  %v667_v0 = vadd.f32 %v1532_v37, %v666_v62  ;;  %v589_v2 = vpop.f32.mrf.mxu0 }
  0xa4   : > { %v707_v1 = vadd.f32 %v1532_v37, %v706_v63  ;;  %v629_v3 = vpop.f32.mrf.mxu1  ;;  %v590_v4 = vadd.f32 %v1532_v37, %v589_v2 }
  0xa5   : > { %v630_v5 = vadd.f32 %v1532_v37, %v629_v3  ;;  %vm777_vm10 = vcmp.ge.f32.partialorder %v667_v0, 0.0  ;;  %v841_v6 = vmul.f32 0.2, %v667_v0 }
  0xa6   : > { %vm793_vm11 = vcmp.ge.f32.partialorder %v707_v1, 0.0  ;;  %v857_v7 = vmul.f32 0.2, %v707_v1  ;;  %vm746_vm12 = vcmp.ge.f32.partialorder %v590_v4, 0.0  ;;  %v810_v8 = vmul.f32 0.2, %v590_v4 }
  0xa7   : > { %vm762_vm13 = vcmp.ge.f32.partialorder %v630_v5, 0.0  ;;  %v826_v9 = vmul.f32 0.2, %v630_v5  ;;  %v905_v10 = vsel %vm777_vm10, %v667_v0, %v841_v6 }
  0xa8   : > { %v921_v11 = vsel %vm793_vm11, %v707_v1, %v857_v7  ;;  %970 = vst.msk [vmem:[%s1540_s5 + $0x108] sm:$0xff] %vm936_vm3, %v905_v10  ;;  %v874_v12 = vsel %vm746_vm12, %v590_v4, %v810_v8 }
  0xa9   : > { %v890_v13 = vsel %vm762_vm13, %v630_v5, %v826_v9  ;;  %986 = vst.msk [vmem:[%s1540_s5 + $0x188] sm:$0xff] %vm936_vm3, %v921_v11 }
  0xaa   : > { %939 = vst.msk [vmem:[%s1540_s5 + $0x10] sm:$0xff] %vm936_vm3, %v874_v12  ;;  %v669_v14 = vpop.f32.mrf.mxu2 }
  0xab   : > { %v709_v15 = vpop.f32.mrf.mxu3  ;;  %955 = vst.msk [vmem:[%s1540_s5 + $0x90] sm:$0xff] %vm936_vm3, %v890_v13  ;;  %v670_v16 = vadd.f32 %v1532_v37, %v669_v14  ;;  %v591_v18 = vpop.f32.mrf.mxu0 }
  0xac   : > { %v710_v17 = vadd.f32 %v1532_v37, %v709_v15  ;;  %v631_v19 = vpop.f32.mrf.mxu1  ;;  %v592_v20 = vadd.f32 %v1532_v37, %v591_v18 }
  0xad   : > { %v632_v21 = vadd.f32 %v1532_v37, %v631_v19  ;;  %vm778_vm14 = vcmp.ge.f32.partialorder %v670_v16, 0.0  ;;  %v842_v22 = vmul.f32 0.2, %v670_v16 }
  0xae   : > { %vm794_vm15 = vcmp.ge.f32.partialorder %v710_v17, 0.0  ;;  %v858_v23 = vmul.f32 0.2, %v710_v17  ;;  %vm747_vm0 = vcmp.ge.f32.partialorder %v592_v20, 0.0  ;;  %v811_v24 = vmul.f32 0.2, %v592_v20 }
  0xaf   : > { %vm763_vm1 = vcmp.ge.f32.partialorder %v632_v21, 0.0  ;;  %v827_v25 = vmul.f32 0.2, %v632_v21  ;;  %v906_v26 = vsel %vm778_vm14, %v670_v16, %v842_v22 }
  0xb0   : > { %v922_v27 = vsel %vm794_vm15, %v710_v17, %v858_v23  ;;  %971 = vst.msk [vmem:[%s1540_s5 + $0x110] sm:$0xff] %vm936_vm3, %v906_v26  ;;  %v875_v28 = vsel %vm747_vm0, %v592_v20, %v811_v24 }
  0xb1   : > { %v891_v29 = vsel %vm763_vm1, %v632_v21, %v827_v25  ;;  %987 = vst.msk [vmem:[%s1540_s5 + $0x190] sm:$0xff] %vm936_vm3, %v922_v27 }
  0xb2   : > { %940 = vst.msk [vmem:[%s1540_s5 + $0x18] sm:$0xff] %vm936_vm3, %v875_v28  ;;  %v671_v30 = vpop.f32.mrf.mxu2 }
  0xb3   : > { %v711_v31 = vpop.f32.mrf.mxu3  ;;  %956 = vst.msk [vmem:[%s1540_s5 + $0x98] sm:$0xff] %vm936_vm3, %v891_v29  ;;  %v672_v32 = vadd.f32 %v1532_v37, %v671_v30  ;;  %v594_v34 = vpop.f32.mrf.mxu0 }
  0xb4   : > { %v712_v33 = vadd.f32 %v1532_v37, %v711_v31  ;;  %v634_v35 = vpop.f32.mrf.mxu1  ;;  %v595_v36 = vadd.f32 %v1532_v37, %v594_v34 }
  0xb5   : > { %v635_v38 = vadd.f32 %v1532_v37, %v634_v35  ;;  %vm779_vm2 = vcmp.ge.f32.partialorder %v672_v32, 0.0  ;;  %v843_v39 = vmul.f32 0.2, %v672_v32 }
  0xb6   : > { %vm795_vm4 = vcmp.ge.f32.partialorder %v712_v33, 0.0  ;;  %v859_v40 = vmul.f32 0.2, %v712_v33  ;;  %vm748_vm5 = vcmp.ge.f32.partialorder %v595_v36, 0.0  ;;  %v812_v41 = vmul.f32 0.2, %v595_v36 }
  0xb7   : > { %vm764_vm6 = vcmp.ge.f32.partialorder %v635_v38, 0.0  ;;  %v828_v42 = vmul.f32 0.2, %v635_v38  ;;  %v907_v43 = vsel %vm779_vm2, %v672_v32, %v843_v39 }
  0xb8   : > { %v923_v44 = vsel %vm795_vm4, %v712_v33, %v859_v40  ;;  %972 = vst.msk [vmem:[%s1540_s5 + $0x118] sm:$0xff] %vm936_vm3, %v907_v43  ;;  %v876_v45 = vsel %vm748_vm5, %v595_v36, %v812_v41 }
  0xb9   : > { %v892_v46 = vsel %vm764_vm6, %v635_v38, %v828_v42  ;;  %988 = vst.msk [vmem:[%s1540_s5 + $0x198] sm:$0xff] %vm936_vm3, %v923_v44 }
  0xba   : > { %941 = vst.msk [vmem:[%s1540_s5 + $0x20] sm:$0xff] %vm936_vm3, %v876_v45  ;;  %v674_v47 = vpop.f32.mrf.mxu2 }
  0xbb   : > { %v714_v48 = vpop.f32.mrf.mxu3  ;;  %957 = vst.msk [vmem:[%s1540_s5 + $0xa0] sm:$0xff] %vm936_vm3, %v892_v46  ;;  %v675_v49 = vadd.f32 %v1532_v37, %v674_v47  ;;  %v596_v51 = vpop.f32.mrf.mxu0 }
  0xbc   : > { %v715_v50 = vadd.f32 %v1532_v37, %v714_v48  ;;  %v636_v52 = vpop.f32.mrf.mxu1  ;;  %v597_v53 = vadd.f32 %v1532_v37, %v596_v51 }
  0xbd   : > { %v637_v54 = vadd.f32 %v1532_v37, %v636_v52  ;;  %vm780_vm7 = vcmp.ge.f32.partialorder %v675_v49, 0.0  ;;  %v844_v55 = vmul.f32 0.2, %v675_v49 }
  0xbe   : > { %vm796_vm8 = vcmp.ge.f32.partialorder %v715_v50, 0.0  ;;  %v860_v56 = vmul.f32 0.2, %v715_v50  ;;  %vm749_vm9 = vcmp.ge.f32.partialorder %v597_v53, 0.0  ;;  %v813_v57 = vmul.f32 0.2, %v597_v53 }
  0xbf   : > { %vm765_vm10 = vcmp.ge.f32.partialorder %v637_v54, 0.0  ;;  %v829_v58 = vmul.f32 0.2, %v637_v54  ;;  %v908_v59 = vsel %vm780_vm7, %v675_v49, %v844_v55 }
  0xc0   : > { %v924_v60 = vsel %vm796_vm8, %v715_v50, %v860_v56  ;;  %973 = vst.msk [vmem:[%s1540_s5 + $0x120] sm:$0xff] %vm936_vm3, %v908_v59  ;;  %v877_v61 = vsel %vm749_vm9, %v597_v53, %v813_v57 }
  0xc1   : > { %v893_v62 = vsel %vm765_vm10, %v637_v54, %v829_v58  ;;  %989 = vst.msk [vmem:[%s1540_s5 + $0x1a0] sm:$0xff] %vm936_vm3, %v924_v60 }
  0xc2   : > { %942 = vst.msk [vmem:[%s1540_s5 + $0x28] sm:$0xff] %vm936_vm3, %v877_v61  ;;  %v676_v63 = vpop.f32.mrf.mxu2 }
  0xc3   : > { %v716_v0 = vpop.f32.mrf.mxu3  ;;  %958 = vst.msk [vmem:[%s1540_s5 + $0xa8] sm:$0xff] %vm936_vm3, %v893_v62  ;;  %v677_v1 = vadd.f32 %v1532_v37, %v676_v63  ;;  %v599_v3 = vpop.f32.mrf.mxu0 }
  0xc4   : > { %v717_v2 = vadd.f32 %v1532_v37, %v716_v0  ;;  %v639_v4 = vpop.f32.mrf.mxu1  ;;  %v600_v5 = vadd.f32 %v1532_v37, %v599_v3 }
  0xc5   : > { %v640_v6 = vadd.f32 %v1532_v37, %v639_v4  ;;  %vm781_vm11 = vcmp.ge.f32.partialorder %v677_v1, 0.0  ;;  %v845_v7 = vmul.f32 0.2, %v677_v1 }
  0xc6   : > { %vm797_vm12 = vcmp.ge.f32.partialorder %v717_v2, 0.0  ;;  %v861_v8 = vmul.f32 0.2, %v717_v2  ;;  %vm750_vm13 = vcmp.ge.f32.partialorder %v600_v5, 0.0  ;;  %v814_v9 = vmul.f32 0.2, %v600_v5 }
  0xc7   : > { %vm766_vm14 = vcmp.ge.f32.partialorder %v640_v6, 0.0  ;;  %v830_v10 = vmul.f32 0.2, %v640_v6  ;;  %v909_v11 = vsel %vm781_vm11, %v677_v1, %v845_v7 }
  0xc8   : > { %v925_v12 = vsel %vm797_vm12, %v717_v2, %v861_v8  ;;  %974 = vst.msk [vmem:[%s1540_s5 + $0x128] sm:$0xff] %vm936_vm3, %v909_v11  ;;  %v878_v13 = vsel %vm750_vm13, %v600_v5, %v814_v9 }
  0xc9   : > { %v894_v14 = vsel %vm766_vm14, %v640_v6, %v830_v10  ;;  %990 = vst.msk [vmem:[%s1540_s5 + $0x1a8] sm:$0xff] %vm936_vm3, %v925_v12 }
  0xca   : > { %943 = vst.msk [vmem:[%s1540_s5 + $0x30] sm:$0xff] %vm936_vm3, %v878_v13  ;;  %v679_v15 = vpop.f32.mrf.mxu2 }
  0xcb   : > { %v719_v16 = vpop.f32.mrf.mxu3  ;;  %959 = vst.msk [vmem:[%s1540_s5 + $0xb0] sm:$0xff] %vm936_vm3, %v894_v14  ;;  %v680_v17 = vadd.f32 %v1532_v37, %v679_v15  ;;  %v601_v19 = vpop.f32.mrf.mxu0 }
  0xcc   : > { %v720_v18 = vadd.f32 %v1532_v37, %v719_v16  ;;  %v641_v20 = vpop.f32.mrf.mxu1  ;;  %v602_v21 = vadd.f32 %v1532_v37, %v601_v19 }
  0xcd   : > { %v642_v22 = vadd.f32 %v1532_v37, %v641_v20  ;;  %vm782_vm15 = vcmp.ge.f32.partialorder %v680_v17, 0.0  ;;  %v846_v23 = vmul.f32 0.2, %v680_v17 }
  0xce   : > { %vm798_vm0 = vcmp.ge.f32.partialorder %v720_v18, 0.0  ;;  %v862_v24 = vmul.f32 0.2, %v720_v18  ;;  %vm751_vm1 = vcmp.ge.f32.partialorder %v602_v21, 0.0  ;;  %v815_v25 = vmul.f32 0.2, %v602_v21 }
  0xcf   : > { %vm767_vm2 = vcmp.ge.f32.partialorder %v642_v22, 0.0  ;;  %v831_v26 = vmul.f32 0.2, %v642_v22  ;;  %v910_v27 = vsel %vm782_vm15, %v680_v17, %v846_v23 }
  0xd0   : > { %v926_v28 = vsel %vm798_vm0, %v720_v18, %v862_v24  ;;  %975 = vst.msk [vmem:[%s1540_s5 + $0x130] sm:$0xff] %vm936_vm3, %v910_v27  ;;  %v879_v29 = vsel %vm751_vm1, %v602_v21, %v815_v25 }
  0xd1   : > { %v895_v30 = vsel %vm767_vm2, %v642_v22, %v831_v26  ;;  %991 = vst.msk [vmem:[%s1540_s5 + $0x1b0] sm:$0xff] %vm936_vm3, %v926_v28 }
  0xd2   : > { %944 = vst.msk [vmem:[%s1540_s5 + $0x38] sm:$0xff] %vm936_vm3, %v879_v29  ;;  %v681_v31 = vpop.f32.mrf.mxu2 }
  0xd3   : > { %v721_v32 = vpop.f32.mrf.mxu3  ;;  %960 = vst.msk [vmem:[%s1540_s5 + $0xb8] sm:$0xff] %vm936_vm3, %v895_v30  ;;  %v682_v33 = vadd.f32 %v1532_v37, %v681_v31  ;;  %v604_v35 = vpop.f32.mrf.mxu0 }
  0xd4   : > { %v722_v34 = vadd.f32 %v1532_v37, %v721_v32  ;;  %v644_v36 = vpop.f32.mrf.mxu1  ;;  %v605_v38 = vadd.f32 %v1532_v37, %v604_v35 }
  0xd5   : > { %v645_v39 = vadd.f32 %v1532_v37, %v644_v36  ;;  %vm783_vm4 = vcmp.ge.f32.partialorder %v682_v33, 0.0  ;;  %v847_v40 = vmul.f32 0.2, %v682_v33 }
  0xd6   : > { %vm799_vm5 = vcmp.ge.f32.partialorder %v722_v34, 0.0  ;;  %v863_v41 = vmul.f32 0.2, %v722_v34  ;;  %vm752_vm6 = vcmp.ge.f32.partialorder %v605_v38, 0.0  ;;  %v816_v42 = vmul.f32 0.2, %v605_v38 }
  0xd7   : > { %vm768_vm7 = vcmp.ge.f32.partialorder %v645_v39, 0.0  ;;  %v832_v43 = vmul.f32 0.2, %v645_v39  ;;  %v911_v44 = vsel %vm783_vm4, %v682_v33, %v847_v40 }
  0xd8   : > { %v927_v45 = vsel %vm799_vm5, %v722_v34, %v863_v41  ;;  %976 = vst.msk [vmem:[%s1540_s5 + $0x138] sm:$0xff] %vm936_vm3, %v911_v44  ;;  %v880_v46 = vsel %vm752_vm6, %v605_v38, %v816_v42 }
  0xd9   : > { %v896_v47 = vsel %vm768_vm7, %v645_v39, %v832_v43  ;;  %992 = vst.msk [vmem:[%s1540_s5 + $0x1b8] sm:$0xff] %vm936_vm3, %v927_v45 }
  0xda   : > { %945 = vst.msk [vmem:[%s1540_s5 + $0x40] sm:$0xff] %vm936_vm3, %v880_v46  ;;  %v684_v48 = vpop.f32.mrf.mxu2 }
  0xdb   : > { %v724_v49 = vpop.f32.mrf.mxu3  ;;  %961 = vst.msk [vmem:[%s1540_s5 + $0xc0] sm:$0xff] %vm936_vm3, %v896_v47  ;;  %v685_v50 = vadd.f32 %v1532_v37, %v684_v48  ;;  %v606_v52 = vpop.f32.mrf.mxu0 }
  0xdc   : > { %v725_v51 = vadd.f32 %v1532_v37, %v724_v49  ;;  %v646_v53 = vpop.f32.mrf.mxu1  ;;  %v607_v54 = vadd.f32 %v1532_v37, %v606_v52 }
  0xdd   : > { %v647_v55 = vadd.f32 %v1532_v37, %v646_v53  ;;  %vm784_vm8 = vcmp.ge.f32.partialorder %v685_v50, 0.0  ;;  %v848_v56 = vmul.f32 0.2, %v685_v50 }
  0xde   : > { %vm800_vm9 = vcmp.ge.f32.partialorder %v725_v51, 0.0  ;;  %v864_v57 = vmul.f32 0.2, %v725_v51  ;;  %vm753_vm10 = vcmp.ge.f32.partialorder %v607_v54, 0.0  ;;  %v817_v58 = vmul.f32 0.2, %v607_v54 }
  0xdf   : > { %vm769_vm11 = vcmp.ge.f32.partialorder %v647_v55, 0.0  ;;  %v833_v59 = vmul.f32 0.2, %v647_v55  ;;  %v912_v60 = vsel %vm784_vm8, %v685_v50, %v848_v56 }
  0xe0   : > { %v928_v61 = vsel %vm800_vm9, %v725_v51, %v864_v57  ;;  %977 = vst.msk [vmem:[%s1540_s5 + $0x140] sm:$0xff] %vm936_vm3, %v912_v60  ;;  %v881_v62 = vsel %vm753_vm10, %v607_v54, %v817_v58 }
  0xe1   : > { %v897_v63 = vsel %vm769_vm11, %v647_v55, %v833_v59  ;;  %993 = vst.msk [vmem:[%s1540_s5 + $0x1c0] sm:$0xff] %vm936_vm3, %v928_v61 }
  0xe2   : > { %946 = vst.msk [vmem:[%s1540_s5 + $0x48] sm:$0xff] %vm936_vm3, %v881_v62  ;;  %v686_v0 = vpop.f32.mrf.mxu2 }
  0xe3   : > { %v726_v1 = vpop.f32.mrf.mxu3  ;;  %962 = vst.msk [vmem:[%s1540_s5 + $0xc8] sm:$0xff] %vm936_vm3, %v897_v63  ;;  %v687_v2 = vadd.f32 %v1532_v37, %v686_v0  ;;  %v609_v4 = vpop.f32.mrf.mxu0 }
  0xe4   : > { %v727_v3 = vadd.f32 %v1532_v37, %v726_v1  ;;  %v649_v5 = vpop.f32.mrf.mxu1  ;;  %v610_v6 = vadd.f32 %v1532_v37, %v609_v4 }
  0xe5   : > { %v650_v7 = vadd.f32 %v1532_v37, %v649_v5  ;;  %vm785_vm12 = vcmp.ge.f32.partialorder %v687_v2, 0.0  ;;  %v849_v8 = vmul.f32 0.2, %v687_v2 }
  0xe6   : > { %vm801_vm13 = vcmp.ge.f32.partialorder %v727_v3, 0.0  ;;  %v865_v9 = vmul.f32 0.2, %v727_v3  ;;  %vm754_vm14 = vcmp.ge.f32.partialorder %v610_v6, 0.0  ;;  %v818_v10 = vmul.f32 0.2, %v610_v6 }
  0xe7   : > { %vm770_vm15 = vcmp.ge.f32.partialorder %v650_v7, 0.0  ;;  %v834_v11 = vmul.f32 0.2, %v650_v7  ;;  %v913_v12 = vsel %vm785_vm12, %v687_v2, %v849_v8 }
  0xe8   : > { %v929_v13 = vsel %vm801_vm13, %v727_v3, %v865_v9  ;;  %978 = vst.msk [vmem:[%s1540_s5 + $0x148] sm:$0xff] %vm936_vm3, %v913_v12  ;;  %v882_v14 = vsel %vm754_vm14, %v610_v6, %v818_v10 }
  0xe9   : > { %v898_v15 = vsel %vm770_vm15, %v650_v7, %v834_v11  ;;  %994 = vst.msk [vmem:[%s1540_s5 + $0x1c8] sm:$0xff] %vm936_vm3, %v929_v13 }
  0xea   : > { %947 = vst.msk [vmem:[%s1540_s5 + $0x50] sm:$0xff] %vm936_vm3, %v882_v14  ;;  %v689_v16 = vpop.f32.mrf.mxu2 }
  0xeb   : > { %v729_v17 = vpop.f32.mrf.mxu3  ;;  %963 = vst.msk [vmem:[%s1540_s5 + $0xd0] sm:$0xff] %vm936_vm3, %v898_v15  ;;  %v690_v18 = vadd.f32 %v1532_v37, %v689_v16  ;;  %v611_v20 = vpop.f32.mrf.mxu0 }
  0xec   : > { %v730_v19 = vadd.f32 %v1532_v37, %v729_v17  ;;  %v651_v21 = vpop.f32.mrf.mxu1  ;;  %v612_v22 = vadd.f32 %v1532_v37, %v611_v20 }
  0xed   : > { %v652_v23 = vadd.f32 %v1532_v37, %v651_v21  ;;  %vm786_vm0 = vcmp.ge.f32.partialorder %v690_v18, 0.0  ;;  %v850_v24 = vmul.f32 0.2, %v690_v18 }
  0xee   : > { %vm802_vm1 = vcmp.ge.f32.partialorder %v730_v19, 0.0  ;;  %v866_v25 = vmul.f32 0.2, %v730_v19  ;;  %vm755_vm2 = vcmp.ge.f32.partialorder %v612_v22, 0.0  ;;  %v819_v26 = vmul.f32 0.2, %v612_v22 }
  0xef   : > { %vm771_vm4 = vcmp.ge.f32.partialorder %v652_v23, 0.0  ;;  %v835_v27 = vmul.f32 0.2, %v652_v23  ;;  %v914_v28 = vsel %vm786_vm0, %v690_v18, %v850_v24 }
  0xf0   : > { %v930_v29 = vsel %vm802_vm1, %v730_v19, %v866_v25  ;;  %979 = vst.msk [vmem:[%s1540_s5 + $0x150] sm:$0xff] %vm936_vm3, %v914_v28  ;;  %v883_v30 = vsel %vm755_vm2, %v612_v22, %v819_v26 }
  0xf1   : > { %v899_v31 = vsel %vm771_vm4, %v652_v23, %v835_v27  ;;  %995 = vst.msk [vmem:[%s1540_s5 + $0x1d0] sm:$0xff] %vm936_vm3, %v930_v29 }
  0xf2   : > { %948 = vst.msk [vmem:[%s1540_s5 + $0x58] sm:$0xff] %vm936_vm3, %v883_v30  ;;  %v691_v32 = vpop.f32.mrf.mxu2 }
  0xf3   : > { %v731_v33 = vpop.f32.mrf.mxu3  ;;  %964 = vst.msk [vmem:[%s1540_s5 + $0xd8] sm:$0xff] %vm936_vm3, %v899_v31  ;;  %v692_v34 = vadd.f32 %v1532_v37, %v691_v32  ;;  %v614_v36 = vpop.f32.mrf.mxu0 }
  0xf4   : > { %v732_v35 = vadd.f32 %v1532_v37, %v731_v33  ;;  %v654_v38 = vpop.f32.mrf.mxu1  ;;  %v615_v39 = vadd.f32 %v1532_v37, %v614_v36 }
  0xf5   : > { %v655_v40 = vadd.f32 %v1532_v37, %v654_v38  ;;  %vm787_vm5 = vcmp.ge.f32.partialorder %v692_v34, 0.0  ;;  %v851_v41 = vmul.f32 0.2, %v692_v34 }
  0xf6   : > { %vm803_vm6 = vcmp.ge.f32.partialorder %v732_v35, 0.0  ;;  %v867_v42 = vmul.f32 0.2, %v732_v35  ;;  %vm756_vm7 = vcmp.ge.f32.partialorder %v615_v39, 0.0  ;;  %v820_v43 = vmul.f32 0.2, %v615_v39 }
  0xf7   : > { %vm772_vm8 = vcmp.ge.f32.partialorder %v655_v40, 0.0  ;;  %v836_v44 = vmul.f32 0.2, %v655_v40  ;;  %v915_v45 = vsel %vm787_vm5, %v692_v34, %v851_v41 }
  0xf8   : > { %v931_v46 = vsel %vm803_vm6, %v732_v35, %v867_v42  ;;  %980 = vst.msk [vmem:[%s1540_s5 + $0x158] sm:$0xff] %vm936_vm3, %v915_v45  ;;  %v884_v47 = vsel %vm756_vm7, %v615_v39, %v820_v43 }
  0xf9   : > { %v900_v48 = vsel %vm772_vm8, %v655_v40, %v836_v44  ;;  %996 = vst.msk [vmem:[%s1540_s5 + $0x1d8] sm:$0xff] %vm936_vm3, %v931_v46 }
  0xfa   : > { %949 = vst.msk [vmem:[%s1540_s5 + $0x60] sm:$0xff] %vm936_vm3, %v884_v47  ;;  %v694_v49 = vpop.f32.mrf.mxu2 }
  0xfb   : > { %v734_v50 = vpop.f32.mrf.mxu3  ;;  %965 = vst.msk [vmem:[%s1540_s5 + $0xe0] sm:$0xff] %vm936_vm3, %v900_v48  ;;  %v695_v51 = vadd.f32 %v1532_v37, %v694_v49  ;;  %v616_v53 = vpop.f32.mrf.mxu0 }
  0xfc   : > { %v735_v52 = vadd.f32 %v1532_v37, %v734_v50  ;;  %v656_v54 = vpop.f32.mrf.mxu1  ;;  %v617_v55 = vadd.f32 %v1532_v37, %v616_v53 }
  0xfd   : > { %v657_v56 = vadd.f32 %v1532_v37, %v656_v54  ;;  %vm788_vm9 = vcmp.ge.f32.partialorder %v695_v51, 0.0  ;;  %v852_v57 = vmul.f32 0.2, %v695_v51 }
  0xfe   : > { %vm804_vm10 = vcmp.ge.f32.partialorder %v735_v52, 0.0  ;;  %v868_v58 = vmul.f32 0.2, %v735_v52  ;;  %vm757_vm11 = vcmp.ge.f32.partialorder %v617_v55, 0.0  ;;  %v821_v59 = vmul.f32 0.2, %v617_v55 }
  0xff   : > { %vm773_vm12 = vcmp.ge.f32.partialorder %v657_v56, 0.0  ;;  %v837_v60 = vmul.f32 0.2, %v657_v56  ;;  %v916_v61 = vsel %vm788_vm9, %v695_v51, %v852_v57 }
 0x100   : > { %v932_v62 = vsel %vm804_vm10, %v735_v52, %v868_v58  ;;  %981 = vst.msk [vmem:[%s1540_s5 + $0x160] sm:$0xff] %vm936_vm3, %v916_v61  ;;  %v885_v63 = vsel %vm757_vm11, %v617_v55, %v821_v59 }
 0x101   : > { %v901_v0 = vsel %vm773_vm12, %v657_v56, %v837_v60  ;;  %997 = vst.msk [vmem:[%s1540_s5 + $0x1e0] sm:$0xff] %vm936_vm3, %v932_v62 }
 0x102   : > { %950 = vst.msk [vmem:[%s1540_s5 + $0x68] sm:$0xff] %vm936_vm3, %v885_v63  ;;  %v696_v1 = vpop.f32.mrf.mxu2 }
 0x103   : > { %v736_v2 = vpop.f32.mrf.mxu3  ;;  %966 = vst.msk [vmem:[%s1540_s5 + $0xe8] sm:$0xff] %vm936_vm3, %v901_v0  ;;  %v697_v3 = vadd.f32 %v1532_v37, %v696_v1  ;;  %v619_v5 = vpop.f32.mrf.mxu0 }
 0x104   : > { %v737_v4 = vadd.f32 %v1532_v37, %v736_v2  ;;  %v659_v6 = vpop.f32.mrf.mxu1  ;;  %v620_v7 = vadd.f32 %v1532_v37, %v619_v5 }
 0x105   : > { %v660_v8 = vadd.f32 %v1532_v37, %v659_v6  ;;  %vm789_vm13 = vcmp.ge.f32.partialorder %v697_v3, 0.0  ;;  %v853_v9 = vmul.f32 0.2, %v697_v3 }
 0x106   : > { %vm805_vm14 = vcmp.ge.f32.partialorder %v737_v4, 0.0  ;;  %v869_v10 = vmul.f32 0.2, %v737_v4  ;;  %vm758_vm15 = vcmp.ge.f32.partialorder %v620_v7, 0.0  ;;  %v822_v11 = vmul.f32 0.2, %v620_v7 }
 0x107   : > { %vm774_vm0 = vcmp.ge.f32.partialorder %v660_v8, 0.0  ;;  %v838_v12 = vmul.f32 0.2, %v660_v8  ;;  %v917_v13 = vsel %vm789_vm13, %v697_v3, %v853_v9 }
 0x108   : > { %v933_v14 = vsel %vm805_vm14, %v737_v4, %v869_v10  ;;  %982 = vst.msk [vmem:[%s1540_s5 + $0x168] sm:$0xff] %vm936_vm3, %v917_v13  ;;  %v886_v15 = vsel %vm758_vm15, %v620_v7, %v822_v11 }
 0x109   : > { %v902_v16 = vsel %vm774_vm0, %v660_v8, %v838_v12  ;;  %998 = vst.msk [vmem:[%s1540_s5 + $0x1e8] sm:$0xff] %vm936_vm3, %v933_v14 }
 0x10a   : > { %951 = vst.msk [vmem:[%s1540_s5 + $0x70] sm:$0xff] %vm936_vm3, %v886_v15  ;;  %v699_v17 = vpop.f32.mrf.mxu2 }
 0x10b   : > { %v739_v18 = vpop.f32.mrf.mxu3  ;;  %967 = vst.msk [vmem:[%s1540_s5 + $0xf0] sm:$0xff] %vm936_vm3, %v902_v16  ;;  %v700_v19 = vadd.f32 %v1532_v37, %v699_v17  ;;  %v621_v21 = vpop.f32.mrf.mxu0 }
 0x10c   : > { %v740_v20 = vadd.f32 %v1532_v37, %v739_v18  ;;  %v661_v22 = vpop.f32.mrf.mxu1  ;;  %v622_v23 = vadd.f32 %v1532_v37, %v621_v21 }
 0x10d   : > { %v662_v24 = vadd.f32 %v1532_v37, %v661_v22  ;;  %vm790_vm1 = vcmp.ge.f32.partialorder %v700_v19, 0.0  ;;  %v854_v25 = vmul.f32 0.2, %v700_v19 }
 0x10e   : > { %vm806_vm2 = vcmp.ge.f32.partialorder %v740_v20, 0.0  ;;  %v870_v26 = vmul.f32 0.2, %v740_v20  ;;  %vm759_vm4 = vcmp.ge.f32.partialorder %v622_v23, 0.0  ;;  %v823_v27 = vmul.f32 0.2, %v622_v23 }
 0x10f   : > { %vm775_vm5 = vcmp.ge.f32.partialorder %v662_v24, 0.0  ;;  %v839_v28 = vmul.f32 0.2, %v662_v24  ;;  %v918_v29 = vsel %vm790_vm1, %v700_v19, %v854_v25 }
 0x110   : > { %v934_v30 = vsel %vm806_vm2, %v740_v20, %v870_v26  ;;  %983 = vst.msk [vmem:[%s1540_s5 + $0x170] sm:$0xff] %vm936_vm3, %v918_v29  ;;  %v887_v31 = vsel %vm759_vm4, %v622_v23, %v823_v27 }
 0x111   : > { %v903_v32 = vsel %vm775_vm5, %v662_v24, %v839_v28  ;;  %999 = vst.msk [vmem:[%s1540_s5 + $0x1f0] sm:$0xff] %vm936_vm3, %v934_v30 }
 0x112   : > { %952 = vst.msk [vmem:[%s1540_s5 + $0x78] sm:$0xff] %vm936_vm3, %v887_v31  ;;  %v701_v33 = vpop.f32.mrf.mxu2 }
 0x113   : > { %v741_v34 = vpop.f32.mrf.mxu3  ;;  %968 = vst.msk [vmem:[%s1540_s5 + $0xf8] sm:$0xff] %vm936_vm3, %v903_v32  ;;  %v702_v35 = vadd.f32 %v1532_v37, %v701_v33 }
 0x114   : > { %v742_v36 = vadd.f32 %v1532_v37, %v741_v34 }
 0x115   : > { %vm791_vm6 = vcmp.ge.f32.partialorder %v702_v35, 0.0  ;;  %v855_v38 = vmul.f32 0.2, %v702_v35 }
 0x116   : > { %vm807_vm7 = vcmp.ge.f32.partialorder %v742_v36, 0.0  ;;  %v871_v39 = vmul.f32 0.2, %v742_v36 }
 0x117   : > { %v919_v40 = vsel %vm791_vm6, %v702_v35, %v855_v38 }
 0x118   : > { %v935_v41 = vsel %vm807_vm7, %v742_v36, %v871_v39  ;;  %984 = vst.msk [vmem:[%s1540_s5 + $0x178] sm:$0xff] %vm936_vm3, %v919_v40 }
 0x119   : > { %1000 = vst.msk [vmem:[%s1540_s5 + $0x1f8] sm:$0xff] %vm936_vm3, %v935_v41 }
 0x11a PF: > { %s14_s14 = sadd.s32 1, %s1411_s14   ;;  %s1745_s12 = smov %s1407_s13 }
 0x11b   : > { %p11_p8 = scmp.ge.s32.totalorder %s14_s14, 4   ;;  %s1746_s13 = smov %s1748_s16 }
 0x11d   :  { %13 = sbr.rel (!%p11_p8) target bundleno = 2 (0x2), region = 71 }
 0x122   :  { %1029 = vsyncpa [#allocation3], 1 }
 0x123   :  { %1031 = vsyncpa [#allocation3 + $0x1], 1 }

// kernel: wave_discriminator_block.8
= control target key start
LH: loop header
LB: loop body
LE: loop exit
PB: predicated region body
PF: predicated region fallthrough
CT: control target
= control target key end

     0   :  { %vm907_vm0 = vcmask 130048   ;;  %vm1586_vm1 = vcmask 523264   ;;  %s3337_s1 = inlined_call_operand.vmem [shape: bf16[1,656,64], index: 1, kind: input, shape index: {}]   ;;  %s3338_s2 = inlined_call_operand.vmem [shape: f32[1,64], index: 2, kind: input, shape index: {}]   ;;  %s3339_s0 = inlined_call_operand.vmem [shape: bf16[1,256,656], index: 0, kind: input, shape index: {}]   ;;  %s3340_s3 = inlined_call_operand.vmem [shape: f32[256,64], index: 3, kind: output, shape index: {}]  }
   0x1   :  { %v2290_v0 = vld [vmem:[%s3337_s1 + $0x38] sm:$0xff]  ;;  %v2289_v2 = vld [vmem:[%s3337_s1 + $0x30] sm:$0xff]  ;;  %v2288_v4 = vld [vmem:[%s3337_s1 + $0x28] sm:$0xff] }
   0x2   :  { %v2298_v1 = vld [vmem:[%s3337_s1 + $0x78] sm:$0xff]  ;;  %2324 = vmatpush.bf16.msra.mxu2 %v2290_v0  ;;  %v2297_v3 = vld [vmem:[%s3337_s1 + $0x70] sm:$0xff]  ;;  %956 = vmatpush.bf16.msra.mxu0 %v2290_v0  ;;  %v2296_v5 = vld [vmem:[%s3337_s1 + $0x68] sm:$0xff] }
   0x3   :  { %2332 = vmatpush.bf16.msra.mxu3 %v2298_v1  ;;  %1045 = vmatpush.bf16.msra.mxu1 %v2298_v1  ;;  %v2287_v6 = vld [vmem:[%s3337_s1 + $0x20] sm:$0xff]  ;;  %v2286_v8 = vld [vmem:[%s3337_s1 + $0x18] sm:$0xff]  ;;  %v2285_v10 = vld [vmem:[%s3337_s1 + $0x10] sm:$0xff] }
   0x4   :  { %v2295_v7 = vld [vmem:[%s3337_s1 + $0x60] sm:$0xff]  ;;  %v2294_v9 = vld [vmem:[%s3337_s1 + $0x58] sm:$0xff]  ;;  %v2293_v11 = vld [vmem:[%s3337_s1 + $0x50] sm:$0xff] }
   0x5   :  { %v2284_v12 = vld [vmem:[%s3337_s1 + $0x8] sm:$0xff]  ;;  %v2283_v14 = vld [vmem:[%s3337_s1] sm:$0xff]  ;;  %v2238_v17 = vld [vmem:[%s3339_s0 + $0x194] sm:$0xf0] }
   0x6   :  { %2325 = vmatpush.bf16.msra.mxu2 %v2289_v2  ;;  %957 = vmatpush.bf16.msra.mxu0 %v2289_v2  ;;  %v2292_v13 = vld [vmem:[%s3337_s1 + $0x48] sm:$0xff]  ;;  %v2291_v15 = vld [vmem:[%s3337_s1 + $0x40] sm:$0xff]  ;;  %v1819_v19 = vld [vmem:[%s3339_s0 + $0x198] sm:$0xf0] }
   0x7   :  { %2333 = vmatpush.bf16.msra.mxu3 %v2297_v3  ;;  %1046 = vmatpush.bf16.msra.mxu1 %v2297_v3  ;;  %v1817_v16 = vld [vmem:[%s3339_s0 + $0x180] sm:$0xf]  ;;  %v2235_v18 = vld [vmem:[%s3339_s0 + $0x184] sm:$0xf]  ;;  %v2306_v20 = vld [vmem:[%s3337_s1 + $0xb8] sm:$0xff] }
   0x8   :  { %v1625_v21 = vld [vmem:[%s3339_s0] sm:$0xf]  ;;  %v2190_v22 = vld [vmem:[%s3339_s0 + $0x14] sm:$0xf0]  ;;  %v2187_v24 = vld [vmem:[%s3339_s0 + $0x4] sm:$0xf]  ;;  %v1818_v26 = vor.u32 %v2238_v17, %v1817_v16  ;;  %v1822_v27 = vor.u32 %v2235_v18, %v1819_v19 }
   0x9   :  { %v2314_v23 = vld [vmem:[%s3337_s1 + $0xf8] sm:$0xff]  ;;  %v1626_v28 = vor.u32 %v2190_v22, %v1625_v21  ;;  %v2323_v29 = vld [vmem:[%s3337_s1 + $0x140] sm:$0xff]  ;;  %v2305_v32 = vld [vmem:[%s3337_s1 + $0xb0] sm:$0xff] }
   0xa   :  { %2326 = vmatpush.bf16.msra.mxu2 %v2288_v4  ;;  %958 = vmatpush.bf16.msra.mxu0 %v2288_v4  ;;  %v1627_v25 = vld [vmem:[%s3339_s0 + $0x18] sm:$0xf0]  ;;  %v2313_v33 = vld [vmem:[%s3337_s1 + $0xf0] sm:$0xff]  ;;  %v2304_v35 = vld [vmem:[%s3337_s1 + $0xa8] sm:$0xff] }
   0xb   :  { %2334 = vmatpush.bf16.msra.mxu3 %v2296_v5  ;;  %1047 = vmatpush.bf16.msra.mxu1 %v2296_v5  ;;  %v1630_v30 = vor.u32 %v2187_v24, %v1627_v25  ;;  %v2322_v31 = vld [vmem:[%s3337_s1 + $0x138] sm:$0xff]  ;;  %v2321_v34 = vld [vmem:[%s3337_s1 + $0x130] sm:$0xff]  ;;  %v2312_v36 = vld [vmem:[%s3337_s1 + $0xe8] sm:$0xff] }
   0xc   :  { %v2320_v37 = vld [vmem:[%s3337_s1 + $0x128] sm:$0xff]  ;;  %v1841_v38 = vld [vmem:[%s3339_s0 + $0x1b0] sm:$0xf]  ;;  %v2241_v40 = vld [vmem:[%s3339_s0 + $0x1b4] sm:$0xf] }
   0xd   :  { %v2244_v39 = vld [vmem:[%s3339_s0 + $0x1c4] sm:$0xf0]  ;;  %v1843_v41 = vld [vmem:[%s3339_s0 + $0x1c8] sm:$0xf0]  ;;  %v1649_v42 = vld [vmem:[%s3339_s0 + $0x30] sm:$0xf] }
   0xe   :  { %2327 = vmatpush.bf16.msra.mxu2 %v2287_v6  ;;  %959 = vmatpush.bf16.msra.mxu0 %v2287_v6  ;;  %v2196_v43 = vld [vmem:[%s3339_s0 + $0x44] sm:$0xf0]  ;;  %v2193_v44 = vld [vmem:[%s3339_s0 + $0x34] sm:$0xf]  ;;  %v1651_v45 = vld [vmem:[%s3339_s0 + $0x48] sm:$0xf0]  ;;  %v1842_v46 = vor.u32 %v2244_v39, %v1841_v38  ;;  %v1846_v47 = vor.u32 %v2241_v40, %v1843_v41 }
   0xf   :  { %2335 = vmatpush.bf16.msra.mxu3 %v2295_v7  ;;  %1048 = vmatpush.bf16.msra.mxu1 %v2295_v7  ;;  %v1650_v48 = vor.u32 %v2196_v43, %v1649_v42  ;;  %v1654_v49 = vor.u32 %v2193_v44, %v1651_v45  ;;  %v2303_v50 = vld [vmem:[%s3337_s1 + $0xa0] sm:$0xff]  ;;  %v2250_v54 = vld [vmem:[%s3339_s0 + $0x1f4] sm:$0xf0]  ;;  %v1867_v56 = vld [vmem:[%s3339_s0 + $0x1f8] sm:$0xf0] }
  0x10   :  { %v2311_v51 = vld [vmem:[%s3337_s1 + $0xe0] sm:$0xff]  ;;  %v2202_v58 = vld [vmem:[%s3339_s0 + $0x74] sm:$0xf0]  ;;  %v1675_v60 = vld [vmem:[%s3339_s0 + $0x78] sm:$0xf0] }
  0x11   :  { %v2319_v52 = vld [vmem:[%s3337_s1 + $0x120] sm:$0xff]  ;;  %v2302_v1 = vld [vmem:[%s3337_s1 + $0x98] sm:$0xff]  ;;  %v1889_v4 = vld [vmem:[%s3339_s0 + $0x210] sm:$0xf] }
  0x12   :  { %2328 = vmatpush.bf16.msra.mxu2 %v2286_v8  ;;  %960 = vmatpush.bf16.msra.mxu0 %v2286_v8  ;;  %v1865_v53 = vld [vmem:[%s3339_s0 + $0x1e0] sm:$0xf]  ;;  %v2247_v55 = vld [vmem:[%s3339_s0 + $0x1e4] sm:$0xf]  ;;  %v2310_v2 = vld [vmem:[%s3337_s1 + $0xd8] sm:$0xff] }
  0x13   :  { %2336 = vmatpush.bf16.msra.mxu3 %v2294_v9  ;;  %1049 = vmatpush.bf16.msra.mxu1 %v2294_v9  ;;  %v1673_v57 = vld [vmem:[%s3339_s0 + $0x60] sm:$0xf]  ;;  %v2199_v59 = vld [vmem:[%s3339_s0 + $0x64] sm:$0xf]  ;;  %v1866_v61 = vor.u32 %v2250_v54, %v1865_v53  ;;  %v1870_v62 = vor.u32 %v2247_v55, %v1867_v56  ;;  %v2318_v3 = vld [vmem:[%s3337_s1 + $0x118] sm:$0xff] }
  0x14   :  { %v1674_v63 = vor.u32 %v2202_v58, %v1673_v57  ;;  %v1678_v0 = vor.u32 %v2199_v59, %v1675_v60  ;;  %v2256_v5 = vld [vmem:[%s3339_s0 + $0x224] sm:$0xf0]  ;;  %v2253_v6 = vld [vmem:[%s3339_s0 + $0x214] sm:$0xf]  ;;  %v1891_v7 = vld [vmem:[%s3339_s0 + $0x228] sm:$0xf0] }
  0x15   :  { %v1697_v8 = vld [vmem:[%s3339_s0 + $0x90] sm:$0xf]  ;;  %v2208_v9 = vld [vmem:[%s3339_s0 + $0xa4] sm:$0xf0]  ;;  %v1913_v19 = vld [vmem:[%s3339_s0 + $0x240] sm:$0xf] }
  0x16   :  { %2329 = vmatpush.bf16.msra.mxu2 %v2285_v10  ;;  %961 = vmatpush.bf16.msra.mxu0 %v2285_v10  ;;  %v2205_v10 = vld [vmem:[%s3339_s0 + $0x94] sm:$0xf]  ;;  %v2259_v21 = vld [vmem:[%s3339_s0 + $0x244] sm:$0xf]  ;;  %v1915_v22 = vld [vmem:[%s3339_s0 + $0x258] sm:$0xf0] }
  0x17   :  { %2337 = vmatpush.bf16.msra.mxu3 %v2293_v11  ;;  %1050 = vmatpush.bf16.msra.mxu1 %v2293_v11  ;;  %v1699_v11 = vld [vmem:[%s3339_s0 + $0xa8] sm:$0xf0]  ;;  %v2301_v16 = vld [vmem:[%s3337_s1 + $0x90] sm:$0xff]  ;;  %v2214_v24 = vld [vmem:[%s3339_s0 + $0xd4] sm:$0xf0] }
  0x18   :  { %v2309_v17 = vld [vmem:[%s3337_s1 + $0xd0] sm:$0xff]  ;;  %v2211_v25 = vld [vmem:[%s3339_s0 + $0xc4] sm:$0xf]  ;;  %v2220_v39 = vld [vmem:[%s3339_s0 + $0x104] sm:$0xf0] }
  0x19   :  { %v2317_v18 = vld [vmem:[%s3337_s1 + $0x110] sm:$0xff]  ;;  %v1747_v41 = vld [vmem:[%s3339_s0 + $0x108] sm:$0xf0]  ;;  %v1769_v53 = vld [vmem:[%s3339_s0 + $0x120] sm:$0xf] }
  0x1a   :  { %2330 = vmatpush.bf16.msra.mxu2 %v2284_v12  ;;  %962 = vmatpush.bf16.msra.mxu0 %v2284_v12  ;;  %v1890_v12 = vor.u32 %v2256_v5, %v1889_v4  ;;  %v1745_v38 = vld [vmem:[%s3339_s0 + $0xf0] sm:$0xf]  ;;  %v2217_v40 = vld [vmem:[%s3339_s0 + $0xf4] sm:$0xf]  ;;  %v2226_v54 = vld [vmem:[%s3339_s0 + $0x134] sm:$0xf0] }
  0x1b   :  { %2338 = vmatpush.bf16.msra.mxu3 %v2292_v13  ;;  %1051 = vmatpush.bf16.msra.mxu1 %v2292_v13  ;;  %v1894_v13 = vor.u32 %v2253_v6, %v1891_v7  ;;  %v1746_v44 = vor.u32 %v2220_v39, %v1745_v38  ;;  %v1750_v45 = vor.u32 %v2217_v40, %v1747_v41  ;;  %v2223_v55 = vld [vmem:[%s3339_s0 + $0x124] sm:$0xf]  ;;  %v1771_v56 = vld [vmem:[%s3339_s0 + $0x138] sm:$0xf0]  ;;  %v1795_v4 = vld [vmem:[%s3339_s0 + $0x168] sm:$0xf0] }
  0x1c   :  { %v1770_v59 = vor.u32 %v2226_v54, %v1769_v53  ;;  %v1774_v60 = vor.u32 %v2223_v55, %v1771_v56  ;;  %v1665_v38 = vld [vmem:[%s3339_s0 + $0x40] sm:$0xf]  ;;  %v2198_v39 = vld [vmem:[%s3339_s0 + $0x54] sm:$0xf0] }
  0x1e   :  { %2331 = vmatpush.bf16.msra.mxu2 %v2283_v14  ;;  %963 = vmatpush.bf16.msra.mxu0 %v2283_v14  ;;  %v1698_v14 = vor.u32 %v2208_v9, %v1697_v8  ;;  %v1633_v9 = vld [vmem:[%s3339_s0 + $0x8] sm:$0xf] }
  0x1f   :  { %2339 = vmatpush.bf16.msra.mxu3 %v2291_v15  ;;  %1052 = vmatpush.bf16.msra.mxu1 %v2291_v15  ;;  %v1702_v15 = vor.u32 %v2205_v10, %v1699_v11  ;;  %v2191_v10 = vld [vmem:[%s3339_s0 + $0x1c] sm:$0xf0]  ;;  %v2188_v11 = vld [vmem:[%s3339_s0 + $0xc] sm:$0xf] }
  0x21   :  { %1004 = vmatmul.bf16.vlgmr.msra.gmra.mxu2 %v1818_v26  ;;  %964 = vmatmul.bf16.vlgmr.msra.gmra.mxu0 %v1626_v28  ;;  %v1723_v26 = vld [vmem:[%s3339_s0 + $0xd8] sm:$0xf0]  ;;  %v1918_v28 = vor.u32 %v2259_v21, %v1915_v22 }
  0x22   :  { %1134 = vmatpush.bf16.msrb.mxu2 %v2306_v20  ;;  %1093 = vmatmul.bf16.vlgmr.msra.gmra.mxu3 %v1822_v27  ;;  %v2262_v20 = vld [vmem:[%s3339_s0 + $0x254] sm:$0xf0] }
  0x23   :  { %1223 = vmatpush.bf16.msrb.mxu3 %v2314_v23  ;;  %1408 = vmatpush.bf16.msrb.mxu1 %v2323_v29  ;;  %v1721_v23 = vld [vmem:[%s3339_s0 + $0xc0] sm:$0xf]  ;;  %v1914_v27 = vor.u32 %v2262_v20, %v1913_v19 }
  0x24   :  { %1053 = vmatmul.bf16.vlgmr.msra.gmra.mxu1 %v1630_v30  ;;  %1312 = vmatpush.bf16.msrb.mxu0 %v2322_v31  ;;  %v1722_v29 = vor.u32 %v2214_v24, %v1721_v23  ;;  %v1726_v30 = vor.u32 %v2211_v25, %v1723_v26  ;;  %v2300_v31 = vld [vmem:[%s3337_s1 + $0x88] sm:$0xff]  ;;  %v2703_v19 = vld [vmem:[%s3338_s2] ss:$0 sm:$0xff] }
  0x26   :  { %1135 = vmatpush.bf16.msrb.mxu2 %v2305_v32  ;;  %v2308_v32 = vld [vmem:[%s3337_s1 + $0xc8] sm:$0xff] }
  0x27   :  { %1224 = vmatpush.bf16.msrb.mxu3 %v2313_v33  ;;  %v2316_v33 = vld [vmem:[%s3337_s1 + $0x108] sm:$0xff] }
  0x28   :  { %1313 = vmatpush.bf16.msrb.mxu0 %v2321_v34  ;;  %v1937_v34 = vld [vmem:[%s3339_s0 + $0x270] sm:$0xf] }
  0x2a   :  { %1136 = vmatpush.bf16.msrb.mxu2 %v2304_v35  ;;  %v2268_v35 = vld [vmem:[%s3339_s0 + $0x284] sm:$0xf0] }
  0x2b   :  { %1225 = vmatpush.bf16.msrb.mxu3 %v2312_v36  ;;  %v2265_v36 = vld [vmem:[%s3339_s0 + $0x274] sm:$0xf]  ;;  %v1938_v42 = vor.u32 %v2268_v35, %v1937_v34  ;;  %v2197_v35 = vld [vmem:[%s3339_s0 + $0x4c] sm:$0xf0] }
  0x2c   :  { %1314 = vmatpush.bf16.msrb.mxu0 %v2320_v37  ;;  %v1939_v37 = vld [vmem:[%s3339_s0 + $0x288] sm:$0xf0] }
  0x2d   :  { %v1942_v43 = vor.u32 %v2265_v36, %v1939_v37  ;;  %v2194_v36 = vld [vmem:[%s3339_s0 + $0x3c] sm:$0xf]  ;;  %v1659_v37 = vld [vmem:[%s3339_s0 + $0x50] sm:$0xf0] }
  0x2e   :  { %1137 = vmatpush.bf16.msrb.mxu2 %v2303_v50  ;;  %v2274_v50 = vld [vmem:[%s3339_s0 + $0x2b4] sm:$0xf0] }
  0x2f   :  { %1226 = vmatpush.bf16.msrb.mxu3 %v2311_v51  ;;  %v2271_v51 = vld [vmem:[%s3339_s0 + $0x2a4] sm:$0xf] }
  0x30   :  { %1315 = vmatpush.bf16.msrb.mxu0 %v2319_v52  ;;  %v1963_v52 = vld [vmem:[%s3339_s0 + $0x2b8] sm:$0xf0] }
  0x31   :  { %1009 = vmatmul.bf16.gmra.mxu2 %v1842_v46  ;;  %969 = vmatmul.bf16.gmra.mxu0 %v1650_v48  ;;  %v2299_v46 = vld [vmem:[%s3337_s1 + $0x80] sm:$0xff]  ;;  %v1966_v58 = vor.u32 %v2271_v51, %v1963_v52 }
  0x32   :  { %1098 = vmatmul.bf16.gmra.mxu3 %v1846_v47  ;;  %1138 = vmatpush.bf16.msrb.mxu2 %v2302_v1  ;;  %v2307_v47 = vld [vmem:[%s3337_s1 + $0xc0] sm:$0xff]  ;;  %v1793_v1 = vld [vmem:[%s3339_s0 + $0x150] sm:$0xf] }
  0x33   :  { %1227 = vmatpush.bf16.msrb.mxu3 %v2310_v2  ;;  %v2315_v48 = vld [vmem:[%s3337_s1 + $0x100] sm:$0xff]  ;;  %v2232_v2 = vld [vmem:[%s3339_s0 + $0x164] sm:$0xf0] }
  0x34   :  { %1058 = vmatmul.bf16.gmra.mxu1 %v1654_v49  ;;  %1316 = vmatpush.bf16.msrb.mxu0 %v2318_v3  ;;  %v1961_v49 = vld [vmem:[%s3339_s0 + $0x2a0] sm:$0xf]  ;;  %v2229_v3 = vld [vmem:[%s3339_s0 + $0x154] sm:$0xf]  ;;  %v1794_v7 = vor.u32 %v2232_v2, %v1793_v1  ;;  %v1683_v1 = vld [vmem:[%s3339_s0 + $0x80] sm:$0xf0] }
  0x35   :  { %v1962_v57 = vor.u32 %v2274_v50, %v1961_v49  ;;  %v1798_v8 = vor.u32 %v2229_v3, %v1795_v4  ;;  %v1689_v2 = vld [vmem:[%s3339_s0 + $0x70] sm:$0xf]  ;;  %v2204_v3 = vld [vmem:[%s3339_s0 + $0x84] sm:$0xf0] }
  0x36   :  { %1139 = vmatpush.bf16.msrb.mxu2 %v2301_v16  ;;  %v1643_v16 = vld [vmem:[%s3339_s0 + $0x28] sm:$0xf0] }
  0x37   :  { %1228 = vmatpush.bf16.msrb.mxu3 %v2309_v17  ;;  %v1634_v17 = vor.u32 %v2191_v10, %v1633_v9 }
  0x38   :  { %1317 = vmatpush.bf16.msrb.mxu0 %v2317_v18 }
  0x3a   :  { %1140 = vmatpush.bf16.msrb.mxu2 %v2300_v31 }
  0x3b   :  { %1229 = vmatpush.bf16.msrb.mxu3 %v2308_v32 }
  0x3c   :  { %1318 = vmatpush.bf16.msrb.mxu0 %v2316_v33  ;;  %v1657_v33 = vld [vmem:[%s3339_s0 + $0x38] sm:$0xf] }
  0x3e   :  { %1141 = vmatpush.bf16.msrb.mxu2 %v2299_v46  ;;  %v1662_v46 = vor.u32 %v2194_v36, %v1659_v37 }
  0x3f   :  { %1230 = vmatpush.bf16.msrb.mxu3 %v2307_v47  ;;  %v1666_v47 = vor.u32 %v2198_v39, %v1665_v38  ;;  %v2207_v38 = vld [vmem:[%s3339_s0 + $0xa4] sm:$0xf]  ;;  %v1715_v39 = vld [vmem:[%s3339_s0 + $0xb8] sm:$0xf0] }
  0x40   :  { %1319 = vmatpush.bf16.msrb.mxu0 %v2315_v48 }
  0x41   :  { %1014 = vmatmul.bf16.gmra.mxu2 %v1866_v61  ;;  %974 = vmatmul.bf16.gmra.mxu0 %v1674_v63  ;;  %v1985_v61 = vld [vmem:[%s3339_s0 + $0x2d0] sm:$0xf]  ;;  %v2277_v63 = vld [vmem:[%s3339_s0 + $0x2d4] sm:$0xf] }
  0x42   :  { %1103 = vmatmul.bf16.gmra.mxu3 %v1870_v62  ;;  %v2280_v62 = vld [vmem:[%s3339_s0 + $0x2e4] sm:$0xf0] }
  0x43   :  { %v1986_v5 = vor.u32 %v2280_v62, %v1985_v61  ;;  %v1681_v61 = vld [vmem:[%s3339_s0 + $0x68] sm:$0xf] }
  0x44   :  { %1063 = vmatmul.bf16.gmra.mxu1 %v1678_v0  ;;  %v1987_v0 = vld [vmem:[%s3339_s0 + $0x2e8] sm:$0xf0] }
  0x45   :  { %v1990_v6 = vor.u32 %v2277_v63, %v1987_v0  ;;  %v2203_v63 = vld [vmem:[%s3339_s0 + $0x7c] sm:$0xf0]  ;;  %v2200_v0 = vld [vmem:[%s3339_s0 + $0x6c] sm:$0xf] }
  0x46   :  { %v1682_v9 = vor.u32 %v2203_v63, %v1681_v61  ;;  %v1686_v10 = vor.u32 %v2200_v0, %v1683_v1  ;;  %v2215_v63 = vld [vmem:[%s3339_s0 + $0xdc] sm:$0xf0]  ;;  %v2212_v0 = vld [vmem:[%s3339_s0 + $0xcc] sm:$0xf]  ;;  %v1731_v1 = vld [vmem:[%s3339_s0 + $0xe0] sm:$0xf0] }
  0x51   :  { %1019 = vmatmul.bf16.gmra.mxu2 %v1890_v12  ;;  %979 = vmatmul.bf16.gmra.mxu0 %v1698_v14  ;;  %v1635_v12 = vld [vmem:[%s3339_s0 + $0x20] sm:$0xf0]  ;;  %v2192_v14 = vld [vmem:[%s3339_s0 + $0x24] sm:$0xf0] }
  0x52   :  { %1108 = vmatmul.bf16.gmra.mxu3 %v1894_v13  ;;  %v1641_v13 = vld [vmem:[%s3339_s0 + $0x10] sm:$0xf]  ;;  %v1638_v18 = vor.u32 %v2188_v11, %v1635_v12  ;;  %v1690_v11 = vor.u32 %v2204_v3, %v1689_v2  ;;  %v2216_v3 = vld [vmem:[%s3339_s0 + $0xe4] sm:$0xf0] }
  0x53   :  { %v1642_v20 = vor.u32 %v2192_v14, %v1641_v13  ;;  %v1737_v2 = vld [vmem:[%s3339_s0 + $0xd0] sm:$0xf] }
  0x54   :  { %1068 = vmatmul.bf16.gmra.mxu1 %v1702_v15  ;;  %v2189_v15 = vld [vmem:[%s3339_s0 + $0x14] sm:$0xf] }
  0x55   :  { %v1646_v22 = vor.u32 %v2189_v15, %v1643_v16 }
  0x61   :  { %1024 = vmatmul.bf16.gmra.mxu2 %v1914_v27  ;;  %984 = vmatmul.bf16.gmra.mxu0 %v1722_v29 }
  0x62   :  { %1113 = vmatmul.bf16.gmra.mxu3 %v1918_v28 }
  0x64   :  { %1073 = vmatmul.bf16.gmra.mxu1 %v1726_v30 }
  0x71   :  { %1029 = vmatmul.bf16.gmra.mxu2 %v1938_v42  ;;  %989 = vmatmul.bf16.gmra.mxu0 %v1746_v44  ;;  %v2195_v42 = vld [vmem:[%s3339_s0 + $0x44] sm:$0xf] }
  0x72   :  { %1118 = vmatmul.bf16.gmra.mxu3 %v1942_v43  ;;  %v1667_v43 = vld [vmem:[%s3339_s0 + $0x58] sm:$0xf0] }
  0x73   :  { %v1670_v50 = vor.u32 %v2195_v42, %v1667_v43 }
  0x74   :  { %1078 = vmatmul.bf16.gmra.mxu1 %v1750_v45  ;;  %v1658_v45 = vor.u32 %v2197_v35, %v1657_v33  ;;  %v1713_v33 = vld [vmem:[%s3339_s0 + $0xa0] sm:$0xf]  ;;  %v2210_v35 = vld [vmem:[%s3339_s0 + $0xb4] sm:$0xf0] }
  0x75   :  { %v1714_v43 = vor.u32 %v2210_v35, %v1713_v33  ;;  %v2221_v35 = vld [vmem:[%s3339_s0 + $0x10c] sm:$0xf0] }
  0x81   :  { %1034 = vmatmul.bf16.gmra.mxu2 %v1962_v57  ;;  %994 = vmatmul.bf16.gmra.mxu0 %v1770_v59 }
  0x82   :  { %1123 = vmatmul.bf16.gmra.mxu3 %v1966_v58 }
  0x84   :  { %1083 = vmatmul.bf16.gmra.mxu1 %v1774_v60 }
  0x91   :  { %1039 = vmatmul.bf16.gmra.mxu2 %v1986_v5  ;;  %999 = vmatmul.bf16.gmra.mxu0 %v1794_v7  ;;  %v1691_v7 = vld [vmem:[%s3339_s0 + $0x88] sm:$0xf0] }
  0x92   :  { %1128 = vmatmul.bf16.gmra.mxu3 %v1990_v6  ;;  %v2201_v6 = vld [vmem:[%s3339_s0 + $0x74] sm:$0xf] }
  0x93   :  { %v1694_v14 = vor.u32 %v2201_v6, %v1691_v7  ;;  %v2213_v6 = vld [vmem:[%s3339_s0 + $0xd4] sm:$0xf]  ;;  %v1739_v7 = vld [vmem:[%s3339_s0 + $0xe8] sm:$0xf0] }
  0x94   :  { %1088 = vmatmul.bf16.gmra.mxu1 %v1798_v8 }
  0x9e   :  { %v965_v21 = vpop.f32.mrf.mxu0 }
  0x9f   :  { %v966_v23 = vadd.f32 %v2703_v19, %v965_v21 }
  0xa1   :  { %v1054_v24 = vpop.f32.mrf.mxu1  ;;  %1142 = vmatmul.bf16.vlgmr.msrb.gmra.mxu2 %v1634_v17  ;;  %1320 = vmatmul.bf16.vlgmr.msrb.gmra.mxu0 %v1642_v20 }
  0xa2   :  { %1231 = vmatmul.bf16.vlgmr.msrb.gmra.mxu3 %v1638_v18  ;;  %v2706_v25 = vadd.f32 %v1054_v24, %v966_v23 }
  0xa4   :  { %2171 = vmatmul.msk.bf16.vlgmr.msrb.gmra.mxu1 %vm907_vm0, %v1646_v22  ;;  %v1005_v26 = vpop.f32.mrf.mxu2 }
  0xa5   :  { %v1094_v27 = vpop.f32.mrf.mxu3  ;;  %v1006_v28 = vadd.f32 %v2703_v19, %v1005_v26 }
  0xa6   :  { %v967_v30 = vpop.f32.mrf.mxu0 }
  0xa7   :  { %v2710_v29 = vadd.f32 %v1094_v27, %v1006_v28  ;;  %v968_v31 = vadd.f32 %v2703_v19, %v967_v30  ;;  %v1705_v27 = vld [vmem:[%s3339_s0 + $0x98] sm:$0xf]  ;;  %v2209_v30 = vld [vmem:[%s3339_s0 + $0xac] sm:$0xf0] }
  0xa9   :  { %v1056_v32 = vpop.f32.mrf.mxu1 }
  0xaa   :  { %v2716_v34 = vadd.f32 %v1056_v32, %v968_v31  ;;  %v2206_v31 = vld [vmem:[%s3339_s0 + $0x9c] sm:$0xf]  ;;  %v1707_v32 = vld [vmem:[%s3339_s0 + $0xb0] sm:$0xf0] }
  0xab   :  { %v1710_v42 = vor.u32 %v2206_v31, %v1707_v32  ;;  %v1753_v32 = vld [vmem:[%s3339_s0 + $0xf8] sm:$0xf] }
  0xac   :  { %v1007_v40 = vpop.f32.mrf.mxu2 }
  0xad   :  { %v1096_v41 = vpop.f32.mrf.mxu3  ;;  %v1008_v44 = vadd.f32 %v2703_v19, %v1007_v40 }
  0xae   :  { %v970_v49 = vpop.f32.mrf.mxu0 }
  0xaf   :  { %v2740_v48 = vadd.f32 %v1096_v41, %v1008_v44  ;;  %v971_v51 = vadd.f32 %v2703_v19, %v970_v49  ;;  %v1706_v41 = vor.u32 %v2209_v30, %v1705_v27 }
  0xb1   :  { %v1059_v52 = vpop.f32.mrf.mxu1  ;;  %1147 = vmatmul.bf16.gmra.mxu2 %v1658_v45  ;;  %1325 = vmatmul.bf16.gmra.mxu0 %v1666_v47 }
  0xb2   :  { %1236 = vmatmul.bf16.gmra.mxu3 %v1662_v46  ;;  %v2743_v53 = vadd.f32 %v1059_v52, %v971_v51  ;;  %v1718_v46 = vor.u32 %v2207_v38, %v1715_v39  ;;  %v1761_v38 = vld [vmem:[%s3339_s0 + $0x100] sm:$0xf]  ;;  %v2222_v39 = vld [vmem:[%s3339_s0 + $0x114] sm:$0xf0] }
  0xb4   :  { %2172 = vmatmul.msk.bf16.gmra.mxu1 %vm907_vm0, %v1670_v50  ;;  %v1010_v54 = vpop.f32.mrf.mxu2 }
  0xb5   :  { %v1099_v55 = vpop.f32.mrf.mxu3  ;;  %v1011_v56 = vadd.f32 %v2703_v19, %v1010_v54 }
  0xb6   :  { %v972_v58 = vpop.f32.mrf.mxu0 }
  0xb7   :  { %v2747_v57 = vadd.f32 %v1099_v55, %v1011_v56  ;;  %v973_v59 = vadd.f32 %v2703_v19, %v972_v58 }
  0xb9   :  { %v1061_v60 = vpop.f32.mrf.mxu1 }
  0xba   :  { %v2753_v62 = vadd.f32 %v1061_v60, %v973_v59  ;;  %v1729_v60 = vld [vmem:[%s3339_s0 + $0xc8] sm:$0xf] }
  0xbc   :  { %v1012_v4 = vpop.f32.mrf.mxu2 }
  0xbd   :  { %v1101_v5 = vpop.f32.mrf.mxu3  ;;  %v1013_v8 = vadd.f32 %v2703_v19, %v1012_v4 }
  0xbe   :  { %v975_v13 = vpop.f32.mrf.mxu0 }
  0xbf   :  { %v2777_v12 = vadd.f32 %v1101_v5, %v1013_v8  ;;  %v976_v15 = vadd.f32 %v2703_v19, %v975_v13 }
  0xc1   :  { %v1064_v16 = vpop.f32.mrf.mxu1  ;;  %1152 = vmatmul.bf16.gmra.mxu2 %v1682_v9  ;;  %1330 = vmatmul.bf16.gmra.mxu0 %v1690_v11  ;;  %v1730_v9 = vor.u32 %v2215_v63, %v1729_v60  ;;  %v1738_v11 = vor.u32 %v2216_v3, %v1737_v2 }
  0xc2   :  { %1241 = vmatmul.bf16.gmra.mxu3 %v1686_v10  ;;  %v2780_v17 = vadd.f32 %v1064_v16, %v976_v15  ;;  %v1734_v10 = vor.u32 %v2212_v0, %v1731_v1  ;;  %v1742_v15 = vor.u32 %v2213_v6, %v1739_v7  ;;  %v2227_v7 = vld [vmem:[%s3339_s0 + $0x13c] sm:$0xf0] }
  0xc4   :  { %2173 = vmatmul.msk.bf16.gmra.mxu1 %vm907_vm0, %v1694_v14  ;;  %v1015_v18 = vpop.f32.mrf.mxu2 }
  0xc5   :  { %v1104_v20 = vpop.f32.mrf.mxu3  ;;  %v1016_v21 = vadd.f32 %v2703_v19, %v1015_v18 }
  0xc6   :  { %v977_v23 = vpop.f32.mrf.mxu0 }
  0xc7   :  { %v2784_v22 = vadd.f32 %v1104_v20, %v1016_v21  ;;  %v978_v24 = vadd.f32 %v2703_v19, %v977_v23 }
  0xc9   :  { %v1066_v26 = vpop.f32.mrf.mxu1 }
  0xca   :  { %v2790_v28 = vadd.f32 %v1066_v26, %v978_v24 }
  0xcc   :  { %v1017_v36 = vpop.f32.mrf.mxu2 }
  0xcd   :  { %v1106_v37 = vpop.f32.mrf.mxu3  ;;  %v1018_v40 = vadd.f32 %v2703_v19, %v1017_v36  ;;  %v2218_v36 = vld [vmem:[%s3339_s0 + $0xfc] sm:$0xf] }
  0xce   :  { %v980_v45 = vpop.f32.mrf.mxu0 }
  0xcf   :  { %v2814_v44 = vadd.f32 %v1106_v37, %v1018_v40  ;;  %v981_v47 = vadd.f32 %v2703_v19, %v980_v45  ;;  %v1755_v37 = vld [vmem:[%s3339_s0 + $0x110] sm:$0xf0] }
  0xd1   :  { %v1069_v49 = vpop.f32.mrf.mxu1  ;;  %1157 = vmatmul.bf16.gmra.mxu2 %v1706_v41  ;;  %1335 = vmatmul.bf16.gmra.mxu0 %v1714_v43  ;;  %v1763_v43 = vld [vmem:[%s3339_s0 + $0x118] sm:$0xf0] }
  0xd2   :  { %1246 = vmatmul.bf16.gmra.mxu3 %v1710_v42  ;;  %v2817_v50 = vadd.f32 %v1069_v49, %v981_v47  ;;  %v2219_v42 = vld [vmem:[%s3339_s0 + $0x104] sm:$0xf]  ;;  %v1758_v47 = vor.u32 %v2218_v36, %v1755_v37  ;;  %v1762_v49 = vor.u32 %v2222_v39, %v1761_v38 }
  0xd4   :  { %2174 = vmatmul.msk.bf16.gmra.mxu1 %vm907_vm0, %v1718_v46  ;;  %v1020_v51 = vpop.f32.mrf.mxu2  ;;  %v1754_v46 = vor.u32 %v2221_v35, %v1753_v32 }
  0xd5   :  { %v1109_v52 = vpop.f32.mrf.mxu3  ;;  %v1021_v54 = vadd.f32 %v2703_v19, %v1020_v51 }
  0xd6   :  { %v982_v56 = vpop.f32.mrf.mxu0 }
  0xd7   :  { %v2821_v55 = vadd.f32 %v1109_v52, %v1021_v54  ;;  %v983_v58 = vadd.f32 %v2703_v19, %v982_v56  ;;  %v1766_v54 = vor.u32 %v2219_v42, %v1763_v43 }
  0xd9   :  { %v1071_v59 = vpop.f32.mrf.mxu1 }
  0xda   :  { %v2827_v61 = vadd.f32 %v1071_v59, %v983_v58 }
  0xdc   :  { %v1022_v4 = vpop.f32.mrf.mxu2 }
  0xdd   :  { %v1111_v5 = vpop.f32.mrf.mxu3  ;;  %v1023_v8 = vadd.f32 %v2703_v19, %v1022_v4 }
  0xde   :  { %v985_v14 = vpop.f32.mrf.mxu0 }
  0xdf   :  { %v2851_v13 = vadd.f32 %v1111_v5, %v1023_v8  ;;  %v986_v16 = vadd.f32 %v2703_v19, %v985_v14  ;;  %v1777_v5 = vld [vmem:[%s3339_s0 + $0x128] sm:$0xf]  ;;  %v2224_v8 = vld [vmem:[%s3339_s0 + $0x12c] sm:$0xf] }
  0xe1   :  { %v1074_v18 = vpop.f32.mrf.mxu1  ;;  %1162 = vmatmul.bf16.gmra.mxu2 %v1730_v9  ;;  %1340 = vmatmul.bf16.gmra.mxu0 %v1738_v11  ;;  %v1779_v9 = vld [vmem:[%s3339_s0 + $0x140] sm:$0xf0]  ;;  %v2228_v11 = vld [vmem:[%s3339_s0 + $0x144] sm:$0xf0] }
  0xe2   :  { %1251 = vmatmul.bf16.gmra.mxu3 %v1734_v10  ;;  %v2854_v20 = vadd.f32 %v1074_v18, %v986_v16  ;;  %v1785_v10 = vld [vmem:[%s3339_s0 + $0x130] sm:$0xf]  ;;  %v2225_v16 = vld [vmem:[%s3339_s0 + $0x134] sm:$0xf]  ;;  %v1787_v18 = vld [vmem:[%s3339_s0 + $0x148] sm:$0xf0] }
  0xe3   :  { %v1790_v32 = vor.u32 %v2225_v16, %v1787_v18 }
  0xe4   :  { %2175 = vmatmul.msk.bf16.gmra.mxu1 %vm907_vm0, %v1742_v15  ;;  %v1025_v21 = vpop.f32.mrf.mxu2 }
  0xe5   :  { %v1114_v23 = vpop.f32.mrf.mxu3  ;;  %v1026_v24 = vadd.f32 %v2703_v19, %v1025_v21 }
  0xe6   :  { %v987_v27 = vpop.f32.mrf.mxu0 }
  0xe7   :  { %v2858_v26 = vadd.f32 %v1114_v23, %v1026_v24  ;;  %v988_v30 = vadd.f32 %v2703_v19, %v987_v27  ;;  %v1778_v23 = vor.u32 %v2227_v7, %v1777_v5  ;;  %v1782_v24 = vor.u32 %v2224_v8, %v1779_v9 }
  0xe8   :  { %v1786_v27 = vor.u32 %v2228_v11, %v1785_v10 }
  0xe9   :  { %v1076_v31 = vpop.f32.mrf.mxu1 }
  0xea   :  { %v2864_v33 = vadd.f32 %v1076_v31, %v988_v30 }
  0xec   :  { %v1027_v40 = vpop.f32.mrf.mxu2 }
  0xed   :  { %v1116_v41 = vpop.f32.mrf.mxu3  ;;  %v1028_v45 = vadd.f32 %v2703_v19, %v1027_v40 }
  0xee   :  { %v990_v52 = vpop.f32.mrf.mxu0 }
  0xef   :  { %v2888_v51 = vadd.f32 %v1116_v41, %v1028_v45  ;;  %v991_v56 = vadd.f32 %v2703_v19, %v990_v52  ;;  %v2230_v52 = vld [vmem:[%s3339_s0 + $0x15c] sm:$0xf] }
  0xf1   :  { %v1079_v58 = vpop.f32.mrf.mxu1  ;;  %1167 = vmatmul.bf16.gmra.mxu2 %v1754_v46  ;;  %1345 = vmatmul.bf16.gmra.mxu0 %v1762_v49  ;;  %v1801_v46 = vld [vmem:[%s3339_s0 + $0x158] sm:$0xf]  ;;  %v2233_v49 = vld [vmem:[%s3339_s0 + $0x16c] sm:$0xf0] }
  0xf2   :  { %1256 = vmatmul.bf16.gmra.mxu3 %v1758_v47  ;;  %v2891_v59 = vadd.f32 %v1079_v58, %v991_v56  ;;  %v1809_v56 = vld [vmem:[%s3339_s0 + $0x160] sm:$0xf]  ;;  %v2234_v58 = vld [vmem:[%s3339_s0 + $0x174] sm:$0xf0] }
  0xf3   :  { %v1810_v7 = vor.u32 %v2234_v58, %v1809_v56 }
  0xf4   :  { %2176 = vmatmul.msk.bf16.gmra.mxu1 %vm907_vm0, %v1766_v54  ;;  %v1030_v60 = vpop.f32.mrf.mxu2  ;;  %v1803_v54 = vld [vmem:[%s3339_s0 + $0x170] sm:$0xf0] }
  0xf5   :  { %v1119_v63 = vpop.f32.mrf.mxu3  ;;  %v1031_v0 = vadd.f32 %v2703_v19, %v1030_v60  ;;  %v1806_v5 = vor.u32 %v2230_v52, %v1803_v54 }
  0xf6   :  { %v992_v2 = vpop.f32.mrf.mxu0 }
  0xf7   :  { %v2895_v1 = vadd.f32 %v1119_v63, %v1031_v0  ;;  %v993_v3 = vadd.f32 %v2703_v19, %v992_v2  ;;  %v2231_v0 = vld [vmem:[%s3339_s0 + $0x164] sm:$0xf]  ;;  %v1811_v2 = vld [vmem:[%s3339_s0 + $0x178] sm:$0xf0] }
  0xf8   :  { %v1814_v10 = vor.u32 %v2231_v0, %v1811_v2 }
  0xf9   :  { %v1081_v4 = vpop.f32.mrf.mxu1 }
  0xfa   :  { %v2901_v6 = vadd.f32 %v1081_v4, %v993_v3  ;;  %v1802_v4 = vor.u32 %v2233_v49, %v1801_v46  ;;  %v2237_v46 = vld [vmem:[%s3339_s0 + $0x194] sm:$0xf]  ;;  %v1835_v49 = vld [vmem:[%s3339_s0 + $0x1a8] sm:$0xf0] }
  0xfb   :  { %v1838_v0 = vor.u32 %v2237_v46, %v1835_v49 }
  0xfc   :  { %v1032_v14 = vpop.f32.mrf.mxu2 }
  0xfd   :  { %v1121_v15 = vpop.f32.mrf.mxu3  ;;  %v1033_v21 = vadd.f32 %v2703_v19, %v1032_v14 }
  0xfe   :  { %v995_v31 = vpop.f32.mrf.mxu0 }
  0xff   :  { %v2925_v30 = vadd.f32 %v1121_v15, %v1033_v21  ;;  %v996_v35 = vadd.f32 %v2703_v19, %v995_v31 }
 0x101   :  { %v1084_v36 = vpop.f32.mrf.mxu1  ;;  %1172 = vmatmul.bf16.gmra.mxu2 %v1778_v23  ;;  %1350 = vmatmul.bf16.gmra.mxu0 %v1786_v27 }
 0x102   :  { %1261 = vmatmul.bf16.gmra.mxu3 %v1782_v24  ;;  %v2928_v37 = vadd.f32 %v1084_v36, %v996_v35  ;;  %v2239_v36 = vld [vmem:[%s3339_s0 + $0x19c] sm:$0xf0] }
 0x104   :  { %2177 = vmatmul.msk.bf16.gmra.mxu1 %vm907_vm0, %v1790_v32  ;;  %v1035_v38 = vpop.f32.mrf.mxu2  ;;  %v1825_v32 = vld [vmem:[%s3339_s0 + $0x188] sm:$0xf] }
 0x105   :  { %v1124_v39 = vpop.f32.mrf.mxu3  ;;  %v1036_v40 = vadd.f32 %v2703_v19, %v1035_v38  ;;  %v2236_v38 = vld [vmem:[%s3339_s0 + $0x18c] sm:$0xf]  ;;  %v1826_v54 = vor.u32 %v2239_v36, %v1825_v32  ;;  %v2243_v36 = vld [vmem:[%s3339_s0 + $0x1c4] sm:$0xf] }
 0x106   :  { %v997_v42 = vpop.f32.mrf.mxu0 }
 0x107   :  { %v2932_v41 = vadd.f32 %v1124_v39, %v1036_v40  ;;  %v998_v43 = vadd.f32 %v2703_v19, %v997_v42  ;;  %v1827_v39 = vld [vmem:[%s3339_s0 + $0x1a0] sm:$0xf0]  ;;  %v1833_v40 = vld [vmem:[%s3339_s0 + $0x190] sm:$0xf]  ;;  %v2240_v42 = vld [vmem:[%s3339_s0 + $0x1a4] sm:$0xf0] }
 0x108   :  { %v1830_v56 = vor.u32 %v2236_v38, %v1827_v39  ;;  %v1834_v58 = vor.u32 %v2240_v42, %v1833_v40  ;;  %v1859_v38 = vld [vmem:[%s3339_s0 + $0x1d8] sm:$0xf0] }
 0x109   :  { %v1086_v45 = vpop.f32.mrf.mxu1 }
 0x10a   :  { %v2938_v47 = vadd.f32 %v1086_v45, %v998_v43 }
 0x10c   :  { %v1037_v60 = vpop.f32.mrf.mxu2 }
 0x10d   :  { %v1126_v63 = vpop.f32.mrf.mxu3  ;;  %v1038_v3 = vadd.f32 %v2703_v19, %v1037_v60 }
 0x10e   :  { %v1000_v9 = vpop.f32.mrf.mxu0 }
 0x10f   :  { %v2962_v8 = vadd.f32 %v1126_v63, %v1038_v3  ;;  %v1001_v11 = vadd.f32 %v2703_v19, %v1000_v9 }
 0x111   :  { %v1089_v14 = vpop.f32.mrf.mxu1  ;;  %1177 = vmatmul.bf16.gmra.mxu2 %v1802_v4  ;;  %1355 = vmatmul.bf16.gmra.mxu0 %v1810_v7 }
 0x112   :  { %1266 = vmatmul.bf16.gmra.mxu3 %v1806_v5  ;;  %v2965_v15 = vadd.f32 %v1089_v14, %v1001_v11  ;;  %v1849_v11 = vld [vmem:[%s3339_s0 + $0x1b8] sm:$0xf]  ;;  %v2245_v14 = vld [vmem:[%s3339_s0 + $0x1cc] sm:$0xf0] }
 0x113   :  { %v1850_v32 = vor.u32 %v2245_v14, %v1849_v11  ;;  %v1875_v11 = vld [vmem:[%s3339_s0 + $0x200] sm:$0xf0] }
 0x114   :  { %2178 = vmatmul.msk.bf16.gmra.mxu1 %vm907_vm0, %v1814_v10  ;;  %v1040_v16 = vpop.f32.mrf.mxu2 }
 0x115   :  { %v1129_v18 = vpop.f32.mrf.mxu3  ;;  %v1041_v21 = vadd.f32 %v2703_v19, %v1040_v16  ;;  %v2242_v16 = vld [vmem:[%s3339_s0 + $0x1bc] sm:$0xf] }
 0x116   :  { %v1002_v24 = vpop.f32.mrf.mxu0 }
 0x117   :  { %v2969_v23 = vadd.f32 %v1129_v18, %v1041_v21  ;;  %v1003_v27 = vadd.f32 %v2703_v19, %v1002_v24  ;;  %v1857_v21 = vld [vmem:[%s3339_s0 + $0x1c0] sm:$0xf]  ;;  %v2246_v24 = vld [vmem:[%s3339_s0 + $0x1d4] sm:$0xf0] }
 0x119   :  { %v1091_v31 = vpop.f32.mrf.mxu1 }
 0x11a   :  { %v2975_v35 = vadd.f32 %v1091_v31, %v1003_v27 }
 0x11c   :  { %v1042_v43 = vpop.f32.mrf.mxu2 }
 0x11d   :  { %v1131_v45 = vpop.f32.mrf.mxu3  ;;  %v1043_v52 = vadd.f32 %v2703_v19, %v1042_v43  ;;  %v1858_v43 = vor.u32 %v2246_v24, %v1857_v21 }
 0x11e   :  { %v1321_v63 = vpop.f32.mrf.mxu0 }
 0x11f   :  { %v2999_v60 = vadd.f32 %v1131_v45, %v1043_v52  ;;  %v1862_v52 = vor.u32 %v2243_v36, %v1859_v38 }
 0x121   :  { %v1410_v2 = vpop.f32.mrf.mxu1  ;;  %1182 = vmatmul.bf16.gmra.mxu2 %v1826_v54  ;;  %1360 = vmatmul.bf16.gmra.mxu0 %v1834_v58 }
 0x122   :  { %1271 = vmatmul.bf16.gmra.mxu3 %v1830_v56 }
 0x124   :  { %2179 = vmatmul.msk.bf16.gmra.mxu1 %vm907_vm0, %v1838_v0  ;;  %v1143_v3 = vpop.f32.mrf.mxu2 }
 0x125   :  { %v1232_v4 = vpop.f32.mrf.mxu3  ;;  %v1144_v5 = vadd.f32 %v1143_v3, %v2706_v25  ;;  %v1851_v25 = vld [vmem:[%s3339_s0 + $0x1d0] sm:$0xf0] }
 0x126   :  { %v1323_v9 = vpop.f32.mrf.mxu0  ;;  %v1854_v42 = vor.u32 %v2242_v16, %v1851_v25  ;;  %v1881_v16 = vld [vmem:[%s3339_s0 + $0x1f0] sm:$0xf]  ;;  %v2252_v25 = vld [vmem:[%s3339_s0 + $0x204] sm:$0xf0] }
 0x127   :  { %v1233_v7 = vadd.f32 %v1232_v4, %v1144_v5 }
 0x129   :  { %v1412_v19 = vpop.f32.mrf.mxu1  ;;  %v1322_v10 = vadd.f32 %v1321_v63, %v1233_v7 }
 0x12b   :  { %v1411_v18 = vadd.f32 %v1410_v2, %v1322_v10  ;;  %v2251_v10 = vld [vmem:[%s3339_s0 + $0x1fc] sm:$0xf0] }
 0x12c   :  { %v1145_v27 = vpop.f32.mrf.mxu2 }
 0x12d   :  { %v1234_v31 = vpop.f32.mrf.mxu3  ;;  %vm1490_vm2 = vcmp.ge.f32.partialorder %v1411_v18, 0.0  ;;  %v1522_v39 = vmul.f32 0.2, %v1411_v18  ;;  %v1146_v40 = vadd.f32 %v1145_v27, %v2716_v34  ;;  %v2249_v27 = vld [vmem:[%s3339_s0 + $0x1f4] sm:$0xf] }
 0x12e   :  { %v1326_v49 = vpop.f32.mrf.mxu0 }
 0x12f   :  { %v1554_v45 = vsel %vm1490_vm2, %v1411_v18, %v1522_v39  ;;  %v1235_v46 = vadd.f32 %v1234_v31, %v1146_v40  ;;  %v1883_v31 = vld [vmem:[%s3339_s0 + $0x208] sm:$0xf0]  ;;  %v1882_v39 = vor.u32 %v2252_v25, %v1881_v16  ;;  %v2255_v16 = vld [vmem:[%s3339_s0 + $0x224] sm:$0xf]  ;;  %v1907_v25 = vld [vmem:[%s3339_s0 + $0x238] sm:$0xf0] }
 0x130   :  { %1587 = vst.msk [vmem:[%s3340_s3] sm:$0xff] %vm1586_vm1, %v1554_v45  ;;  %v1886_v45 = vor.u32 %v2249_v27, %v1883_v31 }
 0x131   :  { %v1415_v54 = vpop.f32.mrf.mxu1  ;;  %v1324_v56 = vadd.f32 %v1323_v9, %v1235_v46  ;;  %1187 = vmatmul.bf16.gmra.mxu2 %v1850_v32  ;;  %1365 = vmatmul.bf16.gmra.mxu0 %v1858_v43 }
 0x132   :  { %1276 = vmatmul.bf16.gmra.mxu3 %v1854_v42 }
 0x133   :  { %v1413_v58 = vadd.f32 %v1412_v19, %v1324_v56  ;;  %v1873_v19 = vld [vmem:[%s3339_s0 + $0x1e8] sm:$0xf] }
 0x134   :  { %2180 = vmatmul.msk.bf16.gmra.mxu1 %vm907_vm0, %v1862_v52  ;;  %v1148_v34 = vpop.f32.mrf.mxu2  ;;  %v1874_v24 = vor.u32 %v2251_v10, %v1873_v19  ;;  %v1905_v19 = vld [vmem:[%s3339_s0 + $0x220] sm:$0xf]  ;;  %v2258_v10 = vld [vmem:[%s3339_s0 + $0x234] sm:$0xf0] }
 0x135   :  { %v1237_v63 = vpop.f32.mrf.mxu3  ;;  %vm1491_vm3 = vcmp.ge.f32.partialorder %v1413_v58, 0.0  ;;  %v1523_v0 = vmul.f32 0.2, %v1413_v58  ;;  %v1149_v2 = vadd.f32 %v1148_v34, %v2743_v53  ;;  %v2248_v53 = vld [vmem:[%s3339_s0 + $0x1ec] sm:$0xf]  ;;  %v1906_v27 = vor.u32 %v2258_v10, %v1905_v19 }
 0x136   :  { %v1328_v5 = vpop.f32.mrf.mxu0  ;;  %v1878_v38 = vor.u32 %v2248_v53, %v1875_v11 }
 0x137   :  { %v1555_v3 = vsel %vm1491_vm3, %v1413_v58, %v1523_v0  ;;  %v1238_v4 = vadd.f32 %v1237_v63, %v1149_v2 }
 0x138   :  { %1588 = vst.msk [vmem:[%s3340_s3 + $0x8] sm:$0xff] %vm1586_vm1, %v1555_v3 }
 0x139   :  { %v1417_v7 = vpop.f32.mrf.mxu1  ;;  %v1327_v9 = vadd.f32 %v1326_v49, %v1238_v4  ;;  %v1897_v4 = vld [vmem:[%s3339_s0 + $0x218] sm:$0xf] }
 0x13b   :  { %v1416_v14 = vadd.f32 %v1415_v54, %v1327_v9 }
 0x13c   :  { %v1150_v18 = vpop.f32.mrf.mxu2 }
 0x13d   :  { %v1239_v21 = vpop.f32.mrf.mxu3  ;;  %vm1492_vm4 = vcmp.ge.f32.partialorder %v1416_v14, 0.0  ;;  %v1524_v32 = vmul.f32 0.2, %v1416_v14  ;;  %v1151_v36 = vadd.f32 %v1150_v18, %v2753_v62 }
 0x13e   :  { %v1331_v43 = vpop.f32.mrf.mxu0 }
 0x13f   :  { %v1556_v40 = vsel %vm1492_vm4, %v1416_v14, %v1524_v32  ;;  %v1240_v42 = vadd.f32 %v1239_v21, %v1151_v36 }
 0x140   :  { %1589 = vst.msk [vmem:[%s3340_s3 + $0x10] sm:$0xff] %vm1586_vm1, %v1556_v40 }
 0x141   :  { %v1420_v46 = vpop.f32.mrf.mxu1  ;;  %v1329_v49 = vadd.f32 %v1328_v5, %v1240_v42  ;;  %1192 = vmatmul.bf16.gmra.mxu2 %v1874_v24  ;;  %1370 = vmatmul.bf16.gmra.mxu0 %v1882_v39  ;;  %v2257_v5 = vld [vmem:[%s3339_s0 + $0x22c] sm:$0xf0] }
 0x142   :  { %1281 = vmatmul.bf16.gmra.mxu3 %v1878_v38  ;;  %v1898_v14 = vor.u32 %v2257_v5, %v1897_v4  ;;  %v1910_v38 = vor.u32 %v2255_v16, %v1907_v25 }
 0x143   :  { %v1418_v52 = vadd.f32 %v1417_v7, %v1329_v49  ;;  %v1899_v7 = vld [vmem:[%s3339_s0 + $0x230] sm:$0xf0] }
 0x144   :  { %2181 = vmatmul.msk.bf16.gmra.mxu1 %vm907_vm0, %v1886_v45  ;;  %v1153_v62 = vpop.f32.mrf.mxu2 }
 0x145   :  { %v1242_v54 = vpop.f32.mrf.mxu3  ;;  %vm1493_vm5 = vcmp.ge.f32.partialorder %v1418_v52, 0.0  ;;  %v1525_v56 = vmul.f32 0.2, %v1418_v52  ;;  %v1154_v58 = vadd.f32 %v1153_v62, %v2780_v17  ;;  %v2254_v17 = vld [vmem:[%s3339_s0 + $0x21c] sm:$0xf] }
 0x146   :  { %v1333_v0 = vpop.f32.mrf.mxu0  ;;  %v1902_v24 = vor.u32 %v2254_v17, %v1899_v7  ;;  %v2261_v7 = vld [vmem:[%s3339_s0 + $0x254] sm:$0xf] }
 0x147   :  { %v1557_v34 = vsel %vm1493_vm5, %v1418_v52, %v1525_v56  ;;  %v1243_v63 = vadd.f32 %v1242_v54, %v1154_v58  ;;  %v1921_v58 = vld [vmem:[%s3339_s0 + $0x248] sm:$0xf] }
 0x148   :  { %1590 = vst.msk [vmem:[%s3340_s3 + $0x18] sm:$0xff] %vm1586_vm1, %v1557_v34  ;;  %v2263_v34 = vld [vmem:[%s3339_s0 + $0x25c] sm:$0xf0] }
 0x149   :  { %v1422_v2 = vpop.f32.mrf.mxu1  ;;  %v1332_v3 = vadd.f32 %v1331_v43, %v1243_v63  ;;  %v1923_v63 = vld [vmem:[%s3339_s0 + $0x260] sm:$0xf0]  ;;  %v1922_v17 = vor.u32 %v2263_v34, %v1921_v58 }
 0x14a   :  { %v2267_v34 = vld [vmem:[%s3339_s0 + $0x284] sm:$0xf] }
 0x14b   :  { %v1421_v9 = vadd.f32 %v1420_v46, %v1332_v3  ;;  %v2264_v3 = vld [vmem:[%s3339_s0 + $0x264] sm:$0xf0] }
 0x14c   :  { %v1155_v53 = vpop.f32.mrf.mxu2 }
 0x14d   :  { %v1244_v11 = vpop.f32.mrf.mxu3  ;;  %vm1494_vm6 = vcmp.ge.f32.partialorder %v1421_v9, 0.0  ;;  %v1526_v18 = vmul.f32 0.2, %v1421_v9  ;;  %v1156_v21 = vadd.f32 %v1155_v53, %v2790_v28 }
 0x14e   :  { %v1336_v36 = vpop.f32.mrf.mxu0 }
 0x14f   :  { %v1558_v31 = vsel %vm1494_vm6, %v1421_v9, %v1526_v18  ;;  %v1245_v32 = vadd.f32 %v1244_v11, %v1156_v21  ;;  %v1931_v9 = vld [vmem:[%s3339_s0 + $0x268] sm:$0xf0] }
 0x150   :  { %1591 = vst.msk [vmem:[%s3340_s3 + $0x20] sm:$0xff] %vm1586_vm1, %v1558_v31  ;;  %v1934_v18 = vor.u32 %v2261_v7, %v1931_v9 }
 0x151   :  { %v1425_v39 = vpop.f32.mrf.mxu1  ;;  %v1334_v40 = vadd.f32 %v1333_v0, %v1245_v32  ;;  %1197 = vmatmul.bf16.gmra.mxu2 %v1898_v14  ;;  %1375 = vmatmul.bf16.gmra.mxu0 %v1906_v27 }
 0x152   :  { %1286 = vmatmul.bf16.gmra.mxu3 %v1902_v24 }
 0x153   :  { %v1423_v42 = vadd.f32 %v1422_v2, %v1334_v40  ;;  %v1929_v2 = vld [vmem:[%s3339_s0 + $0x250] sm:$0xf] }
 0x154   :  { %2182 = vmatmul.msk.bf16.gmra.mxu1 %vm907_vm0, %v1910_v38  ;;  %v1158_v28 = vpop.f32.mrf.mxu2  ;;  %v1930_v11 = vor.u32 %v2264_v3, %v1929_v2 }
 0x155   :  { %v1247_v43 = vpop.f32.mrf.mxu3  ;;  %vm1495_vm7 = vcmp.ge.f32.partialorder %v1423_v42, 0.0  ;;  %v1527_v45 = vmul.f32 0.2, %v1423_v42  ;;  %v1159_v46 = vadd.f32 %v1158_v28, %v2817_v50  ;;  %v2260_v50 = vld [vmem:[%s3339_s0 + $0x24c] sm:$0xf] }
 0x156   :  { %v1338_v62 = vpop.f32.mrf.mxu0  ;;  %v1926_v53 = vor.u32 %v2260_v50, %v1923_v63  ;;  %v1955_v50 = vld [vmem:[%s3339_s0 + $0x298] sm:$0xf0] }
 0x157   :  { %v1559_v49 = vsel %vm1495_vm7, %v1423_v42, %v1527_v45  ;;  %v1248_v52 = vadd.f32 %v1247_v43, %v1159_v46  ;;  %v1945_v43 = vld [vmem:[%s3339_s0 + $0x278] sm:$0xf]  ;;  %v2269_v45 = vld [vmem:[%s3339_s0 + $0x28c] sm:$0xf0]  ;;  %v1947_v46 = vld [vmem:[%s3339_s0 + $0x290] sm:$0xf0]  ;;  %v1958_v7 = vor.u32 %v2267_v34, %v1955_v50 }
 0x158   :  { %1592 = vst.msk [vmem:[%s3340_s3 + $0x28] sm:$0xff] %vm1586_vm1, %v1559_v49  ;;  %v1946_v58 = vor.u32 %v2269_v45, %v1945_v43  ;;  %v1979_v43 = vld [vmem:[%s3339_s0 + $0x2c8] sm:$0xf0] }
 0x159   :  { %v1427_v54 = vpop.f32.mrf.mxu1  ;;  %v1337_v56 = vadd.f32 %v1336_v36, %v1248_v52  ;;  %v1953_v52 = vld [vmem:[%s3339_s0 + $0x280] sm:$0xf] }
 0x15b   :  { %v1426_v0 = vadd.f32 %v1425_v39, %v1337_v56 }
 0x15c   :  { %v1160_v4 = vpop.f32.mrf.mxu2 }
 0x15d   :  { %v1249_v5 = vpop.f32.mrf.mxu3  ;;  %vm1496_vm8 = vcmp.ge.f32.partialorder %v1426_v0, 0.0  ;;  %v1528_v19 = vmul.f32 0.2, %v1426_v0  ;;  %v1161_v10 = vadd.f32 %v1160_v4, %v2827_v61 }
 0x15e   :  { %v1341_v25 = vpop.f32.mrf.mxu0 }
 0x15f   :  { %v1560_v14 = vsel %vm1496_vm8, %v1426_v0, %v1528_v19  ;;  %v1250_v16 = vadd.f32 %v1249_v5, %v1161_v10 }
 0x160   :  { %1593 = vst.msk [vmem:[%s3340_s3 + $0x30] sm:$0xff] %vm1586_vm1, %v1560_v14 }
 0x161   :  { %v1430_v21 = vpop.f32.mrf.mxu1  ;;  %v1339_v24 = vadd.f32 %v1338_v62, %v1250_v16  ;;  %1202 = vmatmul.bf16.gmra.mxu2 %v1922_v17  ;;  %1380 = vmatmul.bf16.gmra.mxu0 %v1930_v11  ;;  %v2270_v62 = vld [vmem:[%s3339_s0 + $0x294] sm:$0xf0] }
 0x162   :  { %1291 = vmatmul.bf16.gmra.mxu3 %v1926_v53  ;;  %v1954_v3 = vor.u32 %v2270_v62, %v1953_v52 }
 0x163   :  { %v1428_v27 = vadd.f32 %v1427_v54, %v1339_v24 }
 0x164   :  { %2183 = vmatmul.msk.bf16.gmra.mxu1 %vm907_vm0, %v1934_v18  ;;  %v1163_v61 = vpop.f32.mrf.mxu2 }
 0x165   :  { %v1252_v31 = vpop.f32.mrf.mxu3  ;;  %vm1497_vm9 = vcmp.ge.f32.partialorder %v1428_v27, 0.0  ;;  %v1529_v32 = vmul.f32 0.2, %v1428_v27  ;;  %v1164_v36 = vadd.f32 %v1163_v61, %v2854_v20  ;;  %v2266_v20 = vld [vmem:[%s3339_s0 + $0x27c] sm:$0xf] }
 0x166   :  { %v1343_v40 = vpop.f32.mrf.mxu0  ;;  %v1950_v2 = vor.u32 %v2266_v20, %v1947_v46  ;;  %v2275_v61 = vld [vmem:[%s3339_s0 + $0x2bc] sm:$0xf0] }
 0x167   :  { %v1561_v38 = vsel %vm1497_vm9, %v1428_v27, %v1529_v32  ;;  %v1253_v39 = vadd.f32 %v1252_v31, %v1164_v36  ;;  %v1969_v27 = vld [vmem:[%s3339_s0 + $0x2a8] sm:$0xf]  ;;  %v1971_v31 = vld [vmem:[%s3339_s0 + $0x2c0] sm:$0xf0]  ;;  %v1977_v36 = vld [vmem:[%s3339_s0 + $0x2b0] sm:$0xf] }
 0x168   :  { %1594 = vst.msk [vmem:[%s3340_s3 + $0x38] sm:$0xff] %vm1586_vm1, %v1561_v38  ;;  %v2276_v38 = vld [vmem:[%s3339_s0 + $0x2c4] sm:$0xf0] }
 0x169   :  { %v1432_v42 = vpop.f32.mrf.mxu1  ;;  %v1342_v28 = vadd.f32 %v1341_v25, %v1253_v39 }
 0x16b   :  { %v1431_v49 = vadd.f32 %v1430_v21, %v1342_v28  ;;  %v2273_v28 = vld [vmem:[%s3339_s0 + $0x2b4] sm:$0xf] }
 0x16c   :  { %v1165_v54 = vpop.f32.mrf.mxu2 }
 0x16d   :  { %v1254_v56 = vpop.f32.mrf.mxu3  ;;  %vm1498_vm10 = vcmp.ge.f32.partialorder %v1431_v49, 0.0  ;;  %v1530_v63 = vmul.f32 0.2, %v1431_v49  ;;  %v1166_v0 = vadd.f32 %v1165_v54, %v2864_v33 }
 0x16e   :  { %v1346_v17 = vpop.f32.mrf.mxu0 }
 0x16f   :  { %v1562_v4 = vsel %vm1498_vm10, %v1431_v49, %v1530_v63  ;;  %v1255_v5 = vadd.f32 %v1254_v56, %v1166_v0  ;;  %v1978_v49 = vor.u32 %v2276_v38, %v1977_v36  ;;  %v1982_v56 = vor.u32 %v2273_v28, %v1979_v43 }
 0x170   :  { %1595 = vst.msk [vmem:[%s3340_s3 + $0x40] sm:$0xff] %vm1586_vm1, %v1562_v4 }
 0x171   :  { %v1435_v9 = vpop.f32.mrf.mxu1  ;;  %v1344_v19 = vadd.f32 %v1343_v40, %v1255_v5  ;;  %1207 = vmatmul.bf16.gmra.mxu2 %v1946_v58  ;;  %1385 = vmatmul.bf16.gmra.mxu0 %v1954_v3 }
 0x172   :  { %1296 = vmatmul.bf16.gmra.mxu3 %v1950_v2 }
 0x173   :  { %v1433_v10 = vadd.f32 %v1432_v42, %v1344_v19  ;;  %v1970_v42 = vor.u32 %v2275_v61, %v1969_v27  ;;  %v2281_v19 = vld [vmem:[%s3339_s0 + $0x2ec] sm:$0xf0] }
 0x174   :  { %2184 = vmatmul.msk.bf16.gmra.mxu1 %vm907_vm0, %v1958_v7  ;;  %v1168_v33 = vpop.f32.mrf.mxu2 }
 0x175   :  { %v1257_v53 = vpop.f32.mrf.mxu3  ;;  %vm1499_vm11 = vcmp.ge.f32.partialorder %v1433_v10, 0.0  ;;  %v1531_v11 = vmul.f32 0.2, %v1433_v10  ;;  %v1169_v14 = vadd.f32 %v1168_v33, %v2891_v59  ;;  %v2272_v59 = vld [vmem:[%s3339_s0 + $0x2ac] sm:$0xf] }
 0x176   :  { %v1348_v18 = vpop.f32.mrf.mxu0  ;;  %v1974_v46 = vor.u32 %v2272_v59, %v1971_v31 }
 0x177   :  { %v1563_v16 = vsel %vm1499_vm11, %v1433_v10, %v1531_v11  ;;  %v1258_v25 = vadd.f32 %v1257_v53, %v1169_v14  ;;  %v1995_v10 = vld [vmem:[%s3339_s0 + $0x2f0] sm:$0xf0]  ;;  %v2001_v53 = vld [vmem:[%s3339_s0 + $0x2e0] sm:$0xf]  ;;  %v2282_v11 = vld [vmem:[%s3339_s0 + $0x2f4] sm:$0xf0] }
 0x178   :  { %1596 = vst.msk [vmem:[%s3340_s3 + $0x48] sm:$0xff] %vm1586_vm1, %v1563_v16  ;;  %v2002_v59 = vor.u32 %v2282_v11, %v2001_v53 }
 0x179   :  { %v1437_v21 = vpop.f32.mrf.mxu1  ;;  %v1347_v24 = vadd.f32 %v1346_v17, %v1258_v25 }
 0x17b   :  { %v1436_v32 = vadd.f32 %v1435_v9, %v1347_v24  ;;  %v1993_v9 = vld [vmem:[%s3339_s0 + $0x2d8] sm:$0xf] }
 0x17c   :  { %v1170_v39 = vpop.f32.mrf.mxu2  ;;  %v1994_v25 = vor.u32 %v2281_v19, %v1993_v9 }
 0x17d   :  { %v1259_v40 = vpop.f32.mrf.mxu3  ;;  %vm1500_vm12 = vcmp.ge.f32.partialorder %v1436_v32, 0.0  ;;  %v1532_v45 = vmul.f32 0.2, %v1436_v32  ;;  %v1171_v20 = vadd.f32 %v1170_v39, %v2901_v6 }
 0x17e   :  { %v1351_v54 = vpop.f32.mrf.mxu0 }
 0x17f   :  { %v1564_v52 = vsel %vm1500_vm12, %v1436_v32, %v1532_v45  ;;  %v1260_v62 = vadd.f32 %v1259_v40, %v1171_v20 }
 0x180   :  { %1597 = vst.msk [vmem:[%s3340_s3 + $0x50] sm:$0xff] %vm1586_vm1, %v1564_v52 }
 0x181   :  { %v1440_v58 = vpop.f32.mrf.mxu1  ;;  %v1349_v34 = vadd.f32 %v1348_v18, %v1260_v62  ;;  %1212 = vmatmul.bf16.gmra.mxu2 %v1970_v42  ;;  %1390 = vmatmul.bf16.gmra.mxu0 %v1978_v49  ;;  %v2279_v18 = vld [vmem:[%s3339_s0 + $0x2e4] sm:$0xf] }
 0x182   :  { %1301 = vmatmul.bf16.gmra.mxu3 %v1974_v46 }
 0x183   :  { %v1438_v50 = vadd.f32 %v1437_v21, %v1349_v34  ;;  %v2003_v21 = vld [vmem:[%s3339_s0 + $0x2f8] sm:$0xf0] }
 0x184   :  { %2185 = vmatmul.msk.bf16.gmra.mxu1 %vm907_vm0, %v1982_v56  ;;  %v1173_v6 = vpop.f32.mrf.mxu2  ;;  %v2006_v38 = vor.u32 %v2279_v18, %v2003_v21 }
 0x185   :  { %v1262_v63 = vpop.f32.mrf.mxu3  ;;  %vm1501_vm13 = vcmp.ge.f32.partialorder %v1438_v50, 0.0  ;;  %v1533_v0 = vmul.f32 0.2, %v1438_v50  ;;  %v1174_v2 = vadd.f32 %v1173_v6, %v2928_v37  ;;  %v2278_v37 = vld [vmem:[%s3339_s0 + $0x2dc] sm:$0xf] }
 0x186   :  { %v1353_v5 = vpop.f32.mrf.mxu0  ;;  %v1998_v61 = vor.u32 %v2278_v37, %v1995_v10 }
 0x187   :  { %v1565_v3 = vsel %vm1501_vm13, %v1438_v50, %v1533_v0  ;;  %v1263_v4 = vadd.f32 %v1262_v63, %v1174_v2 }
 0x188   :  { %1598 = vst.msk [vmem:[%s3340_s3 + $0x58] sm:$0xff] %vm1586_vm1, %v1565_v3 }
 0x189   :  { %v1442_v17 = vpop.f32.mrf.mxu1  ;;  %v1352_v7 = vadd.f32 %v1351_v54, %v1263_v4 }
 0x18b   :  { %v1441_v33 = vadd.f32 %v1440_v58, %v1352_v7 }
 0x18c   :  { %v1175_v14 = vpop.f32.mrf.mxu2 }
 0x18d   :  { %v1264_v16 = vpop.f32.mrf.mxu3  ;;  %vm1502_vm14 = vcmp.ge.f32.partialorder %v1441_v33, 0.0  ;;  %v1534_v24 = vmul.f32 0.2, %v1441_v33  ;;  %v1176_v27 = vadd.f32 %v1175_v14, %v2938_v47 }
 0x18e   :  { %v1356_v36 = vpop.f32.mrf.mxu0 }
 0x18f   :  { %v1566_v31 = vsel %vm1502_vm14, %v1441_v33, %v1534_v24  ;;  %v1265_v32 = vadd.f32 %v1264_v16, %v1176_v27 }
 0x190   :  { %1599 = vst.msk [vmem:[%s3340_s3 + $0x60] sm:$0xff] %vm1586_vm1, %v1566_v31 }
 0x191   :  { %v1445_v39 = vpop.f32.mrf.mxu1  ;;  %v1354_v40 = vadd.f32 %v1353_v5, %v1265_v32  ;;  %1217 = vmatmul.bf16.gmra.mxu2 %v1994_v25  ;;  %1395 = vmatmul.bf16.gmra.mxu0 %v2002_v59 }
 0x192   :  { %1306 = vmatmul.bf16.gmra.mxu3 %v1998_v61 }
 0x193   :  { %v1443_v42 = vadd.f32 %v1442_v17, %v1354_v40 }
 0x194   :  { %2186 = vmatmul.msk.bf16.gmra.mxu1 %vm907_vm0, %v2006_v38  ;;  %v1178_v47 = vpop.f32.mrf.mxu2 }
 0x195   :  { %v1267_v28 = vpop.f32.mrf.mxu3  ;;  %vm1503_vm15 = vcmp.ge.f32.partialorder %v1443_v42, 0.0  ;;  %v1535_v43 = vmul.f32 0.2, %v1443_v42  ;;  %v1179_v45 = vadd.f32 %v1178_v47, %v2965_v15 }
 0x196   :  { %v1358_v49 = vpop.f32.mrf.mxu0 }
 0x197   :  { %v1567_v20 = vsel %vm1503_vm15, %v1443_v42, %v1535_v43  ;;  %v1268_v46 = vadd.f32 %v1267_v28, %v1179_v45 }
 0x198   :  { %1600 = vst.msk [vmem:[%s3340_s3 + $0x68] sm:$0xff] %vm1586_vm1, %v1567_v20 }
 0x199   :  { %v1447_v52 = vpop.f32.mrf.mxu1  ;;  %v1357_v62 = vadd.f32 %v1356_v36, %v1268_v46 }
 0x19b   :  { %v1446_v54 = vadd.f32 %v1445_v39, %v1357_v62 }
 0x19c   :  { %v1180_v56 = vpop.f32.mrf.mxu2 }
 0x19d   :  { %v1269_v58 = vpop.f32.mrf.mxu3  ;;  %vm1504_vm0 = vcmp.ge.f32.partialorder %v1446_v54, 0.0  ;;  %v1536_v34 = vmul.f32 0.2, %v1446_v54  ;;  %v1181_v50 = vadd.f32 %v1180_v56, %v2975_v35 }
 0x19e   :  { %v1361_v15 = vpop.f32.mrf.mxu0 }
 0x19f   :  { %v1568_v6 = vsel %vm1504_vm0, %v1446_v54, %v1536_v34  ;;  %v1270_v63 = vadd.f32 %v1269_v58, %v1181_v50 }
 0x1a0   :  { %1601 = vst.msk [vmem:[%s3340_s3 + $0x70] sm:$0xff] %vm1586_vm1, %v1568_v6 }
 0x1a1   :  { %v1450_v0 = vpop.f32.mrf.mxu1  ;;  %v1359_v2 = vadd.f32 %v1358_v49, %v1270_v63 }
 0x1a3   :  { %v1448_v3 = vadd.f32 %v1447_v52, %v1359_v2 }
 0x1a4   :  { %v1183_v4 = vpop.f32.mrf.mxu2 }
 0x1a5   :  { %v1272_v5 = vpop.f32.mrf.mxu3  ;;  %vm1505_vm2 = vcmp.ge.f32.partialorder %v1448_v3, 0.0  ;;  %v1537_v17 = vmul.f32 0.2, %v1448_v3  ;;  %v1184_v7 = vadd.f32 %v1183_v4, %v2710_v29 }
 0x1a6   :  { %v1363_v35 = vpop.f32.mrf.mxu0 }
 0x1a7   :  { %v1569_v9 = vsel %vm1505_vm2, %v1448_v3, %v1537_v17  ;;  %v1273_v19 = vadd.f32 %v1272_v5, %v1184_v7 }
 0x1a8   :  { %1602 = vst.msk [vmem:[%s3340_s3 + $0x78] sm:$0xff] %vm1586_vm1, %v1569_v9 }
 0x1a9   :  { %v1452_v37 = vpop.f32.mrf.mxu1  ;;  %v1362_v10 = vadd.f32 %v1361_v15, %v1273_v19 }
 0x1ab   :  { %v1451_v33 = vadd.f32 %v1450_v0, %v1362_v10 }
 0x1ac   :  { %v1185_v53 = vpop.f32.mrf.mxu2 }
 0x1ad   :  { %v1274_v11 = vpop.f32.mrf.mxu3  ;;  %vm1506_vm3 = vcmp.ge.f32.partialorder %v1451_v33, 0.0  ;;  %v1538_v14 = vmul.f32 0.2, %v1451_v33  ;;  %v1186_v16 = vadd.f32 %v1185_v53, %v2740_v48 }
 0x1ae   :  { %v1366_v29 = vpop.f32.mrf.mxu0 }
 0x1af   :  { %v1570_v25 = vsel %vm1506_vm3, %v1451_v33, %v1538_v14  ;;  %v1275_v18 = vadd.f32 %v1274_v11, %v1186_v16 }
 0x1b0   :  { %1603 = vst.msk [vmem:[%s3340_s3 + $0x80] sm:$0xff] %vm1586_vm1, %v1570_v25 }
 0x1b1   :  { %v1455_v21 = vpop.f32.mrf.mxu1  ;;  %v1364_v24 = vadd.f32 %v1363_v35, %v1275_v18 }
 0x1b3   :  { %v1453_v27 = vadd.f32 %v1452_v37, %v1364_v24 }
 0x1b4   :  { %v1188_v61 = vpop.f32.mrf.mxu2 }
 0x1b5   :  { %v1277_v59 = vpop.f32.mrf.mxu3  ;;  %vm1507_vm4 = vcmp.ge.f32.partialorder %v1453_v27, 0.0  ;;  %v1539_v31 = vmul.f32 0.2, %v1453_v27  ;;  %v1189_v32 = vadd.f32 %v1188_v61, %v2747_v57 }
 0x1b6   :  { %v1368_v48 = vpop.f32.mrf.mxu0 }
 0x1b7   :  { %v1571_v36 = vsel %vm1507_vm4, %v1453_v27, %v1539_v31  ;;  %v1278_v38 = vadd.f32 %v1277_v59, %v1189_v32 }
 0x1b8   :  { %1604 = vst.msk [vmem:[%s3340_s3 + $0x88] sm:$0xff] %vm1586_vm1, %v1571_v36 }
 0x1b9   :  { %v1457_v39 = vpop.f32.mrf.mxu1  ;;  %v1367_v40 = vadd.f32 %v1366_v29, %v1278_v38 }
 0x1bb   :  { %v1456_v42 = vadd.f32 %v1455_v21, %v1367_v40 }
 0x1bc   :  { %v1190_v47 = vpop.f32.mrf.mxu2 }
 0x1bd   :  { %v1279_v28 = vpop.f32.mrf.mxu3  ;;  %vm1508_vm5 = vcmp.ge.f32.partialorder %v1456_v42, 0.0  ;;  %v1540_v43 = vmul.f32 0.2, %v1456_v42  ;;  %v1191_v45 = vadd.f32 %v1190_v47, %v2777_v12 }
 0x1be   :  { %v1371_v57 = vpop.f32.mrf.mxu0 }
 0x1bf   :  { %v1572_v20 = vsel %vm1508_vm5, %v1456_v42, %v1540_v43  ;;  %v1280_v46 = vadd.f32 %v1279_v28, %v1191_v45 }
 0x1c0   :  { %1605 = vst.msk [vmem:[%s3340_s3 + $0x90] sm:$0xff] %vm1586_vm1, %v1572_v20 }
 0x1c1   :  { %v1460_v49 = vpop.f32.mrf.mxu1  ;;  %v1369_v52 = vadd.f32 %v1368_v48, %v1280_v46 }
 0x1c3   :  { %v1458_v62 = vadd.f32 %v1457_v39, %v1369_v52 }
 0x1c4   :  { %v1193_v54 = vpop.f32.mrf.mxu2 }
 0x1c5   :  { %v1282_v56 = vpop.f32.mrf.mxu3  ;;  %vm1509_vm6 = vcmp.ge.f32.partialorder %v1458_v62, 0.0  ;;  %v1541_v58 = vmul.f32 0.2, %v1458_v62  ;;  %v1194_v34 = vadd.f32 %v1193_v54, %v2784_v22 }
 0x1c6   :  { %v1373_v12 = vpop.f32.mrf.mxu0 }
 0x1c7   :  { %v1573_v50 = vsel %vm1509_vm6, %v1458_v62, %v1541_v58  ;;  %v1283_v6 = vadd.f32 %v1282_v56, %v1194_v34 }
 0x1c8   :  { %1606 = vst.msk [vmem:[%s3340_s3 + $0x98] sm:$0xff] %vm1586_vm1, %v1573_v50 }
 0x1c9   :  { %v1462_v63 = vpop.f32.mrf.mxu1  ;;  %v1372_v15 = vadd.f32 %v1371_v57, %v1283_v6 }
 0x1cb   :  { %v1461_v0 = vadd.f32 %v1460_v49, %v1372_v15 }
 0x1cc   :  { %v1195_v2 = vpop.f32.mrf.mxu2 }
 0x1cd   :  { %v1284_v3 = vpop.f32.mrf.mxu3  ;;  %vm1510_vm7 = vcmp.ge.f32.partialorder %v1461_v0, 0.0  ;;  %v1542_v4 = vmul.f32 0.2, %v1461_v0  ;;  %v1196_v5 = vadd.f32 %v1195_v2, %v2814_v44 }
 0x1ce   :  { %v1376_v22 = vpop.f32.mrf.mxu0 }
 0x1cf   :  { %v1574_v17 = vsel %vm1510_vm7, %v1461_v0, %v1542_v4  ;;  %v1285_v7 = vadd.f32 %v1284_v3, %v1196_v5 }
 0x1d0   :  { %1607 = vst.msk [vmem:[%s3340_s3 + $0xa0] sm:$0xff] %vm1586_vm1, %v1574_v17 }
 0x1d1   :  { %v1465_v9 = vpop.f32.mrf.mxu1  ;;  %v1374_v19 = vadd.f32 %v1373_v12, %v1285_v7 }
 0x1d3   :  { %v1463_v35 = vadd.f32 %v1462_v63, %v1374_v19 }
 0x1d4   :  { %v1198_v37 = vpop.f32.mrf.mxu2 }
 0x1d5   :  { %v1287_v10 = vpop.f32.mrf.mxu3  ;;  %vm1511_vm8 = vcmp.ge.f32.partialorder %v1463_v35, 0.0  ;;  %v1543_v33 = vmul.f32 0.2, %v1463_v35  ;;  %v1199_v53 = vadd.f32 %v1198_v37, %v2821_v55 }
 0x1d6   :  { %v1378_v44 = vpop.f32.mrf.mxu0 }
 0x1d7   :  { %v1575_v11 = vsel %vm1511_vm8, %v1463_v35, %v1543_v33  ;;  %v1288_v14 = vadd.f32 %v1287_v10, %v1199_v53 }
 0x1d8   :  { %1608 = vst.msk [vmem:[%s3340_s3 + $0xa8] sm:$0xff] %vm1586_vm1, %v1575_v11 }
 0x1d9   :  { %v1467_v16 = vpop.f32.mrf.mxu1  ;;  %v1377_v25 = vadd.f32 %v1376_v22, %v1288_v14 }
 0x1db   :  { %v1466_v18 = vadd.f32 %v1465_v9, %v1377_v25 }
 0x1dc   :  { %v1200_v29 = vpop.f32.mrf.mxu2 }
 0x1dd   :  { %v1289_v21 = vpop.f32.mrf.mxu3  ;;  %vm1512_vm9 = vcmp.ge.f32.partialorder %v1466_v18, 0.0  ;;  %v1544_v24 = vmul.f32 0.2, %v1466_v18  ;;  %v1201_v27 = vadd.f32 %v1200_v29, %v2851_v13 }
 0x1de   :  { %v1381_v55 = vpop.f32.mrf.mxu0 }
 0x1df   :  { %v1576_v61 = vsel %vm1512_vm9, %v1466_v18, %v1544_v24  ;;  %v1290_v59 = vadd.f32 %v1289_v21, %v1201_v27 }
 0x1e0   :  { %1609 = vst.msk [vmem:[%s3340_s3 + $0xb0] sm:$0xff] %vm1586_vm1, %v1576_v61 }
 0x1e1   :  { %v1470_v31 = vpop.f32.mrf.mxu1  ;;  %v1379_v32 = vadd.f32 %v1378_v44, %v1290_v59 }
 0x1e3   :  { %v1468_v36 = vadd.f32 %v1467_v16, %v1379_v32 }
 0x1e4   :  { %v1203_v38 = vpop.f32.mrf.mxu2 }
 0x1e5   :  { %v1292_v48 = vpop.f32.mrf.mxu3  ;;  %vm1513_vm10 = vcmp.ge.f32.partialorder %v1468_v36, 0.0  ;;  %v1545_v39 = vmul.f32 0.2, %v1468_v36  ;;  %v1204_v40 = vadd.f32 %v1203_v38, %v2858_v26 }
 0x1e6   :  { %v1383_v13 = vpop.f32.mrf.mxu0 }
 0x1e7   :  { %v1577_v42 = vsel %vm1513_vm10, %v1468_v36, %v1545_v39  ;;  %v1293_v47 = vadd.f32 %v1292_v48, %v1204_v40 }
 0x1e8   :  { %1610 = vst.msk [vmem:[%s3340_s3 + $0xb8] sm:$0xff] %vm1586_vm1, %v1577_v42 }
 0x1e9   :  { %v1472_v28 = vpop.f32.mrf.mxu1  ;;  %v1382_v43 = vadd.f32 %v1381_v55, %v1293_v47 }
 0x1eb   :  { %v1471_v45 = vadd.f32 %v1470_v31, %v1382_v43 }
 0x1ec   :  { %v1205_v20 = vpop.f32.mrf.mxu2 }
 0x1ed   :  { %v1294_v46 = vpop.f32.mrf.mxu3  ;;  %vm1514_vm11 = vcmp.ge.f32.partialorder %v1471_v45, 0.0  ;;  %v1546_v57 = vmul.f32 0.2, %v1471_v45  ;;  %v1206_v49 = vadd.f32 %v1205_v20, %v2888_v51 }
 0x1ee   :  { %v1386_v26 = vpop.f32.mrf.mxu0 }
 0x1ef   :  { %v1578_v52 = vsel %vm1514_vm11, %v1471_v45, %v1546_v57  ;;  %v1295_v62 = vadd.f32 %v1294_v46, %v1206_v49 }
 0x1f0   :  { %1611 = vst.msk [vmem:[%s3340_s3 + $0xc0] sm:$0xff] %vm1586_vm1, %v1578_v52 }
 0x1f1   :  { %v1475_v54 = vpop.f32.mrf.mxu1  ;;  %v1384_v56 = vadd.f32 %v1383_v13, %v1295_v62 }
 0x1f3   :  { %v1473_v58 = vadd.f32 %v1472_v28, %v1384_v56 }
 0x1f4   :  { %v1208_v34 = vpop.f32.mrf.mxu2 }
 0x1f5   :  { %v1297_v50 = vpop.f32.mrf.mxu3  ;;  %vm1515_vm12 = vcmp.ge.f32.partialorder %v1473_v58, 0.0  ;;  %v1547_v6 = vmul.f32 0.2, %v1473_v58  ;;  %v1209_v12 = vadd.f32 %v1208_v34, %v2895_v1 }
 0x1f6   :  { %v1388_v51 = vpop.f32.mrf.mxu0 }
 0x1f7   :  { %v1579_v63 = vsel %vm1515_vm12, %v1473_v58, %v1547_v6  ;;  %v1298_v15 = vadd.f32 %v1297_v50, %v1209_v12 }
 0x1f8   :  { %1612 = vst.msk [vmem:[%s3340_s3 + $0xc8] sm:$0xff] %vm1586_vm1, %v1579_v63 }
 0x1f9   :  { %v1387_v0 = vadd.f32 %v1386_v26, %v1298_v15  ;;  %v1477_v2 = vpop.f32.mrf.mxu1 }
 0x1fb   :  { %v1476_v3 = vadd.f32 %v1475_v54, %v1387_v0 }
 0x1fc   :  { %v1210_v4 = vpop.f32.mrf.mxu2 }
 0x1fd   :  { %v1299_v5 = vpop.f32.mrf.mxu3  ;;  %vm1516_vm13 = vcmp.ge.f32.partialorder %v1476_v3, 0.0  ;;  %v1548_v17 = vmul.f32 0.2, %v1476_v3  ;;  %v1211_v7 = vadd.f32 %v1210_v4, %v2925_v30 }
 0x1fe   :  { %v1391_v19 = vpop.f32.mrf.mxu0 }
 0x1ff   :  { %v1580_v22 = vsel %vm1516_vm13, %v1476_v3, %v1548_v17  ;;  %v1300_v9 = vadd.f32 %v1299_v5, %v1211_v7 }
 0x200   :  { %1613 = vst.msk [vmem:[%s3340_s3 + $0xd0] sm:$0xff] %vm1586_vm1, %v1580_v22 }
 0x201   :  { %v1389_v1 = vadd.f32 %v1388_v51, %v1300_v9  ;;  %v1480_v37 = vpop.f32.mrf.mxu1 }
 0x203   :  { %v1478_v35 = vadd.f32 %v1477_v2, %v1389_v1 }
 0x204   :  { %v1213_v10 = vpop.f32.mrf.mxu2 }
 0x205   :  { %v1302_v33 = vpop.f32.mrf.mxu3  ;;  %vm1517_vm14 = vcmp.ge.f32.partialorder %v1478_v35, 0.0  ;;  %v1549_v53 = vmul.f32 0.2, %v1478_v35  ;;  %v1214_v11 = vadd.f32 %v1213_v10, %v2932_v41 }
 0x206   :  { %v1393_v25 = vpop.f32.mrf.mxu0 }
 0x207   :  { %v1581_v14 = vsel %vm1517_vm14, %v1478_v35, %v1549_v53  ;;  %v1303_v44 = vadd.f32 %v1302_v33, %v1214_v11 }
 0x208   :  { %1614 = vst.msk [vmem:[%s3340_s3 + $0xd8] sm:$0xff] %vm1586_vm1, %v1581_v14 }
 0x209   :  { %v1392_v30 = vadd.f32 %v1391_v19, %v1303_v44  ;;  %v1482_v27 = vpop.f32.mrf.mxu1 }
 0x20b   :  { %v1481_v16 = vadd.f32 %v1480_v37, %v1392_v30 }
 0x20c   :  { %v1215_v18 = vpop.f32.mrf.mxu2 }
 0x20d   :  { %v1304_v29 = vpop.f32.mrf.mxu3  ;;  %vm1518_vm15 = vcmp.ge.f32.partialorder %v1481_v16, 0.0  ;;  %v1550_v21 = vmul.f32 0.2, %v1481_v16  ;;  %v1216_v24 = vadd.f32 %v1215_v18, %v2962_v8 }
 0x20e   :  { %v1396_v48 = vpop.f32.mrf.mxu0 }
 0x20f   :  { %v1582_v61 = vsel %vm1518_vm15, %v1481_v16, %v1550_v21  ;;  %v1305_v59 = vadd.f32 %v1304_v29, %v1216_v24 }
 0x210   :  { %1615 = vst.msk [vmem:[%s3340_s3 + $0xe0] sm:$0xff] %vm1586_vm1, %v1582_v61 }
 0x211   :  { %v1394_v41 = vadd.f32 %v1393_v25, %v1305_v59  ;;  %v1485_v8 = vpop.f32.mrf.mxu1 }
 0x213   :  { %v1483_v55 = vadd.f32 %v1482_v27, %v1394_v41 }
 0x214   :  { %v1218_v31 = vpop.f32.mrf.mxu2 }
 0x215   :  { %v1307_v32 = vpop.f32.mrf.mxu3  ;;  %vm1519_vm0 = vcmp.ge.f32.partialorder %v1483_v55, 0.0  ;;  %v1551_v36 = vmul.f32 0.2, %v1483_v55  ;;  %v1219_v38 = vadd.f32 %v1218_v31, %v2969_v23 }
 0x216   :  { %v1398_v23 = vpop.f32.mrf.mxu0 }
 0x217   :  { %v1583_v39 = vsel %vm1519_vm0, %v1483_v55, %v1551_v36  ;;  %v1308_v40 = vadd.f32 %v1307_v32, %v1219_v38 }
 0x218   :  { %1616 = vst.msk [vmem:[%s3340_s3 + $0xe8] sm:$0xff] %vm1586_vm1, %v1583_v39 }
 0x219   :  { %v1397_v42 = vadd.f32 %v1396_v48, %v1308_v40  ;;  %v1487_v49 = vpop.f32.mrf.mxu1 }
 0x21b   :  { %v1486_v47 = vadd.f32 %v1485_v8, %v1397_v42 }
 0x21c   :  { %v1220_v13 = vpop.f32.mrf.mxu2 }
 0x21d   :  { %vm1520_vm2 = vcmp.ge.f32.partialorder %v1486_v47, 0.0  ;;  %v1552_v28 = vmul.f32 0.2, %v1486_v47  ;;  %v1221_v43 = vadd.f32 %v1220_v13, %v2999_v60  ;;  %v1309_v45 = vpop.f32.mrf.mxu3 }
 0x21f   :  { %v1584_v20 = vsel %vm1520_vm2, %v1486_v47, %v1552_v28  ;;  %v1310_v46 = vadd.f32 %v1309_v45, %v1221_v43 }
 0x220   :  { %1617 = vst.msk [vmem:[%s3340_s3 + $0xf0] sm:$0xff] %vm1586_vm1, %v1584_v20 }
 0x221   :  { %v1399_v57 = vadd.f32 %v1398_v23, %v1310_v46 }
 0x223   :  { %v1488_v52 = vadd.f32 %v1487_v49, %v1399_v57 }
 0x225   :  { %vm1521_vm3 = vcmp.ge.f32.partialorder %v1488_v52, 0.0  ;;  %v1553_v62 = vmul.f32 0.2, %v1488_v52 }
 0x227   :  { %v1585_v26 = vsel %vm1521_vm3, %v1488_v52, %v1553_v62 }
 0x228   :  { %1618 = vst.msk [vmem:[%s3340_s3 + $0xf8] sm:$0xff] %vm1586_vm1, %v1585_v26 }

// kernel: wave_discriminator_block.9
= control target key start
LH: loop header
LB: loop body
LE: loop exit
PB: predicated region body
PF: predicated region fallthrough
CT: control target
= control target key end

     0   :  { %s2457_s12 = smov 0   ;;  %s2459_s13 = smov 0   ;;  %s2782_s0 = inlined_call_operand.vmem [shape: bf16[2,64,1312], index: 0, kind: input, shape index: {}]   ;;  %s2783_s1 = inlined_call_operand.vmem [shape: bf16[2,1312,128], index: 1, kind: input, shape index: {}]   ;;  %s2784_s2 = inlined_call_operand.vmem [shape: f32[1,256], index: 2, kind: input, shape index: {}]   ;;  %s2785_s3 = inlined_call_operand.vmem [shape: f32[64,256], index: 3, kind: output, shape index: {}]  }
   0x1   :  { %s2461_s14 = smov 0   ;;  %s2463_s15 = smov 0  }
   0x2   :  { %s2465_s16 = smov 0  }
   0x3 LB: > { %s1690_s17 = sadd.s32 4294967295, %s2435_s16   ;;  %s25_s18 = sadd.s32 1, %s2431_s15  ;;  %s2435_s16 = sphi %s2465_s16, %s13_s16   ;;  %s2431_s15 = sphi %s2463_s15, %s2790_s15   ;;  %s2427_s14 = sphi %s2461_s14, %s2789_s14   ;;  %s2423_s13 = sphi %s2459_s13, %s2788_s13   ;;  %s2419_s12 = sphi %s2457_s12, %s2787_s12  }
   0x4   : > { %p27_p0 = scmp.ge.s32.totalorder %s25_s18, 2  ;;  %s114_s19 = sadd.s32 1, %s2423_s13 }
   0x5   : > { %p124_p1 = scmp.ne.s32.totalorder %s2423_s13, %s2419_s12  ;;  %p125_p2 = scmp.eq.s32.totalorder %s1690_s17, 1 }
   0x6   : > { %s2792_s18 = smov (%p27_p0, %s25_s18), 0  ;;  %p1694_p4 = scmp.ge.s32.totalorder %s2435_s16, 1 }
   0x7   : > { %p2489_p3 = por %p125_p2, %p124_p1  ;;  %s110_s21 = ssub.s32 %s2431_s15, %s2792_s18 }
   0x8   : > { %p177_p5 = scmp.lt.s32.totalorder %s2435_s16, 3  ;;  %p112_p6 = scmp.eq.s32.totalorder %s110_s21, 0 }
   0xa   : > { %p178_p7 = pnand %p1694_p4, %p177_p5 }
   0xb   : > { %s2498_s22 = scalar_select %p112_p6, %s2423_s13, %s114_s19  }
   0xc   : > { %181 = sbr.rel (%p178_p7) target bundleno = 370 (0x172), region = 32  ;;  %p214_p8 = scmp.lt.s32.totalorder (!%p178_p7), %s2427_s14, 1 }
   0xd   : > { %s210_s10 = sand.u32 (!%p178_p7), 1, %s2419_s12  }
   0xe   : > { %s1695_s11 = sshll.u32 (!%p178_p7), %s210_s10, 6 }
   0xf   : > { %s2734_s12 = scalar_lea.vmem (!%p178_p7), [#allocation2], %s1695_s11 }
  0x11   : > { %s2502_s23 = scalar_select %p214_p8, %s2427_s14, 1  ;;  %vm1162_vm0 = vcmask 261120  }
  0x12   : > { %s2207_s17 = sshll.u32 (%p2489_p3), %s2427_s14, 3 }
  0x13   : > { %s2355_s24 = smul.u32 656, %s2502_s23  ;;  %s231_s4 = scalar_lea.vmem %s2784_s2, %s2502_s23 }
  0x14   : > { %s2354_s28 = smul.u32 352, %s2502_s23  ;;  %s1537_s23 = scalar_lea.vmem (%p2489_p3), %s2785_s3, %s2207_s17 }
  0x15   : > { %s2508_s27 = scalar_lea.vmem %s2783_s1, %s2355_s24 }
  0x16   : > { %v2261_v0 = vld [vmem:[%s2508_s27 + $0x38] sm:$0xff]  ;;  %v2260_v3 = vld [vmem:[%s2508_s27 + $0x30] sm:$0xff]  ;;  %v2259_v6 = vld [vmem:[%s2508_s27 + $0x28] sm:$0xff]  ;;  %s2537_s7 = scalar_lea.vmem %s2782_s0, %s2354_s28 }
  0x17   : > { %v2269_v1 = vld [vmem:[%s2508_s27 + $0x78] sm:$0xff]  ;;  %1175 = vmatpush.bf16.msra.mxu0 %v2261_v0  ;;  %2336 = vmatpush.bf16.msra.mxu3 %v2261_v0  ;;  %v2268_v4 = vld [vmem:[%s2508_s27 + $0x70] sm:$0xff]  ;;  %v2267_v7 = vld [vmem:[%s2508_s27 + $0x68] sm:$0xff] }
  0x18   : > { %v2277_v2 = vld [vmem:[%s2508_s27 + $0xb8] sm:$0xff]  ;;  %1204 = vmatpush.bf16.msra.mxu1 %v2269_v1  ;;  %v2276_v5 = vld [vmem:[%s2508_s27 + $0xb0] sm:$0xff]  ;;  %v2275_v8 = vld [vmem:[%s2508_s27 + $0xa8] sm:$0xff] }
  0x19   : > { %1233 = vmatpush.bf16.msra.mxu2 %v2277_v2  ;;  %v2258_v9 = vld [vmem:[%s2508_s27 + $0x20] sm:$0xff]  ;;  %v2257_v12 = vld [vmem:[%s2508_s27 + $0x18] sm:$0xff]  ;;  %v2256_v15 = vld [vmem:[%s2508_s27 + $0x10] sm:$0xff] }
  0x1a   : > { %v2266_v10 = vld [vmem:[%s2508_s27 + $0x60] sm:$0xff]  ;;  %v2265_v13 = vld [vmem:[%s2508_s27 + $0x58] sm:$0xff]  ;;  %v2264_v16 = vld [vmem:[%s2508_s27 + $0x50] sm:$0xff] }
  0x1b   : > { %1176 = vmatpush.bf16.msra.mxu0 %v2260_v3  ;;  %2337 = vmatpush.bf16.msra.mxu3 %v2260_v3  ;;  %v2274_v11 = vld [vmem:[%s2508_s27 + $0xa0] sm:$0xff]  ;;  %v2273_v14 = vld [vmem:[%s2508_s27 + $0x98] sm:$0xff]  ;;  %v2272_v17 = vld [vmem:[%s2508_s27 + $0x90] sm:$0xff] }
  0x1c   : > { %1205 = vmatpush.bf16.msra.mxu1 %v2268_v4  ;;  %v2255_v18 = vld [vmem:[%s2508_s27 + $0x8] sm:$0xff]  ;;  %v2254_v21 = vld [vmem:[%s2508_s27] sm:$0xff]  ;;  %v1788_v26 = vld [vmem:[%s2537_s7 + $0xb0] sm:$0xf] }
  0x1d   : > { %1234 = vmatpush.bf16.msra.mxu2 %v2276_v5  ;;  %v2263_v19 = vld [vmem:[%s2508_s27 + $0x48] sm:$0xff]  ;;  %v2262_v22 = vld [vmem:[%s2508_s27 + $0x40] sm:$0xff]  ;;  %v2237_v27 = vld [vmem:[%s2537_s7 + $0xd8] sm:$0xf0] }
  0x1e   : > { %v2271_v20 = vld [vmem:[%s2508_s27 + $0x88] sm:$0xff]  ;;  %v2270_v23 = vld [vmem:[%s2508_s27 + $0x80] sm:$0xff]  ;;  %v1702_v29 = vld [vmem:[%s2537_s7 + $0x2c] sm:$0xf0]  ;;  %v1789_v35 = vor.u32 %v2237_v27, %v1788_v26 }
  0x1f   : > { %1177 = vmatpush.bf16.msra.mxu0 %v2259_v6  ;;  %2338 = vmatpush.bf16.msra.mxu3 %v2259_v6  ;;  %v1700_v24 = vld [vmem:[%s2537_s7] sm:$0xf]  ;;  %v2215_v25 = vld [vmem:[%s2537_s7 + $0x28] sm:$0xf0]  ;;  %v2210_v28 = vld [vmem:[%s2537_s7 + $0x4] sm:$0xf] }
  0x20   : > { %1206 = vmatpush.bf16.msra.mxu1 %v2267_v7  ;;  %v1708_v30 = vld [vmem:[%s2537_s7 + $0x8] sm:$0xf]  ;;  %v2216_v31 = vld [vmem:[%s2537_s7 + $0x30] sm:$0xf0]  ;;  %v2285_v32 = vld [vmem:[%s2508_s27 + $0xf8] sm:$0xff]  ;;  %v1701_v34 = vor.u32 %v2215_v25, %v1700_v24  ;;  %v1705_v36 = vor.u32 %v2210_v28, %v1702_v29 }
  0x21   : > { %1235 = vmatpush.bf16.msra.mxu2 %v2275_v8  ;;  %v2309_v33 = vld [vmem:[%s2508_s27 + $0x1b8] sm:$0xff]  ;;  %v1709_v37 = vor.u32 %v2216_v31, %v1708_v30  ;;  %v2284_v40 = vld [vmem:[%s2508_s27 + $0xf0] sm:$0xff]  ;;  %v2283_v44 = vld [vmem:[%s2508_s27 + $0xe8] sm:$0xff] }
  0x22   : > { %v2293_v38 = vld [vmem:[%s2508_s27 + $0x138] sm:$0xff]  ;;  %v2308_v41 = vld [vmem:[%s2508_s27 + $0x1b0] sm:$0xff]  ;;  %v2307_v45 = vld [vmem:[%s2508_s27 + $0x1a8] sm:$0xff] }
  0x23   : > { %1178 = vmatpush.bf16.msra.mxu0 %v2258_v9  ;;  %2339 = vmatpush.bf16.msra.mxu3 %v2258_v9  ;;  %v2301_v39 = vld [vmem:[%s2508_s27 + $0x178] sm:$0xff]  ;;  %v2292_v42 = vld [vmem:[%s2508_s27 + $0x130] sm:$0xff]  ;;  %v2291_v46 = vld [vmem:[%s2508_s27 + $0x128] sm:$0xff] }
  0x24   : > { %1207 = vmatpush.bf16.msra.mxu1 %v2266_v10  ;;  %v2300_v43 = vld [vmem:[%s2508_s27 + $0x170] sm:$0xff]  ;;  %v2299_v47 = vld [vmem:[%s2508_s27 + $0x168] sm:$0xff]  ;;  %v2282_v48 = vld [vmem:[%s2508_s27 + $0xe0] sm:$0xff] }
  0x25   : > { %1236 = vmatpush.bf16.msra.mxu2 %v2274_v11  ;;  %v2306_v49 = vld [vmem:[%s2508_s27 + $0x1a0] sm:$0xff]  ;;  %v1744_v51 = vld [vmem:[%s2537_s7 + $0x58] sm:$0xf]  ;;  %v1832_v53 = vld [vmem:[%s2537_s7 + $0x108] sm:$0xf] }
  0x26   : > { %v2290_v50 = vld [vmem:[%s2508_s27 + $0x120] sm:$0xff]  ;;  %v2248_v54 = vld [vmem:[%s2537_s7 + $0x130] sm:$0xf0]  ;;  %v2221_v55 = vld [vmem:[%s2537_s7 + $0x5c] sm:$0xf] }
  0x27   : > { %1179 = vmatpush.bf16.msra.mxu0 %v2257_v12  ;;  %2340 = vmatpush.bf16.msra.mxu3 %v2257_v12  ;;  %v2226_v52 = vld [vmem:[%s2537_s7 + $0x80] sm:$0xf0]  ;;  %v1746_v56 = vld [vmem:[%s2537_s7 + $0x84] sm:$0xf0]  ;;  %v1752_v57 = vld [vmem:[%s2537_s7 + $0x60] sm:$0xf]  ;;  %v1833_v63 = vor.u32 %v2248_v54, %v1832_v53 }
  0x28   : > { %1208 = vmatpush.bf16.msra.mxu1 %v2265_v13  ;;  %v2227_v58 = vld [vmem:[%s2537_s7 + $0x88] sm:$0xf0]  ;;  %v2298_v59 = vld [vmem:[%s2508_s27 + $0x160] sm:$0xff]  ;;  %v2281_v60 = vld [vmem:[%s2508_s27 + $0xd8] sm:$0xff]  ;;  %v1745_v62 = vor.u32 %v2226_v52, %v1744_v51  ;;  %v1749_v0 = vor.u32 %v2221_v55, %v1746_v56 }
  0x29   : > { %1237 = vmatpush.bf16.msra.mxu2 %v2273_v14  ;;  %v2305_v61 = vld [vmem:[%s2508_s27 + $0x198] sm:$0xff]  ;;  %v1753_v1 = vor.u32 %v2227_v58, %v1752_v57  ;;  %v2280_v4 = vld [vmem:[%s2508_s27 + $0xd0] sm:$0xff]  ;;  %v2279_v8 = vld [vmem:[%s2508_s27 + $0xc8] sm:$0xff] }
  0x2a   : > { %v2289_v2 = vld [vmem:[%s2508_s27 + $0x118] sm:$0xff]  ;;  %v2304_v5 = vld [vmem:[%s2508_s27 + $0x190] sm:$0xff]  ;;  %v2303_v9 = vld [vmem:[%s2508_s27 + $0x188] sm:$0xff] }
  0x2b   : > { %1180 = vmatpush.bf16.msra.mxu0 %v2256_v15  ;;  %2341 = vmatpush.bf16.msra.mxu3 %v2256_v15  ;;  %v2297_v3 = vld [vmem:[%s2508_s27 + $0x158] sm:$0xff]  ;;  %v2288_v6 = vld [vmem:[%s2508_s27 + $0x110] sm:$0xff]  ;;  %v2287_v10 = vld [vmem:[%s2508_s27 + $0x108] sm:$0xff] }
  0x2c   : > { %1209 = vmatpush.bf16.msra.mxu1 %v2264_v16  ;;  %v2296_v7 = vld [vmem:[%s2508_s27 + $0x150] sm:$0xff]  ;;  %v2295_v11 = vld [vmem:[%s2508_s27 + $0x148] sm:$0xff]  ;;  %v2278_v12 = vld [vmem:[%s2508_s27 + $0xc0] sm:$0xff] }
  0x2d   : > { %1238 = vmatpush.bf16.msra.mxu2 %v2272_v17  ;;  %v2302_v13 = vld [vmem:[%s2508_s27 + $0x180] sm:$0xff]  ;;  %v2232_v15 = vld [vmem:[%s2537_s7 + $0xb4] sm:$0xf]  ;;  %v2317_v16 = vld [vmem:[%s2508_s27 + $0x1f8] sm:$0xff] }
  0x2e   : > { %v2286_v14 = vld [vmem:[%s2508_s27 + $0x100] sm:$0xff]  ;;  %v2217_v24 = vld [vmem:[%s2537_s7 + $0x38] sm:$0xf0]  ;;  %v2316_v30 = vld [vmem:[%s2508_s27 + $0x1f0] sm:$0xff] }
  0x2f   : > { %1181 = vmatpush.bf16.msra.mxu0 %v2255_v18  ;;  %2342 = vmatpush.bf16.msra.mxu3 %v2255_v18  ;;  %v1790_v17 = vld [vmem:[%s2537_s7 + $0xdc] sm:$0xf0]  ;;  %v2211_v18 = vld [vmem:[%s2537_s7 + $0xc] sm:$0xf]  ;;  %v2325_v25 = vld [vmem:[%s2508_s27 + $0x238] sm:$0xff] }
  0x30   : > { %1210 = vmatpush.bf16.msra.mxu1 %v2263_v19  ;;  %v1710_v19 = vld [vmem:[%s2537_s7 + $0x34] sm:$0xf0]  ;;  %v1793_v27 = vor.u32 %v2232_v15, %v1790_v17  ;;  %v2324_v31 = vld [vmem:[%s2508_s27 + $0x230] sm:$0xff]  ;;  %v2311_v55 = vld [vmem:[%s2508_s27 + $0x1c8] sm:$0xff] }
  0x31   : > { %1239 = vmatpush.bf16.msra.mxu2 %v2271_v20  ;;  %v1796_v20 = vld [vmem:[%s2537_s7 + $0xb8] sm:$0xf]  ;;  %v1713_v26 = vor.u32 %v2211_v18, %v1710_v19  ;;  %v2312_v53 = vld [vmem:[%s2508_s27 + $0x1d0] sm:$0xff]  ;;  %v2331_v56 = vld [vmem:[%s2508_s27 + $0x268] sm:$0xff] }
  0x32   : > { %v2320_v54 = vld [vmem:[%s2508_s27 + $0x210] sm:$0xff]  ;;  %v2319_v57 = vld [vmem:[%s2508_s27 + $0x208] sm:$0xff]  ;;  %v2330_v58 = vld [vmem:[%s2508_s27 + $0x260] sm:$0xff] }
  0x33   : > { %1182 = vmatpush.bf16.msra.mxu0 %v2254_v21  ;;  %2343 = vmatpush.bf16.msra.mxu3 %v2254_v21  ;;  %v2238_v21 = vld [vmem:[%s2537_s7 + $0xe0] sm:$0xf0]  ;;  %v1762_v15 = vld [vmem:[%s2537_s7 + $0x94] sm:$0xf0]  ;;  %v2229_v17 = vld [vmem:[%s2537_s7 + $0x98] sm:$0xf0] }
  0x34   : > { %1211 = vmatpush.bf16.msra.mxu1 %v2262_v22  ;;  %v2294_v22 = vld [vmem:[%s2508_s27 + $0x140] sm:$0xff]  ;;  %v1797_v28 = vor.u32 %v2238_v21, %v1796_v20  ;;  %v1848_v18 = vld [vmem:[%s2537_s7 + $0x118] sm:$0xf] }
  0x35   : > { %1240 = vmatpush.bf16.msra.mxu2 %v2270_v23  ;;  %v1716_v23 = vld [vmem:[%s2537_s7 + $0x10] sm:$0xf]  ;;  %v2250_v19 = vld [vmem:[%s2537_s7 + $0x140] sm:$0xf0] }
  0x36   : > { %1183 = vmatmul.bf16.vlgmr.msra.gmra.mxu0 %v1701_v34  ;;  %1193 = vmatmul.bf16.vlgmr.msra.gmra.mxu3 %v1789_v35  ;;  %v1717_v29 = vor.u32 %v2217_v24, %v1716_v23  ;;  %v2323_v34 = vld [vmem:[%s2508_s27 + $0x228] sm:$0xff]  ;;  %v2333_v35 = vld [vmem:[%s2508_s27 + $0x278] sm:$0xff]  ;;  %v1849_v23 = vor.u32 %v2250_v19, %v1848_v18  ;;  %v2252_v18 = vld [vmem:[%s2537_s7 + $0x150] sm:$0xf0] }
  0x37   : > { %1262 = vmatpush.bf16.msrb.mxu3 %v2285_v32  ;;  %1212 = vmatmul.bf16.vlgmr.msra.gmra.mxu1 %v1705_v36  ;;  %v2315_v32 = vld [vmem:[%s2508_s27 + $0x1e8] sm:$0xff]  ;;  %v2332_v36 = vld [vmem:[%s2508_s27 + $0x270] sm:$0xff] }
  0x38   : > { %1241 = vmatmul.bf16.vlgmr.msra.gmra.mxu2 %v1709_v37  ;;  %1291 = vmatpush.bf16.msrb.mxu0 %v2293_v38  ;;  %v2314_v37 = vld [vmem:[%s2508_s27 + $0x1e0] sm:$0xff]  ;;  %v2327_v24 = vld [vmem:[%s2508_s27 + $0x248] sm:$0xff] }
  0x39   : > { %1349 = vmatpush.bf16.msrb.mxu2 %v2309_v33  ;;  %1320 = vmatpush.bf16.msrb.mxu1 %v2301_v39  ;;  %v2335_v33 = vld [vmem:[%s2508_s27 + $0x288] sm:$0xff]  ;;  %v2322_v38 = vld [vmem:[%s2508_s27 + $0x220] sm:$0xff] }
  0x3a   : > { %v2243_v39 = vld [vmem:[%s2537_s7 + $0x10c] sm:$0xf] }
  0x3b   : > { %1263 = vmatpush.bf16.msrb.mxu3 %v2284_v40  ;;  %v1834_v40 = vld [vmem:[%s2537_s7 + $0x134] sm:$0xf0] }
  0x3c   : > { %1292 = vmatpush.bf16.msrb.mxu0 %v2292_v42  ;;  %v1754_v42 = vld [vmem:[%s2537_s7 + $0x8c] sm:$0xf0] }
  0x3d   : > { %1350 = vmatpush.bf16.msrb.mxu2 %v2308_v41  ;;  %1321 = vmatpush.bf16.msrb.mxu1 %v2300_v43  ;;  %v2222_v41 = vld [vmem:[%s2537_s7 + $0x64] sm:$0xf]  ;;  %v1840_v43 = vld [vmem:[%s2537_s7 + $0x110] sm:$0xf] }
  0x3f   : > { %1264 = vmatpush.bf16.msrb.mxu3 %v2283_v44  ;;  %v2249_v44 = vld [vmem:[%s2537_s7 + $0x138] sm:$0xf0] }
  0x40   : > { %1293 = vmatpush.bf16.msrb.mxu0 %v2291_v46  ;;  %v1760_v46 = vld [vmem:[%s2537_s7 + $0x68] sm:$0xf]  ;;  %v1841_v51 = vor.u32 %v2249_v44, %v1840_v43  ;;  %v2251_v43 = vld [vmem:[%s2537_s7 + $0x148] sm:$0xf0]  ;;  %v1776_v44 = vld [vmem:[%s2537_s7 + $0x78] sm:$0xf] }
  0x41   : > { %1351 = vmatpush.bf16.msrb.mxu2 %v2307_v45  ;;  %1322 = vmatpush.bf16.msrb.mxu1 %v2299_v47  ;;  %v2313_v45 = vld [vmem:[%s2508_s27 + $0x1d8] sm:$0xff]  ;;  %v2228_v47 = vld [vmem:[%s2537_s7 + $0x90] sm:$0xf0] }
  0x42   : > { %v1761_v52 = vor.u32 %v2228_v47, %v1760_v46 }
  0x43   : > { %1265 = vmatpush.bf16.msrb.mxu3 %v2282_v48  ;;  %v2321_v48 = vld [vmem:[%s2508_s27 + $0x218] sm:$0xff] }
  0x44   : > { %1294 = vmatpush.bf16.msrb.mxu0 %v2290_v50  ;;  %v1837_v50 = vor.u32 %v2243_v39, %v1834_v40  ;;  %v2224_v39 = vld [vmem:[%s2537_s7 + $0x74] sm:$0xf]  ;;  %v1770_v40 = vld [vmem:[%s2537_s7 + $0x9c] sm:$0xf0] }
  0x45   : > { %1352 = vmatpush.bf16.msrb.mxu2 %v2306_v49  ;;  %1323 = vmatpush.bf16.msrb.mxu1 %v2298_v59  ;;  %v1757_v49 = vor.u32 %v2222_v41, %v1754_v42  ;;  %v2310_v59 = vld [vmem:[%s2508_s27 + $0x1c0] sm:$0xff]  ;;  %v1850_v41 = vld [vmem:[%s2537_s7 + $0x144] sm:$0xf0]  ;;  %v1773_v46 = vor.u32 %v2224_v39, %v1770_v40  ;;  %v1866_v39 = vld [vmem:[%s2537_s7 + $0x154] sm:$0xf0] }
  0x46   : > { %1188 = vmatmul.bf16.gmra.mxu0 %v1745_v62  ;;  %1198 = vmatmul.bf16.gmra.mxu3 %v1833_v63  ;;  %v1798_v62 = vld [vmem:[%s2537_s7 + $0xe4] sm:$0xf0]  ;;  %v2212_v63 = vld [vmem:[%s2537_s7 + $0x14] sm:$0xf]  ;;  %v1856_v42 = vld [vmem:[%s2537_s7 + $0x120] sm:$0xf] }
  0x47   : > { %1266 = vmatpush.bf16.msrb.mxu3 %v2281_v60  ;;  %1217 = vmatmul.bf16.gmra.mxu1 %v1749_v0  ;;  %v2318_v60 = vld [vmem:[%s2508_s27 + $0x200] sm:$0xff]  ;;  %v1828_v40 = vld [vmem:[%s2537_s7 + $0xd8] sm:$0xf] }
  0x48   : > { %1246 = vmatmul.bf16.gmra.mxu2 %v1753_v1  ;;  %1295 = vmatpush.bf16.msrb.mxu0 %v2289_v2  ;;  %v1718_v0 = vld [vmem:[%s2537_s7 + $0x3c] sm:$0xf0]  ;;  %v1724_v1 = vld [vmem:[%s2537_s7 + $0x18] sm:$0xf]  ;;  %v2218_v2 = vld [vmem:[%s2537_s7 + $0x40] sm:$0xf0] }
  0x49   : > { %1353 = vmatpush.bf16.msrb.mxu2 %v2305_v61  ;;  %1324 = vmatpush.bf16.msrb.mxu1 %v2297_v3  ;;  %v2233_v61 = vld [vmem:[%s2537_s7 + $0xbc] sm:$0xf]  ;;  %v1804_v3 = vld [vmem:[%s2537_s7 + $0xc0] sm:$0xf] }
  0x4b   : > { %1267 = vmatpush.bf16.msrb.mxu3 %v2280_v4  ;;  %v2239_v4 = vld [vmem:[%s2537_s7 + $0xe8] sm:$0xf0] }
  0x4c   : > { %1296 = vmatpush.bf16.msrb.mxu0 %v2288_v6  ;;  %v1721_v6 = vor.u32 %v2212_v63, %v1718_v0 }
  0x4d   : > { %1354 = vmatpush.bf16.msrb.mxu2 %v2304_v5  ;;  %1325 = vmatpush.bf16.msrb.mxu1 %v2296_v7  ;;  %v1801_v5 = vor.u32 %v2233_v61, %v1798_v62  ;;  %v1725_v7 = vor.u32 %v2218_v2, %v1724_v1 }
  0x4f   : > { %1268 = vmatpush.bf16.msrb.mxu3 %v2279_v8  ;;  %v1805_v8 = vor.u32 %v2239_v4, %v1804_v3 }
  0x50   : > { %1297 = vmatpush.bf16.msrb.mxu0 %v2287_v10  ;;  %v2329_v10 = vld [vmem:[%s2508_s27 + $0x258] sm:$0xff] }
  0x51   : > { %1355 = vmatpush.bf16.msrb.mxu2 %v2303_v9  ;;  %1326 = vmatpush.bf16.msrb.mxu1 %v2295_v11  ;;  %v2334_v9 = vld [vmem:[%s2508_s27 + $0x280] sm:$0xff]  ;;  %v2328_v11 = vld [vmem:[%s2508_s27 + $0x250] sm:$0xff] }
  0x53   : > { %1269 = vmatpush.bf16.msrb.mxu3 %v2278_v12  ;;  %v2244_v12 = vld [vmem:[%s2537_s7 + $0x114] sm:$0xf] }
  0x54   : > { %1298 = vmatpush.bf16.msrb.mxu0 %v2286_v14  ;;  %v2223_v14 = vld [vmem:[%s2537_s7 + $0x6c] sm:$0xf] }
  0x55   : > { %1356 = vmatpush.bf16.msrb.mxu2 %v2302_v13  ;;  %1327 = vmatpush.bf16.msrb.mxu1 %v2294_v22  ;;  %v1842_v13 = vld [vmem:[%s2537_s7 + $0x13c] sm:$0xf0]  ;;  %v1765_v21 = vor.u32 %v2223_v14, %v1762_v15  ;;  %v2231_v15 = vld [vmem:[%s2537_s7 + $0xa8] sm:$0xf0] }
  0x56   : > { %1270 = vmatmul.bf16.vlgmr.msrb.gmra.mxu3 %v1713_v26  ;;  %v1845_v20 = vor.u32 %v2244_v12, %v1842_v13  ;;  %v2234_v26 = vld [vmem:[%s2537_s7 + $0xc4] sm:$0xf]  ;;  %v2236_v12 = vld [vmem:[%s2537_s7 + $0xd4] sm:$0xf]  ;;  %v1822_v13 = vld [vmem:[%s2537_s7 + $0xfc] sm:$0xf0] }
  0x57   : > { %1378 = vmatpush.bf16.msra.mxu3 %v2317_v16  ;;  %1222 = vmatmul.bf16.gmra.mxu1 %v1793_v27  ;;  %v1768_v16 = vld [vmem:[%s2537_s7 + $0x70] sm:$0xf]  ;;  %v2213_v27 = vld [vmem:[%s2537_s7 + $0x1c] sm:$0xf]  ;;  %v1784_v14 = vld [vmem:[%s2537_s7 + $0x80] sm:$0xf] }
  0x58   : > { %1407 = vmatpush.bf16.msra.mxu0 %v2325_v25  ;;  %1251 = vmatmul.bf16.gmra.mxu2 %v1797_v28  ;;  %v1769_v22 = vor.u32 %v2229_v17, %v1768_v16  ;;  %v2326_v25 = vld [vmem:[%s2508_s27 + $0x240] sm:$0xff]  ;;  %v1726_v28 = vld [vmem:[%s2537_s7 + $0x44] sm:$0xf0] }
  0x59   : > { %1299 = vmatmul.bf16.vlgmr.msrb.gmra.mxu0 %v1717_v29  ;;  %1471 = vmatpush.bf16.msra.mxu2 %v2335_v33  ;;  %v1806_v29 = vld [vmem:[%s2537_s7 + $0xec] sm:$0xf0]  ;;  %v1864_v17 = vld [vmem:[%s2537_s7 + $0x128] sm:$0xf] }
  0x5a   : > { %2344 = vmatpush.bf16.msra.mxu1 %v2333_v35 }
  0x5b   : > { %1379 = vmatpush.bf16.msra.mxu3 %v2316_v30  ;;  %v1812_v30 = vld [vmem:[%s2537_s7 + $0xc8] sm:$0xf] }
  0x5c   : > { %1408 = vmatpush.bf16.msra.mxu0 %v2324_v31  ;;  %v2240_v31 = vld [vmem:[%s2537_s7 + $0xf0] sm:$0xf0] }
  0x5d   : > { %1472 = vmatpush.bf16.msra.mxu2 %v2334_v9 }
  0x5e   : > { %2345 = vmatpush.bf16.msra.mxu1 %v2332_v36 }
  0x5f   : > { %1380 = vmatpush.bf16.msra.mxu3 %v2315_v32  ;;  %v1732_v32 = vld [vmem:[%s2537_s7 + $0x20] sm:$0xf] }
  0x60   : > { %1409 = vmatpush.bf16.msra.mxu0 %v2323_v34  ;;  %v1729_v34 = vor.u32 %v2213_v27, %v1726_v28  ;;  %v1865_v27 = vor.u32 %v2252_v18, %v1864_v17 }
  0x62   : > { %2346 = vmatpush.bf16.msra.mxu1 %v2331_v56 }
  0x63   : > { %1381 = vmatpush.bf16.msra.mxu3 %v2314_v37 }
  0x64   : > { %1410 = vmatpush.bf16.msra.mxu0 %v2322_v38  ;;  %v2245_v38 = vld [vmem:[%s2537_s7 + $0x11c] sm:$0xf] }
  0x65   : > { %v1853_v47 = vor.u32 %v2245_v38, %v1850_v41  ;;  %v2253_v38 = vld [vmem:[%s2537_s7 + $0x158] sm:$0xf0]  ;;  %v2242_v41 = vld [vmem:[%s2537_s7 + $0x100] sm:$0xf0] }
  0x66   : > { %1275 = vmatmul.bf16.gmra.mxu3 %v1757_v49  ;;  %2347 = vmatpush.bf16.msra.mxu1 %v2330_v58 }
  0x67   : > { %1382 = vmatpush.bf16.msra.mxu3 %v2313_v45  ;;  %1227 = vmatmul.bf16.gmra.mxu1 %v1837_v50  ;;  %v2230_v45 = vld [vmem:[%s2537_s7 + $0xa0] sm:$0xf0]  ;;  %v2671_v50 = vld [vmem:[%s231_s4] ss:$0 sm:$0xff] }
  0x68   : > { %1411 = vmatpush.bf16.msra.mxu0 %v2321_v48  ;;  %1256 = vmatmul.bf16.gmra.mxu2 %v1841_v51  ;;  %v1857_v48 = vor.u32 %v2251_v43, %v1856_v42  ;;  %v1777_v49 = vor.u32 %v2230_v45, %v1776_v44  ;;  %v2235_v51 = vld [vmem:[%s2537_s7 + $0xcc] sm:$0xf]  ;;  %v2214_v43 = vld [vmem:[%s2537_s7 + $0x24] sm:$0xf]  ;;  %v1734_v44 = vld [vmem:[%s2537_s7 + $0x4c] sm:$0xf0] }
  0x69   : > { %1304 = vmatmul.bf16.gmra.mxu0 %v1761_v52  ;;  %v1814_v52 = vld [vmem:[%s2537_s7 + $0xf4] sm:$0xf0] }
  0x6a   : > { %2348 = vmatpush.bf16.msra.mxu1 %v2329_v10 }
  0x6b   : > { %1383 = vmatpush.bf16.msra.mxu3 %v2312_v53  ;;  %v2225_v53 = vld [vmem:[%s2537_s7 + $0x7c] sm:$0xf] }
  0x6c   : > { %1412 = vmatpush.bf16.msra.mxu0 %v2320_v54  ;;  %v1778_v54 = vld [vmem:[%s2537_s7 + $0xa4] sm:$0xf0] }
  0x6d   : > { %v1781_v61 = vor.u32 %v2225_v53, %v1778_v54  ;;  %v1737_v53 = vor.u32 %v2214_v43, %v1734_v44 }
  0x6e   : > { %2349 = vmatpush.bf16.msra.mxu1 %v2328_v11 }
  0x6f   : > { %1384 = vmatpush.bf16.msra.mxu3 %v2311_v55  ;;  %v1740_v55 = vld [vmem:[%s2537_s7 + $0x28] sm:$0xf] }
  0x70   : > { %1413 = vmatpush.bf16.msra.mxu0 %v2319_v57  ;;  %v1820_v57 = vld [vmem:[%s2537_s7 + $0xd0] sm:$0xf] }
  0x72   : > { %2350 = vmatpush.bf16.msra.mxu1 %v2327_v24 }
  0x73   : > { %1385 = vmatpush.bf16.msra.mxu3 %v2310_v59  ;;  %v1817_v59 = vor.u32 %v2235_v51, %v1814_v52  ;;  %v1829_v51 = vor.u32 %v2242_v41, %v1828_v40 }
  0x74   : > { %1414 = vmatpush.bf16.msra.mxu0 %v2318_v60 }
  0x76   : > { %1280 = vmatmul.bf16.gmra.mxu3 %v1801_v5  ;;  %2351 = vmatpush.bf16.msra.mxu1 %v2326_v25 }
  0x77   : > { %2352 = vmatpush.bf16.msrb.mxu3 %v2335_v33  ;;  %1328 = vmatmul.bf16.vlgmr.msrb.gmra.mxu1 %v1721_v6  ;;  %v2219_v33 = vld [vmem:[%s2537_s7 + $0x48] sm:$0xf0] }
  0x78   : > { %1436 = vmatpush.bf16.msrb.mxu0 %v2333_v35  ;;  %1357 = vmatmul.bf16.vlgmr.msrb.gmra.mxu2 %v1725_v7  ;;  %v1809_v35 = vor.u32 %v2234_v26, %v1806_v29  ;;  %v1733_v37 = vor.u32 %v2219_v33, %v1732_v32 }
  0x79   : > { %1309 = vmatmul.bf16.gmra.mxu0 %v1805_v8 }
  0x7b   : > { %2353 = vmatpush.bf16.msrb.mxu3 %v2334_v9 }
  0x7c   : > { %1437 = vmatpush.bf16.msrb.mxu0 %v2332_v36  ;;  %v1813_v36 = vor.u32 %v2240_v31, %v1812_v30 }
  0x80   : > { %1438 = vmatpush.bf16.msrb.mxu0 %v2331_v56  ;;  %v2220_v56 = vld [vmem:[%s2537_s7 + $0x50] sm:$0xf0] }
  0x81   : > { %v1741_v62 = vor.u32 %v2220_v56, %v1740_v55 }
  0x84   : > { %1439 = vmatpush.bf16.msrb.mxu0 %v2330_v58  ;;  %v2241_v58 = vld [vmem:[%s2537_s7 + $0xf8] sm:$0xf0] }
  0x85   : > { %v1821_v1 = vor.u32 %v2241_v58, %v1820_v57 }
  0x86   : > { %1285 = vmatmul.bf16.gmra.mxu3 %v1845_v20 }
  0x87   : > { %1333 = vmatmul.bf16.gmra.mxu1 %v1765_v21 }
  0x88   : > { %1440 = vmatpush.bf16.msrb.mxu0 %v2329_v10  ;;  %1362 = vmatmul.bf16.gmra.mxu2 %v1769_v22  ;;  %v2246_v10 = vld [vmem:[%s2537_s7 + $0x124] sm:$0xf] }
  0x89   : > { %1314 = vmatmul.bf16.gmra.mxu0 %v1849_v23  ;;  %v1825_v23 = vor.u32 %v2236_v12, %v1822_v13 }
  0x8c   : > { %1441 = vmatpush.bf16.msrb.mxu0 %v2328_v11  ;;  %v1858_v11 = vld [vmem:[%s2537_s7 + $0x14c] sm:$0xf0] }
  0x8d   : > { %v1861_v20 = vor.u32 %v2246_v10, %v1858_v11 }
  0x90   : > { %1442 = vmatpush.bf16.msrb.mxu0 %v2327_v24  ;;  %v1785_v24 = vor.u32 %v2231_v15, %v1784_v14 }
  0x94   : > { %1443 = vmatpush.bf16.msrb.mxu0 %v2326_v25 }
  0x96   : > { %1386 = vmatmul.bf16.vlgmr.msra.gmra.mxu3 %v1729_v34 }
  0x97   : > { %1338 = vmatmul.bf16.gmra.mxu1 %v1809_v35 }
  0x98   : > { %1367 = vmatmul.bf16.gmra.mxu2 %v1813_v36  ;;  %v2247_v36 = vld [vmem:[%s2537_s7 + $0x12c] sm:$0xf] }
  0x99   : > { %1415 = vmatmul.bf16.vlgmr.msra.gmra.mxu0 %v1733_v37  ;;  %v1872_v37 = vld [vmem:[%s2537_s7 + $0x130] sm:$0xf] }
  0xa6   : > { %1391 = vmatmul.bf16.gmra.mxu3 %v1773_v46  ;;  %v1873_v46 = vor.u32 %v2253_v38, %v1872_v37 }
  0xa7   : > { %1343 = vmatmul.bf16.gmra.mxu1 %v1853_v47 }
  0xa8   : > { %1372 = vmatmul.bf16.gmra.mxu2 %v1857_v48 }
  0xa9   : > { %1420 = vmatmul.bf16.gmra.mxu0 %v1777_v49  ;;  %v1869_v49 = vor.u32 %v2247_v36, %v1866_v39 }
  0xb3   : > { %v1184_v60 = vpop.f32.mrf.mxu0 }
  0xb4   : > { %v1185_v63 = vadd.f32 %v2671_v50, %v1184_v60  ;;  %v1213_v0 = vpop.f32.mrf.mxu1 }
  0xb6   : > { %v1214_v2 = vadd.f32 %v1213_v0, %v1185_v63  ;;  %1396 = vmatmul.bf16.gmra.mxu3 %v1817_v59 }
  0xb7   : > { %1449 = vmatmul.bf16.vlgmr.msra.gmra.mxu1 %v1781_v61 }
  0xb8   : > { %2202 = vmatmul.msk.bf16.vlgmr.msra.gmra.mxu2 %vm1162_vm0, %v1741_v62 }
  0xb9   : > { %1425 = vmatmul.bf16.gmra.mxu0 %v1821_v1  ;;  %v1194_v3 = vpop.f32.mrf.mxu3 }
  0xba   : > { %v1195_v47 = vadd.f32 %v2671_v50, %v1194_v3 }
  0xbb   : > { %v1242_v4 = vpop.f32.mrf.mxu2  ;;  %v1186_v6 = vpop.f32.mrf.mxu0 }
  0xbc   : > { %v1243_v5 = vadd.f32 %v1242_v4, %v1214_v2  ;;  %v1187_v7 = vadd.f32 %v2671_v50, %v1186_v6  ;;  %v1215_v8 = vpop.f32.mrf.mxu1 }
  0xbe   : > { %v1216_v9 = vadd.f32 %v1215_v8, %v1187_v7 }
  0xc1   : > { %v1196_v16 = vpop.f32.mrf.mxu3 }
  0xc2   : > { %v1197_v59 = vadd.f32 %v2671_v50, %v1196_v16 }
  0xc3   : > { %v1244_v19 = vpop.f32.mrf.mxu2  ;;  %v1189_v22 = vpop.f32.mrf.mxu0 }
  0xc4   : > { %v1245_v21 = vadd.f32 %v1244_v19, %v1216_v9  ;;  %v1190_v25 = vadd.f32 %v2671_v50, %v1189_v22  ;;  %v1218_v26 = vpop.f32.mrf.mxu1 }
  0xc6   : > { %v1219_v28 = vadd.f32 %v1218_v26, %v1190_v25  ;;  %1401 = vmatmul.bf16.gmra.mxu3 %v1861_v20 }
  0xc7   : > { %1454 = vmatmul.bf16.gmra.mxu1 %v1825_v23 }
  0xc8   : > { %2203 = vmatmul.msk.bf16.gmra.mxu2 %vm1162_vm0, %v1785_v24 }
  0xc9   : > { %1430 = vmatmul.bf16.gmra.mxu0 %v1865_v27  ;;  %v1199_v29 = vpop.f32.mrf.mxu3 }
  0xca   : > { %v1200_v4 = vadd.f32 %v2671_v50, %v1199_v29 }
  0xcb   : > { %v1247_v30 = vpop.f32.mrf.mxu2  ;;  %v1191_v32 = vpop.f32.mrf.mxu0 }
  0xcc   : > { %v1248_v31 = vadd.f32 %v1247_v30, %v1219_v28  ;;  %v1192_v33 = vadd.f32 %v2671_v50, %v1191_v32  ;;  %v1220_v34 = vpop.f32.mrf.mxu1 }
  0xce   : > { %v1221_v35 = vadd.f32 %v1220_v34, %v1192_v33 }
  0xd1   : > { %v1201_v42 = vpop.f32.mrf.mxu3 }
  0xd2   : > { %v1202_v13 = vadd.f32 %v2671_v50, %v1201_v42 }
  0xd3   : > { %v1249_v45 = vpop.f32.mrf.mxu2 }
  0xd4   : > { %v1250_v48 = vadd.f32 %v1249_v45, %v1221_v35  ;;  %v1223_v52 = vpop.f32.mrf.mxu1 }
  0xd5   : > { %v1224_v54 = vadd.f32 %v1223_v52, %v1195_v47 }
  0xd6   : > { %v1300_v55 = vpop.f32.mrf.mxu0  ;;  %2205 = vmatmul.msk.bf16.vlgmr.msrb.gmra.mxu3 %vm1162_vm0, %v1873_v46 }
  0xd7   : > { %1459 = vmatmul.bf16.gmra.mxu1 %v1869_v49 }
  0xd8   : > { %2204 = vmatmul.msk.bf16.gmra.mxu2 %vm1162_vm0, %v1829_v51 }
  0xd9   : > { %1444 = vmatmul.bf16.vlgmr.msrb.gmra.mxu0 %v1737_v53  ;;  %v1271_v56 = vpop.f32.mrf.mxu3 }
  0xda   : > { %v1272_v58 = vadd.f32 %v1271_v56, %v1243_v5 }
  0xdb   : > { %v1252_v57 = vpop.f32.mrf.mxu2 }
  0xdc   : > { %v1253_v60 = vadd.f32 %v1252_v57, %v1224_v54  ;;  %v1225_v61 = vpop.f32.mrf.mxu1  ;;  %v1301_v62 = vadd.f32 %v1300_v55, %v1272_v58 }
  0xdd   : > { %v1226_v63 = vadd.f32 %v1225_v61, %v1197_v59 }
  0xde   : > { %v1302_v0 = vpop.f32.mrf.mxu0 }
  0xe1   : > { %v1273_v1 = vpop.f32.mrf.mxu3 }
  0xe2   : > { %v1274_v3 = vadd.f32 %v1273_v1, %v1245_v21 }
  0xe3   : > { %v1254_v2 = vpop.f32.mrf.mxu2 }
  0xe4   : > { %v1255_v6 = vadd.f32 %v1254_v2, %v1226_v63  ;;  %v1228_v7 = vpop.f32.mrf.mxu1  ;;  %v1303_v8 = vadd.f32 %v1302_v0, %v1274_v3 }
  0xe5   : > { %v1229_v9 = vadd.f32 %v1228_v7, %v1200_v4 }
  0xe6   : > { %v1305_v10 = vpop.f32.mrf.mxu0 }
  0xe9   : > { %v1276_v11 = vpop.f32.mrf.mxu3 }
  0xea   : > { %v1277_v5 = vadd.f32 %v1276_v11, %v1248_v31 }
  0xeb   : > { %v1257_v12 = vpop.f32.mrf.mxu2 }
  0xec   : > { %v1258_v14 = vadd.f32 %v1257_v12, %v1229_v9  ;;  %v1230_v15 = vpop.f32.mrf.mxu1  ;;  %v1306_v16 = vadd.f32 %v1305_v10, %v1277_v5 }
  0xed   : > { %v1231_v17 = vadd.f32 %v1230_v15, %v1202_v13 }
  0xee   : > { %v1307_v18 = vpop.f32.mrf.mxu0 }
  0xf1   : > { %v1278_v19 = vpop.f32.mrf.mxu3 }
  0xf2   : > { %v1279_v21 = vadd.f32 %v1278_v19, %v1250_v48 }
  0xf3   : > { %v1259_v20 = vpop.f32.mrf.mxu2 }
  0xf4   : > { %v1260_v22 = vadd.f32 %v1259_v20, %v1231_v17  ;;  %v1329_v23 = vpop.f32.mrf.mxu1  ;;  %v1308_v24 = vadd.f32 %v1307_v18, %v1279_v21 }
  0xf5   : > { %v1330_v26 = vadd.f32 %v1329_v23, %v1301_v62 }
  0xf6   : > { %v1310_v25 = vpop.f32.mrf.mxu0 }
  0xf9   : > { %v1281_v27 = vpop.f32.mrf.mxu3 }
  0xfa   : > { %v1282_v28 = vadd.f32 %v1281_v27, %v1253_v60 }
  0xfb   : > { %v1358_v29 = vpop.f32.mrf.mxu2 }
  0xfc   : > { %v2709_v30 = vadd.f32 %v1358_v29, %v1330_v26  ;;  %v1331_v31 = vpop.f32.mrf.mxu1  ;;  %v2711_v50 = vadd.f32 %v1310_v25, %v1282_v28 }
  0xfd   : > { %v1332_v33 = vadd.f32 %v1331_v31, %v1303_v8 }
  0xfe   : > { %v1312_v32 = vpop.f32.mrf.mxu0 }
 0x101   : > { %v1283_v34 = vpop.f32.mrf.mxu3 }
 0x102   : > { %v1284_v35 = vadd.f32 %v1283_v34, %v1255_v6 }
 0x103   : > { %v1360_v36 = vpop.f32.mrf.mxu2 }
 0x104   : > { %v2713_v37 = vadd.f32 %v1360_v36, %v1332_v33  ;;  %v1334_v38 = vpop.f32.mrf.mxu1  ;;  %v2715_v39 = vadd.f32 %v1312_v32, %v1284_v35 }
 0x105   : > { %v1335_v11 = vadd.f32 %v1334_v38, %v1306_v16 }
 0x106   : > { %v1315_v40 = vpop.f32.mrf.mxu0 }
 0x109   : > { %v1286_v41 = vpop.f32.mrf.mxu3 }
 0x10a   : > { %v1287_v42 = vadd.f32 %v1286_v41, %v1258_v14 }
 0x10b   : > { %v1363_v43 = vpop.f32.mrf.mxu2 }
 0x10c   : > { %v1336_v44 = vpop.f32.mrf.mxu1  ;;  %v1316_v45 = vadd.f32 %v1315_v40, %v1287_v42  ;;  %v1364_v12 = vadd.f32 %v1363_v43, %v1335_v11 }
 0x10d   : > { %v1337_v18 = vadd.f32 %v1336_v44, %v1308_v24 }
 0x10e   : > { %v1317_v46 = vpop.f32.mrf.mxu0 }
 0x111   : > { %v1288_v47 = vpop.f32.mrf.mxu3 }
 0x112   : > { %v1289_v48 = vadd.f32 %v1288_v47, %v1260_v22 }
 0x113   : > { %v1365_v49 = vpop.f32.mrf.mxu2 }
 0x114   : > { %v1339_v51 = vpop.f32.mrf.mxu1  ;;  %v2717_v52 = vadd.f32 %v1317_v46, %v1289_v48  ;;  %v1366_v20 = vadd.f32 %v1365_v49, %v1337_v18 }
 0x115   : > { %v1340_v31 = vadd.f32 %v1339_v51, %v2711_v50 }
 0x116   : > { %v1416_v53 = vpop.f32.mrf.mxu0 }
 0x119   : > { %v1387_v54 = vpop.f32.mrf.mxu3 }
 0x11a   : > { %v1388_v24 = vadd.f32 %v1387_v54, %v2709_v30 }
 0x11b   : > { %v1368_v55 = vpop.f32.mrf.mxu2 }
 0x11c   : > { %v1341_v56 = vpop.f32.mrf.mxu1  ;;  %v1369_v35 = vadd.f32 %v1368_v55, %v1340_v31  ;;  %v1417_v44 = vadd.f32 %v1416_v53, %v1388_v24 }
 0x11d   : > { %v1342_v49 = vadd.f32 %v1341_v56, %v2715_v39 }
 0x11e   : > { %v2719_v57 = vpop.f32.mrf.mxu0 }
 0x121   : > { %v2721_v58 = vpop.f32.mrf.mxu3 }
 0x122   : > { %v1390_v55 = vadd.f32 %v2721_v58, %v2713_v37 }
 0x123   : > { %v2723_v59 = vpop.f32.mrf.mxu2 }
 0x124   : > { %v1344_v60 = vpop.f32.mrf.mxu1  ;;  %v1419_v58 = vadd.f32 %v2719_v57, %v1390_v55 }
 0x125   : > { %v1345_v29 = vadd.f32 %v1344_v60, %v1316_v45 }
 0x126   : > { %v1421_v61 = vpop.f32.mrf.mxu0 }
 0x129   : > { %v1392_v62 = vpop.f32.mrf.mxu3 }
 0x12a   : > { %v1393_v14 = vadd.f32 %v1392_v62, %v1364_v12  ;;  %v1371_v62 = vadd.f32 %v2723_v59, %v1342_v49 }
 0x12b   : > { %v1373_v63 = vpop.f32.mrf.mxu2 }
 0x12c   : > { %v1346_v0 = vpop.f32.mrf.mxu1  ;;  %v1422_v19 = vadd.f32 %v1421_v61, %v1393_v14  ;;  %v1374_v34 = vadd.f32 %v1373_v63, %v1345_v29 }
 0x12d   : > { %v1347_v30 = vadd.f32 %v1346_v0, %v2717_v52 }
 0x12e   : > { %v1423_v1 = vpop.f32.mrf.mxu0 }
 0x131   : > { %v1394_v2 = vpop.f32.mrf.mxu3 }
 0x132   : > { %v1395_v25 = vadd.f32 %v1394_v2, %v1366_v20 }
 0x133   : > { %v1375_v3 = vpop.f32.mrf.mxu2 }
 0x134   : > { %v1450_v4 = vpop.f32.mrf.mxu1  ;;  %v1424_v32 = vadd.f32 %v1423_v1, %v1395_v25  ;;  %v1376_v60 = vadd.f32 %v1375_v3, %v1347_v30 }
 0x135   : > { %v1451_v21 = vadd.f32 %v1450_v4, %v1422_v19 }
 0x136   : > { %v1426_v6 = vpop.f32.mrf.mxu0 }
 0x139   : > { %v1397_v7 = vpop.f32.mrf.mxu3 }
 0x13a   : > { %v1398_v42 = vadd.f32 %v1397_v7, %v1369_v35 }
 0x13b   : > { %v1474_v8 = vpop.f32.mrf.mxu2 }
 0x13c   : > { %v1452_v9 = vpop.f32.mrf.mxu1  ;;  %v1427_v51 = vadd.f32 %v1426_v6, %v1398_v42 }
 0x13d   : > { %v1453_v36 = vadd.f32 %v1452_v9, %v1424_v32 }
 0x13e   : > { %v2725_v10 = vpop.f32.mrf.mxu0 }
 0x141   : > { %v1399_v5 = vpop.f32.mrf.mxu3 }
 0x142   : > { %v1400_v39 = vadd.f32 %v1399_v5, %v1371_v62 }
 0x143   : > { %v2727_v13 = vpop.f32.mrf.mxu2 }
 0x144   : > { %v1455_v15 = vpop.f32.mrf.mxu1  ;;  %v1429_v12 = vadd.f32 %v2725_v10, %v1400_v39 }
 0x145   : > { %v1456_v63 = vadd.f32 %v1455_v15, %v1427_v51 }
 0x146   : > { %v1431_v17 = vpop.f32.mrf.mxu0 }
 0x149   : > { %v1402_v22 = vpop.f32.mrf.mxu3 }
 0x14a   : > { %v1403_v40 = vadd.f32 %v1402_v22, %v1374_v34 }
 0x14b   : > { %v1479_v23 = vpop.f32.mrf.mxu2 }
 0x14c   : > { %v1480_v26 = vadd.f32 %v1479_v23, %v1451_v21  ;;  %v2730_v27 = vpop.f32.mrf.mxu1  ;;  %v1432_v48 = vadd.f32 %v1431_v17, %v1403_v40 }
 0x14d   : > { %v1458_v57 = vadd.f32 %v2730_v27, %v1429_v12 }
 0x14e   : > { %vm1496_vm1 = vcmp.ge.f32.partialorder %v1480_v26, 0.0  ;;  %v1504_v16 = vmul.f32 0.2, %v1480_v26  ;;  %v1433_v28 = vpop.f32.mrf.mxu0 }
 0x150   : > { %v1512_v33 = vsel %vm1496_vm1, %v1480_v26, %v1504_v16 }
 0x151   : > { %1520 = vst [vmem:[%s2734_s12 + $0x10] sm:$0xff] %v1512_v33  ;;  %v1404_v38 = vpop.f32.mrf.mxu3 }
 0x152   : > { %v1405_v2 = vadd.f32 %v1404_v38, %v1376_v60 }
 0x153   : > { %v1481_v41 = vpop.f32.mrf.mxu2 }
 0x154   : > { %v1482_v43 = vadd.f32 %v1481_v41, %v1453_v36  ;;  %v1460_v45 = vpop.f32.mrf.mxu1  ;;  %v1434_v11 = vadd.f32 %v1433_v28, %v1405_v2 }
 0x155   : > { %v1461_v53 = vadd.f32 %v1460_v45, %v1432_v48 }
 0x156   : > { %vm1497_vm2 = vcmp.ge.f32.partialorder %v1482_v43, 0.0  ;;  %v1505_v50 = vmul.f32 0.2, %v1482_v43  ;;  %v1445_v46 = vpop.f32.mrf.mxu0 }
 0x157   : > { %v1446_v47 = vadd.f32 %v1445_v46, %v1417_v44 }
 0x158   : > { %v1513_v54 = vsel %vm1497_vm2, %v1482_v43, %v1505_v50  ;;  %v1584_v16 = vld [vmem:[%s2734_s12 + $0x10] sm:$0xff] (%p2489_p3) }
 0x159   : > { %1521 = vst [vmem:[%s2734_s12 + $0x18] sm:$0xff] %v1513_v54  ;;  %v1475_v61 = vadd.f32 %v1474_v8, %v1446_v47  ;;  %v1489_v1 = vpop.f32.mrf.mxu3 }
 0x15a   : > { %v1490_v4 = vadd.f32 %v1489_v1, %v1461_v53  ;;  %1585 = vst [vmem:[%s1537_s23 + $0x20] sm:$0xff] (%p2489_p3), %v1584_v16 }
 0x15b   : > { %vm1494_vm3 = vcmp.ge.f32.partialorder %v1475_v61, 0.0  ;;  %v1502_v52 = vmul.f32 0.2, %v1475_v61  ;;  %v1484_v0 = vpop.f32.mrf.mxu2 }
 0x15c   : > { %v1485_v56 = vadd.f32 %v1484_v0, %v1456_v63  ;;  %vm1500_vm4 = vcmp.ge.f32.partialorder %v1490_v4, 0.0  ;;  %v1508_v37 = vmul.f32 0.2, %v1490_v4  ;;  %v1462_v7 = vpop.f32.mrf.mxu1 }
 0x15d   : > { %v1510_v6 = vsel %vm1494_vm3, %v1475_v61, %v1502_v52  ;;  %v1463_v15 = vadd.f32 %v1462_v7, %v1434_v11 }
 0x15e   : > { %1518 = vst [vmem:[%s2734_s12] sm:$0xff] %v1510_v6  ;;  %vm1498_vm5 = vcmp.ge.f32.partialorder %v1485_v56, 0.0  ;;  %v1506_v3 = vmul.f32 0.2, %v1485_v56  ;;  %v1447_v59 = vpop.f32.mrf.mxu0  ;;  %v1516_v8 = vsel %vm1500_vm4, %v1490_v4, %v1508_v37 }
 0x15f   : > { %v1448_v9 = vadd.f32 %v1447_v59, %v1419_v58  ;;  %1524 = vst [vmem:[%s2734_s12 + $0x30] sm:$0xff] %v1516_v8 }
 0x160   : > { %v1514_v5 = vsel %vm1498_vm5, %v1485_v56, %v1506_v3  ;;  %v1586_v28 = vld [vmem:[%s2734_s12 + $0x18] sm:$0xff] (%p2489_p3) }
 0x161   : > { %1522 = vst [vmem:[%s2734_s12 + $0x20] sm:$0xff] %v1514_v5  ;;  %v1477_v14 = vadd.f32 %v2727_v13, %v1448_v9  ;;  %v1491_v17 = vpop.f32.mrf.mxu3 }
 0x162   : > { %v1492_v20 = vadd.f32 %v1491_v17, %v1463_v15  ;;  %1587 = vst [vmem:[%s1537_s23 + $0x30] sm:$0xff] (%p2489_p3), %v1586_v28 }
 0x163   : > { %vm1495_vm6 = vcmp.ge.f32.partialorder %v1477_v14, 0.0  ;;  %v1503_v18 = vmul.f32 0.2, %v1477_v14  ;;  %v1486_v19 = vpop.f32.mrf.mxu2 }
 0x164   : > { %v1487_v21 = vadd.f32 %v1486_v19, %v1458_v57  ;;  %vm1501_vm7 = vcmp.ge.f32.partialorder %v1492_v20, 0.0  ;;  %v1509_v10 = vmul.f32 0.2, %v1492_v20 }
 0x165   : > { %v1511_v22 = vsel %vm1495_vm6, %v1477_v14, %v1503_v18  ;;  %1532 = sbr.rel (!%p2489_p3) target bundleno = 370 (0x172), region = 36  ;;  %v1580_v13 = vld [vmem:[%s2734_s12] sm:$0xff] (%p2489_p3) }
 0x166   : > { %1519 = vst [vmem:[%s2734_s12 + $0x8] sm:$0xff] %v1511_v22  ;;  %vm1499_vm8 = vcmp.ge.f32.partialorder %v1487_v21, 0.0  ;;  %v1507_v23 = vmul.f32 0.2, %v1487_v21  ;;  %v1517_v25 = vsel %vm1501_vm7, %v1492_v20, %v1509_v10  ;;  %v1592_v32 = vld [vmem:[%s2734_s12 + $0x30] sm:$0xff] (%p2489_p3) }
 0x167   : > { %1525 = vst [vmem:[%s2734_s12 + $0x38] sm:$0xff] %v1517_v25 }
 0x168   : > { %v1515_v26 = vsel %vm1499_vm8, %v1487_v21, %v1507_v23  ;;  %1581 = vst [vmem:[%s1537_s23] sm:$0xff] (%p2489_p3), %v1580_v13  ;;  %v1588_v29 = vld [vmem:[%s2734_s12 + $0x20] sm:$0xff] (%p2489_p3) }
 0x169   : > { %1523 = vst [vmem:[%s2734_s12 + $0x28] sm:$0xff] %v1515_v26 }
 0x16a   : > { %1589 = vst [vmem:[%s1537_s23 + $0x40] sm:$0xff] %v1588_v29 }
 0x16b   : > { %1593 = vst [vmem:[%s1537_s23 + $0x60] sm:$0xff] %v1592_v32 }
 0x16d   : > { %v1582_v27 = vld [vmem:[%s2734_s12 + $0x8] sm:$0xff] }
 0x16e   : > { %1583 = vst [vmem:[%s1537_s23 + $0x10] sm:$0xff] %v1582_v27  ;;  %v1594_v33 = vld [vmem:[%s2734_s12 + $0x38] sm:$0xff] }
 0x16f   : > { %1595 = vst [vmem:[%s1537_s23 + $0x70] sm:$0xff] %v1594_v33 }
 0x170   : > { %v1590_v31 = vld [vmem:[%s2734_s12 + $0x28] sm:$0xff] }
 0x171   : > { %1591 = vst [vmem:[%s1537_s23 + $0x50] sm:$0xff] %v1590_v31 }
 0x172 PF: > { %s13_s16 = sadd.s32 1, %s2435_s16   ;;  %s2787_s12 = smov %s2423_s13 }
 0x173   : > { %p10_p9 = scmp.ge.s32.totalorder %s13_s16, 4   ;;  %s2788_s13 = smov %s2498_s22 }
 0x174   : > { %s2789_s14 = smov %s2431_s15  ;;  %s2790_s15 = smov %s2792_s18 }
 0x175   :  { %12 = sbr.rel (!%p10_p9) target bundleno = 3 (0x3), region = 106 }

// kernel: wave_discriminator_block.10
= control target key start
LH: loop header
LB: loop body
LE: loop exit
PB: predicated region body
PF: predicated region fallthrough
CT: control target
= control target key end

     0   :  { %s1848_s12 = smov 0   ;;  %s1850_s13 = smov 0   ;;  %s2042_s0 = inlined_call_operand.vmem [shape: bf16[8,16,1312], index: 0, kind: input, shape index: {}]   ;;  %s2043_s1 = inlined_call_operand.vmem [shape: bf16[8,1312,128], index: 1, kind: input, shape index: {}]   ;;  %s2044_s2 = inlined_call_operand.vmem [shape: f32[1,1024], index: 2, kind: input, shape index: {}]   ;;  %s2045_s3 = inlined_call_operand.vmem [shape: f32[16,1024], index: 3, kind: output, shape index: {}]  }
   0x1   :  { %s1852_s14 = smov 0   ;;  %s1854_s15 = smov 0  }
   0x2   :  { %s1856_s16 = smov 0  }
   0x3 LB: > { %s1267_s17 = sadd.s32 4294967295, %s1826_s16   ;;  %s25_s18 = sadd.s32 1, %s1822_s15  ;;  %s1826_s16 = sphi %s1856_s16, %s13_s16   ;;  %s1822_s15 = sphi %s1854_s15, %s2050_s15   ;;  %s1818_s14 = sphi %s1852_s14, %s2049_s14   ;;  %s1814_s13 = sphi %s1850_s13, %s2048_s13   ;;  %s1810_s12 = sphi %s1848_s12, %s2047_s12  }
   0x4   : > { %p27_p0 = scmp.ge.s32.totalorder %s25_s18, 8  ;;  %s114_s19 = sadd.s32 1, %s1814_s13 }
   0x5   : > { %p124_p1 = scmp.ne.s32.totalorder %s1814_s13, %s1810_s12  ;;  %p125_p2 = scmp.eq.s32.totalorder %s1267_s17, 7 }
   0x6   : > { %s2052_s18 = smov (%p27_p0, %s25_s18), 0  ;;  %p1271_p4 = scmp.ge.s32.totalorder %s1826_s16, 1 }
   0x7   : > { %p1880_p3 = por %p125_p2, %p124_p1  ;;  %s110_s21 = ssub.s32 %s1822_s15, %s2052_s18 }
   0x8   : > { %p177_p5 = scmp.lt.s32.totalorder %s1826_s16, 9  ;;  %p112_p6 = scmp.eq.s32.totalorder %s110_s21, 0 }
   0xa   : > { %p178_p7 = pnand %p1271_p4, %p177_p5 }
   0xb   : > { %s1889_s22 = scalar_select %p112_p6, %s1814_s13, %s114_s19  }
   0xc   : > { %181 = sbr.rel (%p178_p7) target bundleno = 270 (0x10e), region = 32  ;;  %p214_p8 = scmp.lt.s32.totalorder (!%p178_p7), %s1818_s14, 7 }
   0xd   : > { %s210_s10 = sand.u32 (!%p178_p7), 1, %s1810_s12  }
   0xe   : > { %s1272_s11 = sshll.u32 (!%p178_p7), %s210_s10, 4 }
   0xf   : > { %s212_s17 = scalar_lea.vmem (!%p178_p7), [#allocation2], %s1272_s11 }
  0x11   : > { %s1893_s23 = scalar_select %p214_p8, %s1818_s14, 7  ;;  %vm961_vm0 = vcmask 261120  }
  0x12   : > { %s1649_s12 = sshll.u32 (%p1880_p3), %s1818_s14, 3 }
  0x13   : > { %s1746_s24 = smul.u32 656, %s1893_s23  ;;  %s231_s27 = scalar_lea.vmem %s2044_s2, %s1893_s23 }
  0x14   : > { %s1745_s4 = smul.u32 88, %s1893_s23  ;;  %s1138_s23 = scalar_lea.vmem (%p1880_p3), %s2045_s3, %s1649_s12 }
  0x15   : > { %s1903_s30 = scalar_lea.vmem %s2043_s1, %s1746_s24 }
  0x16   : > { %v1670_v0 = vld [vmem:[%s1903_s30 + $0x38] sm:$0xff]  ;;  %v1669_v4 = vld [vmem:[%s1903_s30 + $0x30] sm:$0xff]  ;;  %v1668_v8 = vld [vmem:[%s1903_s30 + $0x28] sm:$0xff]  ;;  %s1937_s7 = scalar_lea.vmem %s2042_s0, %s1745_s4 }
  0x17   : > { %v1678_v1 = vld [vmem:[%s1903_s30 + $0x78] sm:$0xff]  ;;  %965 = vmatpush.bf16.msra.mxu0 %v1670_v0  ;;  %v1677_v5 = vld [vmem:[%s1903_s30 + $0x70] sm:$0xff]  ;;  %v1676_v9 = vld [vmem:[%s1903_s30 + $0x68] sm:$0xff] }
  0x18   : > { %v1686_v2 = vld [vmem:[%s1903_s30 + $0xb8] sm:$0xff]  ;;  %979 = vmatpush.bf16.msra.mxu1 %v1678_v1  ;;  %v1685_v6 = vld [vmem:[%s1903_s30 + $0xb0] sm:$0xff]  ;;  %v1684_v10 = vld [vmem:[%s1903_s30 + $0xa8] sm:$0xff] }
  0x19   : > { %v1694_v3 = vld [vmem:[%s1903_s30 + $0xf8] sm:$0xff]  ;;  %993 = vmatpush.bf16.msra.mxu2 %v1686_v2  ;;  %v1693_v7 = vld [vmem:[%s1903_s30 + $0xf0] sm:$0xff]  ;;  %v1692_v11 = vld [vmem:[%s1903_s30 + $0xe8] sm:$0xff] }
  0x1a   : > { %1007 = vmatpush.bf16.msra.mxu3 %v1694_v3  ;;  %v1667_v12 = vld [vmem:[%s1903_s30 + $0x20] sm:$0xff]  ;;  %v1666_v16 = vld [vmem:[%s1903_s30 + $0x18] sm:$0xff]  ;;  %v1665_v20 = vld [vmem:[%s1903_s30 + $0x10] sm:$0xff] }
  0x1b   : > { %966 = vmatpush.bf16.msra.mxu0 %v1669_v4  ;;  %v1675_v13 = vld [vmem:[%s1903_s30 + $0x60] sm:$0xff]  ;;  %v1674_v17 = vld [vmem:[%s1903_s30 + $0x58] sm:$0xff]  ;;  %v1673_v21 = vld [vmem:[%s1903_s30 + $0x50] sm:$0xff] }
  0x1c   : > { %980 = vmatpush.bf16.msra.mxu1 %v1677_v5  ;;  %v1683_v14 = vld [vmem:[%s1903_s30 + $0xa0] sm:$0xff]  ;;  %v1682_v18 = vld [vmem:[%s1903_s30 + $0x98] sm:$0xff]  ;;  %v1681_v22 = vld [vmem:[%s1903_s30 + $0x90] sm:$0xff] }
  0x1d   : > { %994 = vmatpush.bf16.msra.mxu2 %v1685_v6  ;;  %v1691_v15 = vld [vmem:[%s1903_s30 + $0xe0] sm:$0xff]  ;;  %v1690_v19 = vld [vmem:[%s1903_s30 + $0xd8] sm:$0xff]  ;;  %v1689_v23 = vld [vmem:[%s1903_s30 + $0xd0] sm:$0xff] }
  0x1e   : > { %1008 = vmatpush.bf16.msra.mxu3 %v1693_v7  ;;  %v1664_v24 = vld [vmem:[%s1903_s30 + $0x8] sm:$0xff]  ;;  %v1663_v28 = vld [vmem:[%s1903_s30] sm:$0xff]  ;;  %v1702_v31 = vld [vmem:[%s1903_s30 + $0x138] sm:$0xff] }
  0x1f   : > { %967 = vmatpush.bf16.msra.mxu0 %v1668_v8  ;;  %v1672_v25 = vld [vmem:[%s1903_s30 + $0x48] sm:$0xff]  ;;  %v1671_v29 = vld [vmem:[%s1903_s30 + $0x40] sm:$0xff]  ;;  %v1710_v34 = vld [vmem:[%s1903_s30 + $0x178] sm:$0xff] }
  0x20   : > { %981 = vmatpush.bf16.msra.mxu1 %v1676_v9  ;;  %v1680_v26 = vld [vmem:[%s1903_s30 + $0x88] sm:$0xff]  ;;  %v1679_v30 = vld [vmem:[%s1903_s30 + $0x80] sm:$0xff]  ;;  %v1658_v36 = vld [vmem:[%s1937_s7 + $0x30] sm:$0xf0] }
  0x21   : > { %995 = vmatpush.bf16.msra.mxu2 %v1684_v10  ;;  %v1688_v27 = vld [vmem:[%s1903_s30 + $0xc8] sm:$0xff]  ;;  %v1277_v32 = vld [vmem:[%s1937_s7] sm:$0xf]  ;;  %v1718_v37 = vld [vmem:[%s1903_s30 + $0x1b8] sm:$0xff] }
  0x22   : > { %1009 = vmatpush.bf16.msra.mxu3 %v1692_v11  ;;  %v1657_v33 = vld [vmem:[%s1937_s7 + $0x28] sm:$0xf0]  ;;  %v1285_v35 = vld [vmem:[%s1937_s7 + $0x8] sm:$0xf]  ;;  %v1652_v38 = vld [vmem:[%s1937_s7 + $0x4] sm:$0xf] }
  0x23   : > { %968 = vmatpush.bf16.msra.mxu0 %v1667_v12  ;;  %v1279_v39 = vld [vmem:[%s1937_s7 + $0x2c] sm:$0xf0]  ;;  %v1687_v40 = vld [vmem:[%s1903_s30 + $0xc0] sm:$0xff]  ;;  %v1278_v41 = vor.u32 %v1657_v33, %v1277_v32  ;;  %v1726_v42 = vld [vmem:[%s1903_s30 + $0x1f8] sm:$0xff]  ;;  %v1286_v43 = vor.u32 %v1658_v36, %v1285_v35 }
  0x24   : > { %982 = vmatpush.bf16.msra.mxu1 %v1675_v13  ;;  %v1653_v44 = vld [vmem:[%s1937_s7 + $0xc] sm:$0xf]  ;;  %v1287_v45 = vld [vmem:[%s1937_s7 + $0x34] sm:$0xf0]  ;;  %v1701_v46 = vld [vmem:[%s1903_s30 + $0x130] sm:$0xff]  ;;  %v1282_v47 = vor.u32 %v1652_v38, %v1279_v39 }
  0x25   : > { %996 = vmatpush.bf16.msra.mxu2 %v1683_v14  ;;  %v1709_v48 = vld [vmem:[%s1903_s30 + $0x170] sm:$0xff]  ;;  %v1290_v50 = vor.u32 %v1653_v44, %v1287_v45  ;;  %v1700_v52 = vld [vmem:[%s1903_s30 + $0x128] sm:$0xff]  ;;  %v1699_v56 = vld [vmem:[%s1903_s30 + $0x120] sm:$0xff] }
  0x26   : > { %1010 = vmatpush.bf16.msra.mxu3 %v1691_v15  ;;  %v1717_v49 = vld [vmem:[%s1903_s30 + $0x1b0] sm:$0xff]  ;;  %v1708_v53 = vld [vmem:[%s1903_s30 + $0x168] sm:$0xff]  ;;  %v1707_v57 = vld [vmem:[%s1903_s30 + $0x160] sm:$0xff] }
  0x27   : > { %969 = vmatpush.bf16.msra.mxu0 %v1666_v16  ;;  %v1725_v51 = vld [vmem:[%s1903_s30 + $0x1f0] sm:$0xff]  ;;  %v1716_v54 = vld [vmem:[%s1903_s30 + $0x1a8] sm:$0xff]  ;;  %v1715_v58 = vld [vmem:[%s1903_s30 + $0x1a0] sm:$0xff] }
  0x28   : > { %983 = vmatpush.bf16.msra.mxu1 %v1674_v17  ;;  %v1724_v55 = vld [vmem:[%s1903_s30 + $0x1e8] sm:$0xff]  ;;  %v1723_v59 = vld [vmem:[%s1903_s30 + $0x1e0] sm:$0xff]  ;;  %v1698_v60 = vld [vmem:[%s1903_s30 + $0x118] sm:$0xff] }
  0x29   : > { %997 = vmatpush.bf16.msra.mxu2 %v1682_v18  ;;  %v1706_v61 = vld [vmem:[%s1903_s30 + $0x158] sm:$0xff]  ;;  %v1697_v0 = vld [vmem:[%s1903_s30 + $0x110] sm:$0xff]  ;;  %v1696_v4 = vld [vmem:[%s1903_s30 + $0x108] sm:$0xff] }
  0x2a   : > { %1011 = vmatpush.bf16.msra.mxu3 %v1690_v19  ;;  %v1714_v62 = vld [vmem:[%s1903_s30 + $0x198] sm:$0xff]  ;;  %v1705_v1 = vld [vmem:[%s1903_s30 + $0x150] sm:$0xff]  ;;  %v1704_v5 = vld [vmem:[%s1903_s30 + $0x148] sm:$0xff] }
  0x2b   : > { %970 = vmatpush.bf16.msra.mxu0 %v1665_v20  ;;  %v1722_v63 = vld [vmem:[%s1903_s30 + $0x1d8] sm:$0xff]  ;;  %v1713_v2 = vld [vmem:[%s1903_s30 + $0x190] sm:$0xff]  ;;  %v1712_v6 = vld [vmem:[%s1903_s30 + $0x188] sm:$0xff] }
  0x2c   : > { %984 = vmatpush.bf16.msra.mxu1 %v1673_v21  ;;  %v1721_v3 = vld [vmem:[%s1903_s30 + $0x1d0] sm:$0xff]  ;;  %v1720_v7 = vld [vmem:[%s1903_s30 + $0x1c8] sm:$0xff]  ;;  %v1695_v8 = vld [vmem:[%s1903_s30 + $0x100] sm:$0xff] }
  0x2d   : > { %998 = vmatpush.bf16.msra.mxu2 %v1681_v22  ;;  %v1703_v9 = vld [vmem:[%s1903_s30 + $0x140] sm:$0xff]  ;;  %v1293_v11 = vld [vmem:[%s1937_s7 + $0x10] sm:$0xf]  ;;  %v1659_v12 = vld [vmem:[%s1937_s7 + $0x38] sm:$0xf0] }
  0x2e   : > { %1012 = vmatpush.bf16.msra.mxu3 %v1689_v23  ;;  %v1711_v10 = vld [vmem:[%s1903_s30 + $0x180] sm:$0xff]  ;;  %v1301_v13 = vld [vmem:[%s1937_s7 + $0x18] sm:$0xf]  ;;  %v1654_v15 = vld [vmem:[%s1937_s7 + $0x14] sm:$0xf]  ;;  %v1294_v20 = vor.u32 %v1659_v12, %v1293_v11 }
  0x2f   : > { %971 = vmatpush.bf16.msra.mxu0 %v1664_v24  ;;  %v1660_v14 = vld [vmem:[%s1937_s7 + $0x40] sm:$0xf0]  ;;  %v1295_v16 = vld [vmem:[%s1937_s7 + $0x3c] sm:$0xf0]  ;;  %v1734_v17 = vld [vmem:[%s1903_s30 + $0x238] sm:$0xff] }
  0x30   : > { %985 = vmatpush.bf16.msra.mxu1 %v1672_v25  ;;  %v1742_v18 = vld [vmem:[%s1903_s30 + $0x278] sm:$0xff]  ;;  %v1719_v19 = vld [vmem:[%s1903_s30 + $0x1c0] sm:$0xff]  ;;  %v1303_v22 = vld [vmem:[%s1937_s7 + $0x44] sm:$0xf0]  ;;  %v1302_v23 = vor.u32 %v1660_v14, %v1301_v13  ;;  %v1298_v24 = vor.u32 %v1654_v15, %v1295_v16 }
  0x31   : > { %999 = vmatpush.bf16.msra.mxu2 %v1680_v26  ;;  %v1655_v21 = vld [vmem:[%s1937_s7 + $0x1c] sm:$0xf]  ;;  %v1744_v25 = vld [vmem:[%s1903_s30 + $0x288] sm:$0xff]  ;;  %v1731_v32 = vld [vmem:[%s1903_s30 + $0x220] sm:$0xff] }
  0x32   : > { %1013 = vmatpush.bf16.msra.mxu3 %v1688_v27  ;;  %v1306_v26 = vor.u32 %v1655_v21, %v1303_v22  ;;  %v1733_v27 = vld [vmem:[%s1903_s30 + $0x230] sm:$0xff]  ;;  %v1739_v33 = vld [vmem:[%s1903_s30 + $0x260] sm:$0xff]  ;;  %v1730_v36 = vld [vmem:[%s1903_s30 + $0x218] sm:$0xff] }
  0x33   : > { %972 = vmatpush.bf16.msra.mxu0 %v1663_v28  ;;  %v1741_v28 = vld [vmem:[%s1903_s30 + $0x270] sm:$0xff]  ;;  %v1309_v44 = vld [vmem:[%s1937_s7 + $0x20] sm:$0xf]  ;;  %v1661_v45 = vld [vmem:[%s1937_s7 + $0x48] sm:$0xf0] }
  0x34   : > { %986 = vmatpush.bf16.msra.mxu1 %v1671_v29  ;;  %v1743_v29 = vld [vmem:[%s1903_s30 + $0x280] sm:$0xff]  ;;  %v1662_v35 = vld [vmem:[%s1937_s7 + $0x50] sm:$0xf0] }
  0x35   : > { %1000 = vmatpush.bf16.msra.mxu2 %v1679_v30  ;;  %v1732_v30 = vld [vmem:[%s1903_s30 + $0x228] sm:$0xff]  ;;  %v1729_v39 = vld [vmem:[%s1903_s30 + $0x210] sm:$0xff] }
  0x36   : > { %1014 = vmatpush.bf16.msra.mxu3 %v1687_v40  ;;  %973 = vmatmul.bf16.vlgmr.msra.gmra.mxu0 %v1278_v41  ;;  %v1737_v40 = vld [vmem:[%s1903_s30 + $0x250] sm:$0xff]  ;;  %v1728_v41 = vld [vmem:[%s1903_s30 + $0x208] sm:$0xff] }
  0x37   : > { %1021 = vmatpush.bf16.msrb.mxu0 %v1702_v31  ;;  %987 = vmatmul.bf16.vlgmr.msra.gmra.mxu1 %v1282_v47  ;;  %v1740_v31 = vld [vmem:[%s1903_s30 + $0x268] sm:$0xff]  ;;  %v1656_v47 = vld [vmem:[%s1937_s7 + $0x24] sm:$0xf] }
  0x38   : > { %1035 = vmatpush.bf16.msrb.mxu1 %v1710_v34  ;;  %1001 = vmatmul.bf16.vlgmr.msra.gmra.mxu2 %v1286_v43  ;;  %v1317_v34 = vld [vmem:[%s1937_s7 + $0x28] sm:$0xf]  ;;  %v1727_v43 = vld [vmem:[%s1903_s30 + $0x200] sm:$0xff] }
  0x39   : > { %1049 = vmatpush.bf16.msrb.mxu2 %v1718_v37  ;;  %1015 = vmatmul.bf16.vlgmr.msra.gmra.mxu3 %v1290_v50  ;;  %v1738_v37 = vld [vmem:[%s1903_s30 + $0x258] sm:$0xff]  ;;  %v1318_v38 = vor.u32 %v1662_v35, %v1317_v34 }
  0x3a   : > { %1063 = vmatpush.bf16.msrb.mxu3 %v1726_v42  ;;  %v1736_v42 = vld [vmem:[%s1903_s30 + $0x248] sm:$0xff] }
  0x3b   : > { %1022 = vmatpush.bf16.msrb.mxu0 %v1701_v46  ;;  %v1735_v46 = vld [vmem:[%s1903_s30 + $0x240] sm:$0xff] }
  0x3c   : > { %1036 = vmatpush.bf16.msrb.mxu1 %v1709_v48  ;;  %v1311_v48 = vld [vmem:[%s1937_s7 + $0x4c] sm:$0xf0] }
  0x3d   : > { %1050 = vmatpush.bf16.msrb.mxu2 %v1717_v49  ;;  %v1310_v49 = vor.u32 %v1661_v45, %v1309_v44  ;;  %v1314_v50 = vor.u32 %v1656_v47, %v1311_v48 }
  0x3e   : > { %1064 = vmatpush.bf16.msrb.mxu3 %v1725_v51 }
  0x3f   : > { %1023 = vmatpush.bf16.msrb.mxu0 %v1700_v52 }
  0x40   : > { %1037 = vmatpush.bf16.msrb.mxu1 %v1708_v53 }
  0x41   : > { %1051 = vmatpush.bf16.msrb.mxu2 %v1716_v54  ;;  %v1787_v54 = vld [vmem:[%s231_s27] ss:$0 sm:$0xff] }
  0x42   : > { %1065 = vmatpush.bf16.msrb.mxu3 %v1724_v55 }
  0x43   : > { %1024 = vmatpush.bf16.msrb.mxu0 %v1699_v56 }
  0x44   : > { %1038 = vmatpush.bf16.msrb.mxu1 %v1707_v57 }
  0x45   : > { %1052 = vmatpush.bf16.msrb.mxu2 %v1715_v58 }
  0x46   : > { %1066 = vmatpush.bf16.msrb.mxu3 %v1723_v59 }
  0x47   : > { %1025 = vmatpush.bf16.msrb.mxu0 %v1698_v60 }
  0x48   : > { %1039 = vmatpush.bf16.msrb.mxu1 %v1706_v61 }
  0x49   : > { %1053 = vmatpush.bf16.msrb.mxu2 %v1714_v62 }
  0x4a   : > { %1067 = vmatpush.bf16.msrb.mxu3 %v1722_v63 }
  0x4b   : > { %1026 = vmatpush.bf16.msrb.mxu0 %v1697_v0 }
  0x4c   : > { %1040 = vmatpush.bf16.msrb.mxu1 %v1705_v1 }
  0x4d   : > { %1054 = vmatpush.bf16.msrb.mxu2 %v1713_v2 }
  0x4e   : > { %1068 = vmatpush.bf16.msrb.mxu3 %v1721_v3 }
  0x4f   : > { %1027 = vmatpush.bf16.msrb.mxu0 %v1696_v4 }
  0x50   : > { %1041 = vmatpush.bf16.msrb.mxu1 %v1704_v5 }
  0x51   : > { %1055 = vmatpush.bf16.msrb.mxu2 %v1712_v6 }
  0x52   : > { %1069 = vmatpush.bf16.msrb.mxu3 %v1720_v7 }
  0x53   : > { %1028 = vmatpush.bf16.msrb.mxu0 %v1695_v8 }
  0x54   : > { %1042 = vmatpush.bf16.msrb.mxu1 %v1703_v9 }
  0x55   : > { %1056 = vmatpush.bf16.msrb.mxu2 %v1711_v10 }
  0x56   : > { %1070 = vmatpush.bf16.msrb.mxu3 %v1719_v19  ;;  %1029 = vmatmul.bf16.vlgmr.msrb.gmra.mxu0 %v1294_v20 }
  0x57   : > { %1077 = vmatpush.bf16.msra.mxu0 %v1734_v17  ;;  %1043 = vmatmul.bf16.vlgmr.msrb.gmra.mxu1 %v1298_v24 }
  0x58   : > { %1091 = vmatpush.bf16.msra.mxu1 %v1742_v18  ;;  %1057 = vmatmul.bf16.vlgmr.msrb.gmra.mxu2 %v1302_v23 }
  0x59   : > { %1111 = vmatpush.bf16.msra.mxu2 %v1744_v25  ;;  %1071 = vmatmul.bf16.vlgmr.msrb.gmra.mxu3 %v1306_v26 }
  0x5b   : > { %1078 = vmatpush.bf16.msra.mxu0 %v1733_v27 }
  0x5c   : > { %1092 = vmatpush.bf16.msra.mxu1 %v1741_v28 }
  0x5d   : > { %1112 = vmatpush.bf16.msra.mxu2 %v1743_v29 }
  0x5f   : > { %1079 = vmatpush.bf16.msra.mxu0 %v1732_v30 }
  0x60   : > { %1093 = vmatpush.bf16.msra.mxu1 %v1740_v31 }
  0x63   : > { %1080 = vmatpush.bf16.msra.mxu0 %v1731_v32 }
  0x64   : > { %1094 = vmatpush.bf16.msra.mxu1 %v1739_v33 }
  0x67   : > { %1081 = vmatpush.bf16.msra.mxu0 %v1730_v36 }
  0x68   : > { %1095 = vmatpush.bf16.msra.mxu1 %v1738_v37  ;;  %1647 = vmatmul.msk.bf16.vlgmr.msra.gmra.mxu2 %vm961_vm0, %v1318_v38 }
  0x6b   : > { %1082 = vmatpush.bf16.msra.mxu0 %v1729_v39 }
  0x6c   : > { %1096 = vmatpush.bf16.msra.mxu1 %v1737_v40 }
  0x6f   : > { %1083 = vmatpush.bf16.msra.mxu0 %v1728_v41 }
  0x70   : > { %1097 = vmatpush.bf16.msra.mxu1 %v1736_v42 }
  0x73   : > { %1084 = vmatpush.bf16.msra.mxu0 %v1727_v43 }
  0x74   : > { %1098 = vmatpush.bf16.msra.mxu1 %v1735_v46 }
  0x76   : > { %1085 = vmatmul.bf16.vlgmr.msra.gmra.mxu0 %v1310_v49 }
  0x77   : > { %1099 = vmatmul.bf16.vlgmr.msra.gmra.mxu1 %v1314_v50 }
  0xb3   : > { %v974_v51 = vpop.f32.mrf.mxu0 }
  0xb4   : > { %v988_v52 = vpop.f32.mrf.mxu1  ;;  %v975_v55 = vadd.f32 %v1787_v54, %v974_v51 }
  0xb6   : > { %v989_v60 = vadd.f32 %v988_v52, %v975_v55 }
  0xbb   : > { %v1002_v53 = vpop.f32.mrf.mxu2  ;;  %v976_v56 = vpop.f32.mrf.mxu0 }
  0xbc   : > { %v990_v57 = vpop.f32.mrf.mxu1  ;;  %v1016_v58 = vpop.f32.mrf.mxu3  ;;  %v1003_v61 = vadd.f32 %v1002_v53, %v989_v60  ;;  %v977_v63 = vadd.f32 %v1787_v54, %v976_v56 }
  0xbe   : > { %v1017_v0 = vadd.f32 %v1016_v58, %v1003_v61  ;;  %v991_v4 = vadd.f32 %v990_v57, %v977_v63 }
  0xc3   : > { %v1004_v59 = vpop.f32.mrf.mxu2 }
  0xc4   : > { %v1018_v2 = vpop.f32.mrf.mxu3  ;;  %v1005_v6 = vadd.f32 %v1004_v59, %v991_v4 }
  0xc6   : > { %v1019_v12 = vadd.f32 %v1018_v2, %v1005_v6 }
  0xd3   : > { %v1030_v62 = vpop.f32.mrf.mxu0 }
  0xd4   : > { %v1044_v1 = vpop.f32.mrf.mxu1  ;;  %v1031_v5 = vadd.f32 %v1030_v62, %v1017_v0 }
  0xd6   : > { %v1045_v7 = vadd.f32 %v1044_v1, %v1031_v5 }
  0xdb   : > { %v1058_v3 = vpop.f32.mrf.mxu2  ;;  %v1032_v8 = vpop.f32.mrf.mxu0 }
  0xdc   : > { %v1046_v9 = vpop.f32.mrf.mxu1  ;;  %v1072_v10 = vpop.f32.mrf.mxu3  ;;  %v1059_v13 = vadd.f32 %v1058_v3, %v1045_v7  ;;  %v1033_v14 = vadd.f32 %v1032_v8, %v1019_v12 }
  0xde   : > { %v1073_v15 = vadd.f32 %v1072_v10, %v1059_v13  ;;  %v1047_v17 = vadd.f32 %v1046_v9, %v1033_v14 }
  0xe3   : > { %v1060_v11 = vpop.f32.mrf.mxu2 }
  0xe4   : > { %v1061_v21 = vadd.f32 %v1060_v11, %v1047_v17  ;;  %v1074_v23 = vpop.f32.mrf.mxu3 }
  0xe6   : > { %v1075_v25 = vadd.f32 %v1074_v23, %v1061_v21 }
  0xeb   : > { %v1114_v20 = vpop.f32.mrf.mxu2 }
  0xf3   : > { %v1086_v16 = vpop.f32.mrf.mxu0  ;;  %v1116_v32 = vpop.f32.mrf.mxu2 }
  0xf4   : > { %v1087_v18 = vadd.f32 %v1086_v16, %v1073_v15  ;;  %v1100_v19 = vpop.f32.mrf.mxu1 }
  0xf6   : > { %v1101_v22 = vadd.f32 %v1100_v19, %v1087_v18 }
  0xf8   : > { %v1115_v24 = vadd.f32 %v1114_v20, %v1101_v22 }
  0xfa   : > { %vm1119_vm1 = vcmp.ge.f32.partialorder %v1115_v24, 0.0  ;;  %v1121_v26 = vmul.f32 0.2, %v1115_v24 }
  0xfb   : > { %v1088_v27 = vpop.f32.mrf.mxu0 }
  0xfc   : > { %v1123_v28 = vsel %vm1119_vm1, %v1115_v24, %v1121_v26  ;;  %v1089_v29 = vadd.f32 %v1088_v27, %v1075_v25  ;;  %v1102_v30 = vpop.f32.mrf.mxu1 }
  0xfd   : > { %1125 = vst [vmem:[%s212_s17] sm:$0xff] %v1123_v28 }
  0xfe   : > { %v1103_v31 = vadd.f32 %v1102_v30, %v1089_v29 }
 0x100   : > { %v1117_v33 = vadd.f32 %v1116_v32, %v1103_v31 }
 0x101   : > { %1133 = sbr.rel (!%p1880_p3) target bundleno = 270 (0x10e), region = 36 }
 0x102   : > { %vm1120_vm2 = vcmp.ge.f32.partialorder %v1117_v33, 0.0  ;;  %v1122_v34 = vmul.f32 0.2, %v1117_v33 }
 0x104   : > { %v1124_v35 = vsel %vm1120_vm2, %v1117_v33, %v1122_v34  ;;  %v1169_v36 = vld [vmem:[%s212_s17] sm:$0xff] (%p1880_p3) }
 0x105   : > { %1126 = vst [vmem:[%s212_s17 + $0x8] sm:$0xff] %v1124_v35 }
 0x106   : > { %1170 = vst [vmem:[%s1138_s23] sm:$0xff] %v1169_v36 }
 0x10c   : > { %v1171_v37 = vld [vmem:[%s212_s17 + $0x8] sm:$0xff] }
 0x10d   : > { %1172 = vst [vmem:[%s1138_s23 + $0x40] sm:$0xff] %v1171_v37 }
 0x10e PF: > { %s13_s16 = sadd.s32 1, %s1826_s16   ;;  %s2047_s12 = smov %s1814_s13 }
 0x10f   : > { %p10_p9 = scmp.ge.s32.totalorder %s13_s16, 10   ;;  %s2048_s13 = smov %s1889_s22 }
 0x110   : > { %s2049_s14 = smov %s1822_s15  ;;  %s2050_s15 = smov %s2052_s18 }
 0x111   :  { %12 = sbr.rel (!%p10_p9) target bundleno = 3 (0x3), region = 106 }

// kernel: wave_discriminator_block.11
= control target key start
LH: loop header
LB: loop body
LE: loop exit
PB: predicated region body
PF: predicated region fallthrough
CT: control target
= control target key end

     0   :  { %s5348_s12 = smov 0   ;;  %s5350_s13 = smov 0   ;;  %s5819_s0 = inlined_call_operand.vmem [shape: bf16[8,4,5248], index: 0, kind: input, shape index: {}]   ;;  %s5820_s1 = inlined_call_operand.vmem [shape: bf16[8,5248,128], index: 1, kind: input, shape index: {}]   ;;  %s5821_s2 = inlined_call_operand.vmem [shape: f32[1,1024], index: 2, kind: input, shape index: {}]   ;;  %s5822_s3 = inlined_call_operand.vmem [shape: f32[4,1024], index: 3, kind: output, shape index: {}]  }
   0x1   :  { %s5352_s14 = smov 0  }
   0x2 LB: > { %s25_s15 = sadd.s32 1, %s5322_s13  ;;  %p3631_p0 = scmp.ge.s32.totalorder %s5326_s14, 1  ;;  %s5326_s14 = sphi %s5352_s14, %s13_s14   ;;  %s5322_s13 = sphi %s5350_s13, %s5824_s13   ;;  %s5318_s12 = sphi %s5348_s12, %s5823_s12  }
   0x3   : > { %p27_p1 = scmp.ge.s32.totalorder %s25_s15, 8  ;;  %p175_p2 = scmp.lt.s32.totalorder %s5326_s14, 9 }
   0x5   : > { %s5826_s15 = smov (%p27_p1, %s25_s15), 0  ;;  %p176_p3 = pnand %p3631_p0, %p175_p2 }
   0x6   : > { %p214_p4 = scmp.lt.s32.totalorder (!%p176_p3), %s5318_s12, 7 }
   0x7   : > { %179 = sbr.rel (%p176_p3) target bundleno = 502 (0x1f6), region = 32 }
   0xc   : > { %s5828_s12 = smov (!%p214_p4, %s5318_s12), 7 }
   0xd   : > { %s5278_s16 = smul.u32 2624, %s5828_s12  ;;  %s230_s26 = scalar_lea.vmem %s5821_s2, %s5828_s12 }
   0xe   : > { %s5277_s20 = smul.u32 82, %s5828_s12  ;;  %s3634_s29 = sshll.u32 %s5828_s12, 2 }
   0xf   : > { %s5372_s19 = scalar_lea.vmem %s5820_s1, %s5278_s16  ;;  %s238_s5 = scalar_lea.vmem %s5822_s3, %s3634_s29 }
  0x10   : > { %v4956_v0 = vld [vmem:[%s5372_s19 + $0x38] sm:$0xff]  ;;  %v4955_v4 = vld [vmem:[%s5372_s19 + $0x30] sm:$0xff]  ;;  %v4954_v8 = vld [vmem:[%s5372_s19 + $0x28] sm:$0xff]  ;;  %s5396_s23 = scalar_lea.vmem %s5819_s0, %s5277_s20 }
  0x11   : > { %v4972_v1 = vld [vmem:[%s5372_s19 + $0xb8] sm:$0xff]  ;;  %2983 = vmatpush.bf16.msra.mxu0 %v4956_v0  ;;  %v4971_v5 = vld [vmem:[%s5372_s19 + $0xb0] sm:$0xff]  ;;  %v4970_v9 = vld [vmem:[%s5372_s19 + $0xa8] sm:$0xff] }
  0x12   : > { %v4964_v2 = vld [vmem:[%s5372_s19 + $0x78] sm:$0xff]  ;;  %3009 = vmatpush.bf16.msra.mxu2 %v4972_v1  ;;  %v4963_v6 = vld [vmem:[%s5372_s19 + $0x70] sm:$0xff]  ;;  %v4962_v10 = vld [vmem:[%s5372_s19 + $0x68] sm:$0xff] }
  0x13   : > { %v4980_v3 = vld [vmem:[%s5372_s19 + $0xf8] sm:$0xff]  ;;  %2996 = vmatpush.bf16.msra.mxu1 %v4964_v2  ;;  %v4979_v7 = vld [vmem:[%s5372_s19 + $0xf0] sm:$0xff]  ;;  %v4978_v11 = vld [vmem:[%s5372_s19 + $0xe8] sm:$0xff] }
  0x14   : > { %3022 = vmatpush.bf16.msra.mxu3 %v4980_v3  ;;  %v4953_v12 = vld [vmem:[%s5372_s19 + $0x20] sm:$0xff]  ;;  %v4952_v16 = vld [vmem:[%s5372_s19 + $0x18] sm:$0xff]  ;;  %v4951_v21 = vld [vmem:[%s5372_s19 + $0x10] sm:$0xff] }
  0x15   : > { %2984 = vmatpush.bf16.msra.mxu0 %v4955_v4  ;;  %v4969_v13 = vld [vmem:[%s5372_s19 + $0xa0] sm:$0xff]  ;;  %v4968_v17 = vld [vmem:[%s5372_s19 + $0x98] sm:$0xff]  ;;  %v4967_v22 = vld [vmem:[%s5372_s19 + $0x90] sm:$0xff] }
  0x16   : > { %3010 = vmatpush.bf16.msra.mxu2 %v4971_v5  ;;  %v4961_v14 = vld [vmem:[%s5372_s19 + $0x60] sm:$0xff]  ;;  %v4960_v18 = vld [vmem:[%s5372_s19 + $0x58] sm:$0xff]  ;;  %v4959_v23 = vld [vmem:[%s5372_s19 + $0x50] sm:$0xff] }
  0x17   : > { %2997 = vmatpush.bf16.msra.mxu1 %v4963_v6  ;;  %v4977_v15 = vld [vmem:[%s5372_s19 + $0xe0] sm:$0xff]  ;;  %v4976_v19 = vld [vmem:[%s5372_s19 + $0xd8] sm:$0xff]  ;;  %v4975_v24 = vld [vmem:[%s5372_s19 + $0xd0] sm:$0xff] }
  0x18   : > { %3023 = vmatpush.bf16.msra.mxu3 %v4979_v7  ;;  %v239_v20 = vld [vmem:[%s5396_s23] sm:$0xff]  ;;  %v4950_v25 = vld [vmem:[%s5372_s19 + $0x8] sm:$0xff]  ;;  %v241_v31 = vld [vmem:[%s5396_s23 + $0x10] sm:$0xff] }
  0x19   : > { %2985 = vmatpush.bf16.msra.mxu0 %v4954_v8  ;;  %911 = vst [vmem:[#allocation1] ss:$4 sm:$0xff] %v239_v20  ;;  %v4966_v26 = vld [vmem:[%s5372_s19 + $0x88] sm:$0xff]  ;;  %v4949_v29 = vld [vmem:[%s5372_s19] sm:$0xff]  ;;  %v4988_v36 = vld [vmem:[%s5372_s19 + $0x138] sm:$0xff] }
  0x1a   : > { %3011 = vmatpush.bf16.msra.mxu2 %v4970_v9  ;;  %v4958_v27 = vld [vmem:[%s5372_s19 + $0x48] sm:$0xff]  ;;  %v4965_v30 = vld [vmem:[%s5372_s19 + $0x80] sm:$0xff]  ;;  %v5004_v37 = vld [vmem:[%s5372_s19 + $0x1b8] sm:$0xff] }
  0x1b   : > { %2998 = vmatpush.bf16.msra.mxu1 %v4962_v10  ;;  %v4974_v28 = vld [vmem:[%s5372_s19 + $0xc8] sm:$0xff]  ;;  %v4957_v38 = vld [vmem:[%s5372_s19 + $0x40] sm:$0xff]  ;;  %v4996_v40 = vld [vmem:[%s5372_s19 + $0x178] sm:$0xff] }
  0x1c   : > { %3024 = vmatpush.bf16.msra.mxu3 %v4978_v11  ;;  %v4973_v39 = vld [vmem:[%s5372_s19 + $0xc0] sm:$0xff]  ;;  %v5012_v41 = vld [vmem:[%s5372_s19 + $0x1f8] sm:$0xff]  ;;  %v240_v42 = vld [vmem:[%s5396_s23 + $0x8] sm:$0xff] }
  0x1d   : > { %2986 = vmatpush.bf16.msra.mxu0 %v4953_v12  ;;  %914 = vst [vmem:[#allocation1 + $0x20] ss:$4 sm:$0xff] %v240_v42  ;;  %v4987_v43 = vld [vmem:[%s5372_s19 + $0x130] sm:$0xff]  ;;  %v4986_v47 = vld [vmem:[%s5372_s19 + $0x128] sm:$0xff]  ;;  %v242_v51 = vld [vmem:[%s5396_s23 + $0x18] sm:$0xff] }
  0x1e   : > { %3012 = vmatpush.bf16.msra.mxu2 %v4969_v13  ;;  %v5003_v44 = vld [vmem:[%s5372_s19 + $0x1b0] sm:$0xff]  ;;  %v5002_v48 = vld [vmem:[%s5372_s19 + $0x1a8] sm:$0xff]  ;;  %v4985_v56 = vld [vmem:[%s5372_s19 + $0x120] sm:$0xff] }
  0x1f   : > { %2999 = vmatpush.bf16.msra.mxu1 %v4961_v14  ;;  %v4995_v45 = vld [vmem:[%s5372_s19 + $0x170] sm:$0xff]  ;;  %v4994_v49 = vld [vmem:[%s5372_s19 + $0x168] sm:$0xff]  ;;  %v5001_v57 = vld [vmem:[%s5372_s19 + $0x1a0] sm:$0xff] }
  0x20   : > { %3025 = vmatpush.bf16.msra.mxu3 %v4977_v15  ;;  %v917_v32 = vld.sshfl [vmem:[#allocation1 + $0x10] sm:$0xff pattern:$0x73625140]  ;;  %v915_v33 = vld.sshfl [vmem:[#allocation1] sm:$0xff pattern:$0x73625140] }
  0x21   : > { %2987 = vmatpush.bf16.msra.mxu0 %v4952_v16  ;;  %v918_v34 = vld.sshfl [vmem:[#allocation1 + $0x18] sm:$0xff pattern:$0x73625140]  ;;  %v916_v35 = vld.sshfl [vmem:[#allocation1 + $0x8] sm:$0xff pattern:$0x73625140] }
  0x22   : > { %3013 = vmatpush.bf16.msra.mxu2 %v4968_v17  ;;  %924 = vst [vmem:[#allocation1] ss:$4 sm:$0xff] %v241_v31  ;;  %v5011_v46 = vld [vmem:[%s5372_s19 + $0x1f0] sm:$0xff]  ;;  %v5010_v50 = vld [vmem:[%s5372_s19 + $0x1e8] sm:$0xff]  ;;  %v4993_v58 = vld [vmem:[%s5372_s19 + $0x160] sm:$0xff] }
  0x23   : > { %3000 = vmatpush.bf16.msra.mxu1 %v4960_v18  ;;  %v5009_v59 = vld [vmem:[%s5372_s19 + $0x1e0] sm:$0xff]  ;;  %v4984_v60 = vld [vmem:[%s5372_s19 + $0x118] sm:$0xff]  ;;  %v4983_v0 = vld [vmem:[%s5372_s19 + $0x110] sm:$0xff] }
  0x24   : > { %3026 = vmatpush.bf16.msra.mxu3 %v4976_v19  ;;  %v5428_v52 = vld.sshfl [vmem:[#allocation1 + $0x30] sm:$0xff pattern:$0x73625140]  ;;  %v5430_v53 = vld.sshfl [vmem:[#allocation1 + $0x20] sm:$0xff pattern:$0x73625140] }
  0x25   : > { %2988 = vmatpush.bf16.msra.mxu0 %v4951_v21  ;;  %v5432_v54 = vld.sshfl [vmem:[#allocation1 + $0x38] sm:$0xff pattern:$0x73625140]  ;;  %v5434_v55 = vld.sshfl [vmem:[#allocation1 + $0x28] sm:$0xff pattern:$0x73625140] }
  0x26   : > { %3014 = vmatpush.bf16.msra.mxu2 %v4967_v22  ;;  %926 = vst [vmem:[#allocation1 + $0x20] ss:$4 sm:$0xff] %v242_v51  ;;  %v5000_v61 = vld [vmem:[%s5372_s19 + $0x198] sm:$0xff]  ;;  %v4999_v1 = vld [vmem:[%s5372_s19 + $0x190] sm:$0xff]  ;;  %v4982_v4 = vld [vmem:[%s5372_s19 + $0x108] sm:$0xff] }
  0x27   : > { %3001 = vmatpush.bf16.msra.mxu1 %v4959_v23  ;;  %v4992_v62 = vld [vmem:[%s5372_s19 + $0x158] sm:$0xff]  ;;  %v4991_v2 = vld [vmem:[%s5372_s19 + $0x150] sm:$0xff]  ;;  %v4998_v5 = vld [vmem:[%s5372_s19 + $0x188] sm:$0xff] }
  0x28   : > { %3027 = vmatpush.bf16.msra.mxu3 %v4975_v24  ;;  %v5008_v63 = vld [vmem:[%s5372_s19 + $0x1d8] sm:$0xff]  ;;  %v5007_v3 = vld [vmem:[%s5372_s19 + $0x1d0] sm:$0xff]  ;;  %v4990_v6 = vld [vmem:[%s5372_s19 + $0x148] sm:$0xff] }
  0x29   : > { %2989 = vmatpush.bf16.msra.mxu0 %v4950_v25  ;;  %v5006_v7 = vld [vmem:[%s5372_s19 + $0x1c8] sm:$0xff]  ;;  %v4981_v8 = vld [vmem:[%s5372_s19 + $0x100] sm:$0xff]  ;;  %v5020_v10 = vld [vmem:[%s5372_s19 + $0x238] sm:$0xff] }
  0x2a   : > { %3015 = vmatpush.bf16.msra.mxu2 %v4966_v26  ;;  %v4997_v9 = vld [vmem:[%s5372_s19 + $0x180] sm:$0xff]  ;;  %v5036_v11 = vld [vmem:[%s5372_s19 + $0x2b8] sm:$0xff]  ;;  %v5019_v16 = vld [vmem:[%s5372_s19 + $0x230] sm:$0xff] }
  0x2b   : > { %3002 = vmatpush.bf16.msra.mxu1 %v4958_v27  ;;  %v4989_v12 = vld [vmem:[%s5372_s19 + $0x140] sm:$0xff]  ;;  %v5028_v14 = vld [vmem:[%s5372_s19 + $0x278] sm:$0xff]  ;;  %v5035_v17 = vld [vmem:[%s5372_s19 + $0x2b0] sm:$0xff] }
  0x2c   : > { %3028 = vmatpush.bf16.msra.mxu3 %v4974_v28  ;;  %v5005_v13 = vld [vmem:[%s5372_s19 + $0x1c0] sm:$0xff]  ;;  %v5044_v15 = vld [vmem:[%s5372_s19 + $0x2f8] sm:$0xff]  ;;  %v5468_v19 = vld.sshfl [vmem:[#allocation1 + $0x10] sm:$0xff pattern:$0x73625140] }
  0x2d   : > { %2990 = vmatpush.bf16.msra.mxu0 %v4949_v29  ;;  %v5466_v18 = vld.sshfl [vmem:[#allocation1] sm:$0xff pattern:$0x73625140]  ;;  %v5470_v20 = vld.sshfl [vmem:[#allocation1 + $0x8] sm:$0xff pattern:$0x73625140] }
  0x2e   : > { %3016 = vmatpush.bf16.msra.mxu2 %v4965_v30  ;;  %v243_v21 = vld [vmem:[%s5396_s23 + $0x20] sm:$0xff]  ;;  %v5473_v22 = vld.sshfl [vmem:[#allocation1 + $0x18] sm:$0xff pattern:$0x73625140]  ;;  %v5027_v23 = vld [vmem:[%s5372_s19 + $0x270] sm:$0xff] }
  0x2f   : > { %3003 = vmatpush.bf16.msra.mxu1 %v4957_v38  ;;  %v5043_v24 = vld [vmem:[%s5372_s19 + $0x2f0] sm:$0xff]  ;;  %936 = vst [vmem:[#allocation1] ss:$4 sm:$0xff] %v243_v21  ;;  %v5018_v25 = vld [vmem:[%s5372_s19 + $0x228] sm:$0xff]  ;;  %v5017_v29 = vld [vmem:[%s5372_s19 + $0x220] sm:$0xff] }
  0x30   : > { %3029 = vmatpush.bf16.msra.mxu3 %v4973_v39  ;;  %2991 = vmatmul.bf16.vlgmr.msra.gmra.mxu0 %v915_v33  ;;  %v5034_v26 = vld [vmem:[%s5372_s19 + $0x2a8] sm:$0xff]  ;;  %v5033_v30 = vld [vmem:[%s5372_s19 + $0x2a0] sm:$0xff]  ;;  %v5016_v33 = vld [vmem:[%s5372_s19 + $0x218] sm:$0xff] }
  0x31   : > { %3035 = vmatpush.bf16.msrb.mxu0 %v4988_v36  ;;  %3017 = vmatmul.bf16.vlgmr.msra.gmra.mxu2 %v917_v32  ;;  %v5026_v27 = vld [vmem:[%s5372_s19 + $0x268] sm:$0xff]  ;;  %v5025_v31 = vld [vmem:[%s5372_s19 + $0x260] sm:$0xff]  ;;  %v5040_v36 = vld [vmem:[%s5372_s19 + $0x2d8] sm:$0xff] }
  0x32   : > { %3061 = vmatpush.bf16.msrb.mxu2 %v5004_v37  ;;  %3004 = vmatmul.bf16.vlgmr.msra.gmra.mxu1 %v916_v35  ;;  %v5042_v28 = vld [vmem:[%s5372_s19 + $0x2e8] sm:$0xff]  ;;  %v5041_v32 = vld [vmem:[%s5372_s19 + $0x2e0] sm:$0xff]  ;;  %v5024_v35 = vld [vmem:[%s5372_s19 + $0x258] sm:$0xff] }
  0x33   : > { %3048 = vmatpush.bf16.msrb.mxu1 %v4996_v40  ;;  %3030 = vmatmul.bf16.vlgmr.msra.gmra.mxu3 %v918_v34  ;;  %v5032_v34 = vld [vmem:[%s5372_s19 + $0x298] sm:$0xff]  ;;  %v5015_v37 = vld [vmem:[%s5372_s19 + $0x210] sm:$0xff]  ;;  %v5030_v42 = vld [vmem:[%s5372_s19 + $0x288] sm:$0xff] }
  0x34   : > { %3074 = vmatpush.bf16.msrb.mxu3 %v5012_v41  ;;  %v5031_v38 = vld [vmem:[%s5372_s19 + $0x290] sm:$0xff]  ;;  %v5014_v41 = vld [vmem:[%s5372_s19 + $0x208] sm:$0xff]  ;;  %v5060_v51 = vld [vmem:[%s5372_s19 + $0x378] sm:$0xff] }
  0x35   : > { %3036 = vmatpush.bf16.msrb.mxu0 %v4987_v43  ;;  %v5023_v39 = vld [vmem:[%s5372_s19 + $0x250] sm:$0xff]  ;;  %v5022_v43 = vld [vmem:[%s5372_s19 + $0x248] sm:$0xff]  ;;  %v5100_v21 = vld [vmem:[%s5372_s19 + $0x4b8] sm:$0xff] }
  0x36   : > { %3062 = vmatpush.bf16.msrb.mxu2 %v5003_v44  ;;  %v5039_v40 = vld [vmem:[%s5372_s19 + $0x2d0] sm:$0xff]  ;;  %v5038_v44 = vld [vmem:[%s5372_s19 + $0x2c8] sm:$0xff] }
  0x37   : > { %3049 = vmatpush.bf16.msrb.mxu1 %v4995_v45  ;;  %v5013_v45 = vld [vmem:[%s5372_s19 + $0x200] sm:$0xff] }
  0x38   : > { %3075 = vmatpush.bf16.msrb.mxu3 %v5011_v46  ;;  %v5029_v46 = vld [vmem:[%s5372_s19 + $0x280] sm:$0xff] }
  0x39   : > { %3037 = vmatpush.bf16.msrb.mxu0 %v4986_v47  ;;  %v5052_v47 = vld [vmem:[%s5372_s19 + $0x338] sm:$0xff] }
  0x3a   : > { %3063 = vmatpush.bf16.msrb.mxu2 %v5002_v48  ;;  %v5068_v48 = vld [vmem:[%s5372_s19 + $0x3b8] sm:$0xff] }
  0x3b   : > { %3050 = vmatpush.bf16.msrb.mxu1 %v4994_v49  ;;  %v5021_v49 = vld [vmem:[%s5372_s19 + $0x240] sm:$0xff] }
  0x3c   : > { %3076 = vmatpush.bf16.msrb.mxu3 %v5010_v50  ;;  %v5037_v50 = vld [vmem:[%s5372_s19 + $0x2c0] sm:$0xff] }
  0x3d   : > { %3038 = vmatpush.bf16.msrb.mxu0 %v4985_v56  ;;  %v5513_v56 = vld.sshfl [vmem:[#allocation1 + $0x30] sm:$0xff pattern:$0x73625140] }
  0x3e   : > { %3064 = vmatpush.bf16.msrb.mxu2 %v5001_v57  ;;  %v5515_v57 = vld.sshfl [vmem:[#allocation1 + $0x28] sm:$0xff pattern:$0x73625140] }
  0x3f   : > { %3051 = vmatpush.bf16.msrb.mxu1 %v4993_v58  ;;  %v244_v58 = vld [vmem:[%s5396_s23 + $0x28] sm:$0xff] }
  0x40   : > { %3077 = vmatpush.bf16.msrb.mxu3 %v5009_v59  ;;  %v5520_v59 = vld.sshfl [vmem:[#allocation1 + $0x38] sm:$0xff pattern:$0x73625140] }
  0x41   : > { %3039 = vmatpush.bf16.msrb.mxu0 %v4984_v60  ;;  %v5059_v60 = vld [vmem:[%s5372_s19 + $0x370] sm:$0xff] }
  0x42   : > { %3065 = vmatpush.bf16.msrb.mxu2 %v5000_v61  ;;  %v5075_v61 = vld [vmem:[%s5372_s19 + $0x3f0] sm:$0xff] }
  0x43   : > { %3052 = vmatpush.bf16.msrb.mxu1 %v4992_v62  ;;  %v5050_v62 = vld [vmem:[%s5372_s19 + $0x328] sm:$0xff] }
  0x44   : > { %3078 = vmatpush.bf16.msrb.mxu3 %v5008_v63  ;;  %v5066_v63 = vld [vmem:[%s5372_s19 + $0x3a8] sm:$0xff] }
  0x45   : > { %3040 = vmatpush.bf16.msrb.mxu0 %v4983_v0  ;;  %v5058_v0 = vld [vmem:[%s5372_s19 + $0x368] sm:$0xff] }
  0x46   : > { %3066 = vmatpush.bf16.msrb.mxu2 %v4999_v1  ;;  %v5074_v1 = vld [vmem:[%s5372_s19 + $0x3e8] sm:$0xff] }
  0x47   : > { %3053 = vmatpush.bf16.msrb.mxu1 %v4991_v2  ;;  %v5049_v2 = vld [vmem:[%s5372_s19 + $0x320] sm:$0xff] }
  0x48   : > { %3079 = vmatpush.bf16.msrb.mxu3 %v5007_v3  ;;  %v5065_v3 = vld [vmem:[%s5372_s19 + $0x3a0] sm:$0xff] }
  0x49   : > { %3041 = vmatpush.bf16.msrb.mxu0 %v4982_v4  ;;  %v5057_v4 = vld [vmem:[%s5372_s19 + $0x360] sm:$0xff] }
  0x4a   : > { %3067 = vmatpush.bf16.msrb.mxu2 %v4998_v5  ;;  %v5073_v5 = vld [vmem:[%s5372_s19 + $0x3e0] sm:$0xff] }
  0x4b   : > { %3054 = vmatpush.bf16.msrb.mxu1 %v4990_v6  ;;  %v5048_v6 = vld [vmem:[%s5372_s19 + $0x318] sm:$0xff] }
  0x4c   : > { %3080 = vmatpush.bf16.msrb.mxu3 %v5006_v7  ;;  %v5064_v7 = vld [vmem:[%s5372_s19 + $0x398] sm:$0xff] }
  0x4d   : > { %3042 = vmatpush.bf16.msrb.mxu0 %v4981_v8  ;;  %v5056_v8 = vld [vmem:[%s5372_s19 + $0x358] sm:$0xff] }
  0x4e   : > { %3068 = vmatpush.bf16.msrb.mxu2 %v4997_v9  ;;  %v5072_v9 = vld [vmem:[%s5372_s19 + $0x3d8] sm:$0xff] }
  0x4f   : > { %3055 = vmatpush.bf16.msrb.mxu1 %v4989_v12  ;;  %v5055_v12 = vld [vmem:[%s5372_s19 + $0x350] sm:$0xff] }
  0x50   : > { %3081 = vmatpush.bf16.msrb.mxu3 %v5005_v13  ;;  %3043 = vmatmul.bf16.vlgmr.msrb.gmra.mxu0 %v5430_v53  ;;  %v5051_v53 = vld [vmem:[%s5372_s19 + $0x330] sm:$0xff] }
  0x51   : > { %3087 = vmatpush.bf16.msra.mxu0 %v5020_v10  ;;  %3069 = vmatmul.bf16.vlgmr.msrb.gmra.mxu2 %v5428_v52  ;;  %v5076_v52 = vld [vmem:[%s5372_s19 + $0x3f8] sm:$0xff]  ;;  %v5047_v10 = vld [vmem:[%s5372_s19 + $0x310] sm:$0xff] }
  0x52   : > { %3113 = vmatpush.bf16.msra.mxu2 %v5036_v11  ;;  %3056 = vmatmul.bf16.vlgmr.msrb.gmra.mxu1 %v5434_v55  ;;  %v5511_v55 = vld.sshfl [vmem:[#allocation1 + $0x20] sm:$0xff pattern:$0x73625140]  ;;  %v5063_v11 = vld [vmem:[%s5372_s19 + $0x390] sm:$0xff] }
  0x53   : > { %3100 = vmatpush.bf16.msra.mxu1 %v5028_v14  ;;  %3082 = vmatmul.bf16.vlgmr.msrb.gmra.mxu3 %v5432_v54  ;;  %v5067_v54 = vld [vmem:[%s5372_s19 + $0x3b0] sm:$0xff]  ;;  %938 = vst [vmem:[#allocation1 + $0x20] ss:$4 sm:$0xff] %v244_v58  ;;  %v5046_v14 = vld [vmem:[%s5372_s19 + $0x308] sm:$0xff]  ;;  %v5124_v58 = vld [vmem:[%s5372_s19 + $0x578] sm:$0xff] }
  0x54   : > { %3126 = vmatpush.bf16.msra.mxu3 %v5044_v15  ;;  %v5071_v13 = vld [vmem:[%s5372_s19 + $0x3d0] sm:$0xff]  ;;  %v5062_v15 = vld [vmem:[%s5372_s19 + $0x388] sm:$0xff] }
  0x55   : > { %3088 = vmatpush.bf16.msra.mxu0 %v5019_v16  ;;  %v5054_v16 = vld [vmem:[%s5372_s19 + $0x348] sm:$0xff] }
  0x56   : > { %3114 = vmatpush.bf16.msra.mxu2 %v5035_v17  ;;  %v5070_v17 = vld [vmem:[%s5372_s19 + $0x3c8] sm:$0xff] }
  0x57   : > { %3101 = vmatpush.bf16.msra.mxu1 %v5027_v23  ;;  %v5069_v23 = vld [vmem:[%s5372_s19 + $0x3c0] sm:$0xff] }
  0x58   : > { %3127 = vmatpush.bf16.msra.mxu3 %v5043_v24  ;;  %v5092_v24 = vld [vmem:[%s5372_s19 + $0x478] sm:$0xff] }
  0x59   : > { %3089 = vmatpush.bf16.msra.mxu0 %v5018_v25  ;;  %v5108_v25 = vld [vmem:[%s5372_s19 + $0x4f8] sm:$0xff] }
  0x5a   : > { %3115 = vmatpush.bf16.msra.mxu2 %v5034_v26  ;;  %v5083_v26 = vld [vmem:[%s5372_s19 + $0x430] sm:$0xff] }
  0x5b   : > { %3102 = vmatpush.bf16.msra.mxu1 %v5026_v27  ;;  %v5099_v27 = vld [vmem:[%s5372_s19 + $0x4b0] sm:$0xff] }
  0x5c   : > { %3128 = vmatpush.bf16.msra.mxu3 %v5042_v28  ;;  %v5091_v28 = vld [vmem:[%s5372_s19 + $0x470] sm:$0xff] }
  0x5d   : > { %3090 = vmatpush.bf16.msra.mxu0 %v5017_v29  ;;  %v5107_v29 = vld [vmem:[%s5372_s19 + $0x4f0] sm:$0xff] }
  0x5e   : > { %3116 = vmatpush.bf16.msra.mxu2 %v5033_v30  ;;  %v5082_v30 = vld [vmem:[%s5372_s19 + $0x428] sm:$0xff] }
  0x5f   : > { %3103 = vmatpush.bf16.msra.mxu1 %v5025_v31  ;;  %v5098_v31 = vld [vmem:[%s5372_s19 + $0x4a8] sm:$0xff] }
  0x60   : > { %3129 = vmatpush.bf16.msra.mxu3 %v5041_v32  ;;  %v5090_v32 = vld [vmem:[%s5372_s19 + $0x468] sm:$0xff] }
  0x61   : > { %3091 = vmatpush.bf16.msra.mxu0 %v5016_v33  ;;  %v5106_v33 = vld [vmem:[%s5372_s19 + $0x4e8] sm:$0xff] }
  0x62   : > { %3117 = vmatpush.bf16.msra.mxu2 %v5032_v34  ;;  %v5081_v34 = vld [vmem:[%s5372_s19 + $0x420] sm:$0xff] }
  0x63   : > { %3104 = vmatpush.bf16.msra.mxu1 %v5024_v35  ;;  %v5097_v35 = vld [vmem:[%s5372_s19 + $0x4a0] sm:$0xff] }
  0x64   : > { %3130 = vmatpush.bf16.msra.mxu3 %v5040_v36  ;;  %v5089_v36 = vld [vmem:[%s5372_s19 + $0x460] sm:$0xff] }
  0x65   : > { %3092 = vmatpush.bf16.msra.mxu0 %v5015_v37  ;;  %v5105_v37 = vld [vmem:[%s5372_s19 + $0x4e0] sm:$0xff] }
  0x66   : > { %3118 = vmatpush.bf16.msra.mxu2 %v5031_v38  ;;  %v5080_v38 = vld [vmem:[%s5372_s19 + $0x418] sm:$0xff] }
  0x67   : > { %3105 = vmatpush.bf16.msra.mxu1 %v5023_v39  ;;  %v5096_v39 = vld [vmem:[%s5372_s19 + $0x498] sm:$0xff] }
  0x68   : > { %3131 = vmatpush.bf16.msra.mxu3 %v5039_v40  ;;  %v5088_v40 = vld [vmem:[%s5372_s19 + $0x458] sm:$0xff] }
  0x69   : > { %3093 = vmatpush.bf16.msra.mxu0 %v5014_v41  ;;  %v5104_v41 = vld [vmem:[%s5372_s19 + $0x4d8] sm:$0xff] }
  0x6a   : > { %3119 = vmatpush.bf16.msra.mxu2 %v5030_v42  ;;  %v5079_v42 = vld [vmem:[%s5372_s19 + $0x410] sm:$0xff] }
  0x6b   : > { %3106 = vmatpush.bf16.msra.mxu1 %v5022_v43  ;;  %v5095_v43 = vld [vmem:[%s5372_s19 + $0x490] sm:$0xff] }
  0x6c   : > { %3132 = vmatpush.bf16.msra.mxu3 %v5038_v44  ;;  %v5087_v44 = vld [vmem:[%s5372_s19 + $0x450] sm:$0xff] }
  0x6d   : > { %3094 = vmatpush.bf16.msra.mxu0 %v5013_v45  ;;  %v5103_v45 = vld [vmem:[%s5372_s19 + $0x4d0] sm:$0xff] }
  0x6e   : > { %3120 = vmatpush.bf16.msra.mxu2 %v5029_v46  ;;  %v5078_v46 = vld [vmem:[%s5372_s19 + $0x408] sm:$0xff] }
  0x6f   : > { %3107 = vmatpush.bf16.msra.mxu1 %v5021_v49  ;;  %v5102_v49 = vld [vmem:[%s5372_s19 + $0x4c8] sm:$0xff] }
  0x70   : > { %3133 = vmatpush.bf16.msra.mxu3 %v5037_v50  ;;  %3095 = vmatmul.bf16.vlgmr.msra.gmra.mxu0 %v5466_v18  ;;  %v5045_v18 = vld [vmem:[%s5372_s19 + $0x300] sm:$0xff] }
  0x71   : > { %3139 = vmatpush.bf16.msrb.mxu0 %v5052_v47  ;;  %3121 = vmatmul.bf16.vlgmr.msra.gmra.mxu2 %v5468_v19  ;;  %v5061_v19 = vld [vmem:[%s5372_s19 + $0x380] sm:$0xff]  ;;  %v5094_v47 = vld [vmem:[%s5372_s19 + $0x488] sm:$0xff] }
  0x72   : > { %3165 = vmatpush.bf16.msrb.mxu2 %v5068_v48  ;;  %3108 = vmatmul.bf16.vlgmr.msra.gmra.mxu1 %v5470_v20  ;;  %v5084_v20 = vld [vmem:[%s5372_s19 + $0x438] sm:$0xff]  ;;  %v5086_v48 = vld [vmem:[%s5372_s19 + $0x448] sm:$0xff]  ;;  %v5077_v50 = vld [vmem:[%s5372_s19 + $0x400] sm:$0xff] }
  0x73   : > { %3152 = vmatpush.bf16.msrb.mxu1 %v5060_v51  ;;  %3134 = vmatmul.bf16.vlgmr.msra.gmra.mxu3 %v5473_v22  ;;  %v5053_v22 = vld [vmem:[%s5372_s19 + $0x340] sm:$0xff] }
  0x74   : > { %3178 = vmatpush.bf16.msrb.mxu3 %v5076_v52  ;;  %v5093_v51 = vld [vmem:[%s5372_s19 + $0x480] sm:$0xff]  ;;  %v5116_v52 = vld [vmem:[%s5372_s19 + $0x538] sm:$0xff] }
  0x75   : > { %3140 = vmatpush.bf16.msrb.mxu0 %v5051_v53  ;;  %v5132_v53 = vld [vmem:[%s5372_s19 + $0x5b8] sm:$0xff] }
  0x76   : > { %3166 = vmatpush.bf16.msrb.mxu2 %v5067_v54  ;;  %v5085_v54 = vld [vmem:[%s5372_s19 + $0x440] sm:$0xff] }
  0x77   : > { %3153 = vmatpush.bf16.msrb.mxu1 %v5059_v60  ;;  %v940_v60 = vld.sshfl [vmem:[#allocation1 + $0x8] sm:$0xff pattern:$0x73625140] }
  0x78   : > { %3179 = vmatpush.bf16.msrb.mxu3 %v5075_v61  ;;  %v942_v61 = vld.sshfl [vmem:[#allocation1 + $0x18] sm:$0xff pattern:$0x73625140] }
  0x79   : > { %3141 = vmatpush.bf16.msrb.mxu0 %v5050_v62  ;;  %v5115_v62 = vld [vmem:[%s5372_s19 + $0x530] sm:$0xff] }
  0x7a   : > { %3167 = vmatpush.bf16.msrb.mxu2 %v5066_v63  ;;  %v5131_v63 = vld [vmem:[%s5372_s19 + $0x5b0] sm:$0xff] }
  0x7b   : > { %3154 = vmatpush.bf16.msrb.mxu1 %v5058_v0  ;;  %v5123_v0 = vld [vmem:[%s5372_s19 + $0x570] sm:$0xff] }
  0x7c   : > { %3180 = vmatpush.bf16.msrb.mxu3 %v5074_v1  ;;  %v5139_v1 = vld [vmem:[%s5372_s19 + $0x5f0] sm:$0xff] }
  0x7d   : > { %3142 = vmatpush.bf16.msrb.mxu0 %v5049_v2  ;;  %v5114_v2 = vld [vmem:[%s5372_s19 + $0x528] sm:$0xff] }
  0x7e   : > { %3168 = vmatpush.bf16.msrb.mxu2 %v5065_v3  ;;  %v5130_v3 = vld [vmem:[%s5372_s19 + $0x5a8] sm:$0xff] }
  0x7f   : > { %3155 = vmatpush.bf16.msrb.mxu1 %v5057_v4  ;;  %v5122_v4 = vld [vmem:[%s5372_s19 + $0x568] sm:$0xff] }
  0x80   : > { %3181 = vmatpush.bf16.msrb.mxu3 %v5073_v5  ;;  %v5138_v5 = vld [vmem:[%s5372_s19 + $0x5e8] sm:$0xff] }
  0x81   : > { %3143 = vmatpush.bf16.msrb.mxu0 %v5048_v6  ;;  %v5303_v6 = vld [vmem:[%s230_s26] ss:$0 sm:$0xff] }
  0x82   : > { %3169 = vmatpush.bf16.msrb.mxu2 %v5064_v7  ;;  %v5113_v7 = vld [vmem:[%s5372_s19 + $0x520] sm:$0xff] }
  0x83   : > { %3156 = vmatpush.bf16.msrb.mxu1 %v5056_v8  ;;  %v5129_v8 = vld [vmem:[%s5372_s19 + $0x5a0] sm:$0xff] }
  0x84   : > { %3182 = vmatpush.bf16.msrb.mxu3 %v5072_v9 }
  0x85   : > { %3144 = vmatpush.bf16.msrb.mxu0 %v5047_v10  ;;  %v5121_v10 = vld [vmem:[%s5372_s19 + $0x560] sm:$0xff] }
  0x86   : > { %3170 = vmatpush.bf16.msrb.mxu2 %v5063_v11  ;;  %v5137_v11 = vld [vmem:[%s5372_s19 + $0x5e0] sm:$0xff] }
  0x87   : > { %3157 = vmatpush.bf16.msrb.mxu1 %v5055_v12 }
  0x88   : > { %3183 = vmatpush.bf16.msrb.mxu3 %v5071_v13 }
  0x89   : > { %3145 = vmatpush.bf16.msrb.mxu0 %v5046_v14  ;;  %v5112_v14 = vld [vmem:[%s5372_s19 + $0x518] sm:$0xff] }
  0x8a   : > { %3171 = vmatpush.bf16.msrb.mxu2 %v5062_v15  ;;  %v5128_v15 = vld [vmem:[%s5372_s19 + $0x598] sm:$0xff] }
  0x8b   : > { %3158 = vmatpush.bf16.msrb.mxu1 %v5054_v16 }
  0x8c   : > { %3184 = vmatpush.bf16.msrb.mxu3 %v5070_v17  ;;  %v5120_v17 = vld [vmem:[%s5372_s19 + $0x558] sm:$0xff] }
  0x8d   : > { %3146 = vmatpush.bf16.msrb.mxu0 %v5045_v18  ;;  %v5136_v18 = vld [vmem:[%s5372_s19 + $0x5d8] sm:$0xff] }
  0x8e   : > { %3172 = vmatpush.bf16.msrb.mxu2 %v5061_v19 }
  0x8f   : > { %3159 = vmatpush.bf16.msrb.mxu1 %v5053_v22 }
  0x90   : > { %3185 = vmatpush.bf16.msrb.mxu3 %v5069_v23  ;;  %3147 = vmatmul.bf16.vlgmr.msrb.gmra.mxu0 %v5511_v55  ;;  %v5101_v55 = vld [vmem:[%s5372_s19 + $0x4c0] sm:$0xff] }
  0x91   : > { %3191 = vmatpush.bf16.msra.mxu0 %v5084_v20  ;;  %3173 = vmatmul.bf16.vlgmr.msrb.gmra.mxu2 %v5513_v56  ;;  %v939_v56 = vld.sshfl [vmem:[#allocation1] sm:$0xff pattern:$0x73625140]  ;;  %v5111_v20 = vld [vmem:[%s5372_s19 + $0x510] sm:$0xff] }
  0x92   : > { %3217 = vmatpush.bf16.msra.mxu2 %v5100_v21  ;;  %3160 = vmatmul.bf16.vlgmr.msrb.gmra.mxu1 %v5515_v57  ;;  %v941_v57 = vld.sshfl [vmem:[#allocation1 + $0x10] sm:$0xff pattern:$0x73625140] }
  0x93   : > { %3204 = vmatpush.bf16.msra.mxu1 %v5092_v24  ;;  %3186 = vmatmul.bf16.vlgmr.msrb.gmra.mxu3 %v5520_v59  ;;  %v5140_v59 = vld [vmem:[%s5372_s19 + $0x5f8] sm:$0xff]  ;;  %v5127_v21 = vld [vmem:[%s5372_s19 + $0x590] sm:$0xff] }
  0x94   : > { %3230 = vmatpush.bf16.msra.mxu3 %v5108_v25  ;;  %v5119_v25 = vld [vmem:[%s5372_s19 + $0x550] sm:$0xff] }
  0x95   : > { %3192 = vmatpush.bf16.msra.mxu0 %v5083_v26  ;;  %v5135_v26 = vld [vmem:[%s5372_s19 + $0x5d0] sm:$0xff] }
  0x96   : > { %3218 = vmatpush.bf16.msra.mxu2 %v5099_v27 }
  0x97   : > { %3205 = vmatpush.bf16.msra.mxu1 %v5091_v28 }
  0x98   : > { %3231 = vmatpush.bf16.msra.mxu3 %v5107_v29  ;;  %v5110_v29 = vld [vmem:[%s5372_s19 + $0x508] sm:$0xff] }
  0x99   : > { %3193 = vmatpush.bf16.msra.mxu0 %v5082_v30  ;;  %v5126_v30 = vld [vmem:[%s5372_s19 + $0x588] sm:$0xff] }
  0x9a   : > { %3219 = vmatpush.bf16.msra.mxu2 %v5098_v31  ;;  %v245_v31 = vld [vmem:[%s5396_s23 + $0x30] sm:$0xff] }
  0x9b   : > { %3206 = vmatpush.bf16.msra.mxu1 %v5090_v32  ;;  %948 = vst [vmem:[#allocation1] ss:$4 sm:$0xff] %v245_v31  ;;  %v5118_v32 = vld [vmem:[%s5372_s19 + $0x548] sm:$0xff]  ;;  %v5165_v31 = vld [vmem:[%s5372_s19 + $0x6c0] sm:$0xff] }
  0x9c   : > { %3232 = vmatpush.bf16.msra.mxu3 %v5106_v33  ;;  %v5134_v33 = vld [vmem:[%s5372_s19 + $0x5c8] sm:$0xff] }
  0x9d   : > { %3194 = vmatpush.bf16.msra.mxu0 %v5081_v34 }
  0x9e   : > { %3220 = vmatpush.bf16.msra.mxu2 %v5097_v35  ;;  %v5109_v35 = vld [vmem:[%s5372_s19 + $0x500] sm:$0xff] }
  0x9f   : > { %3207 = vmatpush.bf16.msra.mxu1 %v5089_v36  ;;  %v5125_v36 = vld [vmem:[%s5372_s19 + $0x580] sm:$0xff] }
  0xa0   : > { %3233 = vmatpush.bf16.msra.mxu3 %v5105_v37  ;;  %v5148_v37 = vld [vmem:[%s5372_s19 + $0x638] sm:$0xff] }
  0xa1   : > { %3195 = vmatpush.bf16.msra.mxu0 %v5080_v38  ;;  %v5164_v38 = vld [vmem:[%s5372_s19 + $0x6b8] sm:$0xff] }
  0xa2   : > { %3221 = vmatpush.bf16.msra.mxu2 %v5096_v39 }
  0xa3   : > { %3208 = vmatpush.bf16.msra.mxu1 %v5088_v40  ;;  %v5117_v40 = vld [vmem:[%s5372_s19 + $0x540] sm:$0xff] }
  0xa4   : > { %3234 = vmatpush.bf16.msra.mxu3 %v5104_v41  ;;  %v5133_v41 = vld [vmem:[%s5372_s19 + $0x5c0] sm:$0xff] }
  0xa5   : > { %3196 = vmatpush.bf16.msra.mxu0 %v5079_v42  ;;  %v247_v42 = vld [vmem:[%s5396_s23 + $0x40] sm:$0xff] }
  0xa6   : > { %3222 = vmatpush.bf16.msra.mxu2 %v5095_v43  ;;  %v943_v43 = vld.sshfl [vmem:[#allocation1 + $0x20] sm:$0xff pattern:$0x73625140] }
  0xa7   : > { %3209 = vmatpush.bf16.msra.mxu1 %v5087_v44  ;;  %v945_v44 = vld.sshfl [vmem:[#allocation1 + $0x30] sm:$0xff pattern:$0x73625140] }
  0xa8   : > { %3235 = vmatpush.bf16.msra.mxu3 %v5103_v45  ;;  %v5156_v45 = vld [vmem:[%s5372_s19 + $0x678] sm:$0xff] }
  0xa9   : > { %3197 = vmatpush.bf16.msra.mxu0 %v5078_v46  ;;  %v5172_v46 = vld [vmem:[%s5372_s19 + $0x6f8] sm:$0xff] }
  0xaa   : > { %3223 = vmatpush.bf16.msra.mxu2 %v5094_v47  ;;  %v944_v47 = vld.sshfl [vmem:[#allocation1 + $0x28] sm:$0xff pattern:$0x73625140] }
  0xab   : > { %3210 = vmatpush.bf16.msra.mxu1 %v5086_v48  ;;  %v946_v48 = vld.sshfl [vmem:[#allocation1 + $0x38] sm:$0xff pattern:$0x73625140] }
  0xac   : > { %3236 = vmatpush.bf16.msra.mxu3 %v5102_v49  ;;  %v5147_v49 = vld [vmem:[%s5372_s19 + $0x630] sm:$0xff] }
  0xad   : > { %3198 = vmatpush.bf16.msra.mxu0 %v5077_v50  ;;  %v2992_v9 = vpop.f32.mrf.mxu0  ;;  %v5163_v50 = vld [vmem:[%s5372_s19 + $0x6b0] sm:$0xff] }
  0xae   : > { %3224 = vmatpush.bf16.msra.mxu2 %v5093_v51  ;;  %v2993_v12 = vadd.f32 %v5303_v6, %v2992_v9  ;;  %v5633_v51 = vld.sshfl [vmem:[#allocation1] sm:$0xff pattern:$0x73625140]  ;;  %v5160_v6 = vld [vmem:[%s5372_s19 + $0x698] sm:$0xff] }
  0xaf   : > { %3211 = vmatpush.bf16.msra.mxu1 %v5085_v54  ;;  %v3005_v13 = vpop.f32.mrf.mxu1  ;;  %v5639_v54 = vld.sshfl [vmem:[#allocation1 + $0x18] sm:$0xff pattern:$0x73625140] }
  0xb0   : > { %3237 = vmatpush.bf16.msra.mxu3 %v5101_v55  ;;  %3199 = vmatmul.bf16.vlgmr.msra.gmra.mxu0 %v939_v56  ;;  %v3006_v16 = vadd.f32 %v3005_v13, %v2993_v12  ;;  %v5155_v55 = vld [vmem:[%s5372_s19 + $0x670] sm:$0xff] }
  0xb1   : > { %3243 = vmatpush.bf16.msrb.mxu0 %v5116_v52  ;;  %3225 = vmatmul.bf16.vlgmr.msra.gmra.mxu2 %v941_v57  ;;  %v5635_v52 = vld.sshfl [vmem:[#allocation1 + $0x10] sm:$0xff pattern:$0x73625140]  ;;  %v5146_v57 = vld [vmem:[%s5372_s19 + $0x628] sm:$0xff] }
  0xb2   : > { %3269 = vmatpush.bf16.msrb.mxu2 %v5132_v53  ;;  %3212 = vmatmul.bf16.vlgmr.msra.gmra.mxu1 %v940_v60  ;;  %v5637_v53 = vld.sshfl [vmem:[#allocation1 + $0x8] sm:$0xff pattern:$0x73625140]  ;;  %v5171_v56 = vld [vmem:[%s5372_s19 + $0x6f0] sm:$0xff] }
  0xb3   : > { %3256 = vmatpush.bf16.msrb.mxu1 %v5124_v58  ;;  %3238 = vmatmul.bf16.vlgmr.msra.gmra.mxu3 %v942_v61  ;;  %960 = vst [vmem:[#allocation1] ss:$4 sm:$0xff] %v247_v42  ;;  %v5162_v58 = vld [vmem:[%s5372_s19 + $0x6a8] sm:$0xff]  ;;  %v5145_v61 = vld [vmem:[%s5372_s19 + $0x620] sm:$0xff]  ;;  %v5159_v12 = vld [vmem:[%s5372_s19 + $0x690] sm:$0xff] }
  0xb4   : > { %3282 = vmatpush.bf16.msrb.mxu3 %v5140_v59  ;;  %v3018_v19 = vpop.f32.mrf.mxu2  ;;  %v5154_v59 = vld [vmem:[%s5372_s19 + $0x668] sm:$0xff]  ;;  %v5203_v42 = vld [vmem:[%s5372_s19 + $0x7f0] sm:$0xff] }
  0xb5   : > { %3244 = vmatpush.bf16.msrb.mxu0 %v5115_v62  ;;  %v3019_v22 = vadd.f32 %v3018_v19, %v3006_v16  ;;  %v2994_v24 = vpop.f32.mrf.mxu0  ;;  %v5170_v60 = vld [vmem:[%s5372_s19 + $0x6e8] sm:$0xff]  ;;  %v5161_v62 = vld [vmem:[%s5372_s19 + $0x6a0] sm:$0xff]  ;;  %v5151_v16 = vld [vmem:[%s5372_s19 + $0x650] sm:$0xff] }
  0xb6   : > { %3270 = vmatpush.bf16.msrb.mxu2 %v5131_v63  ;;  %v3031_v23 = vpop.f32.mrf.mxu3  ;;  %v5142_v19 = vld [vmem:[%s5372_s19 + $0x608] sm:$0xff] }
  0xb7   : > { %3257 = vmatpush.bf16.msrb.mxu1 %v5123_v0  ;;  %v5615_v27 = vadd.f32 %v3031_v23, %v3019_v22  ;;  %v3007_v28 = vpop.f32.mrf.mxu1  ;;  %v5150_v22 = vld [vmem:[%s5372_s19 + $0x648] sm:$0xff] }
  0xb8   : > { %3283 = vmatpush.bf16.msrb.mxu3 %v5139_v1  ;;  %v5153_v1 = vld [vmem:[%s5372_s19 + $0x660] sm:$0xff]  ;;  %v5166_v23 = vld [vmem:[%s5372_s19 + $0x6c8] sm:$0xff]  ;;  %v5180_v28 = vld [vmem:[%s5372_s19 + $0x738] sm:$0xff] }
  0xb9   : > { %3245 = vmatpush.bf16.msrb.mxu0 %v5114_v2  ;;  %v5169_v2 = vld [vmem:[%s5372_s19 + $0x6e0] sm:$0xff] }
  0xba   : > { %3271 = vmatpush.bf16.msrb.mxu2 %v5130_v3 }
  0xbb   : > { %3258 = vmatpush.bf16.msrb.mxu1 %v5122_v4 }
  0xbc   : > { %3284 = vmatpush.bf16.msrb.mxu3 %v5138_v5  ;;  %v3020_v34 = vpop.f32.mrf.mxu2  ;;  %v5144_v5 = vld [vmem:[%s5372_s19 + $0x618] sm:$0xff] }
  0xbd   : > { %3246 = vmatpush.bf16.msrb.mxu0 %v5113_v7  ;;  %v5152_v7 = vld [vmem:[%s5372_s19 + $0x658] sm:$0xff]  ;;  %v248_v34 = vld [vmem:[%s5396_s23 + $0x48] sm:$0xff] }
  0xbe   : > { %3272 = vmatpush.bf16.msrb.mxu2 %v5129_v8  ;;  %v3033_v39 = vpop.f32.mrf.mxu3  ;;  %v5168_v8 = vld [vmem:[%s5372_s19 + $0x6d8] sm:$0xff] }
  0xbf   : > { %3259 = vmatpush.bf16.msrb.mxu1 %v5121_v10 }
  0xc0   : > { %3285 = vmatpush.bf16.msrb.mxu3 %v5137_v11  ;;  %v5143_v11 = vld [vmem:[%s5372_s19 + $0x610] sm:$0xff] }
  0xc1   : > { %3247 = vmatpush.bf16.msrb.mxu0 %v5112_v14 }
  0xc2   : > { %3273 = vmatpush.bf16.msrb.mxu2 %v5128_v15 }
  0xc3   : > { %3260 = vmatpush.bf16.msrb.mxu1 %v5120_v17  ;;  %v5167_v17 = vld [vmem:[%s5372_s19 + $0x6d0] sm:$0xff] }
  0xc4   : > { %3286 = vmatpush.bf16.msrb.mxu3 %v5136_v18 }
  0xc5   : > { %3248 = vmatpush.bf16.msrb.mxu0 %v5111_v20  ;;  %v5158_v20 = vld [vmem:[%s5372_s19 + $0x688] sm:$0xff] }
  0xc6   : > { %3274 = vmatpush.bf16.msrb.mxu2 %v5127_v21  ;;  %v246_v21 = vld [vmem:[%s5396_s23 + $0x38] sm:$0xff] }
  0xc7   : > { %3261 = vmatpush.bf16.msrb.mxu1 %v5119_v25  ;;  %950 = vst [vmem:[#allocation1 + $0x20] ss:$4 sm:$0xff] %v246_v21  ;;  %v5141_v25 = vld [vmem:[%s5372_s19 + $0x600] sm:$0xff]  ;;  %v5227_v21 = vld [vmem:[%s5372_s19 + $0x8b0] sm:$0xff] }
  0xc8   : > { %3287 = vmatpush.bf16.msrb.mxu3 %v5135_v26  ;;  %v5157_v26 = vld [vmem:[%s5372_s19 + $0x680] sm:$0xff] }
  0xc9   : > { %3249 = vmatpush.bf16.msrb.mxu0 %v5110_v29  ;;  %v5196_v29 = vld [vmem:[%s5372_s19 + $0x7b8] sm:$0xff] }
  0xca   : > { %3275 = vmatpush.bf16.msrb.mxu2 %v5126_v30  ;;  %v5149_v30 = vld [vmem:[%s5372_s19 + $0x640] sm:$0xff] }
  0xcb   : > { %3262 = vmatpush.bf16.msrb.mxu1 %v5118_v32  ;;  %v5188_v32 = vld [vmem:[%s5372_s19 + $0x778] sm:$0xff] }
  0xcc   : > { %3288 = vmatpush.bf16.msrb.mxu3 %v5134_v33  ;;  %v5204_v33 = vld [vmem:[%s5372_s19 + $0x7f8] sm:$0xff] }
  0xcd   : > { %3250 = vmatpush.bf16.msrb.mxu0 %v5109_v35  ;;  %v3044_v63 = vpop.f32.mrf.mxu0  ;;  %v5179_v35 = vld [vmem:[%s5372_s19 + $0x730] sm:$0xff] }
  0xce   : > { %3276 = vmatpush.bf16.msrb.mxu2 %v5125_v36  ;;  %v3045_v0 = vadd.f32 %v3044_v63, %v5615_v27  ;;  %v5195_v36 = vld [vmem:[%s5372_s19 + $0x7b0] sm:$0xff]  ;;  %v5682_v39 = vld.sshfl [vmem:[#allocation1 + $0x28] sm:$0xff pattern:$0x73625140] }
  0xcf   : > { %3263 = vmatpush.bf16.msrb.mxu1 %v5117_v40  ;;  %v3057_v3 = vpop.f32.mrf.mxu1  ;;  %v5684_v40 = vld.sshfl [vmem:[#allocation1 + $0x38] sm:$0xff pattern:$0x73625140] }
  0xd0   : > { %3289 = vmatpush.bf16.msrb.mxu3 %v5133_v41  ;;  %3251 = vmatmul.bf16.vlgmr.msrb.gmra.mxu0 %v943_v43  ;;  %v3058_v4 = vadd.f32 %v3057_v3, %v3045_v0  ;;  %v5187_v41 = vld [vmem:[%s5372_s19 + $0x770] sm:$0xff]  ;;  %v5178_v43 = vld [vmem:[%s5372_s19 + $0x728] sm:$0xff] }
  0xd1   : > { %3295 = vmatpush.bf16.msra.mxu0 %v5148_v37  ;;  %3277 = vmatmul.bf16.vlgmr.msrb.gmra.mxu2 %v945_v44  ;;  %v5676_v37 = vld.sshfl [vmem:[#allocation1 + $0x20] sm:$0xff pattern:$0x73625140]  ;;  %v5194_v44 = vld [vmem:[%s5372_s19 + $0x7a8] sm:$0xff]  ;;  %v5175_v0 = vld [vmem:[%s5372_s19 + $0x710] sm:$0xff] }
  0xd2   : > { %3321 = vmatpush.bf16.msra.mxu2 %v5164_v38  ;;  %3264 = vmatmul.bf16.vlgmr.msrb.gmra.mxu1 %v944_v47  ;;  %v5678_v38 = vld.sshfl [vmem:[#allocation1 + $0x30] sm:$0xff pattern:$0x73625140] }
  0xd3   : > { %3308 = vmatpush.bf16.msra.mxu1 %v5156_v45  ;;  %3290 = vmatmul.bf16.vlgmr.msrb.gmra.mxu3 %v946_v48  ;;  %962 = vst [vmem:[#allocation1 + $0x20] ss:$4 sm:$0xff] %v248_v34  ;;  %v5186_v45 = vld [vmem:[%s5372_s19 + $0x768] sm:$0xff]  ;;  %v5183_v3 = vld [vmem:[%s5372_s19 + $0x750] sm:$0xff]  ;;  %v5209_v34 = vld [vmem:[%s5372_s19 + $0x820] sm:$0xff] }
  0xd4   : > { %3334 = vmatpush.bf16.msra.mxu3 %v5172_v46  ;;  %v3070_v9 = vpop.f32.mrf.mxu2  ;;  %v5202_v46 = vld [vmem:[%s5372_s19 + $0x7e8] sm:$0xff] }
  0xd5   : > { %3296 = vmatpush.bf16.msra.mxu0 %v5147_v49  ;;  %v3071_v10 = vadd.f32 %v3070_v9, %v3058_v4  ;;  %v3046_v14 = vpop.f32.mrf.mxu0  ;;  %v5177_v49 = vld [vmem:[%s5372_s19 + $0x720] sm:$0xff]  ;;  %v5199_v4 = vld [vmem:[%s5372_s19 + $0x7d0] sm:$0xff]  ;;  %v5198_v9 = vld [vmem:[%s5372_s19 + $0x7c8] sm:$0xff] }
  0xd6   : > { %3322 = vmatpush.bf16.msra.mxu2 %v5163_v50  ;;  %v3083_v13 = vpop.f32.mrf.mxu3  ;;  %v5193_v50 = vld [vmem:[%s5372_s19 + $0x7a0] sm:$0xff]  ;;  %v5228_v14 = vld [vmem:[%s5372_s19 + $0x8b8] sm:$0xff] }
  0xd7   : > { %3309 = vmatpush.bf16.msra.mxu1 %v5155_v55  ;;  %v3084_v15 = vadd.f32 %v3083_v13, %v3071_v10  ;;  %v3059_v18 = vpop.f32.mrf.mxu1  ;;  %v5176_v55 = vld [vmem:[%s5372_s19 + $0x718] sm:$0xff] }
  0xd8   : > { %3335 = vmatpush.bf16.msra.mxu3 %v5171_v56  ;;  %v5192_v56 = vld [vmem:[%s5372_s19 + $0x798] sm:$0xff] }
  0xd9   : > { %3297 = vmatpush.bf16.msra.mxu0 %v5146_v57  ;;  %v5212_v13 = vld [vmem:[%s5372_s19 + $0x838] sm:$0xff] }
  0xda   : > { %3323 = vmatpush.bf16.msra.mxu2 %v5162_v58  ;;  %v5236_v18 = vld [vmem:[%s5372_s19 + $0x8f8] sm:$0xff] }
  0xdb   : > { %3310 = vmatpush.bf16.msra.mxu1 %v5154_v59  ;;  %v5184_v59 = vld [vmem:[%s5372_s19 + $0x758] sm:$0xff] }
  0xdc   : > { %3336 = vmatpush.bf16.msra.mxu3 %v5170_v60  ;;  %v3072_v24 = vpop.f32.mrf.mxu2  ;;  %v5200_v60 = vld [vmem:[%s5372_s19 + $0x7d8] sm:$0xff] }
  0xdd   : > { %3298 = vmatpush.bf16.msra.mxu0 %v5145_v61  ;;  %v5729_v24 = vld.sshfl [vmem:[#allocation1 + $0x8] sm:$0xff pattern:$0x73625140] }
  0xde   : > { %3324 = vmatpush.bf16.msra.mxu2 %v5161_v62  ;;  %v3085_v27 = vpop.f32.mrf.mxu3 }
  0xdf   : > { %3311 = vmatpush.bf16.msra.mxu1 %v5153_v1  ;;  %v5191_v1 = vld [vmem:[%s5372_s19 + $0x790] sm:$0xff] }
  0xe0   : > { %3337 = vmatpush.bf16.msra.mxu3 %v5169_v2  ;;  %v5235_v27 = vld [vmem:[%s5372_s19 + $0x8f0] sm:$0xff] }
  0xe1   : > { %3299 = vmatpush.bf16.msra.mxu0 %v5144_v5  ;;  %v5174_v5 = vld [vmem:[%s5372_s19 + $0x708] sm:$0xff] }
  0xe2   : > { %3325 = vmatpush.bf16.msra.mxu2 %v5160_v6  ;;  %v5190_v6 = vld [vmem:[%s5372_s19 + $0x788] sm:$0xff] }
  0xe3   : > { %3312 = vmatpush.bf16.msra.mxu1 %v5152_v7 }
  0xe4   : > { %3338 = vmatpush.bf16.msra.mxu3 %v5168_v8  ;;  %v5182_v8 = vld [vmem:[%s5372_s19 + $0x748] sm:$0xff] }
  0xe5   : > { %3300 = vmatpush.bf16.msra.mxu0 %v5143_v11  ;;  %v5173_v11 = vld [vmem:[%s5372_s19 + $0x700] sm:$0xff] }
  0xe6   : > { %3326 = vmatpush.bf16.msra.mxu2 %v5159_v12  ;;  %v5189_v12 = vld [vmem:[%s5372_s19 + $0x780] sm:$0xff] }
  0xe7   : > { %3313 = vmatpush.bf16.msra.mxu1 %v5151_v16  ;;  %v5197_v16 = vld [vmem:[%s5372_s19 + $0x7c0] sm:$0xff] }
  0xe8   : > { %3339 = vmatpush.bf16.msra.mxu3 %v5167_v17  ;;  %v5220_v17 = vld [vmem:[%s5372_s19 + $0x878] sm:$0xff] }
  0xe9   : > { %3301 = vmatpush.bf16.msra.mxu0 %v5142_v19  ;;  %v249_v19 = vld [vmem:[%s5396_s23 + $0x50] sm:$0x3] }
  0xea   : > { %3327 = vmatpush.bf16.msra.mxu2 %v5158_v20  ;;  %v5211_v20 = vld [vmem:[%s5372_s19 + $0x830] sm:$0xff] }
  0xeb   : > { %3314 = vmatpush.bf16.msra.mxu1 %v5150_v22  ;;  %v5723_v22 = vld.sshfl [vmem:[#allocation1] sm:$0xff pattern:$0x73625140] }
  0xec   : > { %3340 = vmatpush.bf16.msra.mxu3 %v5166_v23  ;;  %v5725_v23 = vld.sshfl [vmem:[#allocation1 + $0x10] sm:$0xff pattern:$0x73625140] }
  0xed   : > { %3302 = vmatpush.bf16.msra.mxu0 %v5141_v25  ;;  %v3096_v47 = vpop.f32.mrf.mxu0  ;;  %v5731_v25 = vld.sshfl [vmem:[#allocation1 + $0x18] sm:$0xff pattern:$0x73625140] }
  0xee   : > { %3328 = vmatpush.bf16.msra.mxu2 %v5157_v26  ;;  %v3097_v48 = vadd.f32 %v3096_v47, %v3084_v15  ;;  %v5181_v15 = vld [vmem:[%s5372_s19 + $0x740] sm:$0xff]  ;;  %v5219_v26 = vld [vmem:[%s5372_s19 + $0x870] sm:$0xff]  ;;  %972 = vst [vmem:[#allocation1] ss:$4 sm:$0xff] %v249_v19 }
  0xef   : > { %3315 = vmatpush.bf16.msra.mxu1 %v5149_v30  ;;  %v5218_v30 = vld [vmem:[%s5372_s19 + $0x868] sm:$0xff]  ;;  %v5265_v19 = vld [vmem:[%s5372_s19 + $0x9e0] sm:$0xff] }
  0xf0   : > { %3341 = vmatpush.bf16.msra.mxu3 %v5165_v31  ;;  %3303 = vmatmul.bf16.vlgmr.msra.gmra.mxu0 %v5633_v51  ;;  %v3109_v51 = vpop.f32.mrf.mxu1  ;;  %v5234_v31 = vld [vmem:[%s5372_s19 + $0x8e8] sm:$0xff] }
  0xf1   : > { %3347 = vmatpush.bf16.msrb.mxu0 %v5180_v28  ;;  %3329 = vmatmul.bf16.vlgmr.msra.gmra.mxu2 %v5635_v52  ;;  %v3110_v52 = vadd.f32 %v3109_v51, %v3097_v48  ;;  %v5210_v28 = vld [vmem:[%s5372_s19 + $0x828] sm:$0xff] }
  0xf2   : > { %3373 = vmatpush.bf16.msrb.mxu2 %v5196_v29  ;;  %3316 = vmatmul.bf16.vlgmr.msra.gmra.mxu1 %v5637_v53  ;;  %v5185_v53 = vld [vmem:[%s5372_s19 + $0x760] sm:$0xff]  ;;  %v5226_v29 = vld [vmem:[%s5372_s19 + $0x8a8] sm:$0xff] }
  0xf3   : > { %3360 = vmatpush.bf16.msrb.mxu1 %v5188_v32  ;;  %3342 = vmatmul.bf16.vlgmr.msra.gmra.mxu3 %v5639_v54  ;;  %v5201_v54 = vld [vmem:[%s5372_s19 + $0x7e0] sm:$0xff] }
  0xf4   : > { %3386 = vmatpush.bf16.msrb.mxu3 %v5204_v33  ;;  %v3122_v57 = vpop.f32.mrf.mxu2 }
  0xf5   : > { %3348 = vmatpush.bf16.msrb.mxu0 %v5179_v35  ;;  %v3123_v58 = vadd.f32 %v3122_v57, %v3110_v52  ;;  %v3098_v62 = vpop.f32.mrf.mxu0  ;;  %v5225_v35 = vld [vmem:[%s5372_s19 + $0x8a0] sm:$0xff]  ;;  %v5215_v52 = vld [vmem:[%s5372_s19 + $0x850] sm:$0xff]  ;;  %v5214_v57 = vld [vmem:[%s5372_s19 + $0x848] sm:$0xff] }
  0xf6   : > { %3374 = vmatpush.bf16.msrb.mxu2 %v5195_v36  ;;  %v3135_v61 = vpop.f32.mrf.mxu3  ;;  %v5244_v62 = vld [vmem:[%s5372_s19 + $0x938] sm:$0xff] }
  0xf7   : > { %3361 = vmatpush.bf16.msrb.mxu1 %v5187_v41  ;;  %v5702_v63 = vadd.f32 %v3135_v61, %v3123_v58  ;;  %v5224_v41 = vld [vmem:[%s5372_s19 + $0x898] sm:$0xff]  ;;  %v5230_v58 = vld [vmem:[%s5372_s19 + $0x8c8] sm:$0xff]  ;;  %v5221_v61 = vld [vmem:[%s5372_s19 + $0x880] sm:$0xff] }
  0xf8   : > { %3387 = vmatpush.bf16.msrb.mxu3 %v5203_v42  ;;  %v3111_v2 = vpop.f32.mrf.mxu1 }
  0xf9   : > { %3349 = vmatpush.bf16.msrb.mxu0 %v5178_v43  ;;  %v5252_v2 = vld [vmem:[%s5372_s19 + $0x978] sm:$0xff] }
  0xfa   : > { %3375 = vmatpush.bf16.msrb.mxu2 %v5194_v44  ;;  %v5216_v44 = vld [vmem:[%s5372_s19 + $0x858] sm:$0xff] }
  0xfb   : > { %3362 = vmatpush.bf16.msrb.mxu1 %v5186_v45  ;;  %v5232_v45 = vld [vmem:[%s5372_s19 + $0x8d8] sm:$0xff] }
  0xfc   : > { %3388 = vmatpush.bf16.msrb.mxu3 %v5202_v46  ;;  %v3124_v7 = vpop.f32.mrf.mxu2 }
  0xfd   : > { %3350 = vmatpush.bf16.msrb.mxu0 %v5177_v49  ;;  %v5207_v49 = vld [vmem:[%s5372_s19 + $0x810] sm:$0xff] }
  0xfe   : > { %3376 = vmatpush.bf16.msrb.mxu2 %v5193_v50  ;;  %v3137_v10 = vpop.f32.mrf.mxu3  ;;  %v5223_v50 = vld [vmem:[%s5372_s19 + $0x890] sm:$0xff] }
  0xff   : > { %3363 = vmatpush.bf16.msrb.mxu1 %v5185_v53  ;;  %v5231_v53 = vld [vmem:[%s5372_s19 + $0x8d0] sm:$0xff]  ;;  %v5250_v10 = vld [vmem:[%s5372_s19 + $0x968] sm:$0xff] }
 0x100   : > { %3389 = vmatpush.bf16.msrb.mxu3 %v5201_v54  ;;  %v5206_v54 = vld [vmem:[%s5372_s19 + $0x808] sm:$0xff]  ;;  %v5267_v7 = vld [vmem:[%s5372_s19 + $0x9f0] sm:$0xff] }
 0x101   : > { %3351 = vmatpush.bf16.msrb.mxu0 %v5176_v55  ;;  %v5222_v55 = vld [vmem:[%s5372_s19 + $0x888] sm:$0xff] }
 0x102   : > { %3377 = vmatpush.bf16.msrb.mxu2 %v5192_v56 }
 0x103   : > { %3364 = vmatpush.bf16.msrb.mxu1 %v5184_v59 }
 0x104   : > { %3390 = vmatpush.bf16.msrb.mxu3 %v5200_v60  ;;  %v5205_v60 = vld [vmem:[%s5372_s19 + $0x800] sm:$0xff] }
 0x105   : > { %3352 = vmatpush.bf16.msrb.mxu0 %v5175_v0  ;;  %v5213_v0 = vld [vmem:[%s5372_s19 + $0x840] sm:$0xff] }
 0x106   : > { %3378 = vmatpush.bf16.msrb.mxu2 %v5191_v1  ;;  %v5229_v1 = vld [vmem:[%s5372_s19 + $0x8c0] sm:$0xff] }
 0x107   : > { %3365 = vmatpush.bf16.msrb.mxu1 %v5183_v3  ;;  %v5268_v3 = vld [vmem:[%s5372_s19 + $0x9f8] sm:$0xff] }
 0x108   : > { %3391 = vmatpush.bf16.msrb.mxu3 %v5199_v4  ;;  %v5243_v4 = vld [vmem:[%s5372_s19 + $0x930] sm:$0xff] }
 0x109   : > { %3353 = vmatpush.bf16.msrb.mxu0 %v5174_v5  ;;  %v5259_v5 = vld [vmem:[%s5372_s19 + $0x9b0] sm:$0xff] }
 0x10a   : > { %3379 = vmatpush.bf16.msrb.mxu2 %v5190_v6  ;;  %v5251_v6 = vld [vmem:[%s5372_s19 + $0x970] sm:$0xff] }
 0x10b   : > { %3366 = vmatpush.bf16.msrb.mxu1 %v5182_v8  ;;  %v5242_v8 = vld [vmem:[%s5372_s19 + $0x928] sm:$0xff] }
 0x10c   : > { %3392 = vmatpush.bf16.msrb.mxu3 %v5198_v9  ;;  %v5258_v9 = vld [vmem:[%s5372_s19 + $0x9a8] sm:$0xff] }
 0x10d   : > { %3354 = vmatpush.bf16.msrb.mxu0 %v5173_v11  ;;  %v3148_v32 = vpop.f32.mrf.mxu0  ;;  %v5266_v11 = vld [vmem:[%s5372_s19 + $0x9e8] sm:$0xff] }
 0x10e   : > { %3380 = vmatpush.bf16.msrb.mxu2 %v5189_v12  ;;  %v3149_v33 = vadd.f32 %v3148_v32, %v5702_v63  ;;  %v5260_v63 = vld [vmem:[%s5372_s19 + $0x9b8] sm:$0xff]  ;;  %v5247_v32 = vld [vmem:[%s5372_s19 + $0x950] sm:$0xff] }
 0x10f   : > { %3367 = vmatpush.bf16.msrb.mxu1 %v5181_v15  ;;  %v3161_v36 = vpop.f32.mrf.mxu1  ;;  %v5257_v15 = vld [vmem:[%s5372_s19 + $0x9a0] sm:$0xff] }
 0x110   : > { %3393 = vmatpush.bf16.msrb.mxu3 %v5197_v16  ;;  %3355 = vmatmul.bf16.vlgmr.msrb.gmra.mxu0 %v5676_v37  ;;  %v3162_v37 = vadd.f32 %v3161_v36, %v3149_v33  ;;  %v5263_v33 = vld [vmem:[%s5372_s19 + $0x9d0] sm:$0xff] }
 0x111   : > { %3399 = vmatpush.bf16.msra.mxu0 %v5212_v13  ;;  %3381 = vmatmul.bf16.vlgmr.msrb.gmra.mxu2 %v5678_v38  ;;  %v5217_v38 = vld [vmem:[%s5372_s19 + $0x860] sm:$0xff] }
 0x112   : > { %3425 = vmatpush.bf16.msra.mxu2 %v5228_v14  ;;  %3368 = vmatmul.bf16.vlgmr.msrb.gmra.mxu1 %v5682_v39  ;;  %v5233_v39 = vld [vmem:[%s5372_s19 + $0x8e0] sm:$0xff] }
 0x113   : > { %3412 = vmatpush.bf16.msra.mxu1 %v5220_v17  ;;  %3394 = vmatmul.bf16.vlgmr.msrb.gmra.mxu3 %v5684_v40  ;;  %v5208_v40 = vld [vmem:[%s5372_s19 + $0x818] sm:$0xff]  ;;  %v5241_v14 = vld [vmem:[%s5372_s19 + $0x920] sm:$0xff] }
 0x114   : > { %3438 = vmatpush.bf16.msra.mxu3 %v5236_v18  ;;  %v3174_v42 = vpop.f32.mrf.mxu2  ;;  %v5249_v18 = vld [vmem:[%s5372_s19 + $0x960] sm:$0xff] }
 0x115   : > { %3400 = vmatpush.bf16.msra.mxu0 %v5211_v20  ;;  %v3175_v43 = vadd.f32 %v3174_v42, %v3162_v37  ;;  %v3150_v47 = vpop.f32.mrf.mxu0  ;;  %v5240_v20 = vld [vmem:[%s5372_s19 + $0x918] sm:$0xff]  ;;  %v5246_v37 = vld [vmem:[%s5372_s19 + $0x948] sm:$0xff] }
 0x116   : > { %3426 = vmatpush.bf16.msra.mxu2 %v5227_v21  ;;  %v3187_v46 = vpop.f32.mrf.mxu3  ;;  %v5256_v21 = vld [vmem:[%s5372_s19 + $0x998] sm:$0xff]  ;;  %v968_v47 = vld.sshfl [vmem:[#allocation1 + $0x28] sm:$0xff pattern:$0x73625140] }
 0x117   : > { %3413 = vmatpush.bf16.msra.mxu1 %v5219_v26  ;;  %v3188_v48 = vadd.f32 %v3187_v46, %v3175_v43  ;;  %v3163_v51 = vpop.f32.mrf.mxu1  ;;  %v5276_v42 = vld [vmem:[%s5372_s19 + $0xa38] sm:$0xff]  ;;  %v5245_v43 = vld [vmem:[%s5372_s19 + $0x940] sm:$0xff]  ;;  %v969_v46 = vld.sshfl [vmem:[#allocation1 + $0x30] sm:$0xff pattern:$0x73625140] }
 0x118   : > { %3439 = vmatpush.bf16.msra.mxu3 %v5235_v27 }
 0x119   : > { %3401 = vmatpush.bf16.msra.mxu0 %v5210_v28 }
 0x11a   : > { %3427 = vmatpush.bf16.msra.mxu2 %v5226_v29  ;;  %v5239_v29 = vld [vmem:[%s5372_s19 + $0x910] sm:$0xff] }
 0x11b   : > { %3414 = vmatpush.bf16.msra.mxu1 %v5218_v30  ;;  %v5255_v30 = vld [vmem:[%s5372_s19 + $0x990] sm:$0xff] }
 0x11c   : > { %3440 = vmatpush.bf16.msra.mxu3 %v5234_v31  ;;  %v3176_v56 = vpop.f32.mrf.mxu2 }
 0x11d   : > { %3402 = vmatpush.bf16.msra.mxu0 %v5209_v34  ;;  %v5238_v34 = vld [vmem:[%s5372_s19 + $0x908] sm:$0xff]  ;;  %v5272_v56 = vld [vmem:[%s5372_s19 + $0xa18] sm:$0xff] }
 0x11e   : > { %3428 = vmatpush.bf16.msra.mxu2 %v5225_v35  ;;  %v3189_v59 = vpop.f32.mrf.mxu3  ;;  %v5254_v35 = vld [vmem:[%s5372_s19 + $0x988] sm:$0xff] }
 0x11f   : > { %3415 = vmatpush.bf16.msra.mxu1 %v5217_v38  ;;  %v5262_v38 = vld [vmem:[%s5372_s19 + $0x9c8] sm:$0xff] }
 0x120   : > { %3441 = vmatpush.bf16.msra.mxu3 %v5233_v39 }
 0x121   : > { %3403 = vmatpush.bf16.msra.mxu0 %v5208_v40  ;;  %v5237_v40 = vld [vmem:[%s5372_s19 + $0x900] sm:$0xff] }
 0x122   : > { %3429 = vmatpush.bf16.msra.mxu2 %v5224_v41  ;;  %v5253_v41 = vld [vmem:[%s5372_s19 + $0x980] sm:$0xff] }
 0x123   : > { %3416 = vmatpush.bf16.msra.mxu1 %v5216_v44  ;;  %v5261_v44 = vld [vmem:[%s5372_s19 + $0x9c0] sm:$0xff] }
 0x124   : > { %3442 = vmatpush.bf16.msra.mxu3 %v5232_v45  ;;  %v967_v45 = vld.sshfl [vmem:[#allocation1 + $0x20] sm:$0xff pattern:$0x73625140] }
 0x125   : > { %3404 = vmatpush.bf16.msra.mxu0 %v5207_v49  ;;  %v5275_v49 = vld [vmem:[%s5372_s19 + $0xa30] sm:$0xff] }
 0x126   : > { %3430 = vmatpush.bf16.msra.mxu2 %v5223_v50  ;;  %v5274_v50 = vld [vmem:[%s5372_s19 + $0xa28] sm:$0xff] }
 0x127   : > { %3417 = vmatpush.bf16.msra.mxu1 %v5215_v52 }
 0x128   : > { %3443 = vmatpush.bf16.msra.mxu3 %v5231_v53  ;;  %v5273_v53 = vld [vmem:[%s5372_s19 + $0xa20] sm:$0xff] }
 0x129   : > { %3405 = vmatpush.bf16.msra.mxu0 %v5206_v54 }
 0x12a   : > { %3431 = vmatpush.bf16.msra.mxu2 %v5222_v55 }
 0x12b   : > { %3418 = vmatpush.bf16.msra.mxu1 %v5214_v57 }
 0x12c   : > { %3444 = vmatpush.bf16.msra.mxu3 %v5230_v58 }
 0x12d   : > { %3406 = vmatpush.bf16.msra.mxu0 %v5205_v60  ;;  %v3200_v12 = vpop.f32.mrf.mxu0 }
 0x12e   : > { %3432 = vmatpush.bf16.msra.mxu2 %v5221_v61  ;;  %v3201_v13 = vadd.f32 %v3200_v12, %v3188_v48  ;;  %v970_v48 = vld.sshfl [vmem:[#allocation1 + $0x38] sm:$0xff pattern:$0x73625140] }
 0x12f   : > { %3419 = vmatpush.bf16.msra.mxu1 %v5213_v0  ;;  %v3213_v16 = vpop.f32.mrf.mxu1  ;;  %v5270_v0 = vld [vmem:[%s5372_s19 + $0xa08] sm:$0xff] }
 0x130   : > { %3445 = vmatpush.bf16.msra.mxu3 %v5229_v1  ;;  %3407 = vmatmul.bf16.vlgmr.msra.gmra.mxu0 %v5723_v22  ;;  %v3214_v17 = vadd.f32 %v3213_v16, %v3201_v13 }
 0x131   : > { %3451 = vmatpush.bf16.msrb.mxu0 %v5244_v62  ;;  %3433 = vmatmul.bf16.vlgmr.msra.gmra.mxu2 %v5725_v23  ;;  %v5271_v62 = vld [vmem:[%s5372_s19 + $0xa10] sm:$0xff] }
 0x132   : > { %3477 = vmatpush.bf16.msrb.mxu2 %v5260_v63  ;;  %3420 = vmatmul.bf16.vlgmr.msra.gmra.mxu1 %v5729_v24  ;;  %v5248_v24 = vld [vmem:[%s5372_s19 + $0x958] sm:$0xff] }
 0x133   : > { %3464 = vmatpush.bf16.msrb.mxu1 %v5252_v2  ;;  %3446 = vmatmul.bf16.vlgmr.msra.gmra.mxu3 %v5731_v25  ;;  %v5264_v25 = vld [vmem:[%s5372_s19 + $0x9d8] sm:$0xff] }
 0x134   : > { %3490 = vmatpush.bf16.msrb.mxu3 %v5268_v3  ;;  %v3226_v22 = vpop.f32.mrf.mxu2  ;;  %v5269_v3 = vld [vmem:[%s5372_s19 + $0xa00] sm:$0xff] }
 0x135   : > { %3452 = vmatpush.bf16.msrb.mxu0 %v5243_v4  ;;  %v3227_v23 = vadd.f32 %v3226_v22, %v3214_v17  ;;  %v3202_v27 = vpop.f32.mrf.mxu0  ;;  %v973_v4 = vld.sshfl [vmem:[#allocation1] sm:$0xff pattern:$0x73625140] }
 0x136   : > { %3478 = vmatpush.bf16.msrb.mxu2 %v5259_v5  ;;  %v3239_v26 = vpop.f32.mrf.mxu3 }
 0x137   : > { %3465 = vmatpush.bf16.msrb.mxu1 %v5251_v6  ;;  %v3240_v28 = vadd.f32 %v3239_v26, %v3227_v23  ;;  %v3215_v31 = vpop.f32.mrf.mxu1 }
 0x138   : > { %3491 = vmatpush.bf16.msrb.mxu3 %v5267_v7 }
 0x139   : > { %3453 = vmatpush.bf16.msrb.mxu0 %v5242_v8 }
 0x13a   : > { %3479 = vmatpush.bf16.msrb.mxu2 %v5258_v9 }
 0x13b   : > { %3466 = vmatpush.bf16.msrb.mxu1 %v5250_v10 }
 0x13c   : > { %3492 = vmatpush.bf16.msrb.mxu3 %v5266_v11  ;;  %v3228_v36 = vpop.f32.mrf.mxu2 }
 0x13d   : > { %3454 = vmatpush.bf16.msrb.mxu0 %v5241_v14 }
 0x13e   : > { %3480 = vmatpush.bf16.msrb.mxu2 %v5257_v15  ;;  %v3241_v39 = vpop.f32.mrf.mxu3 }
 0x13f   : > { %3467 = vmatpush.bf16.msrb.mxu1 %v5249_v18 }
 0x140   : > { %3493 = vmatpush.bf16.msrb.mxu3 %v5265_v19 }
 0x141   : > { %3455 = vmatpush.bf16.msrb.mxu0 %v5240_v20 }
 0x142   : > { %3481 = vmatpush.bf16.msrb.mxu2 %v5256_v21 }
 0x143   : > { %3468 = vmatpush.bf16.msrb.mxu1 %v5248_v24 }
 0x144   : > { %3494 = vmatpush.bf16.msrb.mxu3 %v5264_v25 }
 0x145   : > { %3456 = vmatpush.bf16.msrb.mxu0 %v5239_v29 }
 0x146   : > { %3482 = vmatpush.bf16.msrb.mxu2 %v5255_v30 }
 0x147   : > { %3469 = vmatpush.bf16.msrb.mxu1 %v5247_v32 }
 0x148   : > { %3495 = vmatpush.bf16.msrb.mxu3 %v5263_v33 }
 0x149   : > { %3457 = vmatpush.bf16.msrb.mxu0 %v5238_v34 }
 0x14a   : > { %3483 = vmatpush.bf16.msrb.mxu2 %v5254_v35 }
 0x14b   : > { %3470 = vmatpush.bf16.msrb.mxu1 %v5246_v37 }
 0x14c   : > { %3496 = vmatpush.bf16.msrb.mxu3 %v5262_v38 }
 0x14d   : > { %3458 = vmatpush.bf16.msrb.mxu0 %v5237_v40  ;;  %v3252_v51 = vpop.f32.mrf.mxu0 }
 0x14e   : > { %3484 = vmatpush.bf16.msrb.mxu2 %v5253_v41  ;;  %v3253_v52 = vadd.f32 %v3252_v51, %v3240_v28 }
 0x14f   : > { %3471 = vmatpush.bf16.msrb.mxu1 %v5245_v43  ;;  %v3265_v54 = vpop.f32.mrf.mxu1 }
 0x150   : > { %3497 = vmatpush.bf16.msrb.mxu3 %v5261_v44  ;;  %3459 = vmatmul.bf16.vlgmr.msrb.gmra.mxu0 %v967_v45  ;;  %v3266_v55 = vadd.f32 %v3265_v54, %v3253_v52 }
 0x151   : > { %3503 = vmatpush.bf16.msra.mxu0 %v5276_v42  ;;  %3485 = vmatmul.bf16.vlgmr.msrb.gmra.mxu2 %v969_v46 }
 0x152   : > { %3472 = vmatmul.bf16.vlgmr.msrb.gmra.mxu1 %v968_v47 }
 0x153   : > { %3498 = vmatmul.bf16.vlgmr.msrb.gmra.mxu3 %v970_v48 }
 0x154   : > { %v3278_v57 = vpop.f32.mrf.mxu2 }
 0x155   : > { %3504 = vmatpush.bf16.msra.mxu0 %v5275_v49  ;;  %v3279_v58 = vadd.f32 %v3278_v57, %v3266_v55  ;;  %v3254_v60 = vpop.f32.mrf.mxu0 }
 0x156   : > { %v3291_v59 = vpop.f32.mrf.mxu3 }
 0x157   : > { %v3292_v61 = vadd.f32 %v3291_v59, %v3279_v58  ;;  %v3267_v63 = vpop.f32.mrf.mxu1 }
 0x159   : > { %3505 = vmatpush.bf16.msra.mxu0 %v5274_v50 }
 0x15c   : > { %v3280_v1 = vpop.f32.mrf.mxu2 }
 0x15d   : > { %3506 = vmatpush.bf16.msra.mxu0 %v5273_v53 }
 0x15e   : > { %v3293_v2 = vpop.f32.mrf.mxu3 }
 0x161   : > { %3507 = vmatpush.bf16.msra.mxu0 %v5272_v56 }
 0x165   : > { %3508 = vmatpush.bf16.msra.mxu0 %v5271_v62 }
 0x169   : > { %3509 = vmatpush.bf16.msra.mxu0 %v5270_v0 }
 0x16d   : > { %3510 = vmatpush.bf16.msra.mxu0 %v5269_v3  ;;  %v3304_v5 = vpop.f32.mrf.mxu0 }
 0x16e   : > { %v3305_v6 = vadd.f32 %v3304_v5, %v3292_v61 }
 0x16f   : > { %v3317_v7 = vpop.f32.mrf.mxu1 }
 0x170   : > { %3511 = vmatmul.bf16.vlgmr.msra.gmra.mxu0 %v973_v4  ;;  %v3318_v8 = vadd.f32 %v3317_v7, %v3305_v6 }
 0x174   : > { %v3330_v9 = vpop.f32.mrf.mxu2 }
 0x175   : > { %v3331_v10 = vadd.f32 %v3330_v9, %v3318_v8  ;;  %v3306_v12 = vpop.f32.mrf.mxu0 }
 0x176   : > { %v3343_v11 = vpop.f32.mrf.mxu3 }
 0x177   : > { %v3344_v13 = vadd.f32 %v3343_v11, %v3331_v10  ;;  %v3319_v14 = vpop.f32.mrf.mxu1 }
 0x17c   : > { %v3332_v15 = vpop.f32.mrf.mxu2 }
 0x17e   : > { %v3345_v16 = vpop.f32.mrf.mxu3 }
 0x18d   : > { %v3356_v17 = vpop.f32.mrf.mxu0 }
 0x18e   : > { %v3357_v18 = vadd.f32 %v3356_v17, %v3344_v13 }
 0x18f   : > { %v3369_v19 = vpop.f32.mrf.mxu1 }
 0x190   : > { %v3370_v20 = vadd.f32 %v3369_v19, %v3357_v18 }
 0x194   : > { %v3382_v21 = vpop.f32.mrf.mxu2 }
 0x195   : > { %v3383_v22 = vadd.f32 %v3382_v21, %v3370_v20  ;;  %v3358_v24 = vpop.f32.mrf.mxu0 }
 0x196   : > { %v3395_v23 = vpop.f32.mrf.mxu3 }
 0x197   : > { %v3396_v25 = vadd.f32 %v3395_v23, %v3383_v22  ;;  %v3371_v26 = vpop.f32.mrf.mxu1 }
 0x19c   : > { %v3384_v27 = vpop.f32.mrf.mxu2 }
 0x19e   : > { %v3397_v28 = vpop.f32.mrf.mxu3 }
 0x1ad   : > { %v3408_v29 = vpop.f32.mrf.mxu0 }
 0x1ae   : > { %v3409_v40 = vadd.f32 %v3408_v29, %v3396_v25 }
 0x1af   : > { %v3421_v30 = vpop.f32.mrf.mxu1 }
 0x1b0   : > { %v3422_v44 = vadd.f32 %v3421_v30, %v3409_v40 }
 0x1b4   : > { %v3434_v31 = vpop.f32.mrf.mxu2 }
 0x1b5   : > { %v3410_v33 = vpop.f32.mrf.mxu0  ;;  %v3435_v45 = vadd.f32 %v3434_v31, %v3422_v44 }
 0x1b6   : > { %v3447_v32 = vpop.f32.mrf.mxu3 }
 0x1b7   : > { %v3423_v34 = vpop.f32.mrf.mxu1  ;;  %v3448_v48 = vadd.f32 %v3447_v32, %v3435_v45 }
 0x1bc   : > { %v3436_v35 = vpop.f32.mrf.mxu2 }
 0x1be   : > { %v3449_v36 = vpop.f32.mrf.mxu3 }
 0x1cd   : > { %v3460_v37 = vpop.f32.mrf.mxu0 }
 0x1ce   : > { %v3461_v49 = vadd.f32 %v3460_v37, %v3448_v48 }
 0x1cf   : > { %v3473_v38 = vpop.f32.mrf.mxu1 }
 0x1d0   : > { %v3474_v50 = vadd.f32 %v3473_v38, %v3461_v49 }
 0x1d4   : > { %v3486_v39 = vpop.f32.mrf.mxu2 }
 0x1d5   : > { %v3462_v42 = vpop.f32.mrf.mxu0  ;;  %v3487_v51 = vadd.f32 %v3486_v39, %v3474_v50 }
 0x1d6   : > { %v3499_v41 = vpop.f32.mrf.mxu3 }
 0x1d7   : > { %v3475_v43 = vpop.f32.mrf.mxu1  ;;  %v3500_v52 = vadd.f32 %v3499_v41, %v3487_v51 }
 0x1dc   : > { %v3488_v46 = vpop.f32.mrf.mxu2 }
 0x1de   : > { %v3501_v47 = vpop.f32.mrf.mxu3 }
 0x1ed   : > { %v3512_v53 = vpop.f32.mrf.mxu0 }
 0x1ee   : > { %v3513_v54 = vadd.f32 %v3512_v53, %v3500_v52 }
 0x1f0   : > { %vm3516_vm0 = vcmp.ge.f32.partialorder %v3513_v54, 0.0  ;;  %v3517_v55 = vmul.f32 0.2, %v3513_v54 }
 0x1f2   : > { %v3518_v56 = vsel %vm3516_vm0, %v3513_v54, %v3517_v55 }
 0x1f3   : > { %3519 = vst [vmem:[%s238_s5] sm:$0xf] %v3518_v56 }
 0x1f5   : > { %v3514_v57 = vpop.f32.mrf.mxu0 }
 0x1f6 PF: > { %s13_s14 = sadd.s32 1, %s5326_s14   ;;  %s5823_s12 = smov %s5322_s13 }
 0x1f7   : > { %p10_p5 = scmp.ge.s32.totalorder %s13_s14, 10   ;;  %s5824_s13 = smov %s5826_s15 }
 0x1f9   :  { %12 = sbr.rel (!%p10_p5) target bundleno = 2 (0x2), region = 69 }

// kernel: wave_discriminator_block.12
= control target key start
LH: loop header
LB: loop body
LE: loop exit
PB: predicated region body
PF: predicated region fallthrough
CT: control target
= control target key end

     0   :  { %s8638_s12 = smov 0   ;;  %s8640_s13 = smov 0   ;;  %s10178_s0 = inlined_call_operand.vmem [shape: bf16[1,4,5120], index: 0, kind: input, shape index: {}]   ;;  %s10179_s1 = inlined_call_operand.vmem [shape: bf16[4,5120,256], index: 1, kind: input, shape index: {}]   ;;  %s10180_s2 = inlined_call_operand.vmem [shape: f32[1,1024], index: 2, kind: input, shape index: {}]   ;;  %s10181_s3 = inlined_call_operand.vmem [shape: f32[4,1024], index: 3, kind: output, shape index: {}]  }
   0x1   :  { %s8642_s14 = smov 0  }
   0x2 LB: > { %s25_s15 = sadd.s32 1, %s8612_s13  ;;  %p5353_p0 = scmp.ge.s32.totalorder %s8616_s14, 1  ;;  %s8616_s14 = sphi %s8642_s14, %s13_s14   ;;  %s8612_s13 = sphi %s8640_s13, %s10184_s13   ;;  %s8608_s12 = sphi %s8638_s12, %s10183_s12  }
   0x3   : > { %p27_p1 = scmp.ge.s32.totalorder %s25_s15, 4  ;;  %p171_p2 = scmp.lt.s32.totalorder %s8616_s14, 5 }
   0x5   : > { %s10186_s15 = smov (%p27_p1, %s25_s15), 0  ;;  %p172_p3 = pnand %p5353_p0, %p171_p2 }
   0x6   : > { %p213_p4 = scmp.lt.s32.totalorder (!%p172_p3), %s8608_s12, 3  ;;  %s5355_s6 = sshll.u32 (!%p172_p3), %s8608_s12, 1 }
   0x7   : > { %175 = sbr.rel (%p172_p3) target bundleno = 804 (0x324), region = 32  ;;  %p9089_p5 = scmp.lt.s32.totalorder (!%p172_p3), %s5355_s6, 7 }
   0xc   : > { %s214_s16 = scalar_select %p213_p4, %s8608_s12, 3  ;;  %vm5239_vm2 = vcmask 1043456  }
   0xd   : > { %s10188_s6 = smov (!%p9089_p5, %s5355_s6), 7 }
   0xe   : > { %s8560_s17 = smul.u32 5120, %s214_s16  ;;  %s9120_s10 = scalar_lea.vmem %s10180_s2, %s10188_s6 }
  0x10   : > { %s8663_s20 = scalar_lea.vmem %s10179_s1, %s8560_s17 }
  0x11   : > { %v5416_v0 = vld [vmem:[%s8663_s20 + $0x70] sm:$0xf]  ;;  %v7935_v1 = vld [vmem:[%s8663_s20 + $0x74] sm:$0xf0]  ;;  %v5408_v11 = vld [vmem:[%s8663_s20 + $0x60] sm:$0xf] }
  0x12   : > { %v5480_v2 = vld [vmem:[%s8663_s20 + $0xf0] sm:$0xf]  ;;  %v5417_v3 = vor.u32 %v7935_v1, %v5416_v0  ;;  %v7951_v4 = vld [vmem:[%s8663_s20 + $0xf4] sm:$0xf0]  ;;  %v7933_v13 = vld [vmem:[%s8663_s20 + $0x64] sm:$0xf0] }
  0x13   : > { %v5544_v5 = vld [vmem:[%s8663_s20 + $0x170] sm:$0xf]  ;;  %v7967_v6 = vld [vmem:[%s8663_s20 + $0x174] sm:$0xf0]  ;;  %v5481_v7 = vor.u32 %v7951_v4, %v5480_v2  ;;  %v5472_v14 = vld [vmem:[%s8663_s20 + $0xe0] sm:$0xf]  ;;  %v5409_v16 = vor.u32 %v7933_v13, %v5408_v11 }
  0x14   : > { %v5545_v8 = vor.u32 %v7967_v6, %v5544_v5  ;;  %v5608_v9 = vld [vmem:[%s8663_s20 + $0x1f0] sm:$0xf]  ;;  %v7983_v10 = vld [vmem:[%s8663_s20 + $0x1f4] sm:$0xf0]  ;;  %4190 = vmatpush.bf16.msra.mxu0 %v5417_v3  ;;  %v7949_v15 = vld [vmem:[%s8663_s20 + $0xe4] sm:$0xf0] }
  0x15   : > { %v5609_v12 = vor.u32 %v7983_v10, %v5608_v9  ;;  %4203 = vmatpush.bf16.msra.mxu1 %v5481_v7  ;;  %v5473_v17 = vor.u32 %v7949_v15, %v5472_v14  ;;  %v5536_v18 = vld [vmem:[%s8663_s20 + $0x160] sm:$0xf]  ;;  %v7965_v19 = vld [vmem:[%s8663_s20 + $0x164] sm:$0xf0]  ;;  %v5400_v23 = vld [vmem:[%s8663_s20 + $0x50] sm:$0xf] }
  0x16   : > { %4216 = vmatpush.bf16.msra.mxu2 %v5545_v8  ;;  %v5600_v20 = vld [vmem:[%s8663_s20 + $0x1e0] sm:$0xf]  ;;  %v5537_v21 = vor.u32 %v7965_v19, %v5536_v18  ;;  %v7981_v22 = vld [vmem:[%s8663_s20 + $0x1e4] sm:$0xf0]  ;;  %v7931_v24 = vld [vmem:[%s8663_s20 + $0x54] sm:$0xf0] }
  0x17   : > { %4229 = vmatpush.bf16.msra.mxu3 %v5609_v12  ;;  %v5601_v25 = vor.u32 %v7981_v22, %v5600_v20  ;;  %v5464_v26 = vld [vmem:[%s8663_s20 + $0xd0] sm:$0xf]  ;;  %v7947_v27 = vld [vmem:[%s8663_s20 + $0xd4] sm:$0xf0]  ;;  %v5401_v29 = vor.u32 %v7931_v24, %v5400_v23  ;;  %v5392_v35 = vld [vmem:[%s8663_s20 + $0x40] sm:$0xf] }
  0x18   : > { %v5528_v28 = vld [vmem:[%s8663_s20 + $0x150] sm:$0xf]  ;;  %4191 = vmatpush.bf16.msra.mxu0 %v5409_v16  ;;  %v7963_v30 = vld [vmem:[%s8663_s20 + $0x154] sm:$0xf0]  ;;  %v5465_v33 = vor.u32 %v7947_v27, %v5464_v26  ;;  %v7929_v36 = vld [vmem:[%s8663_s20 + $0x44] sm:$0xf0] }
  0x19   : > { %v5592_v31 = vld [vmem:[%s8663_s20 + $0x1d0] sm:$0xf]  ;;  %v7979_v32 = vld [vmem:[%s8663_s20 + $0x1d4] sm:$0xf0]  ;;  %4204 = vmatpush.bf16.msra.mxu1 %v5473_v17  ;;  %v5529_v34 = vor.u32 %v7963_v30, %v5528_v28  ;;  %v5456_v37 = vld [vmem:[%s8663_s20 + $0xc0] sm:$0xf]  ;;  %v5393_v44 = vor.u32 %v7929_v36, %v5392_v35 }
  0x1a   : > { %4217 = vmatpush.bf16.msra.mxu2 %v5537_v21  ;;  %v5593_v38 = vor.u32 %v7979_v32, %v5592_v31  ;;  %v7945_v39 = vld [vmem:[%s8663_s20 + $0xc4] sm:$0xf0]  ;;  %v5520_v40 = vld [vmem:[%s8663_s20 + $0x140] sm:$0xf]  ;;  %v5384_v47 = vld [vmem:[%s8663_s20 + $0x30] sm:$0xf] }
  0x1b   : > { %4230 = vmatpush.bf16.msra.mxu3 %v5601_v25  ;;  %v7961_v41 = vld [vmem:[%s8663_s20 + $0x144] sm:$0xf0]  ;;  %v5584_v42 = vld [vmem:[%s8663_s20 + $0x1c0] sm:$0xf]  ;;  %v5457_v45 = vor.u32 %v7945_v39, %v5456_v37  ;;  %v7927_v48 = vld [vmem:[%s8663_s20 + $0x34] sm:$0xf0] }
  0x1c   : > { %v7977_v43 = vld [vmem:[%s8663_s20 + $0x1c4] sm:$0xf0]  ;;  %4192 = vmatpush.bf16.msra.mxu0 %v5401_v29  ;;  %v5521_v46 = vor.u32 %v7961_v41, %v5520_v40  ;;  %v5448_v49 = vld [vmem:[%s8663_s20 + $0xb0] sm:$0xf]  ;;  %v7943_v51 = vld [vmem:[%s8663_s20 + $0xb4] sm:$0xf0]  ;;  %v5385_v56 = vor.u32 %v7927_v48, %v5384_v47 }
  0x1d   : > { %4205 = vmatpush.bf16.msra.mxu1 %v5465_v33  ;;  %v5585_v50 = vor.u32 %v7977_v43, %v5584_v42  ;;  %v5512_v52 = vld [vmem:[%s8663_s20 + $0x130] sm:$0xf]  ;;  %v7959_v53 = vld [vmem:[%s8663_s20 + $0x134] sm:$0xf0]  ;;  %v5449_v57 = vor.u32 %v7943_v51, %v5448_v49  ;;  %v5376_v59 = vld [vmem:[%s8663_s20 + $0x20] sm:$0xf] }
  0x1e   : > { %4218 = vmatpush.bf16.msra.mxu2 %v5529_v34  ;;  %v5576_v54 = vld [vmem:[%s8663_s20 + $0x1b0] sm:$0xf]  ;;  %v7975_v55 = vld [vmem:[%s8663_s20 + $0x1b4] sm:$0xf0]  ;;  %v5513_v58 = vor.u32 %v7959_v53, %v5512_v52  ;;  %v7925_v60 = vld [vmem:[%s8663_s20 + $0x24] sm:$0xf0] }
  0x1f   : > { %4231 = vmatpush.bf16.msra.mxu3 %v5593_v38  ;;  %v5440_v61 = vld [vmem:[%s8663_s20 + $0xa0] sm:$0xf]  ;;  %v5577_v62 = vor.u32 %v7975_v55, %v5576_v54  ;;  %v7941_v63 = vld [vmem:[%s8663_s20 + $0xa4] sm:$0xf0]  ;;  %v5377_v4 = vor.u32 %v7925_v60, %v5376_v59  ;;  %v5368_v7 = vld [vmem:[%s8663_s20 + $0x10] sm:$0xf] }
  0x20   : > { %4193 = vmatpush.bf16.msra.mxu0 %v5393_v44  ;;  %v5504_v0 = vld [vmem:[%s8663_s20 + $0x120] sm:$0xf]  ;;  %v7957_v1 = vld [vmem:[%s8663_s20 + $0x124] sm:$0xf0]  ;;  %v5441_v5 = vor.u32 %v7941_v63, %v5440_v61  ;;  %v7923_v8 = vld [vmem:[%s8663_s20 + $0x14] sm:$0xf0] }
  0x21   : > { %4206 = vmatpush.bf16.msra.mxu1 %v5457_v45  ;;  %v5568_v2 = vld [vmem:[%s8663_s20 + $0x1a0] sm:$0xf]  ;;  %v7973_v3 = vld [vmem:[%s8663_s20 + $0x1a4] sm:$0xf0]  ;;  %v5505_v6 = vor.u32 %v7957_v1, %v5504_v0  ;;  %v5432_v9 = vld [vmem:[%s8663_s20 + $0x90] sm:$0xf]  ;;  %v5369_v16 = vor.u32 %v7923_v8, %v5368_v7 }
  0x22   : > { %4219 = vmatpush.bf16.msra.mxu2 %v5521_v46  ;;  %v5569_v10 = vor.u32 %v7973_v3, %v5568_v2  ;;  %v7939_v11 = vld [vmem:[%s8663_s20 + $0x94] sm:$0xf0]  ;;  %v5496_v12 = vld [vmem:[%s8663_s20 + $0x110] sm:$0xf]  ;;  %v5360_v17 = vld [vmem:[%s8663_s20] sm:$0xf] }
  0x23   : > { %4232 = vmatpush.bf16.msra.mxu3 %v5585_v50  ;;  %v7955_v13 = vld [vmem:[%s8663_s20 + $0x114] sm:$0xf0]  ;;  %v5560_v14 = vld [vmem:[%s8663_s20 + $0x190] sm:$0xf]  ;;  %v7921_v18 = vld [vmem:[%s8663_s20 + $0x4] sm:$0xf0]  ;;  %v5433_v19 = vor.u32 %v7939_v11, %v5432_v9 }
  0x24   : > { %4194 = vmatpush.bf16.msra.mxu0 %v5385_v56  ;;  %v7971_v15 = vld [vmem:[%s8663_s20 + $0x194] sm:$0xf0]  ;;  %v5497_v20 = vor.u32 %v7955_v13, %v5496_v12  ;;  %v5424_v21 = vld [vmem:[%s8663_s20 + $0x80] sm:$0xf]  ;;  %v7937_v22 = vld [vmem:[%s8663_s20 + $0x84] sm:$0xf0]  ;;  %v5361_v31 = vor.u32 %v7921_v18, %v5360_v17 }
  0x25   : > { %4207 = vmatpush.bf16.msra.mxu1 %v5449_v57  ;;  %v5488_v23 = vld [vmem:[%s8663_s20 + $0x100] sm:$0xf]  ;;  %v5561_v24 = vor.u32 %v7971_v15, %v5560_v14  ;;  %v7953_v25 = vld [vmem:[%s8663_s20 + $0x104] sm:$0xf0]  ;;  %v5672_v28 = vld [vmem:[%s8663_s20 + $0x270] sm:$0xf]  ;;  %v5425_v35 = vor.u32 %v7937_v22, %v5424_v21 }
  0x26   : > { %4220 = vmatpush.bf16.msra.mxu2 %v5513_v58  ;;  %v5552_v26 = vld [vmem:[%s8663_s20 + $0x180] sm:$0xf]  ;;  %v7969_v27 = vld [vmem:[%s8663_s20 + $0x184] sm:$0xf0]  ;;  %v7999_v29 = vld [vmem:[%s8663_s20 + $0x274] sm:$0xf0]  ;;  %v5489_v36 = vor.u32 %v7953_v25, %v5488_v23 }
  0x27   : > { %4233 = vmatpush.bf16.msra.mxu3 %v5577_v62  ;;  %v5736_v30 = vld [vmem:[%s8663_s20 + $0x2f0] sm:$0xf]  ;;  %v8015_v32 = vld [vmem:[%s8663_s20 + $0x2f4] sm:$0xf0]  ;;  %v5553_v39 = vor.u32 %v7969_v27, %v5552_v26  ;;  %v5673_v40 = vor.u32 %v7999_v29, %v5672_v28  ;;  %v5664_v43 = vld [vmem:[%s8663_s20 + $0x260] sm:$0xf] }
  0x28   : > { %4195 = vmatpush.bf16.msra.mxu0 %v5377_v4  ;;  %v5800_v33 = vld [vmem:[%s8663_s20 + $0x370] sm:$0xf]  ;;  %v8031_v34 = vld [vmem:[%s8663_s20 + $0x374] sm:$0xf0]  ;;  %v5737_v41 = vor.u32 %v8015_v32, %v5736_v30  ;;  %v7997_v44 = vld [vmem:[%s8663_s20 + $0x264] sm:$0xf0] }
  0x29   : > { %4208 = vmatpush.bf16.msra.mxu1 %v5441_v5  ;;  %v5864_v37 = vld [vmem:[%s8663_s20 + $0x3f0] sm:$0xf]  ;;  %v8047_v38 = vld [vmem:[%s8663_s20 + $0x3f4] sm:$0xf0]  ;;  %v5801_v42 = vor.u32 %v8031_v34, %v5800_v33  ;;  %v5728_v45 = vld [vmem:[%s8663_s20 + $0x2e0] sm:$0xf]  ;;  %v5665_v52 = vor.u32 %v7997_v44, %v5664_v43 }
  0x2a   : > { %4221 = vmatpush.bf16.msra.mxu2 %v5505_v6  ;;  %v5865_v46 = vor.u32 %v8047_v38, %v5864_v37  ;;  %v8013_v47 = vld [vmem:[%s8663_s20 + $0x2e4] sm:$0xf0]  ;;  %v5792_v48 = vld [vmem:[%s8663_s20 + $0x360] sm:$0xf]  ;;  %v5656_v55 = vld [vmem:[%s8663_s20 + $0x250] sm:$0xf] }
  0x2b   : > { %4234 = vmatpush.bf16.msra.mxu3 %v5569_v10  ;;  %v8029_v49 = vld [vmem:[%s8663_s20 + $0x364] sm:$0xf0]  ;;  %v5856_v50 = vld [vmem:[%s8663_s20 + $0x3e0] sm:$0xf]  ;;  %v5729_v53 = vor.u32 %v8013_v47, %v5728_v45  ;;  %v7995_v56 = vld [vmem:[%s8663_s20 + $0x254] sm:$0xf0] }
  0x2c   : > { %4196 = vmatpush.bf16.msra.mxu0 %v5369_v16  ;;  %v8045_v51 = vld [vmem:[%s8663_s20 + $0x3e4] sm:$0xf0]  ;;  %v5793_v54 = vor.u32 %v8029_v49, %v5792_v48  ;;  %v5720_v57 = vld [vmem:[%s8663_s20 + $0x2d0] sm:$0xf]  ;;  %v8011_v59 = vld [vmem:[%s8663_s20 + $0x2d4] sm:$0xf0]  ;;  %v5657_v0 = vor.u32 %v7995_v56, %v5656_v55 }
  0x2d   : > { %4209 = vmatpush.bf16.msra.mxu1 %v5433_v19  ;;  %v5857_v58 = vor.u32 %v8045_v51, %v5856_v50  ;;  %v5784_v60 = vld [vmem:[%s8663_s20 + $0x350] sm:$0xf]  ;;  %v8027_v61 = vld [vmem:[%s8663_s20 + $0x354] sm:$0xf0]  ;;  %v5648_v1 = vld [vmem:[%s8663_s20 + $0x240] sm:$0xf]  ;;  %v5721_v3 = vor.u32 %v8011_v59, %v5720_v57 }
  0x2e   : > { %4222 = vmatpush.bf16.msra.mxu2 %v5497_v20  ;;  %v5848_v62 = vld [vmem:[%s8663_s20 + $0x3d0] sm:$0xf]  ;;  %v8043_v63 = vld [vmem:[%s8663_s20 + $0x3d4] sm:$0xf0]  ;;  %v233_v2 = vld [vmem:[%s10178_s0] sm:$0xff]  ;;  %v5785_v4 = vor.u32 %v8027_v61, %v5784_v60 }
  0x2f   : > { %4235 = vmatpush.bf16.msra.mxu3 %v5561_v24  ;;  %v7993_v5 = vld [vmem:[%s8663_s20 + $0x244] sm:$0xf0]  ;;  %v5712_v6 = vld [vmem:[%s8663_s20 + $0x2c0] sm:$0xf]  ;;  %890 = vst [vmem:[#allocation1] ss:$4 sm:$0xff] %v233_v2  ;;  %v5849_v7 = vor.u32 %v8043_v63, %v5848_v62 }
  0x30   : > { %4197 = vmatpush.bf16.msra.mxu0 %v5361_v31  ;;  %v8009_v8 = vld [vmem:[%s8663_s20 + $0x2c4] sm:$0xf0]  ;;  %v5776_v9 = vld [vmem:[%s8663_s20 + $0x340] sm:$0xf]  ;;  %v5649_v13 = vor.u32 %v7993_v5, %v5648_v1  ;;  %v5640_v14 = vld [vmem:[%s8663_s20 + $0x230] sm:$0xf] }
  0x31   : > { %4210 = vmatpush.bf16.msra.mxu1 %v5425_v35  ;;  %v8025_v10 = vld [vmem:[%s8663_s20 + $0x344] sm:$0xf0]  ;;  %v5840_v11 = vld [vmem:[%s8663_s20 + $0x3c0] sm:$0xf]  ;;  %v7991_v15 = vld [vmem:[%s8663_s20 + $0x234] sm:$0xf0]  ;;  %v5713_v16 = vor.u32 %v8009_v8, %v5712_v6 }
  0x32   : > { %4223 = vmatpush.bf16.msra.mxu2 %v5489_v36  ;;  %v8041_v12 = vld [vmem:[%s8663_s20 + $0x3c4] sm:$0xf0]  ;;  %v5777_v17 = vor.u32 %v8025_v10, %v5776_v9  ;;  %v5704_v18 = vld [vmem:[%s8663_s20 + $0x2b0] sm:$0xf]  ;;  %v8007_v19 = vld [vmem:[%s8663_s20 + $0x2b4] sm:$0xf0]  ;;  %v5641_v28 = vor.u32 %v7991_v15, %v5640_v14 }
  0x33   : > { %4236 = vmatpush.bf16.msra.mxu3 %v5553_v39  ;;  %v5768_v20 = vld [vmem:[%s8663_s20 + $0x330] sm:$0xf]  ;;  %v5841_v21 = vor.u32 %v8041_v12, %v5840_v11  ;;  %v8023_v22 = vld [vmem:[%s8663_s20 + $0x334] sm:$0xf0]  ;;  %v5632_v25 = vld [vmem:[%s8663_s20 + $0x220] sm:$0xf]  ;;  %v5705_v33 = vor.u32 %v8007_v19, %v5704_v18 }
  0x34   : > { %4242 = vmatpush.bf16.msrb.mxu0 %v5673_v40  ;;  %v5832_v23 = vld [vmem:[%s8663_s20 + $0x3b0] sm:$0xf]  ;;  %v8039_v24 = vld [vmem:[%s8663_s20 + $0x3b4] sm:$0xf0]  ;;  %v7989_v26 = vld [vmem:[%s8663_s20 + $0x224] sm:$0xf0]  ;;  %v5769_v34 = vor.u32 %v8023_v22, %v5768_v20 }
  0x35   : > { %4255 = vmatpush.bf16.msrb.mxu1 %v5737_v41  ;;  %v235_v27 = vld [vmem:[%s10178_s0 + $0x10] sm:$0xff]  ;;  %v5696_v29 = vld [vmem:[%s8663_s20 + $0x2a0] sm:$0xf]  ;;  %v8005_v30 = vld [vmem:[%s8663_s20 + $0x2a4] sm:$0xf0]  ;;  %v5833_v37 = vor.u32 %v8039_v24, %v5832_v23 }
  0x36   : > { %4268 = vmatpush.bf16.msrb.mxu2 %v5801_v42  ;;  %v8779_v31 = vld.sshfl [vmem:[#allocation1 + $0x10] sm:$0xff pattern:$0x73625140]  ;;  %v8781_v32 = vld.sshfl [vmem:[#allocation1] sm:$0xff pattern:$0x73625140]  ;;  %v5633_v42 = vor.u32 %v7989_v26, %v5632_v25  ;;  %v5697_v45 = vor.u32 %v8005_v30, %v5696_v29 }
  0x37   : > { %4281 = vmatpush.bf16.msrb.mxu3 %v5865_v46  ;;  %v8783_v35 = vld.sshfl [vmem:[#allocation1 + $0x18] sm:$0xff pattern:$0x73625140]  ;;  %v8785_v36 = vld.sshfl [vmem:[#allocation1 + $0x8] sm:$0xff pattern:$0x73625140]  ;;  %4224 = vmatmul.bf16.vlgmr.msra.gmra.mxu2 %v8779_v31 }
  0x38   : > { %4243 = vmatpush.bf16.msrb.mxu0 %v5665_v52  ;;  %v5760_v38 = vld [vmem:[%s8663_s20 + $0x320] sm:$0xf]  ;;  %v8021_v39 = vld [vmem:[%s8663_s20 + $0x324] sm:$0xf0]  ;;  %903 = vst [vmem:[#allocation1] ss:$4 sm:$0xff] %v235_v27  ;;  %4237 = vmatmul.bf16.vlgmr.msra.gmra.mxu3 %v8783_v35 }
  0x39   : > { %4256 = vmatpush.bf16.msrb.mxu1 %v5729_v53  ;;  %v5824_v40 = vld [vmem:[%s8663_s20 + $0x3a0] sm:$0xf]  ;;  %v8037_v41 = vld [vmem:[%s8663_s20 + $0x3a4] sm:$0xf0]  ;;  %4198 = vmatmul.bf16.vlgmr.msra.gmra.mxu0 %v8781_v32  ;;  %v5624_v43 = vld [vmem:[%s8663_s20 + $0x210] sm:$0xf]  ;;  %v5761_v46 = vor.u32 %v8021_v39, %v5760_v38 }
  0x3a   : > { %4269 = vmatpush.bf16.msrb.mxu2 %v5793_v54  ;;  %v7987_v44 = vld [vmem:[%s8663_s20 + $0x214] sm:$0xf0]  ;;  %4211 = vmatmul.bf16.vlgmr.msra.gmra.mxu1 %v8785_v36  ;;  %v5688_v47 = vld [vmem:[%s8663_s20 + $0x290] sm:$0xf]  ;;  %v5825_v50 = vor.u32 %v8037_v41, %v5824_v40  ;;  %v234_v53 = vld [vmem:[%s10178_s0 + $0x8] sm:$0xff] }
  0x3b   : > { %4282 = vmatpush.bf16.msrb.mxu3 %v5857_v58  ;;  %v8003_v48 = vld [vmem:[%s8663_s20 + $0x294] sm:$0xf0]  ;;  %v5752_v49 = vld [vmem:[%s8663_s20 + $0x310] sm:$0xf]  ;;  %v5616_v55 = vld [vmem:[%s8663_s20 + $0x200] sm:$0xf]  ;;  %v5625_v56 = vor.u32 %v7987_v44, %v5624_v43 }
  0x3c   : > { %4244 = vmatpush.bf16.msrb.mxu0 %v5657_v0  ;;  %v8019_v51 = vld [vmem:[%s8663_s20 + $0x314] sm:$0xf0]  ;;  %v5816_v52 = vld [vmem:[%s8663_s20 + $0x390] sm:$0xf]  ;;  %893 = vst [vmem:[#allocation1 + $0x20] ss:$4 sm:$0xff] %v234_v53  ;;  %v5689_v60 = vor.u32 %v8003_v48, %v5688_v47 }
  0x3d   : > { %4257 = vmatpush.bf16.msrb.mxu1 %v5721_v3  ;;  %v8035_v54 = vld [vmem:[%s8663_s20 + $0x394] sm:$0xf0]  ;;  %v7985_v57 = vld [vmem:[%s8663_s20 + $0x204] sm:$0xf0]  ;;  %v5680_v58 = vld [vmem:[%s8663_s20 + $0x280] sm:$0xf]  ;;  %v5753_v61 = vor.u32 %v8019_v51, %v5752_v49 }
  0x3e   : > { %4270 = vmatpush.bf16.msrb.mxu2 %v5785_v4  ;;  %v8001_v59 = vld [vmem:[%s8663_s20 + $0x284] sm:$0xf0]  ;;  %v5744_v62 = vld [vmem:[%s8663_s20 + $0x300] sm:$0xf]  ;;  %v5817_v1 = vor.u32 %v8035_v54, %v5816_v52  ;;  %v5928_v3 = vld [vmem:[%s8663_s20 + $0x470] sm:$0xf]  ;;  %v5617_v8 = vor.u32 %v7985_v57, %v5616_v55 }
  0x3f   : > { %4283 = vmatpush.bf16.msrb.mxu3 %v5849_v7  ;;  %v8017_v63 = vld [vmem:[%s8663_s20 + $0x304] sm:$0xf0]  ;;  %v5808_v0 = vld [vmem:[%s8663_s20 + $0x380] sm:$0xf]  ;;  %v8063_v4 = vld [vmem:[%s8663_s20 + $0x474] sm:$0xf0]  ;;  %v5681_v12 = vor.u32 %v8001_v59, %v5680_v58 }
  0x40   : > { %4245 = vmatpush.bf16.msrb.mxu0 %v5649_v13  ;;  %v8033_v2 = vld [vmem:[%s8663_s20 + $0x384] sm:$0xf0]  ;;  %v5992_v5 = vld [vmem:[%s8663_s20 + $0x4f0] sm:$0xf]  ;;  %v8079_v6 = vld [vmem:[%s8663_s20 + $0x4f4] sm:$0xf0]  ;;  %v5745_v13 = vor.u32 %v8017_v63, %v5744_v62  ;;  %v5929_v18 = vor.u32 %v8063_v4, %v5928_v3 }
  0x41   : > { %4258 = vmatpush.bf16.msrb.mxu1 %v5713_v16  ;;  %v6056_v7 = vld [vmem:[%s8663_s20 + $0x570] sm:$0xf]  ;;  %v8095_v9 = vld [vmem:[%s8663_s20 + $0x574] sm:$0xf0]  ;;  %v5920_v14 = vld [vmem:[%s8663_s20 + $0x460] sm:$0xf]  ;;  %v5993_v23 = vor.u32 %v8079_v6, %v5992_v5 }
  0x42   : > { %4271 = vmatpush.bf16.msrb.mxu2 %v5777_v17  ;;  %v6120_v10 = vld [vmem:[%s8663_s20 + $0x5f0] sm:$0xf]  ;;  %v8111_v11 = vld [vmem:[%s8663_s20 + $0x5f4] sm:$0xf0]  ;;  %v8061_v15 = vld [vmem:[%s8663_s20 + $0x464] sm:$0xf0]  ;;  %v5809_v17 = vor.u32 %v8033_v2, %v5808_v0  ;;  %v6057_v24 = vor.u32 %v8095_v9, %v6056_v7 }
  0x43   : > { %4284 = vmatpush.bf16.msrb.mxu3 %v5841_v21  ;;  %v236_v16 = vld [vmem:[%s10178_s0 + $0x18] sm:$0xff]  ;;  %v5984_v19 = vld [vmem:[%s8663_s20 + $0x4e0] sm:$0xf]  ;;  %v8077_v20 = vld [vmem:[%s8663_s20 + $0x4e4] sm:$0xf0]  ;;  %v6121_v27 = vor.u32 %v8111_v11, %v6120_v10 }
  0x44   : > { %4246 = vmatpush.bf16.msrb.mxu0 %v5641_v28  ;;  %v8829_v21 = vld.sshfl [vmem:[#allocation1 + $0x30] sm:$0xff pattern:$0x73625140]  ;;  %v8831_v22 = vld.sshfl [vmem:[#allocation1 + $0x20] sm:$0xff pattern:$0x73625140] }
  0x45   : > { %4259 = vmatpush.bf16.msrb.mxu1 %v5705_v33  ;;  %v8833_v25 = vld.sshfl [vmem:[#allocation1 + $0x38] sm:$0xff pattern:$0x73625140]  ;;  %v8835_v26 = vld.sshfl [vmem:[#allocation1 + $0x28] sm:$0xff pattern:$0x73625140] }
  0x46   : > { %4272 = vmatpush.bf16.msrb.mxu2 %v5769_v34  ;;  %v6048_v28 = vld [vmem:[%s8663_s20 + $0x560] sm:$0xf]  ;;  %v8093_v29 = vld [vmem:[%s8663_s20 + $0x564] sm:$0xf0]  ;;  %905 = vst [vmem:[#allocation1 + $0x20] ss:$4 sm:$0xff] %v236_v16  ;;  %v5921_v34 = vor.u32 %v8061_v15, %v5920_v14 }
  0x47   : > { %4285 = vmatpush.bf16.msrb.mxu3 %v5833_v37  ;;  %v6112_v30 = vld [vmem:[%s8663_s20 + $0x5e0] sm:$0xf]  ;;  %v8109_v33 = vld [vmem:[%s8663_s20 + $0x5e4] sm:$0xf0]  ;;  %v5985_v37 = vor.u32 %v8077_v20, %v5984_v19  ;;  %v6049_v38 = vor.u32 %v8093_v29, %v6048_v28  ;;  %v5912_v39 = vld [vmem:[%s8663_s20 + $0x450] sm:$0xf] }
  0x48   : > { %4247 = vmatpush.bf16.msrb.mxu0 %v5633_v42  ;;  %v8059_v40 = vld [vmem:[%s8663_s20 + $0x454] sm:$0xf0]  ;;  %v5976_v41 = vld [vmem:[%s8663_s20 + $0x4d0] sm:$0xf]  ;;  %v6113_v42 = vor.u32 %v8109_v33, %v6112_v30  ;;  %v5904_v51 = vld [vmem:[%s8663_s20 + $0x440] sm:$0xf] }
  0x49   : > { %4260 = vmatpush.bf16.msrb.mxu1 %v5697_v45  ;;  %v8075_v43 = vld [vmem:[%s8663_s20 + $0x4d4] sm:$0xf0]  ;;  %v6040_v44 = vld [vmem:[%s8663_s20 + $0x550] sm:$0xf]  ;;  %v5913_v48 = vor.u32 %v8059_v40, %v5912_v39  ;;  %v8057_v52 = vld [vmem:[%s8663_s20 + $0x444] sm:$0xf0] }
  0x4a   : > { %4273 = vmatpush.bf16.msrb.mxu2 %v5761_v46  ;;  %v8091_v45 = vld [vmem:[%s8663_s20 + $0x554] sm:$0xf0]  ;;  %v6104_v46 = vld [vmem:[%s8663_s20 + $0x5d0] sm:$0xf]  ;;  %v5977_v49 = vor.u32 %v8075_v43, %v5976_v41  ;;  %v5968_v53 = vld [vmem:[%s8663_s20 + $0x4c0] sm:$0xf] }
  0x4b   : > { %4286 = vmatpush.bf16.msrb.mxu3 %v5825_v50  ;;  %v8107_v47 = vld [vmem:[%s8663_s20 + $0x5d4] sm:$0xf0]  ;;  %v6041_v50 = vor.u32 %v8091_v45, %v6040_v44  ;;  %v8073_v55 = vld [vmem:[%s8663_s20 + $0x4c4] sm:$0xf0]  ;;  %v6096_v58 = vld [vmem:[%s8663_s20 + $0x5c0] sm:$0xf] }
  0x4c   : > { %4248 = vmatpush.bf16.msrb.mxu0 %v5625_v56  ;;  %v6105_v54 = vor.u32 %v8107_v47, %v6104_v46  ;;  %v6032_v56 = vld [vmem:[%s8663_s20 + $0x540] sm:$0xf]  ;;  %v8089_v57 = vld [vmem:[%s8663_s20 + $0x544] sm:$0xf0]  ;;  %v8055_v62 = vld [vmem:[%s8663_s20 + $0x434] sm:$0xf0]  ;;  %v5969_v0 = vor.u32 %v8073_v55, %v5968_v53 }
  0x4d   : > { %4261 = vmatpush.bf16.msrb.mxu1 %v5689_v60  ;;  %v8105_v59 = vld [vmem:[%s8663_s20 + $0x5c4] sm:$0xf0]  ;;  %v5905_v60 = vor.u32 %v8057_v52, %v5904_v51  ;;  %v5960_v63 = vld [vmem:[%s8663_s20 + $0x4b0] sm:$0xf]  ;;  %v8071_v2 = vld [vmem:[%s8663_s20 + $0x4b4] sm:$0xf0] }
  0x4e   : > { %4274 = vmatpush.bf16.msrb.mxu2 %v5753_v61  ;;  %v5896_v61 = vld [vmem:[%s8663_s20 + $0x430] sm:$0xf]  ;;  %v8087_v4 = vld [vmem:[%s8663_s20 + $0x534] sm:$0xf0]  ;;  %v6097_v5 = vor.u32 %v8105_v59, %v6096_v58  ;;  %v5888_v9 = vld [vmem:[%s8663_s20 + $0x420] sm:$0xf]  ;;  %v5961_v15 = vor.u32 %v8071_v2, %v5960_v63 }
  0x4f   : > { %4287 = vmatpush.bf16.msrb.mxu3 %v5817_v1  ;;  %v6033_v1 = vor.u32 %v8089_v57, %v6032_v56  ;;  %v6024_v3 = vld [vmem:[%s8663_s20 + $0x530] sm:$0xf]  ;;  %v8103_v7 = vld [vmem:[%s8663_s20 + $0x5b4] sm:$0xf0]  ;;  %v8069_v20 = vld [vmem:[%s8663_s20 + $0x4a4] sm:$0xf0] }
  0x50   : > { %4249 = vmatpush.bf16.msrb.mxu0 %v5617_v8  ;;  %v6088_v6 = vld [vmem:[%s8663_s20 + $0x5b0] sm:$0xf]  ;;  %v237_v8 = vld [vmem:[%s10178_s0 + $0x20] sm:$0xff]  ;;  %v8879_v14 = vld.sshfl [vmem:[#allocation1 + $0x18] sm:$0xff pattern:$0x73625140]  ;;  %v6025_v16 = vor.u32 %v8087_v4, %v6024_v3 }
  0x51   : > { %4262 = vmatpush.bf16.msrb.mxu1 %v5681_v12  ;;  %v8873_v10 = vld.sshfl [vmem:[#allocation1] sm:$0xff pattern:$0x73625140]  ;;  %v8875_v11 = vld.sshfl [vmem:[#allocation1 + $0x10] sm:$0xff pattern:$0x73625140]  ;;  %v5897_v12 = vor.u32 %v8055_v62, %v5896_v61  ;;  %v6089_v19 = vor.u32 %v8103_v7, %v6088_v6 }
  0x52   : > { %4275 = vmatpush.bf16.msrb.mxu2 %v5745_v13  ;;  %v8877_v13 = vld.sshfl [vmem:[#allocation1 + $0x8] sm:$0xff pattern:$0x73625140]  ;;  %v8067_v40 = vld [vmem:[%s8663_s20 + $0x494] sm:$0xf0] }
  0x53   : > { %4288 = vmatpush.bf16.msrb.mxu3 %v5809_v17  ;;  %4250 = vmatmul.bf16.vlgmr.msrb.gmra.mxu0 %v8831_v22  ;;  %v8053_v17 = vld [vmem:[%s8663_s20 + $0x424] sm:$0xf0]  ;;  %915 = vst [vmem:[#allocation1] ss:$4 sm:$0xff] %v237_v8  ;;  %v6008_v41 = vld [vmem:[%s8663_s20 + $0x510] sm:$0xf] }
  0x54   : > { %4294 = vmatpush.bf16.msra.mxu0 %v5929_v18  ;;  %4263 = vmatmul.bf16.vlgmr.msrb.gmra.mxu1 %v8835_v26  ;;  %v5952_v18 = vld [vmem:[%s8663_s20 + $0x4a0] sm:$0xf]  ;;  %v8101_v28 = vld [vmem:[%s8663_s20 + $0x5a4] sm:$0xf0]  ;;  %v5889_v29 = vor.u32 %v8053_v17, %v5888_v9  ;;  %v6072_v43 = vld [vmem:[%s8663_s20 + $0x590] sm:$0xf] }
  0x55   : > { %4307 = vmatpush.bf16.msra.mxu1 %v5993_v23  ;;  %4276 = vmatmul.bf16.vlgmr.msrb.gmra.mxu2 %v8829_v21  ;;  %v6016_v23 = vld [vmem:[%s8663_s20 + $0x520] sm:$0xf]  ;;  %v5953_v30 = vor.u32 %v8069_v20, %v5952_v18  ;;  %v8099_v44 = vld [vmem:[%s8663_s20 + $0x594] sm:$0xf0]  ;;  %v8049_v47 = vld [vmem:[%s8663_s20 + $0x404] sm:$0xf0] }
  0x56   : > { %4320 = vmatpush.bf16.msra.mxu2 %v6057_v24  ;;  %4289 = vmatmul.bf16.vlgmr.msrb.gmra.mxu3 %v8833_v25  ;;  %v8085_v24 = vld [vmem:[%s8663_s20 + $0x524] sm:$0xf0]  ;;  %v5872_v46 = vld [vmem:[%s8663_s20 + $0x400] sm:$0xf]  ;;  %v6073_v53 = vor.u32 %v8099_v44, %v6072_v43  ;;  %v6184_v57 = vld [vmem:[%s8663_s20 + $0x670] sm:$0xf] }
  0x57   : > { %4333 = vmatpush.bf16.msra.mxu3 %v6121_v27  ;;  %v6080_v27 = vld [vmem:[%s8663_s20 + $0x5a0] sm:$0xf]  ;;  %v6017_v33 = vor.u32 %v8085_v24, %v6016_v23  ;;  %v8065_v51 = vld [vmem:[%s8663_s20 + $0x484] sm:$0xf0]  ;;  %v8127_v58 = vld [vmem:[%s8663_s20 + $0x674] sm:$0xf0] }
  0x58   : > { %4295 = vmatpush.bf16.msra.mxu0 %v5921_v34  ;;  %v5880_v34 = vld [vmem:[%s8663_s20 + $0x410] sm:$0xf]  ;;  %v6081_v39 = vor.u32 %v8101_v28, %v6080_v27  ;;  %v6000_v52 = vld [vmem:[%s8663_s20 + $0x500] sm:$0xf]  ;;  %v8097_v56 = vld [vmem:[%s8663_s20 + $0x584] sm:$0xf0] }
  0x59   : > { %4308 = vmatpush.bf16.msra.mxu1 %v5985_v37  ;;  %v8051_v37 = vld [vmem:[%s8663_s20 + $0x414] sm:$0xf0]  ;;  %v6064_v55 = vld [vmem:[%s8663_s20 + $0x580] sm:$0xf]  ;;  %v6248_v59 = vld [vmem:[%s8663_s20 + $0x6f0] sm:$0xf] }
  0x5a   : > { %4321 = vmatpush.bf16.msra.mxu2 %v6049_v38  ;;  %v5944_v38 = vld [vmem:[%s8663_s20 + $0x490] sm:$0xf]  ;;  %v5881_v45 = vor.u32 %v8051_v37, %v5880_v34  ;;  %v8143_v61 = vld [vmem:[%s8663_s20 + $0x6f4] sm:$0xf0]  ;;  %v6065_v4 = vor.u32 %v8097_v56, %v6064_v55  ;;  %v6176_v8 = vld [vmem:[%s8663_s20 + $0x660] sm:$0xf] }
  0x5b   : > { %4334 = vmatpush.bf16.msra.mxu3 %v6113_v42  ;;  %v8083_v42 = vld [vmem:[%s8663_s20 + $0x514] sm:$0xf0]  ;;  %v6312_v62 = vld [vmem:[%s8663_s20 + $0x770] sm:$0xf]  ;;  %v6249_v6 = vor.u32 %v8143_v61, %v6248_v59  ;;  %v8125_v9 = vld [vmem:[%s8663_s20 + $0x664] sm:$0xf0] }
  0x5c   : > { %4296 = vmatpush.bf16.msra.mxu0 %v5913_v48  ;;  %v5945_v48 = vor.u32 %v8067_v40, %v5944_v38  ;;  %v8159_v63 = vld [vmem:[%s8663_s20 + $0x774] sm:$0xf0]  ;;  %v6376_v2 = vld [vmem:[%s8663_s20 + $0x7f0] sm:$0xf]  ;;  %v6304_v17 = vld [vmem:[%s8663_s20 + $0x760] sm:$0xf]  ;;  %v6177_v23 = vor.u32 %v8125_v9, %v6176_v8 }
  0x5d   : > { %4309 = vmatpush.bf16.msra.mxu1 %v5977_v49  ;;  %v6009_v49 = vor.u32 %v8083_v42, %v6008_v41  ;;  %v8175_v3 = vld [vmem:[%s8663_s20 + $0x7f4] sm:$0xf0]  ;;  %v6313_v7 = vor.u32 %v8159_v63, %v6312_v62  ;;  %v8157_v18 = vld [vmem:[%s8663_s20 + $0x764] sm:$0xf0]  ;;  %v6168_v24 = vld [vmem:[%s8663_s20 + $0x650] sm:$0xf] }
  0x5e   : > { %4322 = vmatpush.bf16.msra.mxu2 %v6041_v50  ;;  %v5936_v50 = vld [vmem:[%s8663_s20 + $0x480] sm:$0xf]  ;;  %v8173_v20 = vld [vmem:[%s8663_s20 + $0x7e4] sm:$0xf0]  ;;  %v6305_v28 = vor.u32 %v8157_v18, %v6304_v17  ;;  %v6296_v37 = vld [vmem:[%s8663_s20 + $0x750] sm:$0xf] }
  0x5f   : > { %4335 = vmatpush.bf16.msra.mxu3 %v6105_v54  ;;  %v8081_v54 = vld [vmem:[%s8663_s20 + $0x504] sm:$0xf0]  ;;  %v8155_v38 = vld [vmem:[%s8663_s20 + $0x754] sm:$0xf0]  ;;  %v6160_v41 = vld [vmem:[%s8663_s20 + $0x640] sm:$0xf] }
  0x60   : > { %4297 = vmatpush.bf16.msra.mxu0 %v5905_v60  ;;  %v5873_v60 = vor.u32 %v8049_v47, %v5872_v46  ;;  %v8171_v40 = vld [vmem:[%s8663_s20 + $0x7d4] sm:$0xf0]  ;;  %v8121_v42 = vld [vmem:[%s8663_s20 + $0x644] sm:$0xf0]  ;;  %v6224_v44 = vld [vmem:[%s8663_s20 + $0x6c0] sm:$0xf] }
  0x61   : > { %4310 = vmatpush.bf16.msra.mxu1 %v5969_v0  ;;  %v5937_v0 = vor.u32 %v8065_v51, %v5936_v50  ;;  %v6288_v46 = vld [vmem:[%s8663_s20 + $0x740] sm:$0xf]  ;;  %v8153_v47 = vld [vmem:[%s8663_s20 + $0x744] sm:$0xf0]  ;;  %v6297_v50 = vor.u32 %v8155_v38, %v6296_v37  ;;  %v6152_v61 = vld [vmem:[%s8663_s20 + $0x630] sm:$0xf] }
  0x62   : > { %4323 = vmatpush.bf16.msra.mxu2 %v6033_v1  ;;  %v6001_v1 = vor.u32 %v8081_v54, %v6000_v52  ;;  %v8941_v51 = vld.sshfl [vmem:[#allocation1 + $0x20] sm:$0xff pattern:$0x73625140]  ;;  %v8943_v52 = vld.sshfl [vmem:[#allocation1 + $0x30] sm:$0xff pattern:$0x73625140] }
  0x63   : > { %4336 = vmatpush.bf16.msra.mxu3 %v6097_v5  ;;  %v6185_v5 = vor.u32 %v8127_v58, %v6184_v57  ;;  %v8945_v54 = vld.sshfl [vmem:[#allocation1 + $0x28] sm:$0xff pattern:$0x73625140]  ;;  %v8947_v55 = vld.sshfl [vmem:[#allocation1 + $0x38] sm:$0xff pattern:$0x73625140]  ;;  %v6161_v58 = vor.u32 %v8121_v42, %v6160_v41 }
  0x64   : > { %4298 = vmatpush.bf16.msra.mxu0 %v5897_v12  ;;  %v6240_v12 = vld [vmem:[%s8663_s20 + $0x6e0] sm:$0xf]  ;;  %v8169_v57 = vld [vmem:[%s8663_s20 + $0x7c4] sm:$0xf0]  ;;  %v8119_v62 = vld [vmem:[%s8663_s20 + $0x634] sm:$0xf0] }
  0x65   : > { %4311 = vmatpush.bf16.msra.mxu1 %v5961_v15  ;;  %v6377_v15 = vor.u32 %v8175_v3, %v6376_v2  ;;  %v6352_v56 = vld [vmem:[%s8663_s20 + $0x7c0] sm:$0xf]  ;;  %v6216_v63 = vld [vmem:[%s8663_s20 + $0x6b0] sm:$0xf]  ;;  %v8151_v3 = vld [vmem:[%s8663_s20 + $0x734] sm:$0xf0] }
  0x66   : > { %4324 = vmatpush.bf16.msra.mxu2 %v6025_v16  ;;  %v8141_v16 = vld [vmem:[%s8663_s20 + $0x6e4] sm:$0xf0]  ;;  %v6280_v2 = vld [vmem:[%s8663_s20 + $0x730] sm:$0xf]  ;;  %v6144_v9 = vld [vmem:[%s8663_s20 + $0x620] sm:$0xf] }
  0x67   : > { %4337 = vmatpush.bf16.msra.mxu3 %v6089_v19  ;;  %v6368_v19 = vld [vmem:[%s8663_s20 + $0x7e0] sm:$0xf]  ;;  %v6241_v27 = vor.u32 %v8141_v16, %v6240_v12  ;;  %v6281_v8 = vor.u32 %v8151_v3, %v6280_v2  ;;  %v8117_v12 = vld [vmem:[%s8663_s20 + $0x624] sm:$0xf0]  ;;  %v8131_v37 = vld [vmem:[%s8663_s20 + $0x694] sm:$0xf0] }
  0x68   : > { %4299 = vmatpush.bf16.msra.mxu0 %v5889_v29  ;;  %v8123_v29 = vld [vmem:[%s8663_s20 + $0x654] sm:$0xf0]  ;;  %v6369_v34 = vor.u32 %v8173_v20, %v6368_v19  ;;  %v8133_v17 = vld [vmem:[%s8663_s20 + $0x6a4] sm:$0xf0]  ;;  %v6272_v18 = vld [vmem:[%s8663_s20 + $0x720] sm:$0xf] }
  0x69   : > { %4312 = vmatpush.bf16.msra.mxu1 %v5953_v30  ;;  %v6232_v30 = vld [vmem:[%s8663_s20 + $0x6d0] sm:$0xf]  ;;  %v6169_v43 = vor.u32 %v8123_v29, %v6168_v24  ;;  %v8149_v19 = vld [vmem:[%s8663_s20 + $0x724] sm:$0xf0]  ;;  %v6336_v20 = vld [vmem:[%s8663_s20 + $0x7a0] sm:$0xf]  ;;  %v6145_v24 = vor.u32 %v8117_v12, %v6144_v9 }
  0x6a   : > { %4325 = vmatpush.bf16.msra.mxu2 %v6017_v33  ;;  %v8139_v33 = vld [vmem:[%s8663_s20 + $0x6d4] sm:$0xf0]  ;;  %v6136_v29 = vld [vmem:[%s8663_s20 + $0x610] sm:$0xf]  ;;  %v6432_v9 = vld [vmem:[%s8663_s20 + $0x860] sm:$0xf] }
  0x6b   : > { %4338 = vmatpush.bf16.msra.mxu3 %v6081_v39  ;;  %v6360_v39 = vld [vmem:[%s8663_s20 + $0x7d0] sm:$0xf]  ;;  %v8163_v41 = vld [vmem:[%s8663_s20 + $0x794] sm:$0xf0]  ;;  %v8189_v12 = vld [vmem:[%s8663_s20 + $0x864] sm:$0xf0] }
  0x6c   : > { %4300 = vmatpush.bf16.msra.mxu0 %v5881_v45  ;;  %v8137_v45 = vld [vmem:[%s8663_s20 + $0x6c4] sm:$0xf0]  ;;  %v6264_v38 = vld [vmem:[%s8663_s20 + $0x710] sm:$0xf] }
  0x6d   : > { %4313 = vmatpush.bf16.msra.mxu1 %v5945_v48  ;;  %v238_v48 = vld [vmem:[%s10178_s0 + $0x28] sm:$0xff]  ;;  %v6225_v59 = vor.u32 %v8137_v45, %v6224_v44  ;;  %v6632_v3 = vld [vmem:[%s8663_s20 + $0x9f0] sm:$0xf] }
  0x6e   : > { %4326 = vmatpush.bf16.msra.mxu2 %v6009_v49  ;;  %v6233_v49 = vor.u32 %v8139_v33, %v6232_v30  ;;  %917 = vst [vmem:[#allocation1 + $0x20] ss:$4 sm:$0xff] %v238_v48  ;;  %v8115_v30 = vld [vmem:[%s8663_s20 + $0x614] sm:$0xf0]  ;;  %v6200_v33 = vld [vmem:[%s8663_s20 + $0x690] sm:$0xf] }
  0x6f   : > { %4339 = vmatpush.bf16.msra.mxu3 %v6073_v53  ;;  %v6361_v53 = vor.u32 %v8171_v40, %v6360_v39  ;;  %v8147_v39 = vld [vmem:[%s8663_s20 + $0x714] sm:$0xf0]  ;;  %v6328_v40 = vld [vmem:[%s8663_s20 + $0x790] sm:$0xf]  ;;  %v6137_v42 = vor.u32 %v8115_v30, %v6136_v29  ;;  %v8113_v44 = vld [vmem:[%s8663_s20 + $0x604] sm:$0xf0]  ;;  %v6201_v45 = vor.u32 %v8131_v37, %v6200_v33 }
  0x70   : > { %4301 = vmatpush.bf16.msra.mxu0 %v5873_v60  ;;  %v6289_v60 = vor.u32 %v8153_v47, %v6288_v46  ;;  %v6265_v46 = vor.u32 %v8147_v39, %v6264_v38  ;;  %v6192_v47 = vld [vmem:[%s8663_s20 + $0x680] sm:$0xf]  ;;  %v8129_v48 = vld [vmem:[%s8663_s20 + $0x684] sm:$0xf0]  ;;  %v6424_v29 = vld [vmem:[%s8663_s20 + $0x850] sm:$0xf] }
  0x71   : > { %4314 = vmatpush.bf16.msra.mxu1 %v5937_v0  ;;  %v6353_v0 = vor.u32 %v8169_v57, %v6352_v56  ;;  %v6320_v56 = vld [vmem:[%s8663_s20 + $0x780] sm:$0xf]  ;;  %v8161_v57 = vld [vmem:[%s8663_s20 + $0x784] sm:$0xf0]  ;;  %v8187_v30 = vld [vmem:[%s8663_s20 + $0x854] sm:$0xf0] }
  0x72   : > { %4327 = vmatpush.bf16.msra.mxu2 %v6001_v1  ;;  %v8135_v1 = vld [vmem:[%s8663_s20 + $0x6b4] sm:$0xf0]  ;;  %v6488_v33 = vld [vmem:[%s8663_s20 + $0x8d0] sm:$0xf] }
  0x73   : > { %4340 = vmatpush.bf16.msra.mxu3 %v6065_v4  ;;  %4302 = vmatmul.bf16.vlgmr.msra.gmra.mxu0 %v8873_v10  ;;  %v6344_v4 = vld [vmem:[%s8663_s20 + $0x7b0] sm:$0xf]  ;;  %v8203_v37 = vld [vmem:[%s8663_s20 + $0x8d4] sm:$0xf0] }
  0x74   : > { %4346 = vmatpush.bf16.msrb.mxu0 %v6185_v5  ;;  %4315 = vmatmul.bf16.vlgmr.msra.gmra.mxu1 %v8877_v13  ;;  %v8167_v5 = vld [vmem:[%s8663_s20 + $0x7b4] sm:$0xf0]  ;;  %v6552_v38 = vld [vmem:[%s8663_s20 + $0x950] sm:$0xf] }
  0x75   : > { %4359 = vmatpush.bf16.msrb.mxu1 %v6249_v6  ;;  %4328 = vmatmul.bf16.vlgmr.msra.gmra.mxu2 %v8875_v11  ;;  %v6153_v6 = vor.u32 %v8119_v62, %v6152_v61  ;;  %v6345_v16 = vor.u32 %v8167_v5, %v6344_v4  ;;  %v8207_v62 = vld [vmem:[%s8663_s20 + $0x8f4] sm:$0xf0]  ;;  %v6321_v5 = vor.u32 %v8161_v57, %v6320_v56  ;;  %v6608_v56 = vld [vmem:[%s8663_s20 + $0x9c0] sm:$0xf]  ;;  %v8233_v57 = vld [vmem:[%s8663_s20 + $0x9c4] sm:$0xf0] }
  0x76   : > { %4372 = vmatpush.bf16.msrb.mxu2 %v6313_v7  ;;  %4341 = vmatmul.bf16.vlgmr.msra.gmra.mxu3 %v8879_v14  ;;  %v6217_v7 = vor.u32 %v8135_v1, %v6216_v63  ;;  %v6568_v63 = vld [vmem:[%s8663_s20 + $0x970] sm:$0xf]  ;;  %v6193_v1 = vor.u32 %v8129_v48, %v6192_v47  ;;  %v8239_v4 = vld [vmem:[%s8663_s20 + $0x9f4] sm:$0xf0]  ;;  %v6480_v47 = vld [vmem:[%s8663_s20 + $0x8c0] sm:$0xf] }
  0x77   : > { %4385 = vmatpush.bf16.msrb.mxu3 %v6377_v15  ;;  %v6208_v15 = vld [vmem:[%s8663_s20 + $0x6a0] sm:$0xf]  ;;  %v8219_v39 = vld [vmem:[%s8663_s20 + $0x954] sm:$0xf0] }
  0x78   : > { %4347 = vmatpush.bf16.msrb.mxu0 %v6177_v23  ;;  %v8165_v23 = vld [vmem:[%s8663_s20 + $0x7a4] sm:$0xf0] }
  0x79   : > { %4360 = vmatpush.bf16.msrb.mxu1 %v6241_v27  ;;  %v6209_v27 = vor.u32 %v8133_v17, %v6208_v15  ;;  %v6496_v15 = vld [vmem:[%s8663_s20 + $0x8e0] sm:$0xf]  ;;  %v8205_v17 = vld [vmem:[%s8663_s20 + $0x8e4] sm:$0xf0] }
  0x7a   : > { %4373 = vmatpush.bf16.msrb.mxu2 %v6305_v28  ;;  %v6273_v28 = vor.u32 %v8149_v19, %v6272_v18  ;;  %v6560_v18 = vld [vmem:[%s8663_s20 + $0x960] sm:$0xf]  ;;  %v8221_v19 = vld [vmem:[%s8663_s20 + $0x964] sm:$0xf0] }
  0x7b   : > { %4386 = vmatpush.bf16.msrb.mxu3 %v6369_v34  ;;  %v6337_v34 = vor.u32 %v8165_v23, %v6336_v20  ;;  %v6624_v20 = vld [vmem:[%s8663_s20 + $0x9e0] sm:$0xf]  ;;  %v8237_v23 = vld [vmem:[%s8663_s20 + $0x9e4] sm:$0xf0] }
  0x7c   : > { %4348 = vmatpush.bf16.msrb.mxu0 %v6169_v43  ;;  %v6128_v43 = vld [vmem:[%s8663_s20 + $0x600] sm:$0xf] }
  0x7d   : > { %4361 = vmatpush.bf16.msrb.mxu1 %v6233_v49  ;;  %v6256_v49 = vld [vmem:[%s8663_s20 + $0x700] sm:$0xf]  ;;  %v6129_v61 = vor.u32 %v8113_v44, %v6128_v43  ;;  %v6489_v43 = vor.u32 %v8203_v37, %v6488_v33  ;;  %v6553_v44 = vor.u32 %v8219_v39, %v6552_v38  ;;  %v6456_v33 = vld [vmem:[%s8663_s20 + $0x890] sm:$0xf]  ;;  %v8195_v37 = vld [vmem:[%s8663_s20 + $0x894] sm:$0xf0] }
  0x7e   : > { %4374 = vmatpush.bf16.msrb.mxu2 %v6297_v50  ;;  %v6329_v50 = vor.u32 %v8163_v41, %v6328_v40  ;;  %v6616_v40 = vld [vmem:[%s8663_s20 + $0x9d0] sm:$0xf]  ;;  %v8235_v41 = vld [vmem:[%s8663_s20 + $0x9d4] sm:$0xf0] }
  0x7f   : > { %4387 = vmatpush.bf16.msrb.mxu3 %v6361_v53  ;;  %v8145_v53 = vld [vmem:[%s8663_s20 + $0x704] sm:$0xf0]  ;;  %v6617_v48 = vor.u32 %v8235_v41, %v6616_v40  ;;  %v6520_v38 = vld [vmem:[%s8663_s20 + $0x910] sm:$0xf]  ;;  %v8211_v39 = vld [vmem:[%s8663_s20 + $0x914] sm:$0xf0] }
  0x80   : > { %4349 = vmatpush.bf16.msrb.mxu0 %v6161_v58  ;;  %v6440_v58 = vld [vmem:[%s8663_s20 + $0x870] sm:$0xf]  ;;  %v6257_v2 = vor.u32 %v8145_v53, %v6256_v49  ;;  %v8201_v49 = vld [vmem:[%s8663_s20 + $0x8c4] sm:$0xf0]  ;;  %v8227_v41 = vld [vmem:[%s8663_s20 + $0x994] sm:$0xf0] }
  0x81   : > { %4362 = vmatpush.bf16.msrb.mxu1 %v6225_v59  ;;  %v8191_v59 = vld [vmem:[%s8663_s20 + $0x874] sm:$0xf0]  ;;  %v8217_v53 = vld [vmem:[%s8663_s20 + $0x944] sm:$0xf0]  ;;  %v6584_v40 = vld [vmem:[%s8663_s20 + $0x990] sm:$0xf] }
  0x82   : > { %4375 = vmatpush.bf16.msrb.mxu2 %v6289_v60  ;;  %v6504_v60 = vld [vmem:[%s8663_s20 + $0x8f0] sm:$0xf] }
  0x83   : > { %4388 = vmatpush.bf16.msrb.mxu3 %v6353_v0  ;;  %v8223_v0 = vld [vmem:[%s8663_s20 + $0x974] sm:$0xf0] }
  0x84   : > { %4350 = vmatpush.bf16.msrb.mxu0 %v6153_v6  ;;  %v6441_v6 = vor.u32 %v8191_v59, %v6440_v58  ;;  %v6481_v59 = vor.u32 %v8201_v49, %v6480_v47  ;;  %v6448_v47 = vld [vmem:[%s8663_s20 + $0x880] sm:$0xf] }
  0x85   : > { %4363 = vmatpush.bf16.msrb.mxu1 %v6217_v7  ;;  %v6505_v7 = vor.u32 %v8207_v62, %v6504_v60  ;;  %v8183_v62 = vld [vmem:[%s8663_s20 + $0x834] sm:$0xf0]  ;;  %v6512_v49 = vld [vmem:[%s8663_s20 + $0x900] sm:$0xf] }
  0x86   : > { %4376 = vmatpush.bf16.msrb.mxu2 %v6281_v8  ;;  %v6569_v8 = vor.u32 %v8223_v0, %v6568_v63  ;;  %v6472_v63 = vld [vmem:[%s8663_s20 + $0x8b0] sm:$0xf]  ;;  %v6609_v0 = vor.u32 %v8233_v57, %v6608_v56  ;;  %v6576_v56 = vld [vmem:[%s8663_s20 + $0x980] sm:$0xf]  ;;  %v8225_v57 = vld [vmem:[%s8663_s20 + $0x984] sm:$0xf0] }
  0x87   : > { %4389 = vmatpush.bf16.msrb.mxu3 %v6345_v16  ;;  %v6633_v16 = vor.u32 %v8239_v4, %v6632_v3  ;;  %v8215_v3 = vld [vmem:[%s8663_s20 + $0x934] sm:$0xf0]  ;;  %v6600_v4 = vld [vmem:[%s8663_s20 + $0x9b0] sm:$0xf] }
  0x88   : > { %4351 = vmatpush.bf16.msrb.mxu0 %v6145_v24  ;;  %v6433_v24 = vor.u32 %v8189_v12, %v6432_v9  ;;  %v6400_v9 = vld [vmem:[%s8663_s20 + $0x820] sm:$0xf]  ;;  %v8181_v12 = vld [vmem:[%s8663_s20 + $0x824] sm:$0xf0] }
  0x89   : > { %4364 = vmatpush.bf16.msrb.mxu1 %v6209_v27  ;;  %v6497_v27 = vor.u32 %v8205_v17, %v6496_v15  ;;  %v6464_v15 = vld [vmem:[%s8663_s20 + $0x8a0] sm:$0xf]  ;;  %v8197_v17 = vld [vmem:[%s8663_s20 + $0x8a4] sm:$0xf0] }
  0x8a   : > { %4377 = vmatpush.bf16.msrb.mxu2 %v6273_v28  ;;  %v6561_v28 = vor.u32 %v8221_v19, %v6560_v18  ;;  %v6528_v18 = vld [vmem:[%s8663_s20 + $0x920] sm:$0xf]  ;;  %v8213_v19 = vld [vmem:[%s8663_s20 + $0x924] sm:$0xf0] }
  0x8b   : > { %4390 = vmatpush.bf16.msrb.mxu3 %v6337_v34  ;;  %v6625_v34 = vor.u32 %v8237_v23, %v6624_v20  ;;  %v6592_v20 = vld [vmem:[%s8663_s20 + $0x9a0] sm:$0xf]  ;;  %v8229_v23 = vld [vmem:[%s8663_s20 + $0x9a4] sm:$0xf0] }
  0x8c   : > { %4352 = vmatpush.bf16.msrb.mxu0 %v6137_v42  ;;  %v6425_v42 = vor.u32 %v8187_v30, %v6424_v29  ;;  %v6392_v29 = vld [vmem:[%s8663_s20 + $0x810] sm:$0xf]  ;;  %v8179_v30 = vld [vmem:[%s8663_s20 + $0x814] sm:$0xf0] }
  0x8d   : > { %4365 = vmatpush.bf16.msrb.mxu1 %v6201_v45  ;;  %v6416_v45 = vld [vmem:[%s8663_s20 + $0x840] sm:$0xf] }
  0x8e   : > { %4378 = vmatpush.bf16.msrb.mxu2 %v6265_v46  ;;  %v8185_v46 = vld [vmem:[%s8663_s20 + $0x844] sm:$0xf0] }
  0x8f   : > { %4391 = vmatpush.bf16.msrb.mxu3 %v6329_v50  ;;  %v6544_v50 = vld [vmem:[%s8663_s20 + $0x940] sm:$0xf]  ;;  %v6417_v58 = vor.u32 %v8185_v46, %v6416_v45  ;;  %v6457_v45 = vor.u32 %v8195_v37, %v6456_v33  ;;  %v6521_v46 = vor.u32 %v8211_v39, %v6520_v38  ;;  %v6680_v37 = vld [vmem:[%s8663_s20 + $0xa50] sm:$0xf]  ;;  %v8251_v38 = vld [vmem:[%s8663_s20 + $0xa54] sm:$0xf0] }
  0x90   : > { %4353 = vmatpush.bf16.msrb.mxu0 %v6129_v61  ;;  %v6545_v60 = vor.u32 %v8217_v53, %v6544_v50  ;;  %v6408_v61 = vld [vmem:[%s8663_s20 + $0x830] sm:$0xf]  ;;  %v6585_v50 = vor.u32 %v8227_v41, %v6584_v40  ;;  %v8209_v53 = vld [vmem:[%s8663_s20 + $0x904] sm:$0xf0]  ;;  %v8267_v41 = vld [vmem:[%s8663_s20 + $0xad4] sm:$0xf0] }
  0x91   : > { %4366 = vmatpush.bf16.msrb.mxu1 %v6193_v1  ;;  %v8199_v1 = vld [vmem:[%s8663_s20 + $0x8b4] sm:$0xf0]  ;;  %v6744_v39 = vld [vmem:[%s8663_s20 + $0xad0] sm:$0xf] }
  0x92   : > { %4379 = vmatpush.bf16.msrb.mxu2 %v6257_v2  ;;  %v6536_v2 = vld [vmem:[%s8663_s20 + $0x930] sm:$0xf] }
  0x93   : > { %4392 = vmatpush.bf16.msrb.mxu3 %v6321_v5  ;;  %4354 = vmatmul.bf16.vlgmr.msrb.gmra.mxu0 %v8941_v51  ;;  %v8231_v5 = vld [vmem:[%s8663_s20 + $0x9b4] sm:$0xf0] }
  0x94   : > { %4398 = vmatpush.bf16.msra.mxu0 %v6441_v6  ;;  %4367 = vmatmul.bf16.vlgmr.msrb.gmra.mxu1 %v8945_v54  ;;  %v6409_v6 = vor.u32 %v8183_v62, %v6408_v61  ;;  %v8271_v62 = vld [vmem:[%s8663_s20 + $0xaf4] sm:$0xf0] }
  0x95   : > { %4411 = vmatpush.bf16.msra.mxu1 %v6505_v7  ;;  %4380 = vmatmul.bf16.vlgmr.msrb.gmra.mxu2 %v8943_v52  ;;  %v6473_v7 = vor.u32 %v8199_v1, %v6472_v63  ;;  %v6824_v63 = vld [vmem:[%s8663_s20 + $0xb70] sm:$0xf] }
  0x96   : > { %4424 = vmatpush.bf16.msra.mxu2 %v6569_v8  ;;  %4393 = vmatmul.bf16.vlgmr.msrb.gmra.mxu3 %v8947_v55  ;;  %v6537_v8 = vor.u32 %v8215_v3, %v6536_v2  ;;  %v6513_v2 = vor.u32 %v8209_v53, %v6512_v49  ;;  %v6888_v3 = vld [vmem:[%s8663_s20 + $0xbf0] sm:$0xf]  ;;  %v6672_v49 = vld [vmem:[%s8663_s20 + $0xa40] sm:$0xf] }
  0x97   : > { %4437 = vmatpush.bf16.msra.mxu3 %v6633_v16  ;;  %v6601_v16 = vor.u32 %v8231_v5, %v6600_v4  ;;  %v8303_v4 = vld [vmem:[%s8663_s20 + $0xbf4] sm:$0xf0]  ;;  %v6577_v5 = vor.u32 %v8225_v57, %v6576_v56  ;;  %v6736_v53 = vld [vmem:[%s8663_s20 + $0xac0] sm:$0xf]  ;;  %v8265_v57 = vld [vmem:[%s8663_s20 + $0xac4] sm:$0xf0] }
  0x98   : > { %4399 = vmatpush.bf16.msra.mxu0 %v6433_v24  ;;  %v6401_v24 = vor.u32 %v8181_v12, %v6400_v9  ;;  %v9059_v9 = vld.sshfl [vmem:[#allocation1] sm:$0xff pattern:$0x73625140] }
  0x99   : > { %4412 = vmatpush.bf16.msra.mxu1 %v6497_v27  ;;  %v6465_v27 = vor.u32 %v8197_v17, %v6464_v15  ;;  %v6688_v12 = vld [vmem:[%s8663_s20 + $0xa60] sm:$0xf]  ;;  %v8253_v15 = vld [vmem:[%s8663_s20 + $0xa64] sm:$0xf0]  ;;  %v6889_v17 = vor.u32 %v8303_v4, %v6888_v3  ;;  %v6728_v3 = vld [vmem:[%s8663_s20 + $0xab0] sm:$0xf] }
  0x9a   : > { %4425 = vmatpush.bf16.msra.mxu2 %v6561_v28  ;;  %v6529_v28 = vor.u32 %v8213_v19, %v6528_v18  ;;  %v9064_v18 = vld.sshfl [vmem:[#allocation1 + $0x10] sm:$0xff pattern:$0x73625140]  ;;  %v8269_v19 = vld [vmem:[%s8663_s20 + $0xae4] sm:$0xf0] }
  0x9b   : > { %4438 = vmatpush.bf16.msra.mxu3 %v6625_v34  ;;  %v6593_v34 = vor.u32 %v8229_v23, %v6592_v20  ;;  %v6816_v20 = vld [vmem:[%s8663_s20 + $0xb60] sm:$0xf]  ;;  %v8285_v23 = vld [vmem:[%s8663_s20 + $0xb64] sm:$0xf0] }
  0x9c   : > { %4400 = vmatpush.bf16.msra.mxu0 %v6425_v42  ;;  %v6393_v42 = vor.u32 %v8179_v30, %v6392_v29  ;;  %v9074_v29 = vld.sshfl [vmem:[#allocation1 + $0x18] sm:$0xff pattern:$0x73625140]  ;;  %v6689_v30 = vor.u32 %v8253_v15, %v6688_v12 }
  0x9d   : > { %4413 = vmatpush.bf16.msra.mxu1 %v6489_v43  ;;  %v6384_v43 = vld [vmem:[%s8663_s20 + $0x800] sm:$0xf]  ;;  %v8295_v12 = vld [vmem:[%s8663_s20 + $0xbb4] sm:$0xf0] }
  0x9e   : > { %4426 = vmatpush.bf16.msra.mxu2 %v6553_v44  ;;  %v8177_v44 = vld [vmem:[%s8663_s20 + $0x804] sm:$0xf0] }
  0x9f   : > { %4439 = vmatpush.bf16.msra.mxu3 %v6617_v48  ;;  %v8193_v48 = vld [vmem:[%s8663_s20 + $0x884] sm:$0xf0]  ;;  %v6385_v61 = vor.u32 %v8177_v44, %v6384_v43  ;;  %v8283_v43 = vld [vmem:[%s8663_s20 + $0xb54] sm:$0xf0]  ;;  %v6872_v44 = vld [vmem:[%s8663_s20 + $0xbd0] sm:$0xf] }
  0xa0   : > { %4401 = vmatpush.bf16.msra.mxu0 %v6417_v58  ;;  %v6696_v58 = vld [vmem:[%s8663_s20 + $0xa70] sm:$0xf]  ;;  %v6449_v1 = vor.u32 %v8193_v48, %v6448_v47  ;;  %v6745_v47 = vor.u32 %v8267_v41, %v6744_v39 }
  0xa1   : > { %4414 = vmatpush.bf16.msra.mxu1 %v6481_v59  ;;  %v8255_v59 = vld [vmem:[%s8663_s20 + $0xa74] sm:$0xf0] }
  0xa2   : > { %4427 = vmatpush.bf16.msra.mxu2 %v6545_v60  ;;  %v6760_v60 = vld [vmem:[%s8663_s20 + $0xaf0] sm:$0xf] }
  0xa3   : > { %4440 = vmatpush.bf16.msra.mxu3 %v6609_v0  ;;  %v8287_v0 = vld [vmem:[%s8663_s20 + $0xb74] sm:$0xf0] }
  0xa4   : > { %4402 = vmatpush.bf16.msra.mxu0 %v6409_v6  ;;  %v6697_v6 = vor.u32 %v8255_v59, %v6696_v58  ;;  %v6800_v58 = vld [vmem:[%s8663_s20 + $0xb40] sm:$0xf]  ;;  %v8281_v59 = vld [vmem:[%s8663_s20 + $0xb44] sm:$0xf0] }
  0xa5   : > { %4415 = vmatpush.bf16.msra.mxu1 %v6473_v7  ;;  %v6761_v7 = vor.u32 %v8271_v62, %v6760_v60  ;;  %v6864_v60 = vld [vmem:[%s8663_s20 + $0xbc0] sm:$0xf] }
  0xa6   : > { %4428 = vmatpush.bf16.msra.mxu2 %v6537_v8  ;;  %v6825_v8 = vor.u32 %v8287_v0, %v6824_v63  ;;  %v6737_v63 = vor.u32 %v8265_v57, %v6736_v53  ;;  %v6801_v0 = vor.u32 %v8281_v59, %v6800_v58  ;;  %v8291_v53 = vld [vmem:[%s8663_s20 + $0xb94] sm:$0xf0]  ;;  %v8241_v58 = vld [vmem:[%s8663_s20 + $0xa04] sm:$0xf0]  ;;  %v6704_v59 = vld [vmem:[%s8663_s20 + $0xa80] sm:$0xf] }
  0xa7   : > { %4441 = vmatpush.bf16.msra.mxu3 %v6601_v16  ;;  %v6752_v16 = vld [vmem:[%s8663_s20 + $0xae0] sm:$0xf] }
  0xa8   : > { %4403 = vmatpush.bf16.msra.mxu0 %v6401_v24  ;;  %v6880_v24 = vld [vmem:[%s8663_s20 + $0xbe0] sm:$0xf]  ;;  %v6753_v33 = vor.u32 %v8269_v19, %v6752_v16 }
  0xa9   : > { %4416 = vmatpush.bf16.msra.mxu1 %v6465_v27  ;;  %v8301_v27 = vld [vmem:[%s8663_s20 + $0xbe4] sm:$0xf0]  ;;  %v6656_v16 = vld [vmem:[%s8663_s20 + $0xa20] sm:$0xf] }
  0xaa   : > { %4429 = vmatpush.bf16.msra.mxu2 %v6529_v28  ;;  %v9072_v28 = vld.sshfl [vmem:[#allocation1 + $0x8] sm:$0xff pattern:$0x73625140]  ;;  %v6881_v40 = vor.u32 %v8301_v27, %v6880_v24 }
  0xab   : > { %4442 = vmatpush.bf16.msra.mxu3 %v6593_v34  ;;  %v6817_v34 = vor.u32 %v8285_v23, %v6816_v20  ;;  %v8245_v20 = vld [vmem:[%s8663_s20 + $0xa24] sm:$0xf0]  ;;  %v6720_v23 = vld [vmem:[%s8663_s20 + $0xaa0] sm:$0xf] }
  0xac   : > { %4404 = vmatpush.bf16.msra.mxu0 %v6393_v42  ;;  %v6808_v42 = vld [vmem:[%s8663_s20 + $0xb50] sm:$0xf]  ;;  %v8261_v24 = vld [vmem:[%s8663_s20 + $0xaa4] sm:$0xf0]  ;;  %v6657_v39 = vor.u32 %v8245_v20, %v6656_v16 }
  0xad   : > { %4417 = vmatpush.bf16.msra.mxu1 %v6457_v45  ;;  %v8299_v45 = vld [vmem:[%s8663_s20 + $0xbd4] sm:$0xf0]  ;;  %v6809_v48 = vor.u32 %v8283_v43, %v6808_v42  ;;  %v6721_v41 = vor.u32 %v8261_v24, %v6720_v23  ;;  %v7080_v20 = vld [vmem:[%s8663_s20 + $0xd70] sm:$0xf] }
  0xae   : > { %4430 = vmatpush.bf16.msra.mxu2 %v6521_v46  ;;  %v6681_v46 = vor.u32 %v8251_v38, %v6680_v37  ;;  %v6873_v56 = vor.u32 %v8299_v45, %v6872_v44  ;;  %v6848_v37 = vld [vmem:[%s8663_s20 + $0xba0] sm:$0xf]  ;;  %v8293_v38 = vld [vmem:[%s8663_s20 + $0xba4] sm:$0xf0]  ;;  %v8243_v43 = vld [vmem:[%s8663_s20 + $0xa14] sm:$0xf0] }
  0xaf   : > { %4443 = vmatpush.bf16.msra.mxu3 %v6585_v50  ;;  %v8249_v50 = vld [vmem:[%s8663_s20 + $0xa44] sm:$0xf0]  ;;  %v6712_v44 = vld [vmem:[%s8663_s20 + $0xa90] sm:$0xf]  ;;  %v8351_v23 = vld [vmem:[%s8663_s20 + $0xd74] sm:$0xf0] }
  0xb0   : > { %4405 = vmatpush.bf16.msra.mxu0 %v6385_v61  ;;  %v8297_v61 = vld [vmem:[%s8663_s20 + $0xbc4] sm:$0xf0]  ;;  %v6673_v62 = vor.u32 %v8249_v50, %v6672_v49  ;;  %v8275_v49 = vld [vmem:[%s8663_s20 + $0xb14] sm:$0xf0]  ;;  %v6840_v50 = vld [vmem:[%s8663_s20 + $0xb90] sm:$0xf] }
  0xb1   : > { %4418 = vmatpush.bf16.msra.mxu1 %v6449_v1  ;;  %v6664_v1 = vld [vmem:[%s8663_s20 + $0xa30] sm:$0xf]  ;;  %v6865_v4 = vor.u32 %v8297_v61, %v6864_v60  ;;  %v8257_v60 = vld [vmem:[%s8663_s20 + $0xa84] sm:$0xf0] }
  0xb2   : > { %4431 = vmatpush.bf16.msra.mxu2 %v6513_v2  ;;  %v8247_v2 = vld [vmem:[%s8663_s20 + $0xa34] sm:$0xf0]  ;;  %v6705_v24 = vor.u32 %v8257_v60, %v6704_v59  ;;  %v8365_v59 = vld [vmem:[%s8663_s20 + $0xde4] sm:$0xf0] }
  0xb3   : > { %4444 = vmatpush.bf16.msra.mxu3 %v6577_v5  ;;  %4406 = vmatmul.bf16.vlgmr.msra.gmra.mxu0 %v9059_v9  ;;  %v8263_v5 = vld [vmem:[%s8663_s20 + $0xab4] sm:$0xf0]  ;;  %v6665_v15 = vor.u32 %v8247_v2, %v6664_v1  ;;  %v8273_v1 = vld [vmem:[%s8663_s20 + $0xb04] sm:$0xf0]  ;;  %v6832_v2 = vld [vmem:[%s8663_s20 + $0xb80] sm:$0xf] }
  0xb4   : > { %4450 = vmatpush.bf16.msrb.mxu0 %v6697_v6  ;;  %4419 = vmatmul.bf16.vlgmr.msra.gmra.mxu1 %v9072_v28  ;;  %v6792_v6 = vld [vmem:[%s8663_s20 + $0xb30] sm:$0xf] }
  0xb5   : > { %4463 = vmatpush.bf16.msrb.mxu1 %v6761_v7  ;;  %4432 = vmatmul.bf16.vlgmr.msra.gmra.mxu2 %v9064_v18  ;;  %v8279_v7 = vld [vmem:[%s8663_s20 + $0xb34] sm:$0xf0] }
  0xb6   : > { %4476 = vmatpush.bf16.msrb.mxu2 %v6825_v8  ;;  %4445 = vmatmul.bf16.vlgmr.msra.gmra.mxu3 %v9074_v29  ;;  %v6856_v8 = vld [vmem:[%s8663_s20 + $0xbb0] sm:$0xf]  ;;  %v6793_v19 = vor.u32 %v8279_v7, %v6792_v6  ;;  %v4199_v61 = vpop.f32.mrf.mxu0  ;;  %v8289_v6 = vld [vmem:[%s8663_s20 + $0xb84] sm:$0xf0] }
  0xb7   : > { %4489 = vmatpush.bf16.msrb.mxu3 %v6889_v17  ;;  %v6729_v17 = vor.u32 %v8263_v5, %v6728_v3  ;;  %v6857_v27 = vor.u32 %v8295_v12, %v6856_v8  ;;  %v6841_v5 = vor.u32 %v8291_v53, %v6840_v50  ;;  %v6952_v7 = vld [vmem:[%s8663_s20 + $0xc70] sm:$0xf]  ;;  %v8319_v8 = vld [vmem:[%s8663_s20 + $0xc74] sm:$0xf0]  ;;  %v7072_v50 = vld [vmem:[%s8663_s20 + $0xd60] sm:$0xf] }
  0xb8   : > { %4451 = vmatpush.bf16.msrb.mxu0 %v6689_v30  ;;  %v6784_v30 = vld [vmem:[%s8663_s20 + $0xb20] sm:$0xf]  ;;  %v7016_v12 = vld [vmem:[%s8663_s20 + $0xcf0] sm:$0xf]  ;;  %v8349_v53 = vld [vmem:[%s8663_s20 + $0xd64] sm:$0xf0] }
  0xb9   : > { %4464 = vmatpush.bf16.msrb.mxu1 %v6753_v33  ;;  %v8277_v33 = vld [vmem:[%s8663_s20 + $0xb24] sm:$0xf0] }
  0xba   : > { %4477 = vmatpush.bf16.msrb.mxu2 %v6817_v34  ;;  %v883_v34 = vld [vmem:[%s9120_s10] sm:$0x3]  ;;  %v6785_v42 = vor.u32 %v8277_v33, %v6784_v30  ;;  %v7144_v30 = vld [vmem:[%s8663_s20 + $0xdf0] sm:$0xf]  ;;  %v8367_v33 = vld [vmem:[%s8663_s20 + $0xdf4] sm:$0xf0] }
  0xbb   : > { %4490 = vmatpush.bf16.msrb.mxu3 %v6881_v40  ;;  %v6648_v40 = vld [vmem:[%s8663_s20 + $0xa10] sm:$0xf]  ;;  %v885_v45 = vperm.slane %v883_v34, 0  ;;  %v4225_v34 = vpop.f32.mrf.mxu2 }
  0xbc   : > { %4452 = vmatpush.bf16.msrb.mxu0 %v6681_v46  ;;  %v6849_v46 = vor.u32 %v8293_v38, %v6848_v37  ;;  %v6649_v57 = vor.u32 %v8243_v43, %v6648_v40  ;;  %v6833_v37 = vor.u32 %v8289_v6, %v6832_v2  ;;  %v6953_v38 = vor.u32 %v8319_v8, %v6952_v7  ;;  %v4238_v40 = vpop.f32.mrf.mxu3  ;;  %v9158_v43 = vld.sshfl [vmem:[#allocation1 + $0x20] sm:$0xff pattern:$0x73625140]  ;;  %v6936_v2 = vld [vmem:[%s8663_s20 + $0xc50] sm:$0xf] }
  0xbd   : > { %4465 = vmatpush.bf16.msrb.mxu1 %v6745_v47  ;;  %v8259_v47 = vld [vmem:[%s8663_s20 + $0xa94] sm:$0xf0]  ;;  %v4200_v3 = vadd.f32 %v4199_v61, %v885_v45  ;;  %v8317_v45 = vld [vmem:[%s8663_s20 + $0xc64] sm:$0xf0]  ;;  %v7064_v7 = vld [vmem:[%s8663_s20 + $0xd50] sm:$0xf] }
  0xbe   : > { %4478 = vmatpush.bf16.msrb.mxu2 %v6809_v48  ;;  %v6776_v48 = vld [vmem:[%s8663_s20 + $0xb10] sm:$0xf]  ;;  %v9170_v61 = vld.sshfl [vmem:[#allocation1 + $0x28] sm:$0xff pattern:$0x73625140] }
  0xbf   : > { %4491 = vmatpush.bf16.msrb.mxu3 %v6873_v56  ;;  %v6640_v56 = vld [vmem:[%s8663_s20 + $0xa00] sm:$0xf]  ;;  %v8331_v6 = vld [vmem:[%s8663_s20 + $0xcd4] sm:$0xf0] }
  0xc0   : > { %4453 = vmatpush.bf16.msrb.mxu0 %v6673_v62  ;;  %v6713_v62 = vor.u32 %v8259_v47, %v6712_v44  ;;  %v6944_v44 = vld [vmem:[%s8663_s20 + $0xc60] sm:$0xf]  ;;  %v7145_v47 = vor.u32 %v8367_v33, %v7144_v30  ;;  %v8347_v8 = vld [vmem:[%s8663_s20 + $0xd54] sm:$0xf0] }
  0xc1   : > { %4466 = vmatpush.bf16.msrb.mxu1 %v6737_v63  ;;  %v6777_v63 = vor.u32 %v8275_v49, %v6776_v48  ;;  %v9163_v48 = vld.sshfl [vmem:[#allocation1 + $0x30] sm:$0xff pattern:$0x73625140]  ;;  %v8333_v49 = vld [vmem:[%s8663_s20 + $0xce4] sm:$0xf0] }
  0xc2   : > { %4479 = vmatpush.bf16.msrb.mxu2 %v6801_v0  ;;  %v6768_v0 = vld [vmem:[%s8663_s20 + $0xb00] sm:$0xf] }
  0xc3   : > { %4492 = vmatpush.bf16.msrb.mxu3 %v6865_v4  ;;  %v4212_v4 = vpop.f32.mrf.mxu1  ;;  %v6992_v30 = vld [vmem:[%s8663_s20 + $0xcc0] sm:$0xf] }
  0xc4   : > { %4454 = vmatpush.bf16.msrb.mxu0 %v6665_v15  ;;  %v8335_v15 = vld [vmem:[%s8663_s20 + $0xcf4] sm:$0xf0]  ;;  %v4213_v16 = vadd.f32 %v4212_v4, %v4200_v3  ;;  %v7000_v4 = vld [vmem:[%s8663_s20 + $0xcd0] sm:$0xf] }
  0xc5   : > { %4467 = vmatpush.bf16.msrb.mxu1 %v6729_v17  ;;  %v239_v17 = vld [vmem:[%s10178_s0 + $0x30] sm:$0xff]  ;;  %v8315_v3 = vld [vmem:[%s8663_s20 + $0xc54] sm:$0xf0] }
  0xc6   : > { %4480 = vmatpush.bf16.msrb.mxu2 %v6793_v19  ;;  %v6641_v19 = vor.u32 %v8241_v58, %v6640_v56  ;;  %927 = vst [vmem:[#allocation1] ss:$4 sm:$0xff] %v239_v17  ;;  %v7136_v58 = vld [vmem:[%s8663_s20 + $0xde0] sm:$0xf]  ;;  %v6937_v17 = vor.u32 %v8315_v3, %v6936_v2 }
  0xc7   : > { %4493 = vmatpush.bf16.msrb.mxu3 %v6857_v27  ;;  %v6769_v27 = vor.u32 %v8273_v1, %v6768_v0  ;;  %v7073_v1 = vor.u32 %v8349_v53, %v7072_v50 }
  0xc8   : > { %4455 = vmatpush.bf16.msrb.mxu0 %v6657_v39  ;;  %v4226_v39 = vadd.f32 %v4225_v34, %v4213_v16  ;;  %v4227_v16 = vpop.f32.mrf.mxu2  ;;  %v8329_v34 = vld [vmem:[%s8663_s20 + $0xcc4] sm:$0xf0] }
  0xc9   : > { %4468 = vmatpush.bf16.msrb.mxu1 %v6721_v41  ;;  %v7017_v41 = vor.u32 %v8335_v15, %v7016_v12  ;;  %v7128_v12 = vld [vmem:[%s8663_s20 + $0xdd0] sm:$0xf]  ;;  %v8363_v15 = vld [vmem:[%s8663_s20 + $0xdd4] sm:$0xf0]  ;;  %v8341_v16 = vld [vmem:[%s8663_s20 + $0xd24] sm:$0xf0] }
  0xca   : > { %4481 = vmatpush.bf16.msrb.mxu2 %v6785_v42  ;;  %v7081_v42 = vor.u32 %v8351_v23, %v7080_v20  ;;  %v4239_v56 = vadd.f32 %v4238_v40, %v4226_v39  ;;  %v7001_v20 = vor.u32 %v8331_v6, %v7000_v4  ;;  %v7065_v23 = vor.u32 %v8347_v8, %v7064_v7  ;;  %v7120_v39 = vld [vmem:[%s8663_s20 + $0xdc0] sm:$0xf]  ;;  %v8361_v40 = vld [vmem:[%s8663_s20 + $0xdc4] sm:$0xf0] }
  0xcb   : > { %4494 = vmatpush.bf16.msrb.mxu3 %v6849_v46  ;;  %v7008_v46 = vld [vmem:[%s8663_s20 + $0xce0] sm:$0xf]  ;;  %v4214_v60 = vpop.f32.mrf.mxu1  ;;  %v7129_v33 = vor.u32 %v8363_v15, %v7128_v12  ;;  %v8325_v12 = vld [vmem:[%s8663_s20 + $0xca4] sm:$0xf0] }
  0xcc   : > { %4456 = vmatpush.bf16.msrb.mxu0 %v6649_v57  ;;  %v4201_v57 = vpop.f32.mrf.mxu0  ;;  %v7009_v0 = vor.u32 %v8333_v49, %v7008_v46  ;;  %v6920_v46 = vld [vmem:[%s8663_s20 + $0xc30] sm:$0xf]  ;;  %v8343_v60 = vld [vmem:[%s8663_s20 + $0xd34] sm:$0xf0]  ;;  %v6912_v4 = vld [vmem:[%s8663_s20 + $0xc20] sm:$0xf] }
  0xcd   : > { %4469 = vmatpush.bf16.msrb.mxu1 %v6713_v62  ;;  %v9172_v62 = vld.sshfl [vmem:[#allocation1 + $0x38] sm:$0xff pattern:$0x73625140]  ;;  %v6984_v49 = vld [vmem:[%s8663_s20 + $0xcb0] sm:$0xf]  ;;  %v7121_v57 = vor.u32 %v8361_v40, %v7120_v39 }
  0xce   : > { %4482 = vmatpush.bf16.msrb.mxu2 %v6777_v63  ;;  %v6945_v63 = vor.u32 %v8317_v45, %v6944_v44  ;;  %v6993_v44 = vor.u32 %v8329_v34, %v6992_v30  ;;  %v6976_v6 = vld [vmem:[%s8663_s20 + $0xca0] sm:$0xf]  ;;  %v6968_v39 = vld [vmem:[%s8663_s20 + $0xc90] sm:$0xf] }
  0xcf   : > { %4495 = vmatpush.bf16.msrb.mxu3 %v6841_v5  ;;  %v7137_v5 = vor.u32 %v8365_v59, %v7136_v58  ;;  %v8327_v58 = vld [vmem:[%s8663_s20 + $0xcb4] sm:$0xf0]  ;;  %v7048_v59 = vld [vmem:[%s8663_s20 + $0xd30] sm:$0xf]  ;;  %v7040_v15 = vld [vmem:[%s8663_s20 + $0xd20] sm:$0xf] }
  0xd0   : > { %4457 = vmatpush.bf16.msrb.mxu0 %v6641_v19  ;;  %v4240_v19 = vpop.f32.mrf.mxu3  ;;  %v7049_v3 = vor.u32 %v8343_v60, %v7048_v59  ;;  %v7041_v34 = vor.u32 %v8341_v16, %v7040_v15  ;;  %v7336_v16 = vld [vmem:[%s8663_s20 + $0xf70] sm:$0xf] }
  0xd1   : > { %4470 = vmatpush.bf16.msrb.mxu1 %v6705_v24  ;;  %v6928_v24 = vld [vmem:[%s8663_s20 + $0xc40] sm:$0xf] }
  0xd2   : > { %4483 = vmatpush.bf16.msrb.mxu2 %v6769_v27  ;;  %v8313_v27 = vld [vmem:[%s8663_s20 + $0xc44] sm:$0xf0] }
  0xd3   : > { %4496 = vmatpush.bf16.msrb.mxu3 %v6833_v37  ;;  %4458 = vmatmul.bf16.vlgmr.msrb.gmra.mxu0 %v9158_v43  ;;  %v7056_v37 = vld [vmem:[%s8663_s20 + $0xd40] sm:$0xf]  ;;  %v4264_v53 = vpop.f32.mrf.mxu1 }
  0xd4   : > { %4502 = vmatpush.bf16.msra.mxu0 %v6953_v38  ;;  %4471 = vmatmul.bf16.vlgmr.msrb.gmra.mxu1 %v9170_v61  ;;  %v8345_v38 = vld [vmem:[%s8663_s20 + $0xd44] sm:$0xf0] }
  0xd5   : > { %4515 = vmatpush.bf16.msra.mxu1 %v7017_v41  ;;  %4484 = vmatmul.bf16.vlgmr.msrb.gmra.mxu2 %v9163_v48  ;;  %v6929_v41 = vor.u32 %v8313_v27, %v6928_v24  ;;  %v7057_v45 = vor.u32 %v8345_v38, %v7056_v37  ;;  %v6904_v37 = vld [vmem:[%s8663_s20 + $0xc10] sm:$0xf]  ;;  %v8307_v38 = vld [vmem:[%s8663_s20 + $0xc14] sm:$0xf0] }
  0xd6   : > { %4528 = vmatpush.bf16.msra.mxu2 %v7081_v42  ;;  %4497 = vmatmul.bf16.vlgmr.msrb.gmra.mxu3 %v9172_v62  ;;  %v4251_v42 = vpop.f32.mrf.mxu0 }
  0xd7   : > { %4541 = vmatpush.bf16.msra.mxu3 %v7145_v47  ;;  %v8311_v47 = vld [vmem:[%s8663_s20 + $0xc34] sm:$0xf0]  ;;  %v4252_v50 = vadd.f32 %v4251_v42, %v4239_v56  ;;  %v6985_v56 = vor.u32 %v8327_v58, %v6984_v49  ;;  %v6896_v49 = vld [vmem:[%s8663_s20 + $0xc00] sm:$0xf]  ;;  %v8321_v58 = vld [vmem:[%s8663_s20 + $0xc84] sm:$0xf0] }
  0xd8   : > { %4503 = vmatpush.bf16.msra.mxu0 %v6945_v63  ;;  %v7112_v63 = vld [vmem:[%s8663_s20 + $0xdb0] sm:$0xf]  ;;  %v6921_v2 = vor.u32 %v8311_v47, %v6920_v46  ;;  %v4277_v7 = vpop.f32.mrf.mxu2  ;;  %v8323_v42 = vld [vmem:[%s8663_s20 + $0xc94] sm:$0xf0] }
  0xd9   : > { %4516 = vmatpush.bf16.msra.mxu1 %v7009_v0  ;;  %v8359_v0 = vld [vmem:[%s8663_s20 + $0xdb4] sm:$0xf0]  ;;  %v4290_v19 = vpop.f32.mrf.mxu3  ;;  %v7096_v46 = vld [vmem:[%s8663_s20 + $0xd90] sm:$0xf]  ;;  %v6969_v59 = vor.u32 %v8323_v42, %v6968_v39  ;;  %v7200_v39 = vld [vmem:[%s8663_s20 + $0xe60] sm:$0xf] }
  0xda   : > { %4529 = vmatpush.bf16.msra.mxu2 %v7073_v1  ;;  %v4265_v1 = vadd.f32 %v4264_v53, %v4252_v50  ;;  %v7113_v8 = vor.u32 %v8359_v0, %v7112_v63  ;;  %v8355_v47 = vld [vmem:[%s8663_s20 + $0xd94] sm:$0xf0]  ;;  %v6905_v50 = vor.u32 %v8307_v38, %v6904_v37  ;;  %v8305_v53 = vld [vmem:[%s8663_s20 + $0xc04] sm:$0xf0]  ;;  %v7024_v63 = vld [vmem:[%s8663_s20 + $0xd00] sm:$0xf] }
  0xdb   : > { %4542 = vmatpush.bf16.msra.mxu3 %v7137_v5  ;;  %v8309_v5 = vld [vmem:[%s8663_s20 + $0xc24] sm:$0xf0]  ;;  %v4266_v40 = vpop.f32.mrf.mxu1  ;;  %v6897_v15 = vor.u32 %v8305_v53, %v6896_v49  ;;  %v9239_v38 = vld.sshfl [vmem:[#allocation1] sm:$0xff pattern:$0x73625140] }
  0xdc   : > { %4504 = vmatpush.bf16.msra.mxu0 %v6937_v17  ;;  %v4278_v17 = vadd.f32 %v4277_v7, %v4265_v1  ;;  %v6913_v24 = vor.u32 %v8309_v5, %v6912_v4  ;;  %v8337_v0 = vld [vmem:[%s8663_s20 + $0xd04] sm:$0xf0]  ;;  %v7088_v1 = vld [vmem:[%s8663_s20 + $0xd80] sm:$0xf]  ;;  %v7208_v4 = vld [vmem:[%s8663_s20 + $0xe70] sm:$0xf] }
  0xdd   : > { %4517 = vmatpush.bf16.msra.mxu1 %v7001_v20  ;;  %v7104_v20 = vld [vmem:[%s8663_s20 + $0xda0] sm:$0xf]  ;;  %v8383_v5 = vld [vmem:[%s8663_s20 + $0xe74] sm:$0xf0]  ;;  %v7272_v7 = vld [vmem:[%s8663_s20 + $0xef0] sm:$0xf] }
  0xde   : > { %4530 = vmatpush.bf16.msra.mxu2 %v7065_v23  ;;  %v8357_v23 = vld [vmem:[%s8663_s20 + $0xda4] sm:$0xf0]  ;;  %v9210_v27 = vadd.f32 %v4290_v19, %v4278_v17  ;;  %v4253_v30 = vpop.f32.mrf.mxu0  ;;  %v8415_v17 = vld [vmem:[%s8663_s20 + $0xf74] sm:$0xf0]  ;;  %v7392_v49 = vld [vmem:[%s8663_s20 + $0xfe0] sm:$0xf] }
  0xdf   : > { %4543 = vmatpush.bf16.msra.mxu3 %v7129_v33  ;;  %v6977_v33 = vor.u32 %v8325_v12, %v6976_v6  ;;  %v240_v12 = vld [vmem:[%s10178_s0 + $0x38] sm:$0xff]  ;;  %v7337_v37 = vor.u32 %v8415_v17, %v7336_v16  ;;  %v8381_v40 = vld [vmem:[%s8663_s20 + $0xe64] sm:$0xf0]  ;;  %v7248_v17 = vld [vmem:[%s8663_s20 + $0xec0] sm:$0xf] }
  0xe0   : > { %4505 = vmatpush.bf16.msra.mxu0 %v6929_v41  ;;  %v7105_v41 = vor.u32 %v8357_v23, %v7104_v20  ;;  %929 = vst [vmem:[#allocation1 + $0x20] ss:$4 sm:$0xff] %v240_v12  ;;  %v7025_v20 = vor.u32 %v8337_v0, %v7024_v63  ;;  %v7400_v23 = vld [vmem:[%s8663_s20 + $0xff0] sm:$0xf]  ;;  %v8379_v0 = vld [vmem:[%s8663_s20 + $0xe54] sm:$0xf0] }
  0xe1   : > { %4518 = vmatpush.bf16.msra.mxu1 %v6993_v44  ;;  %v7032_v44 = vld [vmem:[%s8663_s20 + $0xd10] sm:$0xf]  ;;  %v4292_v6 = vpop.f32.mrf.mxu3  ;;  %v9251_v53 = vld.sshfl [vmem:[#allocation1 + $0x8] sm:$0xff pattern:$0x73625140] }
  0xe2   : > { %4531 = vmatpush.bf16.msra.mxu2 %v7057_v45  ;;  %v8339_v45 = vld [vmem:[%s8663_s20 + $0xd14] sm:$0xf0]  ;;  %v7192_v63 = vld [vmem:[%s8663_s20 + $0xe50] sm:$0xf]  ;;  %v8377_v16 = vld [vmem:[%s8663_s20 + $0xe44] sm:$0xf0] }
  0xe3   : > { %4544 = vmatpush.bf16.msra.mxu3 %v7121_v57  ;;  %v6960_v57 = vld [vmem:[%s8663_s20 + $0xc80] sm:$0xf]  ;;  %v7033_v60 = vor.u32 %v8339_v45, %v7032_v44  ;;  %v9244_v44 = vld.sshfl [vmem:[#allocation1 + $0x10] sm:$0xff pattern:$0x73625140] }
  0xe4   : > { %4506 = vmatpush.bf16.msra.mxu0 %v6921_v2  ;;  %v4279_v2 = vpop.f32.mrf.mxu2  ;;  %v6961_v19 = vor.u32 %v8321_v58, %v6960_v57  ;;  %v8397_v45 = vld [vmem:[%s8663_s20 + $0xee4] sm:$0xf0]  ;;  %v9253_v57 = vld.sshfl [vmem:[#allocation1 + $0x18] sm:$0xff pattern:$0x73625140]  ;;  %v7201_v58 = vor.u32 %v8381_v40, %v7200_v39 }
  0xe5   : > { %4519 = vmatpush.bf16.msra.mxu1 %v6985_v56  ;;  %v7097_v56 = vor.u32 %v8355_v47, %v7096_v46  ;;  %v7328_v46 = vld [vmem:[%s8663_s20 + $0xf60] sm:$0xf]  ;;  %v8413_v47 = vld [vmem:[%s8663_s20 + $0xf64] sm:$0xf0]  ;;  %v8427_v6 = vld [vmem:[%s8663_s20 + $0xfd4] sm:$0xf0] }
  0xe6   : > { %4532 = vmatpush.bf16.msra.mxu2 %v7049_v3  ;;  %v8353_v3 = vld [vmem:[%s8663_s20 + $0xd84] sm:$0xf0] }
  0xe7   : > { %4545 = vmatpush.bf16.msra.mxu3 %v7113_v8  ;;  %v8399_v8 = vld [vmem:[%s8663_s20 + $0xef4] sm:$0xf0]  ;;  %v7089_v30 = vor.u32 %v8353_v3, %v7088_v1  ;;  %v7256_v1 = vld [vmem:[%s8663_s20 + $0xed0] sm:$0xf] }
  0xe8   : > { %4507 = vmatpush.bf16.msra.mxu0 %v6913_v24  ;;  %v8431_v24 = vld [vmem:[%s8663_s20 + $0xff4] sm:$0xf0]  ;;  %v7320_v3 = vld [vmem:[%s8663_s20 + $0xf50] sm:$0xf] }
  0xe9   : > { %4520 = vmatpush.bf16.msra.mxu1 %v6977_v33  ;;  %v7209_v33 = vor.u32 %v8383_v5, %v7208_v4  ;;  %v7401_v42 = vor.u32 %v8431_v24, %v7400_v23  ;;  %v8411_v4 = vld [vmem:[%s8663_s20 + $0xf54] sm:$0xf0]  ;;  %v7384_v5 = vld [vmem:[%s8663_s20 + $0xfd0] sm:$0xf]  ;;  %v7312_v23 = vld [vmem:[%s8663_s20 + $0xf40] sm:$0xf] }
  0xea   : > { %4533 = vmatpush.bf16.msra.mxu2 %v7041_v34  ;;  %v7273_v34 = vor.u32 %v8399_v8, %v7272_v7  ;;  %v7193_v7 = vor.u32 %v8379_v0, %v7192_v63  ;;  %v7321_v12 = vor.u32 %v8411_v4, %v7320_v3  ;;  %v8409_v24 = vld [vmem:[%s8663_s20 + $0xf44] sm:$0xf0]  ;;  %v8423_v63 = vld [vmem:[%s8663_s20 + $0xfb4] sm:$0xf0]  ;;  %v7232_v4 = vld [vmem:[%s8663_s20 + $0xea0] sm:$0xf] }
  0xeb   : > { %4546 = vmatpush.bf16.msra.mxu3 %v7105_v41  ;;  %v7264_v41 = vld [vmem:[%s8663_s20 + $0xee0] sm:$0xf]  ;;  %v8373_v3 = vld [vmem:[%s8663_s20 + $0xe24] sm:$0xf0] }
  0xec   : > { %4508 = vmatpush.bf16.msra.mxu0 %v6905_v50  ;;  %v8429_v50 = vld [vmem:[%s8663_s20 + $0xfe4] sm:$0xf0] }
  0xed   : > { %4521 = vmatpush.bf16.msra.mxu1 %v6969_v59  ;;  %v7265_v59 = vor.u32 %v8397_v45, %v7264_v41  ;;  %v7393_v2 = vor.u32 %v8429_v50, %v7392_v49  ;;  %v7176_v45 = vld [vmem:[%s8663_s20 + $0xe30] sm:$0xf] }
  0xee   : > { %4534 = vmatpush.bf16.msra.mxu2 %v7033_v60  ;;  %v7329_v60 = vor.u32 %v8413_v47, %v7328_v46  ;;  %v8375_v46 = vld [vmem:[%s8663_s20 + $0xe34] sm:$0xf0]  ;;  %v7240_v47 = vld [vmem:[%s8663_s20 + $0xeb0] sm:$0xf] }
  0xef   : > { %4547 = vmatpush.bf16.msra.mxu3 %v7097_v56  ;;  %v8395_v56 = vld [vmem:[%s8663_s20 + $0xed4] sm:$0xf0]  ;;  %v7177_v0 = vor.u32 %v8375_v46, %v7176_v45  ;;  %v7288_v45 = vld [vmem:[%s8663_s20 + $0xf10] sm:$0xf] }
  0xf0   : > { %4509 = vmatpush.bf16.msra.mxu0 %v6897_v15  ;;  %v7257_v8 = vor.u32 %v8395_v56, %v7256_v1  ;;  %v7184_v15 = vld [vmem:[%s8663_s20 + $0xe40] sm:$0xf]  ;;  %v8403_v46 = vld [vmem:[%s8663_s20 + $0xf14] sm:$0xf0] }
  0xf1   : > { %4522 = vmatpush.bf16.msra.mxu1 %v6961_v19  ;;  %v7385_v19 = vor.u32 %v8427_v6, %v7384_v5  ;;  %v7185_v39 = vor.u32 %v8377_v16, %v7184_v15  ;;  %v4316_v40 = vpop.f32.mrf.mxu1  ;;  %v7168_v56 = vld [vmem:[%s8663_s20 + $0xe20] sm:$0xf] }
  0xf2   : > { %4535 = vmatpush.bf16.msra.mxu2 %v7025_v20  ;;  %v8393_v20 = vld [vmem:[%s8663_s20 + $0xec4] sm:$0xf0] }
  0xf3   : > { %4548 = vmatpush.bf16.msra.mxu3 %v7089_v30  ;;  %4510 = vmatmul.bf16.vlgmr.msra.gmra.mxu0 %v9239_v38  ;;  %v4303_v30 = vpop.f32.mrf.mxu0  ;;  %v7249_v41 = vor.u32 %v8393_v20, %v7248_v17  ;;  %v7360_v17 = vld [vmem:[%s8663_s20 + $0xfa0] sm:$0xf] }
  0xf4   : > { %4554 = vmatpush.bf16.msrb.mxu0 %v7209_v33  ;;  %4523 = vmatmul.bf16.vlgmr.msra.gmra.mxu1 %v9251_v53  ;;  %v7376_v33 = vld [vmem:[%s8663_s20 + $0xfc0] sm:$0xf] }
  0xf5   : > { %4567 = vmatpush.bf16.msrb.mxu1 %v7273_v34  ;;  %4536 = vmatmul.bf16.vlgmr.msra.gmra.mxu2 %v9244_v44  ;;  %v8425_v34 = vld [vmem:[%s8663_s20 + $0xfc4] sm:$0xf0] }
  0xf6   : > { %4580 = vmatpush.bf16.msrb.mxu2 %v7337_v37  ;;  %4549 = vmatmul.bf16.vlgmr.msra.gmra.mxu3 %v9253_v57  ;;  %v4304_v37 = vadd.f32 %v4303_v30, %v9210_v27  ;;  %v7377_v49 = vor.u32 %v8425_v34, %v7376_v33  ;;  %v8407_v27 = vld [vmem:[%s8663_s20 + $0xf34] sm:$0xf0] }
  0xf7   : > { %4593 = vmatpush.bf16.msrb.mxu3 %v7401_v42  ;;  %v7313_v42 = vor.u32 %v8409_v24, %v7312_v23  ;;  %v7169_v23 = vor.u32 %v8373_v3, %v7168_v56  ;;  %v7344_v56 = vld [vmem:[%s8663_s20 + $0xf80] sm:$0xf] }
  0xf8   : > { %4555 = vmatpush.bf16.msrb.mxu0 %v7201_v58  ;;  %v4317_v50 = vadd.f32 %v4316_v40, %v4304_v37  ;;  %v8391_v58 = vld [vmem:[%s8663_s20 + $0xeb4] sm:$0xf0]  ;;  %v4329_v6 = vpop.f32.mrf.mxu2  ;;  %v7160_v37 = vld [vmem:[%s8663_s20 + $0xe10] sm:$0xf] }
  0xf9   : > { %4568 = vmatpush.bf16.msrb.mxu1 %v7265_v59  ;;  %v7304_v59 = vld [vmem:[%s8663_s20 + $0xf30] sm:$0xf]  ;;  %v7241_v1 = vor.u32 %v8391_v58, %v7240_v47  ;;  %v4342_v16 = vpop.f32.mrf.mxu3  ;;  %v4318_v24 = vpop.f32.mrf.mxu1 }
  0xfa   : > { %4581 = vmatpush.bf16.msrb.mxu2 %v7329_v60  ;;  %v7368_v60 = vld [vmem:[%s8663_s20 + $0xfb0] sm:$0xf]  ;;  %v4330_v15 = vadd.f32 %v4329_v6, %v4317_v50  ;;  %v7152_v50 = vld [vmem:[%s8663_s20 + $0xe00] sm:$0xf]  ;;  %v8447_v6 = vld [vmem:[%s8663_s20 + $0x1074] sm:$0xf0] }
  0xfb   : > { %4594 = vmatpush.bf16.msrb.mxu3 %v7393_v2  ;;  %v7305_v2 = vor.u32 %v8407_v27, %v7304_v59  ;;  %v7369_v5 = vor.u32 %v8423_v63, %v7368_v60  ;;  %v4305_v20 = vpop.f32.mrf.mxu0  ;;  %v7224_v40 = vld [vmem:[%s8663_s20 + $0xe90] sm:$0xf]  ;;  %v8369_v59 = vld [vmem:[%s8663_s20 + $0xe04] sm:$0xf0]  ;;  %v7216_v27 = vld [vmem:[%s8663_s20 + $0xe80] sm:$0xf] }
  0xfc   : > { %4556 = vmatpush.bf16.msrb.mxu0 %v7193_v7  ;;  %v8389_v7 = vld [vmem:[%s8663_s20 + $0xea4] sm:$0xf0]  ;;  %v9292_v30 = vadd.f32 %v4342_v16, %v4330_v15  ;;  %v7352_v47 = vld [vmem:[%s8663_s20 + $0xf90] sm:$0xf]  ;;  %v241_v16 = vld [vmem:[%s10178_s0 + $0x40] sm:$0xff] }
  0xfd   : > { %4569 = vmatpush.bf16.msrb.mxu1 %v7257_v8  ;;  %v7296_v8 = vld [vmem:[%s8663_s20 + $0xf20] sm:$0xf]  ;;  %v7233_v33 = vor.u32 %v8389_v7, %v7232_v4  ;;  %v8385_v60 = vld [vmem:[%s8663_s20 + $0xe84] sm:$0xf0]  ;;  %v8479_v20 = vld [vmem:[%s8663_s20 + $0x1174] sm:$0xf0] }
  0xfe   : > { %4582 = vmatpush.bf16.msrb.mxu2 %v7321_v12  ;;  %v8405_v12 = vld [vmem:[%s8663_s20 + $0xf24] sm:$0xf0]  ;;  %939 = vst [vmem:[#allocation1] ss:$4 sm:$0xff] %v241_v16  ;;  %v7640_v16 = vld [vmem:[%s8663_s20 + $0x11d0] sm:$0xf] }
  0xff   : > { %4595 = vmatpush.bf16.msrb.mxu3 %v7385_v19  ;;  %v8421_v19 = vld [vmem:[%s8663_s20 + $0xfa4] sm:$0xf0]  ;;  %v7297_v34 = vor.u32 %v8405_v12, %v7296_v8  ;;  %v7528_v8 = vld [vmem:[%s8663_s20 + $0x10f0] sm:$0xf]  ;;  %v8463_v12 = vld [vmem:[%s8663_s20 + $0x10f4] sm:$0xf0] }
 0x100   : > { %4557 = vmatpush.bf16.msrb.mxu0 %v7185_v39  ;;  %v8371_v39 = vld [vmem:[%s8663_s20 + $0xe14] sm:$0xf0]  ;;  %v8417_v4 = vld [vmem:[%s8663_s20 + $0xf84] sm:$0xf0]  ;;  %v4331_v7 = vpop.f32.mrf.mxu2 }
 0x101   : > { %4570 = vmatpush.bf16.msrb.mxu1 %v7249_v41  ;;  %v7361_v41 = vor.u32 %v8421_v19, %v7360_v17  ;;  %v7161_v58 = vor.u32 %v8371_v39, %v7160_v37  ;;  %v4344_v15 = vpop.f32.mrf.mxu3  ;;  %v7153_v17 = vor.u32 %v8369_v59, %v7152_v50  ;;  %v7592_v19 = vld [vmem:[%s8663_s20 + $0x1170] sm:$0xf]  ;;  %v7345_v37 = vor.u32 %v8417_v4, %v7344_v56  ;;  %v7584_v59 = vld [vmem:[%s8663_s20 + $0x1160] sm:$0xf] }
 0x102   : > { %4583 = vmatpush.bf16.msrb.mxu2 %v7313_v42  ;;  %v8387_v42 = vld [vmem:[%s8663_s20 + $0xe94] sm:$0xf0]  ;;  %v9326_v50 = vld.sshfl [vmem:[#allocation1 + $0x30] sm:$0xff pattern:$0x73625140] }
 0x103   : > { %4596 = vmatpush.bf16.msrb.mxu3 %v7377_v49  ;;  %v8419_v49 = vld [vmem:[%s8663_s20 + $0xf94] sm:$0xf0]  ;;  %v7225_v63 = vor.u32 %v8387_v42, %v7224_v40  ;;  %v7529_v40 = vor.u32 %v8463_v12, %v7528_v8  ;;  %v9321_v42 = vld.sshfl [vmem:[#allocation1 + $0x20] sm:$0xff pattern:$0x73625140] }
 0x104   : > { %4558 = vmatpush.bf16.msrb.mxu0 %v7177_v0  ;;  %v7289_v0 = vor.u32 %v8403_v46, %v7288_v45  ;;  %v7353_v3 = vor.u32 %v8419_v49, %v7352_v47  ;;  %v7456_v45 = vld [vmem:[%s8663_s20 + $0x1060] sm:$0xf]  ;;  %v8445_v46 = vld [vmem:[%s8663_s20 + $0x1064] sm:$0xf0]  ;;  %v7448_v4 = vld [vmem:[%s8663_s20 + $0x1050] sm:$0xf] }
 0x105   : > { %4571 = vmatpush.bf16.msrb.mxu1 %v7241_v1  ;;  %v7280_v1 = vld [vmem:[%s8663_s20 + $0xf00] sm:$0xf]  ;;  %v8459_v8 = vld [vmem:[%s8663_s20 + $0x10d4] sm:$0xf0]  ;;  %v7576_v12 = vld [vmem:[%s8663_s20 + $0x1150] sm:$0xf] }
 0x106   : > { %4584 = vmatpush.bf16.msrb.mxu2 %v7305_v2  ;;  %v8401_v2 = vld [vmem:[%s8663_s20 + $0xf04] sm:$0xf0]  ;;  %v7520_v47 = vld [vmem:[%s8663_s20 + $0x10e0] sm:$0xf]  ;;  %v8475_v15 = vld [vmem:[%s8663_s20 + $0x1154] sm:$0xf0] }
 0x107   : > { %4597 = vmatpush.bf16.msrb.mxu3 %v7369_v5  ;;  %v7464_v5 = vld [vmem:[%s8663_s20 + $0x1070] sm:$0xf]  ;;  %v7281_v24 = vor.u32 %v8401_v2, %v7280_v1  ;;  %v9335_v1 = vld.sshfl [vmem:[#allocation1 + $0x38] sm:$0xff pattern:$0x73625140]  ;;  %v7457_v2 = vor.u32 %v8445_v46, %v7456_v45 }
 0x108   : > { %4559 = vmatpush.bf16.msrb.mxu0 %v7169_v23  ;;  %v7217_v23 = vor.u32 %v8385_v60, %v7216_v27  ;;  %v7465_v39 = vor.u32 %v8447_v6, %v7464_v5  ;;  %v8477_v27 = vld [vmem:[%s8663_s20 + $0x1164] sm:$0xf0]  ;;  %v7648_v60 = vld [vmem:[%s8663_s20 + $0x11e0] sm:$0xf]  ;;  %v8443_v5 = vld [vmem:[%s8663_s20 + $0x1054] sm:$0xf0] }
 0x109   : > { %4572 = vmatpush.bf16.msrb.mxu1 %v7233_v33  ;;  %v7656_v33 = vld [vmem:[%s8663_s20 + $0x11f0] sm:$0xf]  ;;  %v7632_v46 = vld [vmem:[%s8663_s20 + $0x11c0] sm:$0xf] }
 0x10a   : > { %4585 = vmatpush.bf16.msrb.mxu2 %v7297_v34  ;;  %v8495_v34 = vld [vmem:[%s8663_s20 + $0x11f4] sm:$0xf0]  ;;  %v7512_v6 = vld [vmem:[%s8663_s20 + $0x10d0] sm:$0xf] }
 0x10b   : > { %4598 = vmatpush.bf16.msrb.mxu3 %v7361_v41  ;;  %v7593_v41 = vor.u32 %v8479_v20, %v7592_v19  ;;  %v7657_v49 = vor.u32 %v8495_v34, %v7656_v33  ;;  %v7449_v19 = vor.u32 %v8443_v5, %v7448_v4  ;;  %v7513_v20 = vor.u32 %v8459_v8, %v7512_v6  ;;  %v8441_v33 = vld [vmem:[%s8663_s20 + $0x1044] sm:$0xf0]  ;;  %v7504_v34 = vld [vmem:[%s8663_s20 + $0x10c0] sm:$0xf]  ;;  %v8455_v5 = vld [vmem:[%s8663_s20 + $0x10b4] sm:$0xf0] }
 0x10c   : > { %4560 = vmatpush.bf16.msrb.mxu0 %v7161_v58  ;;  %v8461_v58 = vld [vmem:[%s8663_s20 + $0x10e4] sm:$0xf0]  ;;  %v7560_v6 = vld [vmem:[%s8663_s20 + $0x1130] sm:$0xf]  ;;  %v8487_v8 = vld [vmem:[%s8663_s20 + $0x11b4] sm:$0xf0] }
 0x10d   : > { %4573 = vmatpush.bf16.msrb.mxu1 %v7225_v63  ;;  %v8493_v63 = vld [vmem:[%s8663_s20 + $0x11e4] sm:$0xf0]  ;;  %v7521_v56 = vor.u32 %v8461_v58, %v7520_v47 }
 0x10e   : > { %4586 = vmatpush.bf16.msrb.mxu2 %v7289_v0  ;;  %v9333_v0 = vld.sshfl [vmem:[#allocation1 + $0x28] sm:$0xff pattern:$0x73625140]  ;;  %v7649_v7 = vor.u32 %v8493_v63, %v7648_v60  ;;  %v7432_v63 = vld [vmem:[%s8663_s20 + $0x1030] sm:$0xf] }
 0x10f   : > { %4599 = vmatpush.bf16.msrb.mxu3 %v7353_v3  ;;  %v7585_v3 = vor.u32 %v8477_v27, %v7584_v59  ;;  %v8489_v47 = vld [vmem:[%s8663_s20 + $0x11c4] sm:$0xf0] }
 0x110   : > { %4561 = vmatpush.bf16.msrb.mxu0 %v7153_v17  ;;  %v8491_v17 = vld [vmem:[%s8663_s20 + $0x11d4] sm:$0xf0]  ;;  %v4355_v45 = vpop.f32.mrf.mxu0 }
 0x111   : > { %4574 = vmatpush.bf16.msrb.mxu1 %v7217_v23  ;;  %v7577_v23 = vor.u32 %v8475_v15, %v7576_v12  ;;  %v4368_v59 = vpop.f32.mrf.mxu1 }
 0x112   : > { %4587 = vmatpush.bf16.msrb.mxu2 %v7281_v24  ;;  %v7440_v24 = vld [vmem:[%s8663_s20 + $0x1040] sm:$0xf] }
 0x113   : > { %4600 = vmatpush.bf16.msrb.mxu3 %v7345_v37  ;;  %4562 = vmatmul.bf16.vlgmr.msrb.gmra.mxu0 %v9321_v42  ;;  %v7641_v37 = vor.u32 %v8491_v17, %v7640_v16  ;;  %v7441_v58 = vor.u32 %v8441_v33, %v7440_v24  ;;  %v7424_v17 = vld [vmem:[%s8663_s20 + $0x1020] sm:$0xf]  ;;  %v8453_v33 = vld [vmem:[%s8663_s20 + $0x10a4] sm:$0xf0] }
 0x114   : > { %4606 = vmatpush.bf16.msra.mxu0 %v7465_v39  ;;  %4575 = vmatmul.bf16.vlgmr.msrb.gmra.mxu1 %v9333_v0  ;;  %v8457_v39 = vld [vmem:[%s8663_s20 + $0x10c4] sm:$0xf0] }
 0x115   : > { %4619 = vmatpush.bf16.msra.mxu1 %v7529_v40  ;;  %4588 = vmatmul.bf16.vlgmr.msrb.gmra.mxu2 %v9326_v50  ;;  %v7568_v40 = vld [vmem:[%s8663_s20 + $0x1140] sm:$0xf]  ;;  %v7505_v27 = vor.u32 %v8457_v39, %v7504_v34 }
 0x116   : > { %4632 = vmatpush.bf16.msra.mxu2 %v7593_v41  ;;  %4601 = vmatmul.bf16.vlgmr.msrb.gmra.mxu3 %v9335_v1  ;;  %v8473_v41 = vld [vmem:[%s8663_s20 + $0x1144] sm:$0xf0]  ;;  %v7552_v34 = vld [vmem:[%s8663_s20 + $0x1120] sm:$0xf] }
 0x117   : > { %4645 = vmatpush.bf16.msra.mxu3 %v7657_v49  ;;  %v4356_v49 = vadd.f32 %v4355_v45, %v9292_v30  ;;  %v7569_v60 = vor.u32 %v8473_v41, %v7568_v40  ;;  %v8471_v30 = vld [vmem:[%s8663_s20 + $0x1134] sm:$0xf0]  ;;  %v7616_v41 = vld [vmem:[%s8663_s20 + $0x11a0] sm:$0xf]  ;;  %v8485_v45 = vld [vmem:[%s8663_s20 + $0x11a4] sm:$0xf0] }
 0x118   : > { %4607 = vmatpush.bf16.msra.mxu0 %v7457_v2  ;;  %v8439_v2 = vld [vmem:[%s8663_s20 + $0x1034] sm:$0xf0]  ;;  %v7561_v16 = vor.u32 %v8471_v30, %v7560_v6  ;;  %v4381_v24 = vpop.f32.mrf.mxu2  ;;  %v7608_v6 = vld [vmem:[%s8663_s20 + $0x1190] sm:$0xf] }
 0x119   : > { %4620 = vmatpush.bf16.msra.mxu1 %v7521_v56  ;;  %v7496_v56 = vld [vmem:[%s8663_s20 + $0x10b0] sm:$0xf]  ;;  %v4369_v4 = vadd.f32 %v4368_v59, %v4356_v49  ;;  %v7433_v12 = vor.u32 %v8439_v2, %v7432_v63  ;;  %v4394_v40 = vpop.f32.mrf.mxu3  ;;  %v4370_v49 = vpop.f32.mrf.mxu1  ;;  %v8435_v63 = vld [vmem:[%s8663_s20 + $0x1014] sm:$0xf0] }
 0x11a   : > { %4633 = vmatpush.bf16.msra.mxu2 %v7585_v3  ;;  %v7633_v3 = vor.u32 %v8489_v47, %v7632_v46  ;;  %v7497_v15 = vor.u32 %v8455_v5, %v7496_v56  ;;  %v4357_v46 = vpop.f32.mrf.mxu0  ;;  %v7480_v2 = vld [vmem:[%s8663_s20 + $0x1090] sm:$0xf]  ;;  %v7617_v56 = vor.u32 %v8485_v45, %v7616_v41  ;;  %v8467_v5 = vld [vmem:[%s8663_s20 + $0x1114] sm:$0xf0] }
 0x11b   : > { %4646 = vmatpush.bf16.msra.mxu3 %v7649_v7  ;;  %v7624_v7 = vld [vmem:[%s8663_s20 + $0x11b0] sm:$0xf]  ;;  %v4382_v39 = vadd.f32 %v4381_v24, %v4369_v4  ;;  %v8483_v30 = vld [vmem:[%s8663_s20 + $0x1194] sm:$0xf0]  ;;  %v7600_v24 = vld [vmem:[%s8663_s20 + $0x1180] sm:$0xf] }
 0x11c   : > { %4608 = vmatpush.bf16.msra.mxu0 %v7449_v19  ;;  %v8437_v19 = vld [vmem:[%s8663_s20 + $0x1024] sm:$0xf0]  ;;  %v7544_v4 = vld [vmem:[%s8663_s20 + $0x1110] sm:$0xf]  ;;  %v8527_v45 = vld [vmem:[%s8663_s20 + $0x12f4] sm:$0xf0] }
 0x11d   : > { %4621 = vmatpush.bf16.msra.mxu1 %v7513_v20  ;;  %v7488_v20 = vld [vmem:[%s8663_s20 + $0x10a0] sm:$0xf]  ;;  %v7425_v47 = vor.u32 %v8437_v19, %v7424_v17  ;;  %v7545_v19 = vor.u32 %v8467_v5, %v7544_v4  ;;  %v7784_v41 = vld [vmem:[%s8663_s20 + $0x12f0] sm:$0xf] }
 0x11e   : > { %4634 = vmatpush.bf16.msra.mxu2 %v7577_v23  ;;  %v7625_v23 = vor.u32 %v8487_v8, %v7624_v7  ;;  %v7489_v59 = vor.u32 %v8453_v33, %v7488_v20  ;;  %v7408_v7 = vld [vmem:[%s8663_s20 + $0x1000] sm:$0xf]  ;;  %v7609_v33 = vor.u32 %v8483_v30, %v7608_v6  ;;  %v7785_v5 = vor.u32 %v8527_v45, %v7784_v41  ;;  %v7704_v41 = vld [vmem:[%s8663_s20 + $0x1250] sm:$0xf]  ;;  %v8507_v45 = vld [vmem:[%s8663_s20 + $0x1254] sm:$0xf0] }
 0x11f   : > { %4647 = vmatpush.bf16.msra.mxu3 %v7641_v37  ;;  %v8469_v37 = vld [vmem:[%s8663_s20 + $0x1124] sm:$0xf0]  ;;  %v7536_v20 = vld [vmem:[%s8663_s20 + $0x1100] sm:$0xf] }
 0x120   : > { %4609 = vmatpush.bf16.msra.mxu0 %v7441_v58  ;;  %v9374_v58 = vadd.f32 %v4394_v40, %v4382_v39  ;;  %v8511_v39 = vld [vmem:[%s8663_s20 + $0x1274] sm:$0xf0]  ;;  %v4383_v40 = vpop.f32.mrf.mxu2  ;;  %v942_v30 = vld.sshfl [vmem:[#allocation1] sm:$0xff pattern:$0x73625140] }
 0x121   : > { %4622 = vmatpush.bf16.msra.mxu1 %v7505_v27  ;;  %v7553_v27 = vor.u32 %v8469_v37, %v7552_v34  ;;  %v8481_v34 = vld [vmem:[%s8663_s20 + $0x1184] sm:$0xf0]  ;;  %v7720_v37 = vld [vmem:[%s8663_s20 + $0x1270] sm:$0xf]  ;;  %v4396_v46 = vpop.f32.mrf.mxu3 }
 0x122   : > { %4635 = vmatpush.bf16.msra.mxu2 %v7569_v60  ;;  %v7416_v60 = vld [vmem:[%s8663_s20 + $0x1010] sm:$0xf]  ;;  %v7721_v4 = vor.u32 %v8511_v39, %v7720_v37 }
 0x123   : > { %4648 = vmatpush.bf16.msra.mxu3 %v7633_v3  ;;  %v8451_v3 = vld [vmem:[%s8663_s20 + $0x1094] sm:$0xf0]  ;;  %v7417_v8 = vor.u32 %v8435_v63, %v7416_v60  ;;  %v7768_v46 = vld [vmem:[%s8663_s20 + $0x12d0] sm:$0xf] }
 0x124   : > { %4610 = vmatpush.bf16.msra.mxu0 %v7433_v12  ;;  %v8433_v12 = vld [vmem:[%s8663_s20 + $0x1004] sm:$0xf0]  ;;  %v7481_v17 = vor.u32 %v8451_v3, %v7480_v2  ;;  %v7912_v2 = vld [vmem:[%s8663_s20 + $0x13f0] sm:$0xf]  ;;  %v7601_v3 = vor.u32 %v8481_v34, %v7600_v24 }
 0x125   : > { %4623 = vmatpush.bf16.msra.mxu1 %v7497_v15  ;;  %v7472_v15 = vld [vmem:[%s8663_s20 + $0x1080] sm:$0xf]  ;;  %v7409_v49 = vor.u32 %v8433_v12, %v7408_v7  ;;  %v8557_v24 = vld [vmem:[%s8663_s20 + $0x13e4] sm:$0xf0] }
 0x126   : > { %4636 = vmatpush.bf16.msra.mxu2 %v7561_v16  ;;  %v8449_v16 = vld [vmem:[%s8663_s20 + $0x1084] sm:$0xf0]  ;;  %v7712_v7 = vld [vmem:[%s8663_s20 + $0x1260] sm:$0xf] }
 0x127   : > { %4649 = vmatpush.bf16.msra.mxu3 %v7625_v23  ;;  %v8465_v23 = vld [vmem:[%s8663_s20 + $0x1104] sm:$0xf0]  ;;  %v7473_v60 = vor.u32 %v8449_v16, %v7472_v15  ;;  %v7776_v12 = vld [vmem:[%s8663_s20 + $0x12e0] sm:$0xf] }
 0x128   : > { %4611 = vmatpush.bf16.msra.mxu0 %v7425_v47  ;;  %v242_v47 = vld [vmem:[%s10178_s0 + $0x48] sm:$0xff]  ;;  %v7537_v63 = vor.u32 %v8465_v23, %v7536_v20  ;;  %v944_v15 = vld.sshfl [vmem:[#allocation1 + $0x10] sm:$0xff pattern:$0x73625140]  ;;  %v7904_v23 = vld [vmem:[%s8663_s20 + $0x13e0] sm:$0xf] }
 0x129   : > { %4624 = vmatpush.bf16.msra.mxu1 %v7489_v59  ;;  %v7848_v59 = vld [vmem:[%s8663_s20 + $0x1370] sm:$0xf]  ;;  %941 = vst [vmem:[#allocation1 + $0x20] ss:$4 sm:$0xff] %v242_v47  ;;  %v8525_v16 = vld [vmem:[%s8663_s20 + $0x12e4] sm:$0xf0]  ;;  %v7905_v47 = vor.u32 %v8557_v24, %v7904_v23 }
 0x12a   : > { %4637 = vmatpush.bf16.msra.mxu2 %v7553_v27  ;;  %v8543_v27 = vld [vmem:[%s8663_s20 + $0x1374] sm:$0xf0]  ;;  %v8541_v20 = vld [vmem:[%s8663_s20 + $0x1364] sm:$0xf0]  ;;  %v7777_v39 = vor.u32 %v8525_v16, %v7776_v12 }
 0x12b   : > { %4650 = vmatpush.bf16.msra.mxu3 %v7617_v56  ;;  %v8559_v56 = vld [vmem:[%s8663_s20 + $0x13f4] sm:$0xf0]  ;;  %v7849_v6 = vor.u32 %v8543_v27, %v7848_v59  ;;  %v7832_v59 = vld [vmem:[%s8663_s20 + $0x1350] sm:$0xf]  ;;  %v8537_v12 = vld [vmem:[%s8663_s20 + $0x1344] sm:$0xf0] }
 0x12c   : > { %4612 = vmatpush.bf16.msra.mxu0 %v7417_v8  ;;  %v8509_v8 = vld [vmem:[%s8663_s20 + $0x1264] sm:$0xf0]  ;;  %v945_v34 = vld.sshfl [vmem:[#allocation1 + $0x18] sm:$0xff pattern:$0x73625140] }
 0x12d   : > { %4625 = vmatpush.bf16.msra.mxu1 %v7481_v17  ;;  %v7913_v17 = vor.u32 %v8559_v56, %v7912_v2  ;;  %v7713_v37 = vor.u32 %v8509_v8, %v7712_v7  ;;  %v8539_v27 = vld [vmem:[%s8663_s20 + $0x1354] sm:$0xf0]  ;;  %v7705_v2 = vor.u32 %v8507_v45, %v7704_v41  ;;  %v8521_v7 = vld [vmem:[%s8663_s20 + $0x12c4] sm:$0xf0]  ;;  %v7824_v8 = vld [vmem:[%s8663_s20 + $0x1340] sm:$0xf] }
 0x12e   : > { %4638 = vmatpush.bf16.msra.mxu2 %v7545_v19  ;;  %v7840_v19 = vld [vmem:[%s8663_s20 + $0x1360] sm:$0xf]  ;;  %v8553_v16 = vld [vmem:[%s8663_s20 + $0x13c4] sm:$0xf0]  ;;  %v8519_v45 = vld [vmem:[%s8663_s20 + $0x12b4] sm:$0xf0] }
 0x12f   : > { %4651 = vmatpush.bf16.msra.mxu3 %v7609_v33  ;;  %v943_v33 = vld.sshfl [vmem:[#allocation1 + $0x8] sm:$0xff pattern:$0x73625140]  ;;  %v7841_v40 = vor.u32 %v8541_v20, %v7840_v19 }
 0x130   : > { %4613 = vmatpush.bf16.msra.mxu0 %v7409_v49  ;;  %v8523_v49 = vld [vmem:[%s8663_s20 + $0x12d4] sm:$0xf0] }
 0x131   : > { %4626 = vmatpush.bf16.msra.mxu1 %v7473_v60  ;;  %v7896_v60 = vld [vmem:[%s8663_s20 + $0x13d0] sm:$0xf]  ;;  %v7769_v56 = vor.u32 %v8523_v49, %v7768_v46  ;;  %v4420_v23 = vpop.f32.mrf.mxu1  ;;  %v8551_v49 = vld [vmem:[%s8663_s20 + $0x13b4] sm:$0xf0] }
 0x132   : > { %4639 = vmatpush.bf16.msra.mxu2 %v7537_v63  ;;  %v8555_v63 = vld [vmem:[%s8663_s20 + $0x13d4] sm:$0xf0]  ;;  %v7816_v46 = vld [vmem:[%s8663_s20 + $0x1330] sm:$0xf] }
 0x133   : > { %4652 = vmatpush.bf16.msra.mxu3 %v7601_v3  ;;  %4614 = vmatmul.bf16.vlgmr.msra.gmra.mxu0 %v942_v30  ;;  %v7833_v3 = vor.u32 %v8539_v27, %v7832_v59  ;;  %v7897_v30 = vor.u32 %v8555_v63, %v7896_v60  ;;  %v7680_v63 = vld [vmem:[%s8663_s20 + $0x1220] sm:$0xf] }
 0x134   : > { %4658 = vmatpush.bf16.msrb.mxu0 %v7721_v4  ;;  %4627 = vmatmul.bf16.vlgmr.msra.gmra.mxu1 %v943_v33  ;;  %v7696_v4 = vld [vmem:[%s8663_s20 + $0x1240] sm:$0xf]  ;;  %v7825_v33 = vor.u32 %v8537_v12, %v7824_v8 }
 0x135   : > { %4671 = vmatpush.bf16.msrb.mxu1 %v7785_v5  ;;  %4640 = vmatmul.bf16.vlgmr.msra.gmra.mxu2 %v944_v15  ;;  %v8505_v5 = vld [vmem:[%s8663_s20 + $0x1244] sm:$0xf0]  ;;  %v7888_v15 = vld [vmem:[%s8663_s20 + $0x13c0] sm:$0xf] }
 0x136   : > { %4684 = vmatpush.bf16.msrb.mxu2 %v7849_v6  ;;  %4653 = vmatmul.bf16.vlgmr.msra.gmra.mxu3 %v945_v34  ;;  %v7760_v6 = vld [vmem:[%s8663_s20 + $0x12c0] sm:$0xf]  ;;  %v7697_v20 = vor.u32 %v8505_v5, %v7696_v4  ;;  %v7688_v34 = vld [vmem:[%s8663_s20 + $0x1230] sm:$0xf]  ;;  %v8517_v5 = vld [vmem:[%s8663_s20 + $0x12a4] sm:$0xf0] }
 0x137   : > { %4697 = vmatpush.bf16.msrb.mxu3 %v7913_v17  ;;  %v4407_v17 = vpop.f32.mrf.mxu0  ;;  %v7761_v24 = vor.u32 %v8521_v7, %v7760_v6  ;;  %v7808_v6 = vld [vmem:[%s8663_s20 + $0x1320] sm:$0xf] }
 0x138   : > { %4659 = vmatpush.bf16.msrb.mxu0 %v7713_v37  ;;  %v4408_v19 = vadd.f32 %v4407_v17, %v9374_v58  ;;  %v8503_v37 = vld [vmem:[%s8663_s20 + $0x1234] sm:$0xf0]  ;;  %v4433_v4 = vpop.f32.mrf.mxu2  ;;  %v7872_v12 = vld [vmem:[%s8663_s20 + $0x13a0] sm:$0xf]  ;;  %v8549_v17 = vld [vmem:[%s8663_s20 + $0x13a4] sm:$0xf0] }
 0x139   : > { %4672 = vmatpush.bf16.msrb.mxu1 %v7777_v39  ;;  %v7752_v39 = vld [vmem:[%s8663_s20 + $0x12b0] sm:$0xf]  ;;  %v8535_v58 = vld [vmem:[%s8663_s20 + $0x1334] sm:$0xf0]  ;;  %v7689_v59 = vor.u32 %v8503_v37, %v7688_v34  ;;  %v4446_v8 = vpop.f32.mrf.mxu3 }
 0x13a   : > { %4685 = vmatpush.bf16.msrb.mxu2 %v7841_v40  ;;  %v7889_v40 = vor.u32 %v8553_v16, %v7888_v15  ;;  %v4421_v41 = vadd.f32 %v4420_v23, %v4408_v19  ;;  %v7753_v27 = vor.u32 %v8519_v45, %v7752_v39  ;;  %v7817_v60 = vor.u32 %v8535_v58, %v7816_v46  ;;  %v4422_v19 = vpop.f32.mrf.mxu1  ;;  %v8499_v34 = vld [vmem:[%s8663_s20 + $0x1214] sm:$0xf0]  ;;  %v7736_v37 = vld [vmem:[%s8663_s20 + $0x1290] sm:$0xf] }
 0x13b   : > { %4698 = vmatpush.bf16.msrb.mxu3 %v7905_v47  ;;  %v7880_v47 = vld [vmem:[%s8663_s20 + $0x13b0] sm:$0xf]  ;;  %v7873_v39 = vor.u32 %v8549_v17, %v7872_v12  ;;  %v8531_v45 = vld [vmem:[%s8663_s20 + $0x1314] sm:$0xf0]  ;;  %v7950_v12 = vld [vmem:[%s8663_s20 + $0xf4] sm:$0xf] }
 0x13c   : > { %4660 = vmatpush.bf16.msrb.mxu0 %v7705_v2  ;;  %v8501_v2 = vld [vmem:[%s8663_s20 + $0x1224] sm:$0xf0]  ;;  %v4434_v7 = vadd.f32 %v4433_v4, %v4421_v41  ;;  %v7800_v41 = vld [vmem:[%s8663_s20 + $0x1310] sm:$0xf]  ;;  %v8547_v58 = vld [vmem:[%s8663_s20 + $0x1394] sm:$0xf0] }
 0x13d   : > { %4673 = vmatpush.bf16.msrb.mxu1 %v7769_v56  ;;  %v7744_v56 = vld [vmem:[%s8663_s20 + $0x12a0] sm:$0xf]  ;;  %v7681_v16 = vor.u32 %v8501_v2, %v7680_v63  ;;  %v7864_v46 = vld [vmem:[%s8663_s20 + $0x1390] sm:$0xf]  ;;  %v8513_v2 = vld [vmem:[%s8663_s20 + $0x1284] sm:$0xf0] }
 0x13e   : > { %4686 = vmatpush.bf16.msrb.mxu2 %v7833_v3  ;;  %v7881_v3 = vor.u32 %v8551_v49, %v7880_v47  ;;  %v7745_v23 = vor.u32 %v8517_v5, %v7744_v56  ;;  %v7664_v49 = vld [vmem:[%s8663_s20 + $0x1200] sm:$0xf]  ;;  %v8529_v4 = vld [vmem:[%s8663_s20 + $0x1304] sm:$0xf0]  ;;  %v7966_v19 = vld [vmem:[%s8663_s20 + $0x174] sm:$0xf] }
 0x13f   : > { %4699 = vmatpush.bf16.msrb.mxu3 %v7897_v30  ;;  %v8533_v30 = vld [vmem:[%s8663_s20 + $0x1324] sm:$0xf0]  ;;  %v4409_v15 = vpop.f32.mrf.mxu0  ;;  %v7728_v63 = vld [vmem:[%s8663_s20 + $0x1280] sm:$0xf] }
 0x140   : > { %4661 = vmatpush.bf16.msrb.mxu0 %v7697_v20  ;;  %v9444_v20 = vadd.f32 %v4446_v8, %v4434_v7  ;;  %v7792_v56 = vld [vmem:[%s8663_s20 + $0x1300] sm:$0xf]  ;;  %v7934_v7 = vld [vmem:[%s8663_s20 + $0x74] sm:$0xf]  ;;  %v5418_v8 = vld [vmem:[%s8663_s20 + $0x78] sm:$0xf0] }
 0x141   : > { %4674 = vmatpush.bf16.msrb.mxu1 %v7761_v24  ;;  %v7809_v24 = vor.u32 %v8533_v30, %v7808_v6  ;;  %v7856_v5 = vld [vmem:[%s8663_s20 + $0x1380] sm:$0xf]  ;;  %v8545_v6 = vld [vmem:[%s8663_s20 + $0x1384] sm:$0xf0]  ;;  %v4435_v30 = vpop.f32.mrf.mxu2  ;;  %v4448_v17 = vpop.f32.mrf.mxu3 }
 0x142   : > { %4687 = vmatpush.bf16.msrb.mxu2 %v7825_v33  ;;  %v7672_v33 = vld [vmem:[%s8663_s20 + $0x1210] sm:$0xf]  ;;  %v7946_v17 = vld [vmem:[%s8663_s20 + $0xd4] sm:$0xf] }
 0x143   : > { %4700 = vmatpush.bf16.msrb.mxu3 %v7889_v40  ;;  %v8515_v40 = vld [vmem:[%s8663_s20 + $0x1294] sm:$0xf0]  ;;  %v7673_v47 = vor.u32 %v8499_v34, %v7672_v33  ;;  %v7793_v33 = vor.u32 %v8529_v4, %v7792_v56  ;;  %v7982_v34 = vld [vmem:[%s8663_s20 + $0x1f4] sm:$0xf]  ;;  %v7980_v56 = vld [vmem:[%s8663_s20 + $0x1e4] sm:$0xf] }
 0x144   : > { %4662 = vmatpush.bf16.msrb.mxu0 %v7689_v59  ;;  %v8497_v59 = vld [vmem:[%s8663_s20 + $0x1204] sm:$0xf0] }
 0x145   : > { %4675 = vmatpush.bf16.msrb.mxu1 %v7753_v27  ;;  %v7737_v27 = vor.u32 %v8515_v40, %v7736_v37  ;;  %v7665_v15 = vor.u32 %v8497_v59, %v7664_v49  ;;  %v5610_v37 = vld [vmem:[%s8663_s20 + $0x1f8] sm:$0xf0]  ;;  %v5421_v40 = vor.u32 %v7934_v7, %v5418_v8  ;;  %v7948_v49 = vld [vmem:[%s8663_s20 + $0xe4] sm:$0xf]  ;;  %v7930_v8 = vld [vmem:[%s8663_s20 + $0x54] sm:$0xf] }
 0x146   : > { %4688 = vmatpush.bf16.msrb.mxu2 %v7817_v60  ;;  %v7801_v60 = vor.u32 %v8531_v45, %v7800_v41  ;;  %v5613_v59 = vor.u32 %v7982_v34, %v5610_v37  ;;  %v947_v4 = vld.sshfl [vmem:[#allocation1 + $0x28] sm:$0xff pattern:$0x73625140] }
 0x147   : > { %4701 = vmatpush.bf16.msrb.mxu3 %v7881_v3  ;;  %v7865_v3 = vor.u32 %v8547_v58, %v7864_v46  ;;  %v946_v46 = vld.sshfl [vmem:[#allocation1 + $0x20] sm:$0xff pattern:$0x73625140] }
 0x148   : > { %4663 = vmatpush.bf16.msrb.mxu0 %v7681_v16  ;;  %v5482_v16 = vld [vmem:[%s8663_s20 + $0xf8] sm:$0xf0]  ;;  %v7932_v58 = vld [vmem:[%s8663_s20 + $0x64] sm:$0xf] }
 0x149   : > { %4676 = vmatpush.bf16.msrb.mxu1 %v7745_v23  ;;  %v5546_v23 = vld [vmem:[%s8663_s20 + $0x178] sm:$0xf0]  ;;  %v5485_v41 = vor.u32 %v7950_v12, %v5482_v16 }
 0x14a   : > { %4689 = vmatpush.bf16.msrb.mxu2 %v7809_v24  ;;  %v7729_v24 = vor.u32 %v8513_v2, %v7728_v63  ;;  %v5549_v45 = vor.u32 %v7966_v19, %v5546_v23  ;;  %v7964_v63 = vld [vmem:[%s8663_s20 + $0x164] sm:$0xf]  ;;  %v5538_v2 = vld [vmem:[%s8663_s20 + $0x168] sm:$0xf0]  ;;  %v5402_v12 = vld [vmem:[%s8663_s20 + $0x58] sm:$0xf0] }
 0x14b   : > { %4702 = vmatpush.bf16.msrb.mxu3 %v7873_v39  ;;  %v7857_v39 = vor.u32 %v8545_v6, %v7856_v5  ;;  %v949_v5 = vld.sshfl [vmem:[#allocation1 + $0x38] sm:$0xff pattern:$0x73625140]  ;;  %v5541_v7 = vor.u32 %v7964_v63, %v5538_v2  ;;  %v7962_v19 = vld [vmem:[%s8663_s20 + $0x154] sm:$0xf]  ;;  %v5405_v34 = vor.u32 %v7930_v8, %v5402_v12 }
 0x14c   : > { %4664 = vmatpush.bf16.msrb.mxu0 %v7673_v47  ;;  %v5410_v47 = vld [vmem:[%s8663_s20 + $0x68] sm:$0xf0]  ;;  %v5466_v16 = vld [vmem:[%s8663_s20 + $0xd8] sm:$0xf0] }
 0x14d   : > { %4677 = vmatpush.bf16.msrb.mxu1 %v7737_v27  ;;  %v948_v27 = vld.sshfl [vmem:[#allocation1 + $0x30] sm:$0xff pattern:$0x73625140]  ;;  %v5413_v6 = vor.u32 %v7932_v58, %v5410_v47  ;;  %v5530_v23 = vld [vmem:[%s8663_s20 + $0x158] sm:$0xf0]  ;;  %v5469_v37 = vor.u32 %v7946_v17, %v5466_v16 }
 0x14e   : > { %4690 = vmatpush.bf16.msrb.mxu2 %v7801_v60  ;;  %v5474_v60 = vld [vmem:[%s8663_s20 + $0xe8] sm:$0xf0]  ;;  %v7960_v47 = vld [vmem:[%s8663_s20 + $0x144] sm:$0xf]  ;;  %v5450_v12 = vld [vmem:[%s8663_s20 + $0xb8] sm:$0xf0] }
 0x14f   : > { %4703 = vmatpush.bf16.msrb.mxu3 %v7865_v3  ;;  %v5602_v3 = vld [vmem:[%s8663_s20 + $0x1e8] sm:$0xf0]  ;;  %v5477_v30 = vor.u32 %v7948_v49, %v5474_v60  ;;  %v7958_v17 = vld [vmem:[%s8663_s20 + $0x134] sm:$0xf]  ;;  %v5578_v16 = vld [vmem:[%s8663_s20 + $0x1b8] sm:$0xf0] }
 0x150   : > { %4665 = vmatpush.bf16.msrb.mxu0 %v7665_v15  ;;  %v5605_v15 = vor.u32 %v7980_v56, %v5602_v3  ;;  %v5458_v58 = vld [vmem:[%s8663_s20 + $0xc8] sm:$0xf0] }
 0x151   : > { %4678 = vmatpush.bf16.msrb.mxu1 %v7729_v24  ;;  %v7978_v24 = vld [vmem:[%s8663_s20 + $0x1d4] sm:$0xf]  ;;  %v5522_v49 = vld [vmem:[%s8663_s20 + $0x148] sm:$0xf0]  ;;  %v4472_v56 = vpop.f32.mrf.mxu1 }
 0x152   : > { %4691 = vmatpush.bf16.msrb.mxu2 %v7793_v33  ;;  %v5594_v33 = vld [vmem:[%s8663_s20 + $0x1d8] sm:$0xf0]  ;;  %v5586_v60 = vld [vmem:[%s8663_s20 + $0x1c8] sm:$0xf0] }
 0x153   : > { %4704 = vmatpush.bf16.msrb.mxu3 %v7857_v39  ;;  %4666 = vmatmul.bf16.vlgmr.msrb.gmra.mxu0 %v946_v46  ;;  %v5533_v39 = vor.u32 %v7962_v19, %v5530_v23  ;;  %v5597_v46 = vor.u32 %v7978_v24, %v5594_v33  ;;  %v7924_v33 = vld [vmem:[%s8663_s20 + $0x24] sm:$0xf] }
 0x154   : > { %4710 = vmatpush.bf16.msra.mxu0 %v5421_v40  ;;  %4679 = vmatmul.bf16.vlgmr.msrb.gmra.mxu1 %v947_v4  ;;  %v7928_v40 = vld [vmem:[%s8663_s20 + $0x44] sm:$0xf]  ;;  %v5525_v4 = vor.u32 %v7960_v47, %v5522_v49 }
 0x155   : > { %4723 = vmatpush.bf16.msra.mxu1 %v5485_v41  ;;  %4692 = vmatmul.bf16.vlgmr.msrb.gmra.mxu2 %v948_v27  ;;  %v5394_v41 = vld [vmem:[%s8663_s20 + $0x48] sm:$0xf0]  ;;  %v7976_v27 = vld [vmem:[%s8663_s20 + $0x1c4] sm:$0xf] }
 0x156   : > { %4736 = vmatpush.bf16.msra.mxu2 %v5549_v45  ;;  %4705 = vmatmul.bf16.vlgmr.msrb.gmra.mxu3 %v949_v5  ;;  %v7944_v45 = vld [vmem:[%s8663_s20 + $0xc4] sm:$0xf]  ;;  %v5397_v2 = vor.u32 %v7928_v40, %v5394_v41  ;;  %v7926_v5 = vld [vmem:[%s8663_s20 + $0x34] sm:$0xf]  ;;  %v5442_v41 = vld [vmem:[%s8663_s20 + $0xa8] sm:$0xf0] }
 0x157   : > { %4749 = vmatpush.bf16.msra.mxu3 %v5613_v59  ;;  %v4459_v59 = vpop.f32.mrf.mxu0  ;;  %v5461_v3 = vor.u32 %v7944_v45, %v5458_v58  ;;  %v7956_v45 = vld [vmem:[%s8663_s20 + $0x124] sm:$0xf] }
 0x158   : > { %4711 = vmatpush.bf16.msra.mxu0 %v5413_v6  ;;  %v4460_v63 = vadd.f32 %v4459_v59, %v9444_v20  ;;  %v5386_v6 = vld [vmem:[%s8663_s20 + $0x38] sm:$0xf0]  ;;  %v4485_v40 = vpop.f32.mrf.mxu2  ;;  %v7972_v49 = vld [vmem:[%s8663_s20 + $0x1a4] sm:$0xf]  ;;  %v5570_v59 = vld [vmem:[%s8663_s20 + $0x1a8] sm:$0xf0] }
 0x159   : > { %4724 = vmatpush.bf16.msra.mxu1 %v5477_v30  ;;  %v7942_v30 = vld [vmem:[%s8663_s20 + $0xb4] sm:$0xf]  ;;  %v5514_v20 = vld [vmem:[%s8663_s20 + $0x138] sm:$0xf0]  ;;  %v5389_v19 = vor.u32 %v7926_v5, %v5386_v6  ;;  %v4498_v47 = vpop.f32.mrf.mxu3 }
 0x15a   : > { %4737 = vmatpush.bf16.msra.mxu2 %v5541_v7  ;;  %v5589_v7 = vor.u32 %v7976_v27, %v5586_v60  ;;  %v4473_v8 = vadd.f32 %v4472_v56, %v4460_v63  ;;  %v5453_v23 = vor.u32 %v7942_v30, %v5450_v12  ;;  %v5517_v24 = vor.u32 %v7958_v17, %v5514_v20  ;;  %v4474_v63 = vpop.f32.mrf.mxu1  ;;  %v5370_v5 = vld [vmem:[%s8663_s20 + $0x18] sm:$0xf0]  ;;  %v7938_v6 = vld [vmem:[%s8663_s20 + $0x94] sm:$0xf] }
 0x15b   : > { %4750 = vmatpush.bf16.msra.mxu3 %v5605_v15  ;;  %v7974_v15 = vld [vmem:[%s8663_s20 + $0x1b4] sm:$0xf]  ;;  %v5573_v30 = vor.u32 %v7972_v49, %v5570_v59  ;;  %v5498_v12 = vld [vmem:[%s8663_s20 + $0x118] sm:$0xf0] }
 0x15c   : > { %4712 = vmatpush.bf16.msra.mxu0 %v5405_v34  ;;  %v5378_v34 = vld [vmem:[%s8663_s20 + $0x28] sm:$0xf0]  ;;  %v4486_v58 = vadd.f32 %v4485_v40, %v4473_v8  ;;  %v7954_v8 = vld [vmem:[%s8663_s20 + $0x114] sm:$0xf]  ;;  %v5562_v20 = vld [vmem:[%s8663_s20 + $0x198] sm:$0xf0] }
 0x15d   : > { %4725 = vmatpush.bf16.msra.mxu1 %v5469_v37  ;;  %v7940_v37 = vld [vmem:[%s8663_s20 + $0xa4] sm:$0xf]  ;;  %v5381_v60 = vor.u32 %v7924_v33, %v5378_v34  ;;  %v7970_v17 = vld [vmem:[%s8663_s20 + $0x194] sm:$0xf]  ;;  %v5426_v34 = vld [vmem:[%s8663_s20 + $0x88] sm:$0xf0] }
 0x15e   : > { %4738 = vmatpush.bf16.msra.mxu2 %v5533_v39  ;;  %v5581_v39 = vor.u32 %v7974_v15, %v5578_v16  ;;  %v5445_v56 = vor.u32 %v7940_v37, %v5442_v41  ;;  %v7920_v16 = vld [vmem:[%s8663_s20 + $0x4] sm:$0xf]  ;;  %v5490_v40 = vld [vmem:[%s8663_s20 + $0x108] sm:$0xf0]  ;;  %v8014_v49 = vld [vmem:[%s8663_s20 + $0x2f4] sm:$0xf] }
 0x15f   : > { %4751 = vmatpush.bf16.msra.mxu3 %v5597_v46  ;;  %v5506_v46 = vld [vmem:[%s8663_s20 + $0x128] sm:$0xf0]  ;;  %v4461_v27 = vpop.f32.mrf.mxu0  ;;  %v7936_v33 = vld [vmem:[%s8663_s20 + $0x84] sm:$0xf]  ;;  %v8030_v63 = vld [vmem:[%s8663_s20 + $0x374] sm:$0xf] }
 0x160   : > { %4713 = vmatpush.bf16.msra.mxu0 %v5397_v2  ;;  %v9511_v2 = vadd.f32 %v4498_v47, %v4486_v58  ;;  %v7952_v37 = vld [vmem:[%s8663_s20 + $0x104] sm:$0xf]  ;;  %v7998_v58 = vld [vmem:[%s8663_s20 + $0x274] sm:$0xf]  ;;  %v5674_v47 = vld [vmem:[%s8663_s20 + $0x278] sm:$0xf0] }
 0x161   : > { %4726 = vmatpush.bf16.msra.mxu1 %v5461_v3  ;;  %v5509_v3 = vor.u32 %v7956_v45, %v5506_v46  ;;  %v7968_v41 = vld [vmem:[%s8663_s20 + $0x184] sm:$0xf]  ;;  %v5554_v45 = vld [vmem:[%s8663_s20 + $0x188] sm:$0xf0]  ;;  %v4487_v46 = vpop.f32.mrf.mxu2  ;;  %v4500_v59 = vpop.f32.mrf.mxu3 }
 0x162   : > { %4739 = vmatpush.bf16.msra.mxu2 %v5525_v4  ;;  %v7922_v4 = vld [vmem:[%s8663_s20 + $0x14] sm:$0xf]  ;;  %v5786_v59 = vld [vmem:[%s8663_s20 + $0x358] sm:$0xf0] }
 0x163   : > { %4752 = vmatpush.bf16.msra.mxu3 %v5589_v7  ;;  %v5434_v7 = vld [vmem:[%s8663_s20 + $0x98] sm:$0xf0]  ;;  %v5373_v15 = vor.u32 %v7922_v4, %v5370_v5  ;;  %v5493_v4 = vor.u32 %v7952_v37, %v5490_v40  ;;  %v8046_v5 = vld [vmem:[%s8663_s20 + $0x3f4] sm:$0xf] }
 0x164   : > { %4714 = vmatpush.bf16.msra.mxu0 %v5389_v19  ;;  %v5362_v19 = vld [vmem:[%s8663_s20 + $0x8] sm:$0xf0]  ;;  %v8010_v46 = vld [vmem:[%s8663_s20 + $0x2d4] sm:$0xf] }
 0x165   : > { %4727 = vmatpush.bf16.msra.mxu1 %v5453_v23  ;;  %v5437_v23 = vor.u32 %v7938_v6, %v5434_v7  ;;  %v5365_v27 = vor.u32 %v7920_v16, %v5362_v19  ;;  %v5866_v6 = vld [vmem:[%s8663_s20 + $0x3f8] sm:$0xf0]  ;;  %v5677_v7 = vor.u32 %v7998_v58, %v5674_v47  ;;  %v5730_v19 = vld [vmem:[%s8663_s20 + $0x2e8] sm:$0xf0] }
 0x166   : > { %4740 = vmatpush.bf16.msra.mxu2 %v5517_v24  ;;  %v5501_v24 = vor.u32 %v7954_v8, %v5498_v12  ;;  %v5869_v16 = vor.u32 %v8046_v5, %v5866_v6  ;;  %v5722_v47 = vld [vmem:[%s8663_s20 + $0x2d8] sm:$0xf0]  ;;  %v8008_v5 = vld [vmem:[%s8663_s20 + $0x2c4] sm:$0xf] }
 0x167   : > { %4753 = vmatpush.bf16.msra.mxu3 %v5581_v39  ;;  %v5565_v39 = vor.u32 %v7970_v17, %v5562_v20  ;;  %v7996_v17 = vld [vmem:[%s8663_s20 + $0x264] sm:$0xf]  ;;  %v5666_v20 = vld [vmem:[%s8663_s20 + $0x268] sm:$0xf0] }
 0x168   : > { %4715 = vmatpush.bf16.msra.mxu0 %v5381_v60  ;;  %v5738_v60 = vld [vmem:[%s8663_s20 + $0x2f8] sm:$0xf0]  ;;  %v5669_v37 = vor.u32 %v7996_v17, %v5666_v20 }
 0x169   : > { %4728 = vmatpush.bf16.msra.mxu1 %v5445_v56  ;;  %v5802_v56 = vld [vmem:[%s8663_s20 + $0x378] sm:$0xf0]  ;;  %v5741_v8 = vor.u32 %v8014_v49, %v5738_v60  ;;  %v8026_v49 = vld [vmem:[%s8663_s20 + $0x354] sm:$0xf] }
 0x16a   : > { %4741 = vmatpush.bf16.msra.mxu2 %v5509_v3  ;;  %v5429_v3 = vor.u32 %v7936_v33, %v5426_v34  ;;  %v5805_v12 = vor.u32 %v8030_v63, %v5802_v56  ;;  %v8044_v33 = vld [vmem:[%s8663_s20 + $0x3e4] sm:$0xf]  ;;  %v5858_v34 = vld [vmem:[%s8663_s20 + $0x3e8] sm:$0xf0]  ;;  %v5850_v60 = vld [vmem:[%s8663_s20 + $0x3d8] sm:$0xf0]  ;;  %v5725_v56 = vor.u32 %v8010_v46, %v5722_v47 }
 0x16b   : > { %4754 = vmatpush.bf16.msra.mxu3 %v5573_v30  ;;  %v5557_v30 = vor.u32 %v7968_v41, %v5554_v45  ;;  %v7994_v41 = vld [vmem:[%s8663_s20 + $0x254] sm:$0xf]  ;;  %v5658_v45 = vld [vmem:[%s8663_s20 + $0x258] sm:$0xf0]  ;;  %v5861_v58 = vor.u32 %v8044_v33, %v5858_v34  ;;  %v7988_v47 = vld [vmem:[%s8663_s20 + $0x224] sm:$0xf] }
 0x16c   : > { %4716 = vmatpush.bf16.msra.mxu0 %v5373_v15  ;;  %v8012_v15 = vld [vmem:[%s8663_s20 + $0x2e4] sm:$0xf]  ;;  %v5661_v63 = vor.u32 %v7994_v41, %v5658_v45  ;;  %v5834_v41 = vld [vmem:[%s8663_s20 + $0x3b8] sm:$0xf0] }
 0x16d   : > { %4729 = vmatpush.bf16.msra.mxu1 %v5437_v23  ;;  %v8028_v23 = vld [vmem:[%s8663_s20 + $0x364] sm:$0xf] }
 0x16e   : > { %4742 = vmatpush.bf16.msra.mxu2 %v5501_v24  ;;  %v5794_v24 = vld [vmem:[%s8663_s20 + $0x368] sm:$0xf0] }
 0x16f   : > { %4755 = vmatpush.bf16.msra.mxu3 %v5565_v39  ;;  %v5733_v39 = vor.u32 %v8012_v15, %v5730_v19  ;;  %v5797_v40 = vor.u32 %v8028_v23, %v5794_v24  ;;  %v7990_v19 = vld [vmem:[%s8663_s20 + $0x234] sm:$0xf]  ;;  %v5642_v23 = vld [vmem:[%s8663_s20 + $0x238] sm:$0xf0] }
 0x170   : > { %4717 = vmatpush.bf16.msra.mxu0 %v5365_v27  ;;  %v8042_v27 = vld [vmem:[%s8663_s20 + $0x3d4] sm:$0xf]  ;;  %v5645_v45 = vor.u32 %v7990_v19, %v5642_v23  ;;  %v5754_v23 = vld [vmem:[%s8663_s20 + $0x318] sm:$0xf0] }
 0x171   : > { %4730 = vmatpush.bf16.msra.mxu1 %v5429_v3  ;;  %v5789_v3 = vor.u32 %v8026_v49, %v5786_v59  ;;  %v5853_v6 = vor.u32 %v8042_v27, %v5850_v60  ;;  %v4524_v20 = vpop.f32.mrf.mxu1  ;;  %v8006_v24 = vld [vmem:[%s8663_s20 + $0x2b4] sm:$0xf]  ;;  %v5634_v49 = vld [vmem:[%s8663_s20 + $0x228] sm:$0xf0]  ;;  %v8004_v59 = vld [vmem:[%s8663_s20 + $0x2a4] sm:$0xf] }
 0x172   : > { %4743 = vmatpush.bf16.msra.mxu2 %v5493_v4  ;;  %v5650_v4 = vld [vmem:[%s8663_s20 + $0x248] sm:$0xf0]  ;;  %v8018_v19 = vld [vmem:[%s8663_s20 + $0x314] sm:$0xf] }
 0x173   : > { %4756 = vmatpush.bf16.msra.mxu3 %v5557_v30  ;;  %4718 = vmatmul.bf16.vlgmr.msra.gmra.mxu0 %v8781_v32  ;;  %v5714_v32 = vld [vmem:[%s8663_s20 + $0x2c8] sm:$0xf0] }
 0x174   : > { %4762 = vmatpush.bf16.msrb.mxu0 %v5677_v7  ;;  %4731 = vmatmul.bf16.vlgmr.msra.gmra.mxu1 %v8785_v36  ;;  %v5778_v30 = vld [vmem:[%s8663_s20 + $0x348] sm:$0xf0]  ;;  %v4511_v7 = vpop.f32.mrf.mxu0  ;;  %v5717_v15 = vor.u32 %v8008_v5, %v5714_v32  ;;  %v8036_v5 = vld [vmem:[%s8663_s20 + $0x3a4] sm:$0xf] }
 0x175   : > { %4775 = vmatpush.bf16.msrb.mxu1 %v5741_v8  ;;  %4744 = vmatmul.bf16.vlgmr.msra.gmra.mxu2 %v8779_v31  ;;  %v7992_v31 = vld [vmem:[%s8663_s20 + $0x244] sm:$0xf]  ;;  %v4512_v36 = vadd.f32 %v4511_v7, %v9511_v2  ;;  %v5770_v2 = vld [vmem:[%s8663_s20 + $0x338] sm:$0xf0] }
 0x176   : > { %4788 = vmatpush.bf16.msrb.mxu2 %v5805_v12  ;;  %4757 = vmatmul.bf16.vlgmr.msra.gmra.mxu3 %v8783_v35  ;;  %v8024_v35 = vld [vmem:[%s8663_s20 + $0x344] sm:$0xf]  ;;  %v5842_v12 = vld [vmem:[%s8663_s20 + $0x3c8] sm:$0xf0]  ;;  %v5653_v17 = vor.u32 %v7992_v31, %v5650_v4 }
 0x177   : > { %4801 = vmatpush.bf16.msrb.mxu3 %v5869_v16  ;;  %v8040_v8 = vld [vmem:[%s8663_s20 + $0x3c4] sm:$0xf]  ;;  %v5781_v16 = vor.u32 %v8024_v35, %v5778_v30  ;;  %v4525_v34 = vadd.f32 %v4524_v20, %v4512_v36  ;;  %v5637_v35 = vor.u32 %v7988_v47, %v5634_v49  ;;  %v7986_v36 = vld [vmem:[%s8663_s20 + $0x214] sm:$0xf]  ;;  %v5746_v47 = vld [vmem:[%s8663_s20 + $0x308] sm:$0xf0] }
 0x178   : > { %4763 = vmatpush.bf16.msrb.mxu0 %v5669_v37  ;;  %v5845_v33 = vor.u32 %v8040_v8, %v5842_v12  ;;  %v5706_v37 = vld [vmem:[%s8663_s20 + $0x2b8] sm:$0xf0]  ;;  %v4537_v60 = vpop.f32.mrf.mxu2  ;;  %v8002_v20 = vld [vmem:[%s8663_s20 + $0x294] sm:$0xf]  ;;  %v8032_v49 = vld [vmem:[%s8663_s20 + $0x384] sm:$0xf] }
 0x179   : > { %4776 = vmatpush.bf16.msrb.mxu1 %v5733_v39  ;;  %v8022_v39 = vld [vmem:[%s8663_s20 + $0x334] sm:$0xf]  ;;  %v5709_v46 = vor.u32 %v8006_v24, %v5706_v37  ;;  %v4538_v31 = vadd.f32 %v4537_v60, %v4525_v34  ;;  %v4550_v4 = vpop.f32.mrf.mxu3  ;;  %v4526_v30 = vpop.f32.mrf.mxu1  ;;  %v7984_v37 = vld [vmem:[%s8663_s20 + $0x204] sm:$0xf] }
 0x17a   : > { %4789 = vmatpush.bf16.msrb.mxu2 %v5797_v40  ;;  %v8038_v40 = vld [vmem:[%s8663_s20 + $0x3b4] sm:$0xf] }
 0x17b   : > { %4802 = vmatpush.bf16.msrb.mxu3 %v5861_v58  ;;  %v5773_v58 = vor.u32 %v8022_v39, %v5770_v2  ;;  %v5837_v27 = vor.u32 %v8038_v40, %v5834_v41  ;;  %v9582_v7 = vadd.f32 %v4550_v4, %v4538_v31  ;;  %v8034_v24 = vld [vmem:[%s8663_s20 + $0x394] sm:$0xf]  ;;  %v5618_v39 = vld [vmem:[%s8663_s20 + $0x208] sm:$0xf0]  ;;  %v5757_v40 = vor.u32 %v8018_v19, %v5754_v23  ;;  %v8000_v41 = vld [vmem:[%s8663_s20 + $0x284] sm:$0xf] }
 0x17c   : > { %4764 = vmatpush.bf16.msrb.mxu0 %v5661_v63  ;;  %v5698_v63 = vld [vmem:[%s8663_s20 + $0x2a8] sm:$0xf0]  ;;  %v4513_v32 = vpop.f32.mrf.mxu0  ;;  %v8062_v60 = vld [vmem:[%s8663_s20 + $0x474] sm:$0xf]  ;;  %v5621_v31 = vor.u32 %v7984_v37, %v5618_v39  ;;  %v5994_v4 = vld [vmem:[%s8663_s20 + $0x4f8] sm:$0xf0] }
 0x17d   : > { %4777 = vmatpush.bf16.msrb.mxu1 %v5725_v56  ;;  %v8020_v56 = vld [vmem:[%s8663_s20 + $0x324] sm:$0xf]  ;;  %v5701_v8 = vor.u32 %v8004_v59, %v5698_v63  ;;  %v5810_v59 = vld [vmem:[%s8663_s20 + $0x388] sm:$0xf0]  ;;  %v5930_v63 = vld [vmem:[%s8663_s20 + $0x478] sm:$0xf0] }
 0x17e   : > { %4790 = vmatpush.bf16.msrb.mxu2 %v5789_v3  ;;  %v5762_v3 = vld [vmem:[%s8663_s20 + $0x328] sm:$0xf0]  ;;  %v8110_v30 = vld [vmem:[%s8663_s20 + $0x5f4] sm:$0xf]  ;;  %v8076_v19 = vld [vmem:[%s8663_s20 + $0x4e4] sm:$0xf] }
 0x17f   : > { %4803 = vmatpush.bf16.msrb.mxu3 %v5853_v6  ;;  %v5826_v6 = vld [vmem:[%s8663_s20 + $0x3a8] sm:$0xf0]  ;;  %v5765_v12 = vor.u32 %v8020_v56, %v5762_v3  ;;  %v8078_v56 = vld [vmem:[%s8663_s20 + $0x4f4] sm:$0xf]  ;;  %v8108_v37 = vld [vmem:[%s8663_s20 + $0x5e4] sm:$0xf] }
 0x180   : > { %4765 = vmatpush.bf16.msrb.mxu0 %v5653_v17  ;;  %v5626_v17 = vld [vmem:[%s8663_s20 + $0x218] sm:$0xf0]  ;;  %v6114_v39 = vld [vmem:[%s8663_s20 + $0x5e8] sm:$0xf0] }
 0x181   : > { %4778 = vmatpush.bf16.msrb.mxu1 %v5717_v15  ;;  %v5829_v15 = vor.u32 %v8036_v5, %v5826_v6  ;;  %v5629_v34 = vor.u32 %v7986_v36, %v5626_v17  ;;  %v4552_v3 = vpop.f32.mrf.mxu3  ;;  %v8094_v5 = vld [vmem:[%s8663_s20 + $0x574] sm:$0xf]  ;;  %v6058_v6 = vld [vmem:[%s8663_s20 + $0x578] sm:$0xf0]  ;;  %v5933_v36 = vor.u32 %v8062_v60, %v5930_v63  ;;  %v5997_v17 = vor.u32 %v8078_v56, %v5994_v4  ;;  %v5906_v4 = vld [vmem:[%s8663_s20 + $0x448] sm:$0xf0] }
 0x182   : > { %4791 = vmatpush.bf16.msrb.mxu2 %v5781_v16  ;;  %v5690_v16 = vld [vmem:[%s8663_s20 + $0x298] sm:$0xf0]  ;;  %v8106_v60 = vld [vmem:[%s8663_s20 + $0x5d4] sm:$0xf] }
 0x183   : > { %4804 = vmatpush.bf16.msrb.mxu3 %v5845_v33  ;;  %v5818_v33 = vld [vmem:[%s8663_s20 + $0x398] sm:$0xf0]  ;;  %v5693_v2 = vor.u32 %v8002_v20, %v5690_v16  ;;  %v6061_v20 = vor.u32 %v8094_v5, %v6058_v6  ;;  %v5922_v16 = vld [vmem:[%s8663_s20 + $0x468] sm:$0xf0]  ;;  %v8072_v5 = vld [vmem:[%s8663_s20 + $0x4c4] sm:$0xf] }
 0x184   : > { %4766 = vmatpush.bf16.msrb.mxu0 %v5645_v45  ;;  %v5682_v45 = vld [vmem:[%s8663_s20 + $0x288] sm:$0xf0]  ;;  %v6106_v63 = vld [vmem:[%s8663_s20 + $0x5d8] sm:$0xf0] }
 0x185   : > { %4779 = vmatpush.bf16.msrb.mxu1 %v5709_v46  ;;  %v8016_v46 = vld [vmem:[%s8663_s20 + $0x304] sm:$0xf]  ;;  %v5685_v32 = vor.u32 %v8000_v41, %v5682_v45  ;;  %v8058_v45 = vld [vmem:[%s8663_s20 + $0x454] sm:$0xf]  ;;  %v6109_v6 = vor.u32 %v8106_v60, %v6106_v63  ;;  %v6018_v60 = vld [vmem:[%s8663_s20 + $0x528] sm:$0xf0] }
 0x186   : > { %4792 = vmatpush.bf16.msrb.mxu2 %v5773_v58  ;;  %v5821_v58 = vor.u32 %v8034_v24, %v5818_v33  ;;  %v5986_v24 = vld [vmem:[%s8663_s20 + $0x4e8] sm:$0xf0]  ;;  %v8092_v33 = vld [vmem:[%s8663_s20 + $0x564] sm:$0xf] }
 0x187   : > { %4805 = vmatpush.bf16.msrb.mxu3 %v5837_v27  ;;  %v4539_v27 = vpop.f32.mrf.mxu2 }
 0x188   : > { %4767 = vmatpush.bf16.msrb.mxu0 %v5637_v35  ;;  %v5749_v35 = vor.u32 %v8016_v46, %v5746_v47  ;;  %v5914_v46 = vld [vmem:[%s8663_s20 + $0x458] sm:$0xf0]  ;;  %v6117_v47 = vor.u32 %v8108_v37, %v6114_v39  ;;  %v8102_v37 = vld [vmem:[%s8663_s20 + $0x5b4] sm:$0xf] }
 0x189   : > { %4780 = vmatpush.bf16.msrb.mxu1 %v5701_v8  ;;  %v6122_v8 = vld [vmem:[%s8663_s20 + $0x5f8] sm:$0xf0]  ;;  %v5917_v56 = vor.u32 %v8058_v45, %v5914_v46  ;;  %v8052_v45 = vld [vmem:[%s8663_s20 + $0x424] sm:$0xf]  ;;  %v5890_v46 = vld [vmem:[%s8663_s20 + $0x428] sm:$0xf0] }
 0x18a   : > { %4793 = vmatpush.bf16.msrb.mxu2 %v5765_v12  ;;  %v5813_v12 = vor.u32 %v8032_v49, %v5810_v59  ;;  %v6125_v23 = vor.u32 %v8110_v30, %v6122_v8  ;;  %v5978_v49 = vld [vmem:[%s8663_s20 + $0x4d8] sm:$0xf0]  ;;  %v8090_v59 = vld [vmem:[%s8663_s20 + $0x554] sm:$0xf]  ;;  %v8104_v30 = vld [vmem:[%s8663_s20 + $0x5c4] sm:$0xf] }
 0x18b   : > { %4806 = vmatpush.bf16.msrb.mxu3 %v5829_v15  ;;  %v8060_v15 = vld [vmem:[%s8663_s20 + $0x464] sm:$0xf]  ;;  %v6042_v27 = vld [vmem:[%s8663_s20 + $0x558] sm:$0xf0]  ;;  %v6098_v8 = vld [vmem:[%s8663_s20 + $0x5c8] sm:$0xf0] }
 0x18c   : > { %4768 = vmatpush.bf16.msrb.mxu0 %v5629_v34  ;;  %v6050_v34 = vld [vmem:[%s8663_s20 + $0x568] sm:$0xf0]  ;;  %v6045_v3 = vor.u32 %v8090_v59, %v6042_v27  ;;  %v6090_v39 = vld [vmem:[%s8663_s20 + $0x5b8] sm:$0xf0]  ;;  %v8084_v27 = vld [vmem:[%s8663_s20 + $0x524] sm:$0xf] }
 0x18d   : > { %4781 = vmatpush.bf16.msrb.mxu1 %v5693_v2  ;;  %v5925_v2 = vor.u32 %v8060_v15, %v5922_v16  ;;  %v6053_v41 = vor.u32 %v8092_v33, %v6050_v34  ;;  %v8054_v15 = vld [vmem:[%s8663_s20 + $0x434] sm:$0xf]  ;;  %v5898_v16 = vld [vmem:[%s8663_s20 + $0x438] sm:$0xf0]  ;;  %v5954_v59 = vld [vmem:[%s8663_s20 + $0x4a8] sm:$0xf0] }
 0x18e   : > { %4794 = vmatpush.bf16.msrb.mxu2 %v5757_v40  ;;  %v5989_v40 = vor.u32 %v8076_v19, %v5986_v24  ;;  %v8070_v19 = vld [vmem:[%s8663_s20 + $0x4b4] sm:$0xf]  ;;  %v5962_v33 = vld [vmem:[%s8663_s20 + $0x4b8] sm:$0xf0] }
 0x18f   : > { %4807 = vmatpush.bf16.msrb.mxu3 %v5821_v58  ;;  %v8074_v58 = vld [vmem:[%s8663_s20 + $0x4d4] sm:$0xf] }
 0x190   : > { %4769 = vmatpush.bf16.msrb.mxu0 %v5621_v31  ;;  %v8056_v31 = vld [vmem:[%s8663_s20 + $0x444] sm:$0xf]  ;;  %v8086_v34 = vld [vmem:[%s8663_s20 + $0x534] sm:$0xf] }
 0x191   : > { %4782 = vmatpush.bf16.msrb.mxu1 %v5685_v32  ;;  %v6034_v32 = vld [vmem:[%s8663_s20 + $0x548] sm:$0xf0] }
 0x192   : > { %4795 = vmatpush.bf16.msrb.mxu2 %v5749_v35  ;;  %v4563_v35 = vpop.f32.mrf.mxu0 }
 0x193   : > { %4808 = vmatpush.bf16.msrb.mxu3 %v5813_v12  ;;  %4770 = vmatmul.bf16.vlgmr.msrb.gmra.mxu0 %v8831_v22  ;;  %v5970_v22 = vld [vmem:[%s8663_s20 + $0x4c8] sm:$0xf0]  ;;  %v5909_v12 = vor.u32 %v8056_v31, %v5906_v4  ;;  %v5893_v4 = vor.u32 %v8052_v45, %v5890_v46  ;;  %v8126_v45 = vld [vmem:[%s8663_s20 + $0x674] sm:$0xf]  ;;  %v6186_v46 = vld [vmem:[%s8663_s20 + $0x678] sm:$0xf0] }
 0x194   : > { %4814 = vmatpush.bf16.msra.mxu0 %v5933_v36  ;;  %4783 = vmatmul.bf16.vlgmr.msrb.gmra.mxu1 %v8835_v26  ;;  %v4564_v26 = vadd.f32 %v4563_v35, %v9582_v7  ;;  %v4576_v36 = vpop.f32.mrf.mxu1  ;;  %v6026_v7 = vld [vmem:[%s8663_s20 + $0x538] sm:$0xf0] }
 0x195   : > { %4827 = vmatpush.bf16.msra.mxu1 %v5997_v17  ;;  %4796 = vmatmul.bf16.vlgmr.msrb.gmra.mxu2 %v8829_v21  ;;  %v5981_v21 = vor.u32 %v8074_v58, %v5978_v49  ;;  %v5973_v17 = vor.u32 %v8072_v5, %v5970_v22  ;;  %v8068_v58 = vld [vmem:[%s8663_s20 + $0x4a4] sm:$0xf]  ;;  %v5882_v35 = vld [vmem:[%s8663_s20 + $0x418] sm:$0xf0] }
 0x196   : > { %4840 = vmatpush.bf16.msra.mxu2 %v6061_v20  ;;  %4809 = vmatmul.bf16.vlgmr.msrb.gmra.mxu3 %v8833_v25  ;;  %v8088_v25 = vld [vmem:[%s8663_s20 + $0x544] sm:$0xf]  ;;  %v4577_v24 = vadd.f32 %v4576_v36, %v4564_v26  ;;  %v5957_v22 = vor.u32 %v8068_v58, %v5954_v59  ;;  %v5946_v26 = vld [vmem:[%s8663_s20 + $0x498] sm:$0xf0]  ;;  %v8142_v58 = vld [vmem:[%s8663_s20 + $0x6f4] sm:$0xf] }
 0x197   : > { %4853 = vmatpush.bf16.msra.mxu3 %v6125_v23  ;;  %v6037_v20 = vor.u32 %v8088_v25, %v6034_v32  ;;  %v6101_v23 = vor.u32 %v8104_v30, %v6098_v8  ;;  %v6021_v25 = vor.u32 %v8084_v27, %v6018_v60  ;;  %v8050_v32 = vld [vmem:[%s8663_s20 + $0x414] sm:$0xf]  ;;  %v6010_v36 = vld [vmem:[%s8663_s20 + $0x518] sm:$0xf0] }
 0x198   : > { %4815 = vmatpush.bf16.msra.mxu0 %v5925_v2  ;;  %v5901_v2 = vor.u32 %v8054_v15, %v5898_v16  ;;  %v4589_v49 = vpop.f32.mrf.mxu2  ;;  %v8066_v30 = vld [vmem:[%s8663_s20 + $0x494] sm:$0xf]  ;;  %v5885_v15 = vor.u32 %v8050_v32, %v5882_v35  ;;  %v8048_v16 = vld [vmem:[%s8663_s20 + $0x404] sm:$0xf]  ;;  %v6250_v59 = vld [vmem:[%s8663_s20 + $0x6f8] sm:$0xf0] }
 0x199   : > { %4828 = vmatpush.bf16.msra.mxu1 %v5989_v40  ;;  %v5965_v40 = vor.u32 %v8070_v19, %v5962_v33  ;;  %v4590_v63 = vadd.f32 %v4589_v49, %v4577_v24  ;;  %v5874_v19 = vld [vmem:[%s8663_s20 + $0x408] sm:$0xf0]  ;;  %v8064_v33 = vld [vmem:[%s8663_s20 + $0x484] sm:$0xf]  ;;  %v8158_v27 = vld [vmem:[%s8663_s20 + $0x774] sm:$0xf] }
 0x19a   : > { %4841 = vmatpush.bf16.msra.mxu2 %v6053_v41  ;;  %v6029_v41 = vor.u32 %v8086_v34, %v6026_v7  ;;  %v4565_v31 = vpop.f32.mrf.mxu0  ;;  %v5938_v34 = vld [vmem:[%s8663_s20 + $0x488] sm:$0xf0]  ;;  %v8080_v7 = vld [vmem:[%s8663_s20 + $0x504] sm:$0xf]  ;;  %v5877_v49 = vor.u32 %v8048_v16, %v5874_v19  ;;  %v6314_v60 = vld [vmem:[%s8663_s20 + $0x778] sm:$0xf0] }
 0x19b   : > { %4854 = vmatpush.bf16.msra.mxu3 %v6117_v47  ;;  %v6093_v47 = vor.u32 %v8102_v37, %v6090_v39  ;;  %v6002_v39 = vld [vmem:[%s8663_s20 + $0x508] sm:$0xf0]  ;;  %v8140_v35 = vld [vmem:[%s8663_s20 + $0x6e4] sm:$0xf]  ;;  %v8122_v19 = vld [vmem:[%s8663_s20 + $0x654] sm:$0xf] }
 0x19c   : > { %4816 = vmatpush.bf16.msra.mxu0 %v5917_v56  ;;  %v4602_v56 = vpop.f32.mrf.mxu3  ;;  %v4578_v5 = vpop.f32.mrf.mxu1  ;;  %v6178_v32 = vld [vmem:[%s8663_s20 + $0x668] sm:$0xf0] }
 0x19d   : > { %4829 = vmatpush.bf16.msra.mxu1 %v5981_v21  ;;  %v8100_v21 = vld [vmem:[%s8663_s20 + $0x5a4] sm:$0xf]  ;;  %v6253_v5 = vor.u32 %v8142_v58, %v6250_v59  ;;  %v6226_v58 = vld [vmem:[%s8663_s20 + $0x6c8] sm:$0xf0] }
 0x19e   : > { %4842 = vmatpush.bf16.msra.mxu2 %v6045_v3  ;;  %v6082_v3 = vld [vmem:[%s8663_s20 + $0x5a8] sm:$0xf0]  ;;  %v8168_v59 = vld [vmem:[%s8663_s20 + $0x7c4] sm:$0xf] }
 0x19f   : > { %4855 = vmatpush.bf16.msra.mxu3 %v6109_v6  ;;  %v9653_v6 = vadd.f32 %v4602_v56, %v4590_v63  ;;  %v6085_v8 = vor.u32 %v8100_v21, %v6082_v3  ;;  %v5941_v63 = vor.u32 %v8064_v33, %v5938_v34  ;;  %v6005_v56 = vor.u32 %v8080_v7, %v6002_v39  ;;  %v8174_v21 = vld [vmem:[%s8663_s20 + $0x7f4] sm:$0xf]  ;;  %v6378_v3 = vld [vmem:[%s8663_s20 + $0x7f8] sm:$0xf0] }
 0x1a0   : > { %4817 = vmatpush.bf16.msra.mxu0 %v5909_v12  ;;  %v8082_v12 = vld [vmem:[%s8663_s20 + $0x514] sm:$0xf]  ;;  %v6234_v34 = vld [vmem:[%s8663_s20 + $0x6d8] sm:$0xf0] }
 0x1a1   : > { %4830 = vmatpush.bf16.msra.mxu1 %v5973_v17  ;;  %v8098_v17 = vld [vmem:[%s8663_s20 + $0x594] sm:$0xf]  ;;  %v6013_v24 = vor.u32 %v8082_v12, %v6010_v36  ;;  %v6306_v12 = vld [vmem:[%s8663_s20 + $0x768] sm:$0xf0]  ;;  %v8172_v36 = vld [vmem:[%s8663_s20 + $0x7e4] sm:$0xf] }
 0x1a2   : > { %4843 = vmatpush.bf16.msra.mxu2 %v6037_v20  ;;  %v6074_v20 = vld [vmem:[%s8663_s20 + $0x598] sm:$0xf0]  ;;  %v8154_v7 = vld [vmem:[%s8663_s20 + $0x754] sm:$0xf] }
 0x1a3   : > { %4856 = vmatpush.bf16.msra.mxu3 %v6101_v23  ;;  %v5949_v23 = vor.u32 %v8066_v30, %v5946_v26  ;;  %v6077_v37 = vor.u32 %v8098_v17, %v6074_v20  ;;  %v6381_v30 = vor.u32 %v8174_v21, %v6378_v3  ;;  %v8156_v26 = vld [vmem:[%s8663_s20 + $0x764] sm:$0xf]  ;;  %v6370_v17 = vld [vmem:[%s8663_s20 + $0x7e8] sm:$0xf0]  ;;  %v8170_v39 = vld [vmem:[%s8663_s20 + $0x7d4] sm:$0xf] }
 0x1a4   : > { %4818 = vmatpush.bf16.msra.mxu0 %v5901_v2  ;;  %v8096_v2 = vld [vmem:[%s8663_s20 + $0x584] sm:$0xf]  ;;  %v6309_v16 = vor.u32 %v8156_v26, %v6306_v12  ;;  %v6373_v33 = vor.u32 %v8172_v36, %v6370_v17 }
 0x1a5   : > { %4831 = vmatpush.bf16.msra.mxu1 %v5965_v40  ;;  %v6066_v40 = vld [vmem:[%s8663_s20 + $0x588] sm:$0xf0]  ;;  %v8116_v17 = vld [vmem:[%s8663_s20 + $0x624] sm:$0xf] }
 0x1a6   : > { %4844 = vmatpush.bf16.msra.mxu2 %v6029_v41  ;;  %v4591_v41 = vpop.f32.mrf.mxu2  ;;  %v6069_v31 = vor.u32 %v8096_v2, %v6066_v40  ;;  %v6362_v2 = vld [vmem:[%s8663_s20 + $0x7d8] sm:$0xf0] }
 0x1a7   : > { %4857 = vmatpush.bf16.msra.mxu3 %v6093_v47  ;;  %v4604_v47 = vpop.f32.mrf.mxu3 }
 0x1a8   : > { %4819 = vmatpush.bf16.msra.mxu0 %v5893_v4  ;;  %v6189_v4 = vor.u32 %v8126_v45, %v6186_v46  ;;  %v8120_v45 = vld [vmem:[%s8663_s20 + $0x644] sm:$0xf]  ;;  %v6162_v46 = vld [vmem:[%s8663_s20 + $0x648] sm:$0xf0] }
 0x1a9   : > { %4832 = vmatpush.bf16.msra.mxu1 %v5957_v22  ;;  %v6317_v22 = vor.u32 %v8158_v27, %v6314_v60  ;;  %v8152_v47 = vld [vmem:[%s8663_s20 + $0x744] sm:$0xf]  ;;  %v6354_v27 = vld [vmem:[%s8663_s20 + $0x7c8] sm:$0xf0] }
 0x1aa   : > { %4845 = vmatpush.bf16.msra.mxu2 %v6021_v25  ;;  %v8124_v25 = vld [vmem:[%s8663_s20 + $0x664] sm:$0xf] }
 0x1ab   : > { %4858 = vmatpush.bf16.msra.mxu3 %v6085_v8  ;;  %v6242_v8 = vld [vmem:[%s8663_s20 + $0x6e8] sm:$0xf0]  ;;  %v6181_v20 = vor.u32 %v8124_v25, %v6178_v32  ;;  %v6218_v32 = vld [vmem:[%s8663_s20 + $0x6b8] sm:$0xf0] }
 0x1ac   : > { %4820 = vmatpush.bf16.msra.mxu0 %v5885_v15  ;;  %v6245_v15 = vor.u32 %v8140_v35, %v6242_v8  ;;  %v8150_v35 = vld [vmem:[%s8663_s20 + $0x734] sm:$0xf]  ;;  %v6346_v8 = vld [vmem:[%s8663_s20 + $0x7b8] sm:$0xf0] }
 0x1ad   : > { %4833 = vmatpush.bf16.msra.mxu1 %v5949_v23  ;;  %v6170_v23 = vld [vmem:[%s8663_s20 + $0x658] sm:$0xf0] }
 0x1ae   : > { %4846 = vmatpush.bf16.msra.mxu2 %v6013_v24  ;;  %v8138_v24 = vld [vmem:[%s8663_s20 + $0x6d4] sm:$0xf] }
 0x1af   : > { %4859 = vmatpush.bf16.msra.mxu3 %v6077_v37  ;;  %v6298_v37 = vld [vmem:[%s8663_s20 + $0x758] sm:$0xf0]  ;;  %v6237_v40 = vor.u32 %v8138_v24, %v6234_v34  ;;  %v8148_v24 = vld [vmem:[%s8663_s20 + $0x724] sm:$0xf] }
 0x1b0   : > { %4821 = vmatpush.bf16.msra.mxu0 %v5877_v49  ;;  %v6301_v41 = vor.u32 %v8154_v7, %v6298_v37  ;;  %v6290_v49 = vld [vmem:[%s8663_s20 + $0x748] sm:$0xf0]  ;;  %v8164_v37 = vld [vmem:[%s8663_s20 + $0x7a4] sm:$0xf] }
 0x1b1   : > { %4834 = vmatpush.bf16.msra.mxu1 %v5941_v63  ;;  %v6165_v63 = vor.u32 %v8120_v45, %v6162_v46  ;;  %v6293_v3 = vor.u32 %v8152_v47, %v6290_v49  ;;  %v6202_v49 = vld [vmem:[%s8663_s20 + $0x698] sm:$0xf0] }
 0x1b2   : > { %4847 = vmatpush.bf16.msra.mxu2 %v6005_v56  ;;  %v4628_v56 = vpop.f32.mrf.mxu1 }
 0x1b3   : > { %4860 = vmatpush.bf16.msra.mxu3 %v6069_v31  ;;  %4822 = vmatmul.bf16.vlgmr.msra.gmra.mxu0 %v8873_v10  ;;  %v6173_v10 = vor.u32 %v8122_v19, %v6170_v23  ;;  %v8118_v31 = vld [vmem:[%s8663_s20 + $0x634] sm:$0xf]  ;;  %v6210_v23 = vld [vmem:[%s8663_s20 + $0x6a8] sm:$0xf0] }
 0x1b4   : > { %4866 = vmatpush.bf16.msrb.mxu0 %v6189_v4  ;;  %4835 = vmatmul.bf16.vlgmr.msra.gmra.mxu1 %v8877_v13  ;;  %v6365_v13 = vor.u32 %v8170_v39, %v6362_v2  ;;  %v6154_v4 = vld [vmem:[%s8663_s20 + $0x638] sm:$0xf0]  ;;  %v6338_v39 = vld [vmem:[%s8663_s20 + $0x7a8] sm:$0xf0] }
 0x1b5   : > { %4879 = vmatpush.bf16.msrb.mxu1 %v6253_v5  ;;  %4848 = vmatmul.bf16.vlgmr.msra.gmra.mxu2 %v8875_v11  ;;  %v8136_v11 = vld [vmem:[%s8663_s20 + $0x6c4] sm:$0xf]  ;;  %v8134_v5 = vld [vmem:[%s8663_s20 + $0x6b4] sm:$0xf]  ;;  %v6157_v26 = vor.u32 %v8118_v31, %v6154_v4  ;;  %v6341_v47 = vor.u32 %v8164_v37, %v6338_v39 }
 0x1b6   : > { %4892 = vmatpush.bf16.msrb.mxu2 %v6317_v22  ;;  %4861 = vmatmul.bf16.vlgmr.msra.gmra.mxu3 %v8879_v14  ;;  %v4615_v14 = vpop.f32.mrf.mxu0  ;;  %v6229_v21 = vor.u32 %v8136_v11, %v6226_v58  ;;  %v6357_v22 = vor.u32 %v8168_v59, %v6354_v27  ;;  %v6221_v12 = vor.u32 %v8134_v5, %v6218_v32  ;;  %v8114_v11 = vld [vmem:[%s8663_s20 + $0x614] sm:$0xf]  ;;  %v6266_v59 = vld [vmem:[%s8663_s20 + $0x718] sm:$0xf0]  ;;  %v8128_v4 = vld [vmem:[%s8663_s20 + $0x684] sm:$0xf] }
 0x1b7   : > { %4905 = vmatpush.bf16.msrb.mxu3 %v6381_v30  ;;  %v4616_v60 = vadd.f32 %v4615_v14, %v9653_v6  ;;  %v6282_v6 = vld [vmem:[%s8663_s20 + $0x738] sm:$0xf0]  ;;  %v8166_v30 = vld [vmem:[%s8663_s20 + $0x7b4] sm:$0xf]  ;;  %v6194_v5 = vld [vmem:[%s8663_s20 + $0x688] sm:$0xf0] }
 0x1b8   : > { %4867 = vmatpush.bf16.msrb.mxu0 %v6181_v20  ;;  %v6285_v36 = vor.u32 %v8150_v35, %v6282_v6  ;;  %v6146_v20 = vld [vmem:[%s8663_s20 + $0x628] sm:$0xf0]  ;;  %v4641_v19 = vpop.f32.mrf.mxu2  ;;  %v8130_v58 = vld [vmem:[%s8663_s20 + $0x694] sm:$0xf]  ;;  %v8160_v35 = vld [vmem:[%s8663_s20 + $0x784] sm:$0xf] }
 0x1b9   : > { %4880 = vmatpush.bf16.msrb.mxu1 %v6245_v15  ;;  %v4629_v25 = vadd.f32 %v4628_v56, %v4616_v60  ;;  %v8132_v15 = vld [vmem:[%s8663_s20 + $0x6a4] sm:$0xf]  ;;  %v4654_v7 = vpop.f32.mrf.mxu3  ;;  %v8146_v14 = vld [vmem:[%s8663_s20 + $0x714] sm:$0xf]  ;;  %v6330_v60 = vld [vmem:[%s8663_s20 + $0x798] sm:$0xf0] }
 0x1ba   : > { %4893 = vmatpush.bf16.msrb.mxu2 %v6309_v16  ;;  %v6349_v16 = vor.u32 %v8166_v30, %v6346_v8  ;;  %v6213_v45 = vor.u32 %v8132_v15, %v6210_v23  ;;  %v8162_v27 = vld [vmem:[%s8663_s20 + $0x794] sm:$0xf]  ;;  %v8112_v56 = vld [vmem:[%s8663_s20 + $0x604] sm:$0xf]  ;;  %v6269_v31 = vor.u32 %v8146_v14, %v6266_v59  ;;  %v6258_v32 = vld [vmem:[%s8663_s20 + $0x708] sm:$0xf0] }
 0x1bb   : > { %4906 = vmatpush.bf16.msrb.mxu3 %v6373_v33  ;;  %v6274_v33 = vld [vmem:[%s8663_s20 + $0x728] sm:$0xf0]  ;;  %v4642_v34 = vadd.f32 %v4641_v19, %v4629_v25  ;;  %v6333_v25 = vor.u32 %v8162_v27, %v6330_v60  ;;  %v8190_v8 = vld [vmem:[%s8663_s20 + $0x874] sm:$0xf]  ;;  %v6197_v19 = vor.u32 %v8128_v4, %v6194_v5  ;;  %v6426_v60 = vld [vmem:[%s8663_s20 + $0x858] sm:$0xf0] }
 0x1bc   : > { %4868 = vmatpush.bf16.msrb.mxu0 %v6173_v10  ;;  %v6149_v10 = vor.u32 %v8116_v17, %v6146_v20  ;;  %v6277_v46 = vor.u32 %v8148_v24, %v6274_v33  ;;  %v6322_v6 = vld [vmem:[%s8663_s20 + $0x788] sm:$0xf0]  ;;  %v6506_v20 = vld [vmem:[%s8663_s20 + $0x8f8] sm:$0xf0]  ;;  %v8222_v15 = vld [vmem:[%s8663_s20 + $0x974] sm:$0xf] }
 0x1bd   : > { %4881 = vmatpush.bf16.msrb.mxu1 %v6237_v40  ;;  %v4630_v40 = vpop.f32.mrf.mxu1  ;;  %v8238_v24 = vld [vmem:[%s8663_s20 + $0x9f4] sm:$0xf]  ;;  %v6634_v33 = vld [vmem:[%s8663_s20 + $0x9f8] sm:$0xf0] }
 0x1be   : > { %4894 = vmatpush.bf16.msrb.mxu2 %v6301_v41  ;;  %v4617_v2 = vpop.f32.mrf.mxu0  ;;  %v9724_v41 = vadd.f32 %v4654_v7, %v4642_v34  ;;  %v6325_v34 = vor.u32 %v8160_v35, %v6322_v6  ;;  %v8204_v40 = vld [vmem:[%s8663_s20 + $0x8e4] sm:$0xf]  ;;  %v8186_v27 = vld [vmem:[%s8663_s20 + $0x854] sm:$0xf]  ;;  %v6618_v5 = vld [vmem:[%s8663_s20 + $0x9d8] sm:$0xf0] }
 0x1bf   : > { %4907 = vmatpush.bf16.msrb.mxu3 %v6365_v13  ;;  %v6138_v13 = vld [vmem:[%s8663_s20 + $0x618] sm:$0xf0]  ;;  %v8188_v2 = vld [vmem:[%s8663_s20 + $0x864] sm:$0xf]  ;;  %v8234_v4 = vld [vmem:[%s8663_s20 + $0x9d4] sm:$0xf] }
 0x1c0   : > { %4869 = vmatpush.bf16.msrb.mxu0 %v6165_v63  ;;  %v6141_v63 = vor.u32 %v8114_v11, %v6138_v13  ;;  %v4643_v30 = vpop.f32.mrf.mxu2  ;;  %v8220_v11 = vld [vmem:[%s8663_s20 + $0x964] sm:$0xf]  ;;  %v6562_v13 = vld [vmem:[%s8663_s20 + $0x968] sm:$0xf0] }
 0x1c1   : > { %4882 = vmatpush.bf16.msrb.mxu1 %v6229_v21  ;;  %v6130_v21 = vld [vmem:[%s8663_s20 + $0x608] sm:$0xf0]  ;;  %v6565_v59 = vor.u32 %v8220_v11, %v6562_v13  ;;  %v8216_v30 = vld [vmem:[%s8663_s20 + $0x944] sm:$0xf] }
 0x1c2   : > { %4895 = vmatpush.bf16.msrb.mxu2 %v6293_v3  ;;  %v6205_v3 = vor.u32 %v8130_v58, %v6202_v49  ;;  %v6133_v17 = vor.u32 %v8112_v56, %v6130_v21  ;;  %v8236_v58 = vld [vmem:[%s8663_s20 + $0x9e4] sm:$0xf]  ;;  %v6490_v21 = vld [vmem:[%s8663_s20 + $0x8d8] sm:$0xf0]  ;;  %v6418_v35 = vld [vmem:[%s8663_s20 + $0x848] sm:$0xf0] }
 0x1c3   : > { %4908 = vmatpush.bf16.msrb.mxu3 %v6357_v22  ;;  %v8144_v22 = vld [vmem:[%s8663_s20 + $0x704] sm:$0xf]  ;;  %v6482_v6 = vld [vmem:[%s8663_s20 + $0x8c8] sm:$0xf0] }
 0x1c4   : > { %4870 = vmatpush.bf16.msrb.mxu0 %v6157_v26  ;;  %v6442_v26 = vld [vmem:[%s8663_s20 + $0x878] sm:$0xf0]  ;;  %v6261_v23 = vor.u32 %v8144_v22, %v6258_v32  ;;  %v8184_v32 = vld [vmem:[%s8663_s20 + $0x844] sm:$0xf]  ;;  %v6402_v11 = vld [vmem:[%s8663_s20 + $0x828] sm:$0xf0] }
 0x1c5   : > { %4883 = vmatpush.bf16.msrb.mxu1 %v6221_v12  ;;  %v8206_v12 = vld [vmem:[%s8663_s20 + $0x8f4] sm:$0xf]  ;;  %v6445_v7 = vor.u32 %v8190_v8, %v6442_v26  ;;  %v6546_v8 = vld [vmem:[%s8663_s20 + $0x948] sm:$0xf0]  ;;  %v8232_v26 = vld [vmem:[%s8663_s20 + $0x9c4] sm:$0xf] }
 0x1c6   : > { %4896 = vmatpush.bf16.msrb.mxu2 %v6285_v36  ;;  %v4656_v36 = vpop.f32.mrf.mxu3  ;;  %v6509_v37 = vor.u32 %v8206_v12, %v6506_v20  ;;  %v6610_v12 = vld [vmem:[%s8663_s20 + $0x9c8] sm:$0xf0]  ;;  %v8196_v13 = vld [vmem:[%s8663_s20 + $0x8a4] sm:$0xf] }
 0x1c7   : > { %4909 = vmatpush.bf16.msrb.mxu3 %v6349_v16  ;;  %v6570_v16 = vld [vmem:[%s8663_s20 + $0x978] sm:$0xf0] }
 0x1c8   : > { %4871 = vmatpush.bf16.msrb.mxu0 %v6149_v10  ;;  %v6573_v39 = vor.u32 %v8222_v15, %v6570_v16  ;;  %v6434_v10 = vld [vmem:[%s8663_s20 + $0x868] sm:$0xf0]  ;;  %v6549_v16 = vor.u32 %v8216_v30, %v6546_v8  ;;  %v8226_v30 = vld [vmem:[%s8663_s20 + $0x994] sm:$0xf]  ;;  %v6586_v8 = vld [vmem:[%s8663_s20 + $0x998] sm:$0xf0] }
 0x1c9   : > { %4884 = vmatpush.bf16.msrb.mxu1 %v6213_v45  ;;  %v6637_v45 = vor.u32 %v8238_v24, %v6634_v33  ;;  %v6437_v49 = vor.u32 %v8188_v2, %v6434_v10  ;;  %v8198_v24 = vld [vmem:[%s8663_s20 + $0x8b4] sm:$0xf]  ;;  %v6613_v33 = vor.u32 %v8232_v26, %v6610_v12  ;;  %v6602_v2 = vld [vmem:[%s8663_s20 + $0x9b8] sm:$0xf0]  ;;  %v8176_v26 = vld [vmem:[%s8663_s20 + $0x804] sm:$0xf] }
 0x1ca   : > { %4897 = vmatpush.bf16.msrb.mxu2 %v6277_v46  ;;  %v6498_v46 = vld [vmem:[%s8663_s20 + $0x8e8] sm:$0xf0] }
 0x1cb   : > { %4910 = vmatpush.bf16.msrb.mxu3 %v6341_v47  ;;  %v6626_v47 = vld [vmem:[%s8663_s20 + $0x9e8] sm:$0xf0]  ;;  %v6501_v14 = vor.u32 %v8204_v40, %v6498_v46  ;;  %v8180_v46 = vld [vmem:[%s8663_s20 + $0x824] sm:$0xf] }
 0x1cc   : > { %4872 = vmatpush.bf16.msrb.mxu0 %v6141_v63  ;;  %v8202_v63 = vld [vmem:[%s8663_s20 + $0x8d4] sm:$0xf]  ;;  %v6629_v56 = vor.u32 %v8236_v58, %v6626_v47  ;;  %v6386_v12 = vld [vmem:[%s8663_s20 + $0x808] sm:$0xf0] }
 0x1cd   : > { %4885 = vmatpush.bf16.msrb.mxu1 %v6205_v3  ;;  %v8218_v3 = vld [vmem:[%s8663_s20 + $0x954] sm:$0xf]  ;;  %v6493_v22 = vor.u32 %v8202_v63, %v6490_v21  ;;  %v8228_v63 = vld [vmem:[%s8663_s20 + $0x9a4] sm:$0xf] }
 0x1ce   : > { %4898 = vmatpush.bf16.msrb.mxu2 %v6269_v31  ;;  %v6554_v31 = vld [vmem:[%s8663_s20 + $0x958] sm:$0xf0] }
 0x1cf   : > { %4911 = vmatpush.bf16.msrb.mxu3 %v6333_v25  ;;  %v6557_v25 = vor.u32 %v8218_v3, %v6554_v31  ;;  %v6405_v3 = vor.u32 %v8180_v46, %v6402_v11 }
 0x1d0   : > { %4873 = vmatpush.bf16.msrb.mxu0 %v6133_v17  ;;  %v6421_v17 = vor.u32 %v8184_v32, %v6418_v35  ;;  %v8194_v32 = vld [vmem:[%s8663_s20 + $0x894] sm:$0xf] }
 0x1d1   : > { %4886 = vmatpush.bf16.msrb.mxu1 %v6197_v19  ;;  %v4680_v20 = vpop.f32.mrf.mxu1  ;;  %v8182_v19 = vld [vmem:[%s8663_s20 + $0x834] sm:$0xf] }
 0x1d2   : > { %4899 = vmatpush.bf16.msrb.mxu2 %v6261_v23  ;;  %v6410_v23 = vld [vmem:[%s8663_s20 + $0x838] sm:$0xf0] }
 0x1d3   : > { %4912 = vmatpush.bf16.msrb.mxu3 %v6325_v34  ;;  %4874 = vmatmul.bf16.vlgmr.msrb.gmra.mxu0 %v8941_v51  ;;  %v6429_v51 = vor.u32 %v8186_v27, %v6426_v60  ;;  %v6413_v10 = vor.u32 %v8182_v19, %v6410_v23  ;;  %v6589_v19 = vor.u32 %v8226_v30, %v6586_v8  ;;  %v6514_v23 = vld [vmem:[%s8663_s20 + $0x908] sm:$0xf0]  ;;  %v6746_v30 = vld [vmem:[%s8663_s20 + $0xad8] sm:$0xf0]  ;;  %v8282_v8 = vld [vmem:[%s8663_s20 + $0xb54] sm:$0xf] }
 0x1d4   : > { %4918 = vmatpush.bf16.msra.mxu0 %v6445_v7  ;;  %4887 = vmatmul.bf16.vlgmr.msrb.gmra.mxu1 %v8945_v54  ;;  %v6621_v54 = vor.u32 %v8234_v4, %v6618_v5  ;;  %v6474_v7 = vld [vmem:[%s8663_s20 + $0x8b8] sm:$0xf0] }
 0x1d5   : > { %4931 = vmatpush.bf16.msra.mxu1 %v6509_v37  ;;  %4900 = vmatmul.bf16.vlgmr.msrb.gmra.mxu2 %v8943_v52  ;;  %v8200_v52 = vld [vmem:[%s8663_s20 + $0x8c4] sm:$0xf]  ;;  %v8214_v37 = vld [vmem:[%s8663_s20 + $0x934] sm:$0xf]  ;;  %v6477_v40 = vor.u32 %v8198_v24, %v6474_v7 }
 0x1d6   : > { %4944 = vmatpush.bf16.msra.mxu2 %v6573_v39  ;;  %4913 = vmatmul.bf16.vlgmr.msrb.gmra.mxu3 %v8947_v55  ;;  %v4667_v55 = vpop.f32.mrf.mxu0  ;;  %v6485_v15 = vor.u32 %v8200_v52, %v6482_v6  ;;  %v8230_v39 = vld [vmem:[%s8663_s20 + $0x9b4] sm:$0xf]  ;;  %v6458_v52 = vld [vmem:[%s8663_s20 + $0x898] sm:$0xf0]  ;;  %v8224_v24 = vld [vmem:[%s8663_s20 + $0x984] sm:$0xf] }
 0x1d7   : > { %4957 = vmatpush.bf16.msra.mxu3 %v6637_v45  ;;  %v4668_v36 = vadd.f32 %v4667_v55, %v9724_v41  ;;  %v6538_v41 = vld [vmem:[%s8663_s20 + $0x938] sm:$0xf0]  ;;  %v6605_v58 = vor.u32 %v8230_v39, %v6602_v2  ;;  %v8254_v7 = vld [vmem:[%s8663_s20 + $0xa74] sm:$0xf]  ;;  %v6389_v2 = vor.u32 %v8176_v26, %v6386_v12 }
 0x1d8   : > { %4919 = vmatpush.bf16.msra.mxu0 %v6437_v49  ;;  %v6541_v45 = vor.u32 %v8214_v37, %v6538_v41  ;;  %v4693_v47 = vpop.f32.mrf.mxu2  ;;  %v6466_v49 = vld [vmem:[%s8663_s20 + $0x8a8] sm:$0xf0]  ;;  %v6522_v6 = vld [vmem:[%s8663_s20 + $0x918] sm:$0xf0]  ;;  %v8270_v41 = vld [vmem:[%s8663_s20 + $0xaf4] sm:$0xf] }
 0x1d9   : > { %4932 = vmatpush.bf16.msra.mxu1 %v6501_v14  ;;  %v4681_v34 = vadd.f32 %v4680_v20, %v4668_v36  ;;  %v8212_v14 = vld [vmem:[%s8663_s20 + $0x924] sm:$0xf]  ;;  %v4706_v60 = vpop.f32.mrf.mxu3  ;;  %v4682_v31 = vpop.f32.mrf.mxu1  ;;  %v6469_v5 = vor.u32 %v8196_v13, %v6466_v49  ;;  %v6461_v36 = vor.u32 %v8194_v32, %v6458_v52  ;;  %v6698_v37 = vld [vmem:[%s8663_s20 + $0xa78] sm:$0xf0]  ;;  %v8302_v13 = vld [vmem:[%s8663_s20 + $0xbf4] sm:$0xf] }
 0x1da   : > { %4945 = vmatpush.bf16.msra.mxu2 %v6565_v59  ;;  %v6530_v59 = vld [vmem:[%s8663_s20 + $0x928] sm:$0xf0]  ;;  %v8192_v20 = vld [vmem:[%s8663_s20 + $0x884] sm:$0xf]  ;;  %v6701_v49 = vor.u32 %v8254_v7, %v6698_v37  ;;  %v6682_v52 = vld [vmem:[%s8663_s20 + $0xa58] sm:$0xf0] }
 0x1db   : > { %4958 = vmatpush.bf16.msra.mxu3 %v6629_v56  ;;  %v4694_v27 = vadd.f32 %v4693_v47, %v4681_v34  ;;  %v6594_v56 = vld [vmem:[%s8663_s20 + $0x9a8] sm:$0xf0]  ;;  %v8298_v26 = vld [vmem:[%s8663_s20 + $0xbd4] sm:$0xf]  ;;  %v6874_v12 = vld [vmem:[%s8663_s20 + $0xbd8] sm:$0xf0] }
 0x1dc   : > { %4920 = vmatpush.bf16.msra.mxu0 %v6429_v51  ;;  %v6533_v51 = vor.u32 %v8212_v14, %v6530_v59  ;;  %v6597_v35 = vor.u32 %v8228_v63, %v6594_v56  ;;  %v8268_v63 = vld [vmem:[%s8663_s20 + $0xae4] sm:$0xf]  ;;  %v6818_v31 = vld [vmem:[%s8663_s20 + $0xb68] sm:$0xf0] }
 0x1dd   : > { %4933 = vmatpush.bf16.msra.mxu1 %v6493_v22  ;;  %v9795_v4 = vadd.f32 %v4706_v60, %v4694_v27  ;;  %v8178_v22 = vld [vmem:[%s8663_s20 + $0x814] sm:$0xf]  ;;  %v8252_v27 = vld [vmem:[%s8663_s20 + $0xa64] sm:$0xf]  ;;  %v6690_v60 = vld [vmem:[%s8663_s20 + $0xa68] sm:$0xf0] }
 0x1de   : > { %4946 = vmatpush.bf16.msra.mxu2 %v6557_v25  ;;  %v4669_v21 = vpop.f32.mrf.mxu0  ;;  %v6394_v25 = vld [vmem:[%s8663_s20 + $0x818] sm:$0xf0] }
 0x1df   : > { %4959 = vmatpush.bf16.msra.mxu3 %v6621_v54  ;;  %v8210_v54 = vld [vmem:[%s8663_s20 + $0x914] sm:$0xf]  ;;  %v6397_v55 = vor.u32 %v8178_v22, %v6394_v25  ;;  %v6754_v21 = vld [vmem:[%s8663_s20 + $0xae8] sm:$0xf0]  ;;  %v6693_v22 = vor.u32 %v8252_v27, %v6690_v60  ;;  %vm5230_vm1 = vcmp.ge.f32.partialorder %v9795_v4, 0.0 }
 0x1e0   : > { %4921 = vmatpush.bf16.msra.mxu0 %v6421_v17  ;;  %v6525_v17 = vor.u32 %v8210_v54, %v6522_v6  ;;  %v4695_v34 = vpop.f32.mrf.mxu2  ;;  %v6757_v25 = vor.u32 %v8268_v63, %v6754_v21  ;;  %v8266_v54 = vld [vmem:[%s8663_s20 + $0xad4] sm:$0xf]  ;;  %v6658_v21 = vld [vmem:[%s8663_s20 + $0xa28] sm:$0xf0] }
 0x1e1   : > { %4934 = vmatpush.bf16.msra.mxu1 %v6485_v15  ;;  %v6450_v15 = vld [vmem:[%s8663_s20 + $0x888] sm:$0xf0]  ;;  %v4708_v39 = vpop.f32.mrf.mxu3 }
 0x1e2   : > { %4947 = vmatpush.bf16.msra.mxu2 %v6549_v16  ;;  %v8208_v16 = vld [vmem:[%s8663_s20 + $0x904] sm:$0xf]  ;;  %v6453_v46 = vor.u32 %v8192_v20, %v6450_v15  ;;  %v6674_v15 = vld [vmem:[%s8663_s20 + $0xa48] sm:$0xf0] }
 0x1e3   : > { %4960 = vmatpush.bf16.msra.mxu3 %v6613_v33  ;;  %v6578_v33 = vld [vmem:[%s8663_s20 + $0x988] sm:$0xf0]  ;;  %v6517_v11 = vor.u32 %v8208_v16, %v6514_v23  ;;  %v8585_v16 = vld [vmem:[%s9120_s10] sm:$0x3]  ;;  %v8280_v23 = vld [vmem:[%s8663_s20 + $0xb44] sm:$0xf] }
 0x1e4   : > { %4922 = vmatpush.bf16.msra.mxu0 %v6413_v10  ;;  %v6762_v10 = vld [vmem:[%s8663_s20 + $0xaf8] sm:$0xf0]  ;;  %v6581_v47 = vor.u32 %v8224_v24, %v6578_v33  ;;  %v6802_v24 = vld [vmem:[%s8663_s20 + $0xb48] sm:$0xf0]  ;;  %v8296_v33 = vld [vmem:[%s8663_s20 + $0xbc4] sm:$0xf] }
 0x1e5   : > { %4935 = vmatpush.bf16.msra.mxu1 %v6477_v40  ;;  %v8286_v40 = vld [vmem:[%s8663_s20 + $0xb74] sm:$0xf]  ;;  %v6765_v14 = vor.u32 %v8270_v41, %v6762_v10  ;;  %v6866_v34 = vld [vmem:[%s8663_s20 + $0xbc8] sm:$0xf0]  ;;  %v6805_v39 = vor.u32 %v8280_v23, %v6802_v24  ;;  %v6666_v10 = vld [vmem:[%s8663_s20 + $0xa38] sm:$0xf0] }
 0x1e6   : > { %4948 = vmatpush.bf16.msra.mxu2 %v6541_v45  ;;  %v6826_v45 = vld [vmem:[%s8663_s20 + $0xb78] sm:$0xf0]  ;;  %v8240_v23 = vld [vmem:[%s8663_s20 + $0xa04] sm:$0xf]  ;;  %v6642_v24 = vld [vmem:[%s8663_s20 + $0xa08] sm:$0xf0] }
 0x1e7   : > { %4961 = vmatpush.bf16.msra.mxu3 %v6605_v58  ;;  %v6890_v58 = vld [vmem:[%s8663_s20 + $0xbf8] sm:$0xf0]  ;;  %v6829_v59 = vor.u32 %v8286_v40, %v6826_v45  ;;  %v8262_v40 = vld [vmem:[%s8663_s20 + $0xab4] sm:$0xf] }
 0x1e8   : > { %4923 = vmatpush.bf16.msra.mxu0 %v6405_v3  ;;  %v6893_v56 = vor.u32 %v8302_v13, %v6890_v58  ;;  %v8284_v3 = vld [vmem:[%s8663_s20 + $0xb64] sm:$0xf]  ;;  %v6730_v13 = vld [vmem:[%s8663_s20 + $0xab8] sm:$0xf0]  ;;  %v8278_v58 = vld [vmem:[%s8663_s20 + $0xb34] sm:$0xf] }
 0x1e9   : > { %4936 = vmatpush.bf16.msra.mxu1 %v6469_v5  ;;  %v8300_v5 = vld [vmem:[%s8663_s20 + $0xbe4] sm:$0xf]  ;;  %v6821_v32 = vor.u32 %v8284_v3, %v6818_v31  ;;  %v6733_v60 = vor.u32 %v8262_v40, %v6730_v13  ;;  %v6954_v13 = vld [vmem:[%s8663_s20 + $0xc78] sm:$0xf0] }
 0x1ea   : > { %4949 = vmatpush.bf16.msra.mxu2 %v6533_v51  ;;  %v6882_v51 = vld [vmem:[%s8663_s20 + $0xbe8] sm:$0xf0]  ;;  %v8260_v3 = vld [vmem:[%s8663_s20 + $0xaa4] sm:$0xf] }
 0x1eb   : > { %4962 = vmatpush.bf16.msra.mxu3 %v6597_v35  ;;  %v8250_v35 = vld [vmem:[%s8663_s20 + $0xa54] sm:$0xf]  ;;  %v6885_v6 = vor.u32 %v8300_v5, %v6882_v51  ;;  %v6722_v51 = vld [vmem:[%s8663_s20 + $0xaa8] sm:$0xf0]  ;;  %v8288_v40 = vld [vmem:[%s8663_s20 + $0xb84] sm:$0xf] }
 0x1ec   : > { %4924 = vmatpush.bf16.msra.mxu0 %v6397_v55  ;;  %v6810_v55 = vld [vmem:[%s8663_s20 + $0xb58] sm:$0xf0] }
 0x1ed   : > { %4937 = vmatpush.bf16.msra.mxu1 %v6461_v36  ;;  %v8248_v36 = vld [vmem:[%s8663_s20 + $0xa44] sm:$0xf]  ;;  %v6813_v20 = vor.u32 %v8282_v8, %v6810_v55  ;;  %v6725_v55 = vor.u32 %v8260_v3, %v6722_v51 }
 0x1ee   : > { %4950 = vmatpush.bf16.msra.mxu2 %v6525_v17  ;;  %v6749_v17 = vor.u32 %v8266_v54, %v6746_v30  ;;  %v6677_v7 = vor.u32 %v8248_v36, %v6674_v15  ;;  %v6850_v54 = vld [vmem:[%s8663_s20 + $0xba8] sm:$0xf0]  ;;  %v8258_v36 = vld [vmem:[%s8663_s20 + $0xa94] sm:$0xf]  ;;  %v6714_v15 = vld [vmem:[%s8663_s20 + $0xa98] sm:$0xf0] }
 0x1ef   : > { %4963 = vmatpush.bf16.msra.mxu3 %v6589_v19  ;;  %v6877_v19 = vor.u32 %v8298_v26, %v6874_v12  ;;  %v8242_v12 = vld [vmem:[%s8663_s20 + $0xa14] sm:$0xf]  ;;  %v8316_v51 = vld [vmem:[%s8663_s20 + $0xc64] sm:$0xf] }
 0x1f0   : > { %4925 = vmatpush.bf16.msra.mxu0 %v6389_v2  ;;  %v4719_v37 = vpop.f32.mrf.mxu0  ;;  %v8246_v2 = vld [vmem:[%s8663_s20 + $0xa34] sm:$0xf] }
 0x1f1   : > { %4938 = vmatpush.bf16.msra.mxu1 %v6453_v46  ;;  %v4732_v46 = vpop.f32.mrf.mxu1  ;;  %v6669_v27 = vor.u32 %v8246_v2, %v6666_v10  ;;  %v6770_v10 = vld [vmem:[%s8663_s20 + $0xb08] sm:$0xf0] }
 0x1f2   : > { %4951 = vmatpush.bf16.msra.mxu2 %v6517_v11  ;;  %v6869_v11 = vor.u32 %v8296_v33, %v6866_v34  ;;  %v6717_v33 = vor.u32 %v8258_v36, %v6714_v15  ;;  %v6938_v36 = vld [vmem:[%s8663_s20 + $0xc58] sm:$0xf0] }
 0x1f3   : > { %4964 = vmatpush.bf16.msra.mxu3 %v6581_v47  ;;  %4926 = vmatmul.bf16.vlgmr.msra.gmra.mxu0 %v9059_v9  ;;  %v6685_v9 = vor.u32 %v8250_v35, %v6682_v52  ;;  %v6794_v47 = vld [vmem:[%s8663_s20 + $0xb38] sm:$0xf0]  ;;  %v8292_v52 = vld [vmem:[%s8663_s20 + $0xba4] sm:$0xf] }
 0x1f4   : > { %4970 = vmatpush.bf16.msrb.mxu0 %v6701_v49  ;;  %4939 = vmatmul.bf16.vlgmr.msra.gmra.mxu1 %v9072_v28  ;;  %v886_v28 = vperm.slane %v8585_v16, 1  ;;  %v8294_v49 = vld [vmem:[%s8663_s20 + $0xbb4] sm:$0xf]  ;;  %v6797_v63 = vor.u32 %v8278_v58, %v6794_v47  ;;  %v6778_v16 = vld [vmem:[%s8663_s20 + $0xb18] sm:$0xf0]  ;;  %v6645_v47 = vor.u32 %v8240_v23, %v6642_v24 }
 0x1f5   : > { %4983 = vmatpush.bf16.msrb.mxu1 %v6765_v14  ;;  %4952 = vmatmul.bf16.vlgmr.msra.gmra.mxu2 %v9064_v18  ;;  %v8264_v18 = vld [vmem:[%s8663_s20 + $0xac4] sm:$0xf]  ;;  %v6858_v14 = vld [vmem:[%s8663_s20 + $0xbb8] sm:$0xf0]  ;;  %v8334_v58 = vld [vmem:[%s8663_s20 + $0xcf4] sm:$0xf] }
 0x1f6   : > { %4996 = vmatpush.bf16.msrb.mxu2 %v6829_v59  ;;  %4965 = vmatmul.bf16.vlgmr.msra.gmra.mxu3 %v9074_v29  ;;  %v6738_v29 = vld [vmem:[%s8663_s20 + $0xac8] sm:$0xf0]  ;;  %v4720_v45 = vadd.f32 %v4719_v37, %v886_v28  ;;  %v6861_v5 = vor.u32 %v8294_v49, %v6858_v14  ;;  %v8290_v28 = vld [vmem:[%s8663_s20 + $0xb94] sm:$0xf]  ;;  %v7018_v49 = vld [vmem:[%s8663_s20 + $0xcf8] sm:$0xf0] }
 0x1f7   : > { %5009 = vmatpush.bf16.msrb.mxu3 %v6893_v56  ;;  %v6741_v41 = vor.u32 %v8264_v18, %v6738_v29  ;;  %v8244_v56 = vld [vmem:[%s8663_s20 + $0xa24] sm:$0xf]  ;;  %v8274_v18 = vld [vmem:[%s8663_s20 + $0xb14] sm:$0xf]  ;;  %v6706_v37 = vld [vmem:[%s8663_s20 + $0xa88] sm:$0xf0] }
 0x1f8   : > { %4971 = vmatpush.bf16.msrb.mxu0 %v6693_v22  ;;  %v4733_v59 = vadd.f32 %v4732_v46, %v4720_v45  ;;  %v4745_v31 = vpop.f32.mrf.mxu2  ;;  %v8276_v22 = vld [vmem:[%s8663_s20 + $0xb24] sm:$0xf]  ;;  %v4721_v8 = vpop.f32.mrf.mxu0  ;;  %v6781_v34 = vor.u32 %v8274_v18, %v6778_v16  ;;  %v6834_v45 = vld [vmem:[%s8663_s20 + $0xb88] sm:$0xf0]  ;;  %v8350_v14 = vld [vmem:[%s8663_s20 + $0xd74] sm:$0xf] }
 0x1f9   : > { %4984 = vmatpush.bf16.msrb.mxu1 %v6757_v25  ;;  %v6786_v25 = vld [vmem:[%s8663_s20 + $0xb28] sm:$0xf0]  ;;  %v4758_v35 = vpop.f32.mrf.mxu3  ;;  %v7002_v15 = vld [vmem:[%s8663_s20 + $0xcd8] sm:$0xf0]  ;;  %v8346_v18 = vld [vmem:[%s8663_s20 + $0xd54] sm:$0xf] }
 0x1fa   : > { %4997 = vmatpush.bf16.msrb.mxu2 %v6821_v32  ;;  %v4746_v32 = vadd.f32 %v4745_v31, %v4733_v59  ;;  %v6789_v26 = vor.u32 %v8276_v22, %v6786_v25  ;;  %v7082_v59 = vld [vmem:[%s8663_s20 + $0xd78] sm:$0xf0]  ;;  %v7021_v31 = vor.u32 %v8334_v58, %v7018_v49  ;;  %v6946_v22 = vld [vmem:[%s8663_s20 + $0xc68] sm:$0xf0]  ;;  %v8332_v25 = vld [vmem:[%s8663_s20 + $0xce4] sm:$0xf] }
 0x1fb   : > { %5010 = vmatpush.bf16.msrb.mxu3 %v6885_v6  ;;  %v6661_v6 = vor.u32 %v8244_v56, %v6658_v21  ;;  %v7146_v56 = vld [vmem:[%s8663_s20 + $0xdf8] sm:$0xf0]  ;;  %v6837_v21 = vor.u32 %v8288_v40, %v6834_v45  ;;  %v7138_v8 = vld [vmem:[%s8663_s20 + $0xde8] sm:$0xf0]  ;;  %v8312_v24 = vld [vmem:[%s8663_s20 + $0xc44] sm:$0xf] }
 0x1fc   : > { %4972 = vmatpush.bf16.msrb.mxu0 %v6685_v9  ;;  %v9866_v30 = vadd.f32 %v4758_v35, %v4746_v32  ;;  %v6650_v9 = vld [vmem:[%s8663_s20 + $0xa18] sm:$0xf0]  ;;  %v7010_v35 = vld [vmem:[%s8663_s20 + $0xce8] sm:$0xf0]  ;;  %v8310_v45 = vld [vmem:[%s8663_s20 + $0xc34] sm:$0xf] }
 0x1fd   : > { %4985 = vmatpush.bf16.msrb.mxu1 %v6749_v17  ;;  %v4734_v17 = vpop.f32.mrf.mxu1  ;;  %v6653_v29 = vor.u32 %v8242_v12, %v6650_v9  ;;  %v8314_v9 = vld [vmem:[%s8663_s20 + $0xc54] sm:$0xf]  ;;  %v7066_v16 = vld [vmem:[%s8663_s20 + $0xd58] sm:$0xf0] }
 0x1fe   : > { %4998 = vmatpush.bf16.msrb.mxu2 %v6813_v20  ;;  %v6853_v20 = vor.u32 %v8292_v52, %v6850_v54  ;;  %v8348_v52 = vld [vmem:[%s8663_s20 + $0xd64] sm:$0xf]  ;;  %v7074_v54 = vld [vmem:[%s8663_s20 + $0xd68] sm:$0xf0]  ;;  %v8330_v17 = vld [vmem:[%s8663_s20 + $0xcd4] sm:$0xf]  ;;  %v7069_v23 = vor.u32 %v8346_v18, %v7066_v16 }
 0x1ff   : > { %5011 = vmatpush.bf16.msrb.mxu3 %v6877_v19  ;;  %v6842_v19 = vld [vmem:[%s8663_s20 + $0xb98] sm:$0xf0]  ;;  %v7077_v12 = vor.u32 %v8348_v52, %v7074_v54 }
 0x200   : > { %4973 = vmatpush.bf16.msrb.mxu0 %v6677_v7  ;;  %v8256_v7 = vld [vmem:[%s8663_s20 + $0xa84] sm:$0xf]  ;;  %v6845_v2 = vor.u32 %v8290_v28, %v6842_v19  ;;  %v8362_v28 = vld [vmem:[%s8663_s20 + $0xdd4] sm:$0xf]  ;;  %v7130_v19 = vld [vmem:[%s8663_s20 + $0xdd8] sm:$0xf0] }
 0x201   : > { %4986 = vmatpush.bf16.msrb.mxu1 %v6741_v41  ;;  %v8272_v41 = vld [vmem:[%s8663_s20 + $0xb04] sm:$0xf]  ;;  %v4760_v46 = vpop.f32.mrf.mxu3  ;;  %v6986_v49 = vld [vmem:[%s8663_s20 + $0xcb8] sm:$0xf0] }
 0x202   : > { %4999 = vmatpush.bf16.msrb.mxu2 %v6805_v39  ;;  %v4747_v39 = vpop.f32.mrf.mxu2  ;;  %v6922_v46 = vld [vmem:[%s8663_s20 + $0xc38] sm:$0xf0] }
 0x203   : > { %5012 = vmatpush.bf16.msrb.mxu3 %v6869_v11  ;;  %v8318_v11 = vld [vmem:[%s8663_s20 + $0xc74] sm:$0xf] }
 0x204   : > { %4974 = vmatpush.bf16.msrb.mxu0 %v6669_v27  ;;  %v6709_v27 = vor.u32 %v8256_v7, %v6706_v37  ;;  %v6957_v3 = vor.u32 %v8318_v11, %v6954_v13  ;;  %v8344_v7 = vld [vmem:[%s8663_s20 + $0xd44] sm:$0xf]  ;;  %v7058_v37 = vld [vmem:[%s8663_s20 + $0xd48] sm:$0xf0]  ;;  %v8326_v11 = vld [vmem:[%s8663_s20 + $0xcb4] sm:$0xf] }
 0x205   : > { %4987 = vmatpush.bf16.msrb.mxu1 %v6733_v60  ;;  %v6773_v60 = vor.u32 %v8272_v41, %v6770_v10  ;;  %v8360_v41 = vld [vmem:[%s8663_s20 + $0xdc4] sm:$0xf]  ;;  %v7061_v40 = vor.u32 %v8344_v7, %v7058_v37  ;;  %v6962_v37 = vld [vmem:[%s8663_s20 + $0xc88] sm:$0xf0] }
 0x206   : > { %5000 = vmatpush.bf16.msrb.mxu2 %v6797_v63  ;;  %v8366_v63 = vld [vmem:[%s8663_s20 + $0xdf4] sm:$0xf]  ;;  %v8320_v7 = vld [vmem:[%s8663_s20 + $0xc84] sm:$0xf] }
 0x207   : > { %5013 = vmatpush.bf16.msrb.mxu3 %v6861_v5  ;;  %v7085_v5 = vor.u32 %v8350_v14, %v7082_v59  ;;  %v7149_v32 = vor.u32 %v8366_v63, %v7146_v56  ;;  %v8342_v14 = vld [vmem:[%s8663_s20 + $0xd34] sm:$0xf]  ;;  %v7050_v59 = vld [vmem:[%s8663_s20 + $0xd38] sm:$0xf0]  ;;  %v6925_v56 = vor.u32 %v8310_v45, %v6922_v46 }
 0x208   : > { %4975 = vmatpush.bf16.msrb.mxu0 %v6661_v6  ;;  %v8364_v6 = vld [vmem:[%s8663_s20 + $0xde4] sm:$0xf]  ;;  %v8382_v46 = vld [vmem:[%s8663_s20 + $0xe74] sm:$0xf] }
 0x209   : > { %4988 = vmatpush.bf16.msrb.mxu1 %v6725_v55  ;;  %v6949_v55 = vor.u32 %v8316_v51, %v6946_v22 }
 0x20a   : > { %5001 = vmatpush.bf16.msrb.mxu2 %v6789_v26  ;;  %v7013_v26 = vor.u32 %v8332_v25, %v7010_v35  ;;  %v6978_v25 = vld [vmem:[%s8663_s20 + $0xca8] sm:$0xf0] }
 0x20b   : > { %5014 = vmatpush.bf16.msrb.mxu3 %v6853_v20  ;;  %v7141_v20 = vor.u32 %v8364_v6, %v7138_v8  ;;  %v7042_v35 = vld [vmem:[%s8663_s20 + $0xd28] sm:$0xf0]  ;;  %v8356_v6 = vld [vmem:[%s8663_s20 + $0xda4] sm:$0xf] }
 0x20c   : > { %4976 = vmatpush.bf16.msrb.mxu0 %v6653_v29  ;;  %v7005_v29 = vor.u32 %v8330_v17, %v7002_v15  ;;  %v7106_v8 = vld [vmem:[%s8663_s20 + $0xda8] sm:$0xf0]  ;;  %v8306_v17 = vld [vmem:[%s8663_s20 + $0xc14] sm:$0xf] }
 0x20d   : > { %4989 = vmatpush.bf16.msrb.mxu1 %v6717_v33  ;;  %v6930_v33 = vld [vmem:[%s8663_s20 + $0xc48] sm:$0xf0]  ;;  %v8322_v15 = vld [vmem:[%s8663_s20 + $0xc94] sm:$0xf]  ;;  %v7109_v16 = vor.u32 %v8356_v6, %v7106_v8 }
 0x20e   : > { %5002 = vmatpush.bf16.msrb.mxu2 %v6781_v34  ;;  %v6994_v34 = vld [vmem:[%s8663_s20 + $0xcc8] sm:$0xf0]  ;;  %v6933_v39 = vor.u32 %v8312_v24, %v6930_v33  ;;  %v8304_v33 = vld [vmem:[%s8663_s20 + $0xc04] sm:$0xf] }
 0x20f   : > { %5015 = vmatpush.bf16.msrb.mxu3 %v6845_v2 }
 0x210   : > { %4977 = vmatpush.bf16.msrb.mxu0 %v6645_v47  ;;  %v4771_v2 = vpop.f32.mrf.mxu0 }
 0x211   : > { %4990 = vmatpush.bf16.msrb.mxu1 %v6709_v27  ;;  %v4772_v13 = vadd.f32 %v4771_v2, %v9866_v30  ;;  %v4784_v58 = vpop.f32.mrf.mxu1  ;;  %v8358_v27 = vld [vmem:[%s8663_s20 + $0xdb4] sm:$0xf]  ;;  %v6989_v30 = vor.u32 %v8326_v11, %v6986_v49  ;;  %v7026_v2 = vld [vmem:[%s8663_s20 + $0xd08] sm:$0xf0]  ;;  %v7210_v11 = vld [vmem:[%s8663_s20 + $0xe78] sm:$0xf0] }
 0x212   : > { %5003 = vmatpush.bf16.msrb.mxu2 %v6773_v60  ;;  %v7114_v60 = vld [vmem:[%s8663_s20 + $0xdb8] sm:$0xf0]  ;;  %v8414_v49 = vld [vmem:[%s8663_s20 + $0xf74] sm:$0xf] }
 0x213   : > { %5016 = vmatpush.bf16.msrb.mxu3 %v6837_v21  ;;  %4978 = vmatmul.bf16.vlgmr.msrb.gmra.mxu0 %v9158_v43  ;;  %v6941_v43 = vor.u32 %v8314_v9, %v6938_v36  ;;  %v4785_v63 = vadd.f32 %v4784_v58, %v4772_v13  ;;  %v7053_v21 = vor.u32 %v8342_v14, %v7050_v59  ;;  %v8398_v13 = vld [vmem:[%s8663_s20 + $0xef4] sm:$0xf]  ;;  %v7338_v14 = vld [vmem:[%s8663_s20 + $0xf78] sm:$0xf0] }
 0x214   : > { %5022 = vmatpush.bf16.msra.mxu0 %v6957_v3  ;;  %4991 = vmatmul.bf16.vlgmr.msrb.gmra.mxu1 %v9170_v61  ;;  %v7133_v61 = vor.u32 %v8362_v28, %v7130_v19  ;;  %v8308_v3 = vld [vmem:[%s8663_s20 + $0xc24] sm:$0xf]  ;;  %v7117_v22 = vor.u32 %v8358_v27, %v7114_v60  ;;  %v6970_v28 = vld [vmem:[%s8663_s20 + $0xc98] sm:$0xf0]  ;;  %v8338_v19 = vld [vmem:[%s8663_s20 + $0xd14] sm:$0xf]  ;;  %v6965_v59 = vor.u32 %v8320_v7, %v6962_v37 }
 0x215   : > { %5035 = vmatpush.bf16.msra.mxu1 %v7021_v31  ;;  %5004 = vmatmul.bf16.vlgmr.msrb.gmra.mxu2 %v9163_v48  ;;  %v8328_v48 = vld [vmem:[%s8663_s20 + $0xcc4] sm:$0xf]  ;;  %v6914_v31 = vld [vmem:[%s8663_s20 + $0xc28] sm:$0xf0]  ;;  %v8430_v60 = vld [vmem:[%s8663_s20 + $0xff4] sm:$0xf] }
 0x216   : > { %5048 = vmatpush.bf16.msra.mxu2 %v7085_v5  ;;  %5017 = vmatmul.bf16.vlgmr.msrb.gmra.mxu3 %v9172_v62  ;;  %v7122_v62 = vld [vmem:[%s8663_s20 + $0xdc8] sm:$0xf0]  ;;  %v6997_v10 = vor.u32 %v8328_v48, %v6994_v34  ;;  %v8324_v5 = vld [vmem:[%s8663_s20 + $0xca4] sm:$0xf] }
 0x217   : > { %5061 = vmatpush.bf16.msra.mxu3 %v7149_v32  ;;  %v7125_v47 = vor.u32 %v8360_v41, %v7122_v62  ;;  %v8340_v32 = vld [vmem:[%s8663_s20 + $0xd24] sm:$0xf]  ;;  %v6981_v9 = vor.u32 %v8324_v5, %v6978_v25  ;;  %v6898_v48 = vld [vmem:[%s8663_s20 + $0xc08] sm:$0xf0] }
 0x218   : > { %5023 = vmatpush.bf16.msra.mxu0 %v6949_v55  ;;  %v4797_v51 = vpop.f32.mrf.mxu2  ;;  %v6917_v55 = vor.u32 %v8308_v3, %v6914_v31  ;;  %v7045_v36 = vor.u32 %v8340_v32, %v7042_v35  ;;  %v8336_v41 = vld [vmem:[%s8663_s20 + $0xd04] sm:$0xf]  ;;  %v6901_v58 = vor.u32 %v8304_v33, %v6898_v48  ;;  %v7341_v3 = vor.u32 %v8414_v49, %v7338_v14  ;;  %v7202_v5 = vld [vmem:[%s8663_s20 + $0xe68] sm:$0xf0] }
 0x219   : > { %5036 = vmatpush.bf16.msra.mxu1 %v7013_v26  ;;  %v4798_v52 = vadd.f32 %v4797_v51, %v4785_v63  ;;  %v4810_v54 = vpop.f32.mrf.mxu3  ;;  %v4786_v18 = vpop.f32.mrf.mxu1  ;;  %v7029_v27 = vor.u32 %v8336_v41, %v7026_v2  ;;  %v7402_v63 = vld [vmem:[%s8663_s20 + $0xff8] sm:$0xf0]  ;;  %v8380_v31 = vld [vmem:[%s8663_s20 + $0xe64] sm:$0xf]  ;;  %v7266_v25 = vld [vmem:[%s8663_s20 + $0xee8] sm:$0xf0] }
 0x21a   : > { %5049 = vmatpush.bf16.msra.mxu2 %v7077_v12  ;;  %v4773_v12 = vpop.f32.mrf.mxu0  ;;  %v8396_v51 = vld [vmem:[%s8663_s20 + $0xee4] sm:$0xf]  ;;  %v7330_v35 = vld [vmem:[%s8663_s20 + $0xf68] sm:$0xf0]  ;;  %v7205_v6 = vor.u32 %v8380_v31, %v7202_v5  ;;  %v7322_v18 = vld [vmem:[%s8663_s20 + $0xf58] sm:$0xf0] }
 0x21b   : > { %5062 = vmatpush.bf16.msra.mxu3 %v7141_v20  ;;  %v9937_v26 = vadd.f32 %v4810_v54, %v4798_v52  ;;  %v6906_v20 = vld [vmem:[%s8663_s20 + $0xc18] sm:$0xf0]  ;;  %v8412_v32 = vld [vmem:[%s8663_s20 + $0xf64] sm:$0xf]  ;;  %v7394_v54 = vld [vmem:[%s8663_s20 + $0xfe8] sm:$0xf0]  ;;  %v7269_v8 = vor.u32 %v8396_v51, %v7266_v25 }
 0x21c   : > { %5024 = vmatpush.bf16.msra.mxu0 %v6941_v43  ;;  %v7034_v43 = vld [vmem:[%s8663_s20 + $0xd18] sm:$0xf0]  ;;  %v6909_v24 = vor.u32 %v8306_v17, %v6906_v20  ;;  %v8428_v52 = vld [vmem:[%s8663_s20 + $0xfe4] sm:$0xf]  ;;  %v8378_v12 = vld [vmem:[%s8663_s20 + $0xe54] sm:$0xf] }
 0x21d   : > { %5037 = vmatpush.bf16.msra.mxu1 %v7005_v29  ;;  %v8354_v29 = vld [vmem:[%s8663_s20 + $0xd94] sm:$0xf]  ;;  %v7037_v34 = vor.u32 %v8338_v19, %v7034_v43  ;;  %v7397_v17 = vor.u32 %v8428_v52, %v7394_v54  ;;  %v7258_v20 = vld [vmem:[%s8663_s20 + $0xed8] sm:$0xf0]  ;;  %v8408_v33 = vld [vmem:[%s8663_s20 + $0xf44] sm:$0xf] }
 0x21e   : > { %5050 = vmatpush.bf16.msra.mxu2 %v7069_v23  ;;  %v7098_v23 = vld [vmem:[%s8663_s20 + $0xd98] sm:$0xf0]  ;;  %v7314_v48 = vld [vmem:[%s8663_s20 + $0xf48] sm:$0xf0]  ;;  %v8374_v2 = vld [vmem:[%s8663_s20 + $0xe34] sm:$0xf] }
 0x21f   : > { %5063 = vmatpush.bf16.msra.mxu3 %v7133_v61  ;;  %v6973_v61 = vor.u32 %v8322_v15, %v6970_v28  ;;  %v8410_v15 = vld [vmem:[%s8663_s20 + $0xf54] sm:$0xf]  ;;  %v7386_v28 = vld [vmem:[%s8663_s20 + $0xfd8] sm:$0xf0]  ;;  %v7298_v31 = vld [vmem:[%s8663_s20 + $0xf28] sm:$0xf0] }
 0x220   : > { %5025 = vmatpush.bf16.msra.mxu0 %v6933_v39  ;;  %v4799_v62 = vpop.f32.mrf.mxu2  ;;  %v7101_v39 = vor.u32 %v8354_v29, %v7098_v23  ;;  %v7325_v43 = vor.u32 %v8410_v15, %v7322_v18  ;;  %v8376_v29 = vld [vmem:[%s8663_s20 + $0xe44] sm:$0xf]  ;;  %v7186_v23 = vld [vmem:[%s8663_s20 + $0xe48] sm:$0xf0]  ;;  %v7290_v15 = vld [vmem:[%s8663_s20 + $0xf18] sm:$0xf0] }
 0x221   : > { %5038 = vmatpush.bf16.msra.mxu1 %v6997_v10  ;;  %v8352_v10 = vld [vmem:[%s8663_s20 + $0xd84] sm:$0xf]  ;;  %v4812_v45 = vpop.f32.mrf.mxu3  ;;  %v7189_v37 = vor.u32 %v8376_v29, %v7186_v23  ;;  %v7362_v25 = vld [vmem:[%s8663_s20 + $0xfa8] sm:$0xf0]  ;;  %v8418_v18 = vld [vmem:[%s8663_s20 + $0xf94] sm:$0xf] }
 0x222   : > { %5051 = vmatpush.bf16.msra.mxu2 %v7061_v40  ;;  %v7090_v40 = vld [vmem:[%s8663_s20 + $0xd88] sm:$0xf0]  ;;  %v8384_v23 = vld [vmem:[%s8663_s20 + $0xe84] sm:$0xf] }
 0x223   : > { %5064 = vmatpush.bf16.msra.mxu3 %v7125_v47  ;;  %v7274_v47 = vld [vmem:[%s8663_s20 + $0xef8] sm:$0xf0] }
 0x224   : > { %5026 = vmatpush.bf16.msra.mxu0 %v6925_v56  ;;  %v7093_v56 = vor.u32 %v8352_v10, %v7090_v40  ;;  %v7178_v10 = vld [vmem:[%s8663_s20 + $0xe38] sm:$0xf0]  ;;  %v8390_v40 = vld [vmem:[%s8663_s20 + $0xeb4] sm:$0xf] }
 0x225   : > { %5039 = vmatpush.bf16.msra.mxu1 %v6989_v30  ;;  %v7213_v30 = vor.u32 %v8382_v46, %v7210_v11  ;;  %v7242_v11 = vld [vmem:[%s8663_s20 + $0xeb8] sm:$0xf0]  ;;  %v7181_v49 = vor.u32 %v8374_v2, %v7178_v10  ;;  %v8478_v2 = vld [vmem:[%s8663_s20 + $0x1174] sm:$0xf] }
 0x226   : > { %5052 = vmatpush.bf16.msra.mxu2 %v7053_v21  ;;  %v7277_v21 = vor.u32 %v8398_v13, %v7274_v47  ;;  %v8406_v13 = vld [vmem:[%s8663_s20 + $0xf34] sm:$0xf]  ;;  %v7370_v47 = vld [vmem:[%s8663_s20 + $0xfb8] sm:$0xf0]  ;;  %v7245_v14 = vor.u32 %v8390_v40, %v7242_v11 }
 0x227   : > { %5065 = vmatpush.bf16.msra.mxu3 %v7117_v22  ;;  %v7405_v22 = vor.u32 %v8430_v60, %v7402_v63  ;;  %v7170_v60 = vld [vmem:[%s8663_s20 + $0xe28] sm:$0xf0]  ;;  %v8388_v63 = vld [vmem:[%s8663_s20 + $0xea4] sm:$0xf]  ;;  %v7594_v10 = vld [vmem:[%s8663_s20 + $0x1178] sm:$0xf0] }
 0x228   : > { %5027 = vmatpush.bf16.msra.mxu0 %v6917_v55  ;;  %v7333_v55 = vor.u32 %v8412_v32, %v7330_v35  ;;  %v7658_v11 = vld [vmem:[%s8663_s20 + $0x11f8] sm:$0xf0] }
 0x229   : > { %5040 = vmatpush.bf16.msra.mxu1 %v6981_v9  ;;  %v7194_v9 = vld [vmem:[%s8663_s20 + $0xe58] sm:$0xf0] }
 0x22a   : > { %5053 = vmatpush.bf16.msra.mxu2 %v7045_v36  ;;  %v8394_v36 = vld [vmem:[%s8663_s20 + $0xed4] sm:$0xf] }
 0x22b   : > { %5066 = vmatpush.bf16.msra.mxu3 %v7109_v16  ;;  %v8426_v16 = vld [vmem:[%s8663_s20 + $0xfd4] sm:$0xf]  ;;  %v7261_v19 = vor.u32 %v8394_v36, %v7258_v20 }
 0x22c   : > { %5028 = vmatpush.bf16.msra.mxu0 %v6909_v24  ;;  %v7250_v24 = vld [vmem:[%s8663_s20 + $0xec8] sm:$0xf0]  ;;  %v8402_v20 = vld [vmem:[%s8663_s20 + $0xf14] sm:$0xf] }
 0x22d   : > { %5041 = vmatpush.bf16.msra.mxu1 %v6973_v61  ;;  %v8424_v61 = vld [vmem:[%s8663_s20 + $0xfc4] sm:$0xf]  ;;  %v7293_v29 = vor.u32 %v8402_v20, %v7290_v15  ;;  %v7506_v20 = vld [vmem:[%s8663_s20 + $0x10c8] sm:$0xf0] }
 0x22e   : > { %5054 = vmatpush.bf16.msra.mxu2 %v7037_v34  ;;  %v7378_v34 = vld [vmem:[%s8663_s20 + $0xfc8] sm:$0xf0]  ;;  %v8472_v15 = vld [vmem:[%s8663_s20 + $0x1144] sm:$0xf] }
 0x22f   : > { %5067 = vmatpush.bf16.msra.mxu3 %v7101_v39  ;;  %v7317_v39 = vor.u32 %v8408_v33, %v7314_v48  ;;  %v7381_v45 = vor.u32 %v8424_v61, %v7378_v34  ;;  %v7282_v33 = vld [vmem:[%s8663_s20 + $0xf08] sm:$0xf0]  ;;  %v8416_v48 = vld [vmem:[%s8663_s20 + $0xf84] sm:$0xf]  ;;  %v8446_v34 = vld [vmem:[%s8663_s20 + $0x1074] sm:$0xf] }
 0x230   : > { %5029 = vmatpush.bf16.msra.mxu0 %v6901_v58  ;;  %v8422_v58 = vld [vmem:[%s8663_s20 + $0xfb4] sm:$0xf] }
 0x231   : > { %5042 = vmatpush.bf16.msra.mxu1 %v6965_v59  ;;  %v4836_v41 = vpop.f32.mrf.mxu1 }
 0x232   : > { %5055 = vmatpush.bf16.msra.mxu2 %v7029_v27  ;;  %v8372_v27 = vld [vmem:[%s8663_s20 + $0xe24] sm:$0xf] }
 0x233   : > { %5068 = vmatpush.bf16.msra.mxu3 %v7093_v56  ;;  %5030 = vmatmul.bf16.vlgmr.msra.gmra.mxu0 %v9239_v38  ;;  %v7197_v38 = vor.u32 %v8378_v12, %v7194_v9  ;;  %v7373_v56 = vor.u32 %v8422_v58, %v7370_v47  ;;  %v7173_v35 = vor.u32 %v8372_v27, %v7170_v60  ;;  %v7162_v12 = vld [vmem:[%s8663_s20 + $0xe18] sm:$0xf0]  ;;  %v8386_v9 = vld [vmem:[%s8663_s20 + $0xe94] sm:$0xf]  ;;  %v7522_v60 = vld [vmem:[%s8663_s20 + $0x10e8] sm:$0xf0] }
 0x234   : > { %5074 = vmatpush.bf16.msrb.mxu0 %v7213_v30  ;;  %5043 = vmatmul.bf16.vlgmr.msra.gmra.mxu1 %v9251_v53  ;;  %v7389_v53 = vor.u32 %v8426_v16, %v7386_v28  ;;  %v7354_v16 = vld [vmem:[%s8663_s20 + $0xf98] sm:$0xf0]  ;;  %v7597_v47 = vor.u32 %v8478_v2, %v7594_v10  ;;  %v7426_v2 = vld [vmem:[%s8663_s20 + $0x1028] sm:$0xf0]  ;;  %v8452_v10 = vld [vmem:[%s8663_s20 + $0x10a4] sm:$0xf] }
 0x235   : > { %5087 = vmatpush.bf16.msrb.mxu1 %v7277_v21  ;;  %5056 = vmatmul.bf16.vlgmr.msra.gmra.mxu2 %v9244_v44  ;;  %v8392_v44 = vld [vmem:[%s8663_s20 + $0xec4] sm:$0xf]  ;;  %v7234_v21 = vld [vmem:[%s8663_s20 + $0xea8] sm:$0xf0] }
 0x236   : > { %5100 = vmatpush.bf16.msrb.mxu2 %v7341_v3  ;;  %5069 = vmatmul.bf16.vlgmr.msra.gmra.mxu3 %v9253_v57  ;;  %v4823_v57 = vpop.f32.mrf.mxu0  ;;  %v7253_v62 = vor.u32 %v8392_v44, %v7250_v24  ;;  %v8404_v3 = vld [vmem:[%s8663_s20 + $0xf24] sm:$0xf]  ;;  %v7218_v44 = vld [vmem:[%s8663_s20 + $0xe88] sm:$0xf0]  ;;  %v7357_v24 = vor.u32 %v8418_v18, %v7354_v16 }
 0x237   : > { %5113 = vmatpush.bf16.msrb.mxu3 %v7405_v22  ;;  %v4824_v7 = vadd.f32 %v4823_v57, %v9937_v26  ;;  %v7306_v26 = vld [vmem:[%s8663_s20 + $0xf38] sm:$0xf0]  ;;  %v8420_v22 = vld [vmem:[%s8663_s20 + $0xfa4] sm:$0xf]  ;;  %v7346_v57 = vld [vmem:[%s8663_s20 + $0xf88] sm:$0xf0]  ;;  %v7221_v40 = vor.u32 %v8384_v23, %v7218_v44 }
 0x238   : > { %5075 = vmatpush.bf16.msrb.mxu0 %v7205_v6  ;;  %v7309_v59 = vor.u32 %v8406_v13, %v7306_v26  ;;  %v4849_v30 = vpop.f32.mrf.mxu2  ;;  %v7237_v6 = vor.u32 %v8388_v63, %v7234_v21  ;;  %v7365_v36 = vor.u32 %v8420_v22, %v7362_v25  ;;  %v7349_v13 = vor.u32 %v8416_v48, %v7346_v57  ;;  %v8476_v63 = vld [vmem:[%s8663_s20 + $0x1164] sm:$0xf]  ;;  %v7650_v21 = vld [vmem:[%s8663_s20 + $0x11e8] sm:$0xf0]  ;;  %v7450_v22 = vld [vmem:[%s8663_s20 + $0x1058] sm:$0xf0] }
 0x239   : > { %5088 = vmatpush.bf16.msrb.mxu1 %v7269_v8  ;;  %v4837_v46 = vadd.f32 %v4836_v41, %v4824_v7  ;;  %v4862_v51 = vpop.f32.mrf.mxu3  ;;  %v4838_v52 = vpop.f32.mrf.mxu1  ;;  %v7301_v8 = vor.u32 %v8404_v3, %v7298_v31  ;;  %v7466_v7 = vld [vmem:[%s8663_s20 + $0x1078] sm:$0xf0]  ;;  %v8458_v25 = vld [vmem:[%s8663_s20 + $0x10d4] sm:$0xf]  ;;  %v7570_v18 = vld [vmem:[%s8663_s20 + $0x1148] sm:$0xf0] }
 0x23a   : > { %5101 = vmatpush.bf16.msrb.mxu2 %v7333_v55  ;;  %v8370_v55 = vld [vmem:[%s8663_s20 + $0xe14] sm:$0xf]  ;;  %v7469_v26 = vor.u32 %v8446_v34, %v7466_v7  ;;  %v8488_v16 = vld [vmem:[%s8663_s20 + $0x11c4] sm:$0xf]  ;;  %v7573_v23 = vor.u32 %v8472_v15, %v7570_v18  ;;  %v7498_v57 = vld [vmem:[%s8663_s20 + $0x10b8] sm:$0xf0] }
 0x23b   : > { %5114 = vmatpush.bf16.msrb.mxu3 %v7397_v17  ;;  %v4850_v5 = vadd.f32 %v4849_v30, %v4837_v46  ;;  %v7226_v17 = vld [vmem:[%s8663_s20 + $0xe98] sm:$0xf0]  ;;  %v7165_v28 = vor.u32 %v8370_v55, %v7162_v12  ;;  %v8494_v46 = vld [vmem:[%s8663_s20 + $0x11f4] sm:$0xf]  ;;  %v8492_v30 = vld [vmem:[%s8663_s20 + $0x11e4] sm:$0xf] }
 0x23c   : > { %5076 = vmatpush.bf16.msrb.mxu0 %v7197_v38  ;;  %v8368_v38 = vld [vmem:[%s8663_s20 + $0xe04] sm:$0xf]  ;;  %v7661_v27 = vor.u32 %v8494_v46, %v7658_v11  ;;  %v8474_v52 = vld [vmem:[%s8663_s20 + $0x1154] sm:$0xf]  ;;  %v7642_v55 = vld [vmem:[%s8663_s20 + $0x11d8] sm:$0xf0] }
 0x23d   : > { %5089 = vmatpush.bf16.msrb.mxu1 %v7261_v19  ;;  %v10008_v54 = vadd.f32 %v4862_v51, %v4850_v5  ;;  %v7154_v19 = vld [vmem:[%s8663_s20 + $0xe08] sm:$0xf0]  ;;  %v8442_v51 = vld [vmem:[%s8663_s20 + $0x1054] sm:$0xf]  ;;  %v7626_v7 = vld [vmem:[%s8663_s20 + $0x11b8] sm:$0xf0] }
 0x23e   : > { %5102 = vmatpush.bf16.msrb.mxu2 %v7325_v43  ;;  %v4825_v32 = vpop.f32.mrf.mxu0  ;;  %v7229_v43 = vor.u32 %v8386_v9, %v7226_v17  ;;  %v7442_v17 = vld [vmem:[%s8663_s20 + $0x1048] sm:$0xf0]  ;;  %v8438_v44 = vld [vmem:[%s8663_s20 + $0x1034] sm:$0xf]  ;;  %v8468_v11 = vld [vmem:[%s8663_s20 + $0x1124] sm:$0xf] }
 0x23f   : > { %5115 = vmatpush.bf16.msrb.mxu3 %v7389_v53  ;;  %v8400_v53 = vld [vmem:[%s8663_s20 + $0xf04] sm:$0xf]  ;;  %v7653_v32 = vor.u32 %v8492_v30, %v7650_v21  ;;  %v8486_v34 = vld [vmem:[%s8663_s20 + $0x11b4] sm:$0xf]  ;;  %v7490_v46 = vld [vmem:[%s8663_s20 + $0x10a8] sm:$0xf0] }
 0x240   : > { %5077 = vmatpush.bf16.msrb.mxu0 %v7189_v37  ;;  %v4851_v61 = vpop.f32.mrf.mxu2  ;;  %v8462_v37 = vld [vmem:[%s8663_s20 + $0x10f4] sm:$0xf]  ;;  %v7418_v21 = vld [vmem:[%s8663_s20 + $0x1018] sm:$0xf0] }
 0x241   : > { %5090 = vmatpush.bf16.msrb.mxu1 %v7253_v62  ;;  %v4864_v41 = vpop.f32.mrf.mxu3  ;;  %v7157_v62 = vor.u32 %v8368_v38, %v7154_v19  ;;  %v8470_v61 = vld [vmem:[%s8663_s20 + $0x1134] sm:$0xf]  ;;  %v7722_v18 = vld [vmem:[%s8663_s20 + $0x1278] sm:$0xf0] }
 0x242   : > { %5103 = vmatpush.bf16.msrb.mxu2 %v7317_v39  ;;  %v7530_v39 = vld [vmem:[%s8663_s20 + $0x10f8] sm:$0xf0]  ;;  %v8434_v30 = vld [vmem:[%s8663_s20 + $0x1014] sm:$0xf] }
 0x243   : > { %5116 = vmatpush.bf16.msrb.mxu3 %v7381_v45  ;;  %v7285_v45 = vor.u32 %v8400_v53, %v7282_v33  ;;  %v7533_v58 = vor.u32 %v8462_v37, %v7530_v39  ;;  %v7434_v53 = vld [vmem:[%s8663_s20 + $0x1038] sm:$0xf0]  ;;  %v8436_v39 = vld [vmem:[%s8663_s20 + $0x1024] sm:$0xf]  ;;  %v8510_v15 = vld [vmem:[%s8663_s20 + $0x1274] sm:$0xf] }
 0x244   : > { %5078 = vmatpush.bf16.msrb.mxu0 %v7181_v49  ;;  %v8444_v49 = vld [vmem:[%s8663_s20 + $0x1064] sm:$0xf]  ;;  %v7437_v37 = vor.u32 %v8438_v44, %v7434_v53  ;;  %v8558_v44 = vld [vmem:[%s8663_s20 + $0x13f4] sm:$0xf]  ;;  %v7914_v53 = vld [vmem:[%s8663_s20 + $0x13f8] sm:$0xf0] }
 0x245   : > { %5091 = vmatpush.bf16.msrb.mxu1 %v7245_v14  ;;  %v7458_v14 = vld [vmem:[%s8663_s20 + $0x1068] sm:$0xf0] }
 0x246   : > { %5104 = vmatpush.bf16.msrb.mxu2 %v7309_v59  ;;  %v8460_v59 = vld [vmem:[%s8663_s20 + $0x10e4] sm:$0xf]  ;;  %v7461_v3 = vor.u32 %v8444_v49, %v7458_v14  ;;  %v7618_v49 = vld [vmem:[%s8663_s20 + $0x11a8] sm:$0xf0] }
 0x247   : > { %5117 = vmatpush.bf16.msrb.mxu3 %v7373_v56  ;;  %v7586_v56 = vld [vmem:[%s8663_s20 + $0x1168] sm:$0xf0]  ;;  %v7525_v31 = vor.u32 %v8460_v59, %v7522_v60  ;;  %v7429_v59 = vor.u32 %v8436_v39, %v7426_v2  ;;  %v8556_v39 = vld [vmem:[%s8663_s20 + $0x13e4] sm:$0xf] }
 0x248   : > { %5079 = vmatpush.bf16.msrb.mxu0 %v7173_v35  ;;  %v7589_v5 = vor.u32 %v8476_v63, %v7586_v56  ;;  %v7514_v35 = vld [vmem:[%s8663_s20 + $0x10d8] sm:$0xf0]  ;;  %v7493_v63 = vor.u32 %v8452_v10, %v7490_v46  ;;  %v7906_v2 = vld [vmem:[%s8663_s20 + $0x13e8] sm:$0xf0]  ;;  %v8506_v46 = vld [vmem:[%s8663_s20 + $0x1254] sm:$0xf] }
 0x249   : > { %5092 = vmatpush.bf16.msrb.mxu1 %v7237_v6  ;;  %v7578_v6 = vld [vmem:[%s8663_s20 + $0x1158] sm:$0xf0]  ;;  %v7517_v12 = vor.u32 %v8458_v25, %v7514_v35  ;;  %v8482_v25 = vld [vmem:[%s8663_s20 + $0x1194] sm:$0xf]  ;;  %v7421_v35 = vor.u32 %v8434_v30, %v7418_v21 }
 0x24a   : > { %5105 = vmatpush.bf16.msrb.mxu2 %v7301_v8  ;;  %v8490_v8 = vld [vmem:[%s8663_s20 + $0x11d4] sm:$0xf]  ;;  %v7581_v9 = vor.u32 %v8474_v52, %v7578_v6  ;;  %v8432_v52 = vld [vmem:[%s8663_s20 + $0x1004] sm:$0xf]  ;;  %v7410_v6 = vld [vmem:[%s8663_s20 + $0x1008] sm:$0xf0] }
 0x24b   : > { %5118 = vmatpush.bf16.msrb.mxu3 %v7365_v36  ;;  %v8440_v36 = vld [vmem:[%s8663_s20 + $0x1044] sm:$0xf]  ;;  %v8589_v30 = vld.sshfl [vmem:[#allocation1 + $0x18] sm:$0xff pattern:$0x73625140] }
 0x24c   : > { %5080 = vmatpush.bf16.msrb.mxu0 %v7165_v28  ;;  %v7634_v28 = vld [vmem:[%s8663_s20 + $0x11c8] sm:$0xf0]  ;;  %v7445_v19 = vor.u32 %v8440_v36, %v7442_v17 }
 0x24d   : > { %5093 = vmatpush.bf16.msrb.mxu1 %v7229_v43  ;;  %v7637_v33 = vor.u32 %v8488_v16, %v7634_v28  ;;  %v7538_v17 = vld [vmem:[%s8663_s20 + $0x1108] sm:$0xf0]  ;;  %v7413_v28 = vor.u32 %v8432_v52, %v7410_v6 }
 0x24e   : > { %5106 = vmatpush.bf16.msrb.mxu2 %v7293_v29  ;;  %v7826_v52 = vld [vmem:[%s8663_s20 + $0x1348] sm:$0xf0] }
 0x24f   : > { %5119 = vmatpush.bf16.msrb.mxu3 %v7357_v24  ;;  %v8454_v24 = vld [vmem:[%s8663_s20 + $0x10b4] sm:$0xf] }
 0x250   : > { %5081 = vmatpush.bf16.msrb.mxu0 %v7157_v62  ;;  %v7501_v41 = vor.u32 %v8454_v24, %v7498_v57 }
 0x251   : > { %5094 = vmatpush.bf16.msrb.mxu1 %v7221_v40  ;;  %v4888_v43 = vpop.f32.mrf.mxu1  ;;  %v7629_v40 = vor.u32 %v8486_v34, %v7626_v7  ;;  %v8524_v34 = vld [vmem:[%s8663_s20 + $0x12e4] sm:$0xf]  ;;  %v7917_v7 = vor.u32 %v8558_v44, %v7914_v53  ;;  %v7682_v44 = vld [vmem:[%s8663_s20 + $0x1228] sm:$0xf0] }
 0x252   : > { %5107 = vmatpush.bf16.msrb.mxu2 %v7285_v45  ;;  %v8516_v53 = vld [vmem:[%s8663_s20 + $0x12a4] sm:$0xf] }
 0x253   : > { %5120 = vmatpush.bf16.msrb.mxu3 %v7349_v13  ;;  %5082 = vmatmul.bf16.vlgmr.msrb.gmra.mxu0 %v9321_v42  ;;  %v7453_v42 = vor.u32 %v8442_v51, %v7450_v22  ;;  %v7554_v13 = vld [vmem:[%s8663_s20 + $0x1128] sm:$0xf0]  ;;  %v8466_v51 = vld [vmem:[%s8663_s20 + $0x1114] sm:$0xf]  ;;  %v7546_v22 = vld [vmem:[%s8663_s20 + $0x1118] sm:$0xf0] }
 0x254   : > { %5126 = vmatpush.bf16.msra.mxu0 %v7469_v26  ;;  %5095 = vmatmul.bf16.vlgmr.msrb.gmra.mxu1 %v9333_v0  ;;  %v7645_v0 = vor.u32 %v8490_v8, %v7642_v55  ;;  %v7557_v56 = vor.u32 %v8468_v11, %v7554_v13  ;;  %v7549_v55 = vor.u32 %v8466_v51, %v7546_v22  ;;  %v7706_v11 = vld [vmem:[%s8663_s20 + $0x1258] sm:$0xf0]  ;;  %v8522_v13 = vld [vmem:[%s8663_s20 + $0x12d4] sm:$0xf]  ;;  %v7698_v51 = vld [vmem:[%s8663_s20 + $0x1248] sm:$0xf0] }
 0x255   : > { %5139 = vmatpush.bf16.msra.mxu1 %v7533_v58  ;;  %5108 = vmatmul.bf16.vlgmr.msrb.gmra.mxu2 %v9326_v50  ;;  %v8456_v50 = vld [vmem:[%s8663_s20 + $0x10c4] sm:$0xf]  ;;  %v7709_v21 = vor.u32 %v8506_v46, %v7706_v11  ;;  %v7674_v46 = vld [vmem:[%s8663_s20 + $0x1218] sm:$0xf0]  ;;  %v8514_v11 = vld [vmem:[%s8663_s20 + $0x1294] sm:$0xf] }
 0x256   : > { %5152 = vmatpush.bf16.msra.mxu2 %v7597_v47  ;;  %5121 = vmatmul.bf16.vlgmr.msrb.gmra.mxu3 %v9335_v1  ;;  %v4875_v1 = vpop.f32.mrf.mxu0  ;;  %v7509_v29 = vor.u32 %v8456_v50, %v7506_v20  ;;  %v8484_v47 = vld [vmem:[%s8663_s20 + $0x11a4] sm:$0xf] }
 0x257   : > { %5165 = vmatpush.bf16.msra.mxu3 %v7661_v27  ;;  %v4876_v38 = vadd.f32 %v4875_v1, %v10008_v54  ;;  %v7562_v54 = vld [vmem:[%s8663_s20 + $0x1138] sm:$0xf0]  ;;  %v8480_v50 = vld [vmem:[%s8663_s20 + $0x1184] sm:$0xf]  ;;  %v8526_v1 = vld [vmem:[%s8663_s20 + $0x12f4] sm:$0xf] }
 0x258   : > { %5127 = vmatpush.bf16.msra.mxu0 %v7461_v3  ;;  %v7565_v62 = vor.u32 %v8470_v61, %v7562_v54  ;;  %v4901_v45 = vpop.f32.mrf.mxu2  ;;  %v8450_v3 = vld [vmem:[%s8663_s20 + $0x1094] sm:$0xf]  ;;  %v8508_v61 = vld [vmem:[%s8663_s20 + $0x1264] sm:$0xf]  ;;  %v7714_v54 = vld [vmem:[%s8663_s20 + $0x1268] sm:$0xf0] }
 0x259   : > { %5140 = vmatpush.bf16.msra.mxu1 %v7525_v31  ;;  %v4889_v48 = vadd.f32 %v4888_v43, %v4876_v38  ;;  %v4914_v58 = vpop.f32.mrf.mxu3  ;;  %v4890_v27 = vpop.f32.mrf.mxu1  ;;  %v7621_v31 = vor.u32 %v8484_v47, %v7618_v49  ;;  %v7786_v38 = vld [vmem:[%s8663_s20 + $0x12f8] sm:$0xf0]  ;;  %v7717_v10 = vor.u32 %v8508_v61, %v7714_v54  ;;  %v8538_v49 = vld [vmem:[%s8663_s20 + $0x1354] sm:$0xf]  ;;  %v8520_v22 = vld [vmem:[%s8663_s20 + $0x12c4] sm:$0xf] }
 0x25a   : > { %5153 = vmatpush.bf16.msra.mxu2 %v7589_v5  ;;  %v7482_v5 = vld [vmem:[%s8663_s20 + $0x1098] sm:$0xf0]  ;;  %v8588_v27 = vld.sshfl [vmem:[#allocation1 + $0x8] sm:$0xff pattern:$0x73625140] }
 0x25b   : > { %5166 = vmatpush.bf16.msra.mxu3 %v7653_v32  ;;  %v4902_v26 = vadd.f32 %v4901_v45, %v4889_v48  ;;  %v7610_v32 = vld [vmem:[%s8663_s20 + $0x1198] sm:$0xf0]  ;;  %v7485_v8 = vor.u32 %v8450_v3, %v7482_v5  ;;  %v7789_v48 = vor.u32 %v8526_v1, %v7786_v38  ;;  %v8504_v5 = vld [vmem:[%s8663_s20 + $0x1244] sm:$0xf]  ;;  %v7810_v61 = vld [vmem:[%s8663_s20 + $0x1328] sm:$0xf0] }
 0x25c   : > { %5128 = vmatpush.bf16.msra.mxu0 %v7453_v42  ;;  %v8448_v42 = vld [vmem:[%s8663_s20 + $0x1084] sm:$0xf]  ;;  %v7613_v36 = vor.u32 %v8482_v25, %v7610_v32  ;;  %v7850_v43 = vld [vmem:[%s8663_s20 + $0x1378] sm:$0xf0]  ;;  %v7762_v32 = vld [vmem:[%s8663_s20 + $0x12c8] sm:$0xf0] }
 0x25d   : > { %5141 = vmatpush.bf16.msra.mxu1 %v7517_v12  ;;  %v10079_v60 = vadd.f32 %v4914_v58, %v4902_v26  ;;  %v7474_v12 = vld [vmem:[%s8663_s20 + $0x1088] sm:$0xf0]  ;;  %v8586_v26 = vld.sshfl [vmem:[#allocation1] sm:$0xff pattern:$0x73625140]  ;;  %v7909_v58 = vor.u32 %v8556_v39, %v7906_v2 }
 0x25e   : > { %5154 = vmatpush.bf16.msra.mxu2 %v7581_v9  ;;  %v4877_v14 = vpop.f32.mrf.mxu0  ;;  %v8464_v9 = vld [vmem:[%s8663_s20 + $0x1104] sm:$0xf]  ;;  %v7770_v47 = vld [vmem:[%s8663_s20 + $0x12d8] sm:$0xf0] }
 0x25f   : > { %5167 = vmatpush.bf16.msra.mxu3 %v7645_v0  ;;  %v7602_v0 = vld [vmem:[%s8663_s20 + $0x1188] sm:$0xf0]  ;;  %v7834_v14 = vld [vmem:[%s8663_s20 + $0x1358] sm:$0xf0]  ;;  %v7773_v3 = vor.u32 %v8522_v13, %v7770_v47 }
 0x260   : > { %5129 = vmatpush.bf16.msra.mxu0 %v7445_v19  ;;  %v4903_v20 = vpop.f32.mrf.mxu2  ;;  %v8542_v19 = vld [vmem:[%s8663_s20 + $0x1374] sm:$0xf]  ;;  %v7605_v24 = vor.u32 %v8480_v50, %v7602_v0  ;;  %v7690_v0 = vld [vmem:[%s8663_s20 + $0x1238] sm:$0xf0] }
 0x261   : > { %5142 = vmatpush.bf16.msra.mxu1 %v7509_v29  ;;  %v4916_v16 = vpop.f32.mrf.mxu3  ;;  %v7477_v29 = vor.u32 %v8448_v42, %v7474_v12  ;;  %v7853_v57 = vor.u32 %v8542_v19, %v7850_v43  ;;  %v7701_v12 = vor.u32 %v8504_v5, %v7698_v51  ;;  %v8502_v50 = vld [vmem:[%s8663_s20 + $0x1234] sm:$0xf]  ;;  %v7754_v1 = vld [vmem:[%s8663_s20 + $0x12b8] sm:$0xf0]  ;;  %v8528_v5 = vld [vmem:[%s8663_s20 + $0x1304] sm:$0xf] }
 0x262   : > { %5155 = vmatpush.bf16.msra.mxu2 %v7573_v23  ;;  %v7541_v23 = vor.u32 %v8464_v9, %v7538_v17  ;;  %v8518_v20 = vld [vmem:[%s8663_s20 + $0x12b4] sm:$0xf]  ;;  %v7882_v38 = vld [vmem:[%s8663_s20 + $0x13b8] sm:$0xf0]  ;;  %v7693_v19 = vor.u32 %v8502_v50, %v7690_v0  ;;  %v7794_v51 = vld [vmem:[%s8663_s20 + $0x1308] sm:$0xf0] }
 0x263   : > { %5168 = vmatpush.bf16.msra.mxu3 %v7637_v33  ;;  %v7725_v33 = vor.u32 %v8510_v15, %v7722_v18  ;;  %v8534_v16 = vld [vmem:[%s8663_s20 + $0x1334] sm:$0xf]  ;;  %v7757_v43 = vor.u32 %v8518_v20, %v7754_v1  ;;  %v7802_v47 = vld [vmem:[%s8663_s20 + $0x1318] sm:$0xf0] }
 0x264   : > { %5130 = vmatpush.bf16.msra.mxu0 %v7437_v37  ;;  %v7778_v37 = vld [vmem:[%s8663_s20 + $0x12e8] sm:$0xf0] }
 0x265   : > { %5143 = vmatpush.bf16.msra.mxu1 %v7501_v41  ;;  %v8540_v41 = vld [vmem:[%s8663_s20 + $0x1364] sm:$0xf] }
 0x266   : > { %5156 = vmatpush.bf16.msra.mxu2 %v7565_v62  ;;  %v7842_v62 = vld [vmem:[%s8663_s20 + $0x1368] sm:$0xf0] }
 0x267   : > { %5169 = vmatpush.bf16.msra.mxu3 %v7629_v40  ;;  %v7781_v40 = vor.u32 %v8524_v34, %v7778_v37  ;;  %v7845_v45 = vor.u32 %v8540_v41, %v7842_v62  ;;  %v7874_v37 = vld [vmem:[%s8663_s20 + $0x13a8] sm:$0xf0] }
 0x268   : > { %5131 = vmatpush.bf16.msra.mxu0 %v7429_v59  ;;  %v8587_v59 = vld.sshfl [vmem:[#allocation1 + $0x10] sm:$0xff pattern:$0x73625140] }
 0x269   : > { %5144 = vmatpush.bf16.msra.mxu1 %v7493_v63  ;;  %v8554_v63 = vld [vmem:[%s8663_s20 + $0x13d4] sm:$0xf] }
 0x26a   : > { %5157 = vmatpush.bf16.msra.mxu2 %v7557_v56  ;;  %v7898_v56 = vld [vmem:[%s8663_s20 + $0x13d8] sm:$0xf0] }
 0x26b   : > { %5170 = vmatpush.bf16.msra.mxu3 %v7621_v31  ;;  %v7837_v31 = vor.u32 %v8538_v49, %v7834_v14  ;;  %v7901_v25 = vor.u32 %v8554_v63, %v7898_v56  ;;  %v8546_v49 = vld [vmem:[%s8663_s20 + $0x1394] sm:$0xf]  ;;  %v7866_v14 = vld [vmem:[%s8663_s20 + $0x1398] sm:$0xf0]  ;;  %v8496_v56 = vld [vmem:[%s8663_s20 + $0x1204] sm:$0xf] }
 0x26c   : > { %5132 = vmatpush.bf16.msra.mxu0 %v7421_v35  ;;  %v8536_v35 = vld [vmem:[%s8663_s20 + $0x1344] sm:$0xf] }
 0x26d   : > { %5145 = vmatpush.bf16.msra.mxu1 %v7485_v8  ;;  %v8552_v8 = vld [vmem:[%s8663_s20 + $0x13c4] sm:$0xf]  ;;  %v7829_v17 = vor.u32 %v8536_v35, %v7826_v52 }
 0x26e   : > { %5158 = vmatpush.bf16.msra.mxu2 %v7549_v55  ;;  %v7890_v55 = vld [vmem:[%s8663_s20 + $0x13c8] sm:$0xf0] }
 0x26f   : > { %5171 = vmatpush.bf16.msra.mxu3 %v7613_v36  ;;  %v7765_v36 = vor.u32 %v8520_v22, %v7762_v32  ;;  %v7893_v15 = vor.u32 %v8552_v8, %v7890_v55  ;;  %v7858_v32 = vld [vmem:[%s8663_s20 + $0x1388] sm:$0xf0]  ;;  %v7797_v8 = vor.u32 %v8528_v5, %v7794_v51 }
 0x270   : > { %5133 = vmatpush.bf16.msra.mxu0 %v7413_v28  ;;  %v4927_v6 = vpop.f32.mrf.mxu0  ;;  %v8550_v28 = vld [vmem:[%s8663_s20 + $0x13b4] sm:$0xf] }
 0x271   : > { %5146 = vmatpush.bf16.msra.mxu1 %v7477_v29  ;;  %v4928_v42 = vadd.f32 %v4927_v6, %v10079_v60  ;;  %v4940_v9 = vpop.f32.mrf.mxu1  ;;  %v7818_v60 = vld [vmem:[%s8663_s20 + $0x1338] sm:$0xf0] }
 0x272   : > { %5159 = vmatpush.bf16.msra.mxu2 %v7541_v23  ;;  %v7821_v29 = vor.u32 %v8534_v16, %v7818_v60  ;;  %v8500_v23 = vld [vmem:[%s8663_s20 + $0x1224] sm:$0xf] }
 0x273   : > { %5172 = vmatpush.bf16.msra.mxu3 %v7605_v24  ;;  %5134 = vmatmul.bf16.vlgmr.msra.gmra.mxu0 %v8586_v26  ;;  %v4941_v18 = vadd.f32 %v4940_v9, %v4928_v42  ;;  %v7885_v24 = vor.u32 %v8550_v28, %v7882_v38  ;;  %v7685_v62 = vor.u32 %v8500_v23, %v7682_v44  ;;  %v7738_v26 = vld [vmem:[%s8663_s20 + $0x1298] sm:$0xf0]  ;;  %v8590_v42 = vld.sshfl [vmem:[#allocation1 + $0x20] sm:$0xff pattern:$0x73625140] }
 0x274   : > { %5178 = vmatpush.bf16.msrb.mxu0 %v7725_v33  ;;  %5147 = vmatmul.bf16.vlgmr.msra.gmra.mxu1 %v8588_v27  ;;  %v7741_v27 = vor.u32 %v8514_v11, %v7738_v26  ;;  %v8592_v9 = vld.sshfl [vmem:[#allocation1 + $0x30] sm:$0xff pattern:$0x73625140] }
 0x275   : > { %5191 = vmatpush.bf16.msrb.mxu1 %v7789_v48  ;;  %5160 = vmatmul.bf16.vlgmr.msra.gmra.mxu2 %v8587_v59  ;;  %v7746_v48 = vld [vmem:[%s8663_s20 + $0x12a8] sm:$0xf0] }
 0x276   : > { %5204 = vmatpush.bf16.msrb.mxu2 %v7853_v57  ;;  %5173 = vmatmul.bf16.vlgmr.msra.gmra.mxu3 %v8589_v30  ;;  %v8532_v57 = vld [vmem:[%s8663_s20 + $0x1324] sm:$0xf]  ;;  %v7666_v30 = vld [vmem:[%s8663_s20 + $0x1208] sm:$0xf0] }
 0x277   : > { %5217 = vmatpush.bf16.msrb.mxu3 %v7917_v7  ;;  %v8548_v7 = vld [vmem:[%s8663_s20 + $0x13a4] sm:$0xf]  ;;  %v7669_v52 = vor.u32 %v8496_v56, %v7666_v30 }
 0x278   : > { %5179 = vmatpush.bf16.msrb.mxu0 %v7717_v10  ;;  %v4953_v33 = vpop.f32.mrf.mxu2  ;;  %v4929_v41 = vpop.f32.mrf.mxu0  ;;  %v7749_v10 = vor.u32 %v8516_v53, %v7746_v48  ;;  %v7877_v13 = vor.u32 %v8548_v7, %v7874_v37 }
 0x279   : > { %5192 = vmatpush.bf16.msrb.mxu1 %v7781_v40  ;;  %v4954_v54 = vadd.f32 %v4953_v33, %v4941_v18  ;;  %v4966_v34 = vpop.f32.mrf.mxu3  ;;  %v4942_v39 = vpop.f32.mrf.mxu1  ;;  %v7813_v40 = vor.u32 %v8532_v57, %v7810_v61 }
 0x27a   : > { %5205 = vmatpush.bf16.msrb.mxu2 %v7845_v45  ;;  %v8498_v45 = vld [vmem:[%s8663_s20 + $0x1214] sm:$0xf] }
 0x27b   : > { %5218 = vmatpush.bf16.msrb.mxu3 %v7909_v58  ;;  %v4967_v2 = vadd.f32 %v4966_v34, %v4954_v54  ;;  %v8530_v58 = vld [vmem:[%s8663_s20 + $0x1314] sm:$0xf]  ;;  %v7677_v59 = vor.u32 %v8498_v45, %v7674_v46 }
 0x27c   : > { %5180 = vmatpush.bf16.msrb.mxu0 %v7709_v21  ;;  %v7805_v63 = vor.u32 %v8530_v58, %v7802_v47  ;;  %v8512_v21 = vld [vmem:[%s8663_s20 + $0x1284] sm:$0xf] }
 0x27d   : > { %5193 = vmatpush.bf16.msrb.mxu1 %v7773_v3  ;;  %v7869_v3 = vor.u32 %v8546_v49, %v7866_v14 }
 0x27e   : > { %5206 = vmatpush.bf16.msrb.mxu2 %v7837_v31  ;;  %v7730_v31 = vld [vmem:[%s8663_s20 + $0x1288] sm:$0xf0] }
 0x27f   : > { %5219 = vmatpush.bf16.msrb.mxu3 %v7901_v25  ;;  %v8544_v25 = vld [vmem:[%s8663_s20 + $0x1384] sm:$0xf]  ;;  %v7733_v6 = vor.u32 %v8512_v21, %v7730_v31  ;;  %s5357_s20 = sshll.u32 %s10188_s6, 2 }
 0x280   : > { %5181 = vmatpush.bf16.msrb.mxu0 %v7701_v12  ;;  %v4955_v22 = vpop.f32.mrf.mxu2  ;;  %v7861_v55 = vor.u32 %v8544_v25, %v7858_v32  ;;  %v8591_v12 = vld.sshfl [vmem:[#allocation1 + $0x28] sm:$0xff pattern:$0x73625140]  ;;  %s231_s25 = scalar_lea.vmem %s10181_s3, %s5357_s20 }
 0x281   : > { %5194 = vmatpush.bf16.msrb.mxu1 %v7765_v36  ;;  %v4968_v35 = vpop.f32.mrf.mxu3  ;;  %v8593_v36 = vld.sshfl [vmem:[#allocation1 + $0x38] sm:$0xff pattern:$0x73625140] }
 0x282   : > { %5207 = vmatpush.bf16.msrb.mxu2 %v7829_v17 }
 0x283   : > { %5220 = vmatpush.bf16.msrb.mxu3 %v7893_v15 }
 0x284   : > { %5182 = vmatpush.bf16.msrb.mxu0 %v7693_v19 }
 0x285   : > { %5195 = vmatpush.bf16.msrb.mxu1 %v7757_v43 }
 0x286   : > { %5208 = vmatpush.bf16.msrb.mxu2 %v7821_v29 }
 0x287   : > { %5221 = vmatpush.bf16.msrb.mxu3 %v7885_v24 }
 0x288   : > { %5183 = vmatpush.bf16.msrb.mxu0 %v7685_v62 }
 0x289   : > { %5196 = vmatpush.bf16.msrb.mxu1 %v7749_v10 }
 0x28a   : > { %5209 = vmatpush.bf16.msrb.mxu2 %v7813_v40 }
 0x28b   : > { %5222 = vmatpush.bf16.msrb.mxu3 %v7877_v13 }
 0x28c   : > { %5184 = vmatpush.bf16.msrb.mxu0 %v7677_v59 }
 0x28d   : > { %5197 = vmatpush.bf16.msrb.mxu1 %v7741_v27 }
 0x28e   : > { %5210 = vmatpush.bf16.msrb.mxu2 %v7805_v63 }
 0x28f   : > { %5223 = vmatpush.bf16.msrb.mxu3 %v7869_v3 }
 0x290   : > { %5185 = vmatpush.bf16.msrb.mxu0 %v7669_v52  ;;  %v4979_v17 = vpop.f32.mrf.mxu0 }
 0x291   : > { %5198 = vmatpush.bf16.msrb.mxu1 %v7733_v6  ;;  %v4980_v50 = vadd.f32 %v4979_v17, %v4967_v2  ;;  %v4992_v0 = vpop.f32.mrf.mxu1 }
 0x292   : > { %5211 = vmatpush.bf16.msrb.mxu2 %v7797_v8 }
 0x293   : > { %5224 = vmatpush.bf16.msrb.mxu3 %v7861_v55  ;;  %5186 = vmatmul.bf16.vlgmr.msrb.gmra.mxu0 %v8590_v42  ;;  %v4993_v20 = vadd.f32 %v4992_v0, %v4980_v50  ;;  %v5232_v55 = vmul.f32 0.2, %v9795_v4 }
 0x294   : > { %5199 = vmatmul.bf16.vlgmr.msrb.gmra.mxu1 %v8591_v12 }
 0x295   : > { %5212 = vmatmul.bf16.vlgmr.msrb.gmra.mxu2 %v8592_v9  ;;  %v5234_v17 = vsel %vm5230_vm1, %v9795_v4, %v5232_v55 }
 0x296   : > { %5225 = vmatmul.bf16.vlgmr.msrb.gmra.mxu3 %v8593_v36 }
 0x298   : > { %v5005_v15 = vpop.f32.mrf.mxu2  ;;  %v4981_v16 = vpop.f32.mrf.mxu0 }
 0x299   : > { %v5006_v18 = vadd.f32 %v5005_v15, %v4993_v20  ;;  %v5018_v1 = vpop.f32.mrf.mxu3  ;;  %v4994_v60 = vpop.f32.mrf.mxu1 }
 0x29b   : > { %v5019_v28 = vadd.f32 %v5018_v1, %v5006_v18 }
 0x2a0   : > { %v5007_v38 = vpop.f32.mrf.mxu2 }
 0x2a1   : > { %v5020_v19 = vpop.f32.mrf.mxu3 }
 0x2b0   : > { %v5031_v43 = vpop.f32.mrf.mxu0 }
 0x2b1   : > { %v5032_v29 = vadd.f32 %v5031_v43, %v5019_v28  ;;  %v5044_v23 = vpop.f32.mrf.mxu1 }
 0x2b3   : > { %v5045_v44 = vadd.f32 %v5044_v23, %v5032_v29 }
 0x2b8   : > { %v5057_v53 = vpop.f32.mrf.mxu2  ;;  %v5033_v48 = vpop.f32.mrf.mxu0 }
 0x2b9   : > { %v5058_v24 = vadd.f32 %v5057_v53, %v5045_v44  ;;  %v5070_v33 = vpop.f32.mrf.mxu3  ;;  %v5046_v57 = vpop.f32.mrf.mxu1 }
 0x2bb   : > { %v5071_v61 = vadd.f32 %v5070_v33, %v5058_v24 }
 0x2c0   : > { %v5059_v54 = vpop.f32.mrf.mxu2 }
 0x2c1   : > { %v5072_v34 = vpop.f32.mrf.mxu3 }
 0x2d0   : > { %v5083_v7 = vpop.f32.mrf.mxu0 }
 0x2d1   : > { %v5096_v37 = vpop.f32.mrf.mxu1  ;;  %v5084_v11 = vadd.f32 %v5083_v7, %v5071_v61 }
 0x2d3   : > { %v5097_v49 = vadd.f32 %v5096_v37, %v5084_v11 }
 0x2d8   : > { %v5109_v41 = vpop.f32.mrf.mxu2  ;;  %v5085_v39 = vpop.f32.mrf.mxu0 }
 0x2d9   : > { %v5122_v62 = vpop.f32.mrf.mxu3  ;;  %v5098_v2 = vpop.f32.mrf.mxu1  ;;  %v5110_v14 = vadd.f32 %v5109_v41, %v5097_v49 }
 0x2db   : > { %v5123_v63 = vadd.f32 %v5122_v62, %v5110_v14 }
 0x2e0   : > { %v5111_v10 = vpop.f32.mrf.mxu2 }
 0x2e1   : > { %v5124_v40 = vpop.f32.mrf.mxu3 }
 0x2f0   : > { %v5135_v45 = vpop.f32.mrf.mxu0 }
 0x2f1   : > { %v5148_v46 = vpop.f32.mrf.mxu1  ;;  %v5136_v56 = vadd.f32 %v5135_v45, %v5123_v63 }
 0x2f3   : > { %v5149_v30 = vadd.f32 %v5148_v46, %v5136_v56 }
 0x2f8   : > { %v5161_v13 = vpop.f32.mrf.mxu2  ;;  %v5137_v58 = vpop.f32.mrf.mxu0 }
 0x2f9   : > { %v5174_v26 = vpop.f32.mrf.mxu3  ;;  %v5150_v47 = vpop.f32.mrf.mxu1  ;;  %v5162_v21 = vadd.f32 %v5161_v13, %v5149_v30 }
 0x2fb   : > { %v5175_v3 = vadd.f32 %v5174_v26, %v5162_v21 }
 0x300   : > { %v5163_v59 = vpop.f32.mrf.mxu2 }
 0x301   : > { %v5176_v27 = vpop.f32.mrf.mxu3 }
 0x310   : > { %v5187_v31 = vpop.f32.mrf.mxu0 }
 0x311   : > { %v5200_v5 = vpop.f32.mrf.mxu1  ;;  %v5188_v51 = vadd.f32 %v5187_v31, %v5175_v3 }
 0x313   : > { %v5201_v22 = vadd.f32 %v5200_v5, %v5188_v51 }
 0x318   : > { %v5213_v25 = vpop.f32.mrf.mxu2  ;;  %v5189_v52 = vpop.f32.mrf.mxu0 }
 0x319   : > { %v5214_v32 = vadd.f32 %v5213_v25, %v5201_v22  ;;  %v5226_v35 = vpop.f32.mrf.mxu3  ;;  %v5202_v6 = vpop.f32.mrf.mxu1 }
 0x31b   : > { %v5227_v8 = vadd.f32 %v5226_v35, %v5214_v32 }
 0x31d   : > { %vm5231_vm0 = vcmp.ge.f32.partialorder %v5227_v8, 0.0  ;;  %v5233_v42 = vmul.f32 0.2, %v5227_v8 }
 0x31f   : > { %v5235_v12 = vsel %vm5231_vm0, %v5227_v8, %v5233_v42 }
 0x320   : > { %v5238_v9 = vrot.slane %v5235_v12, 4  ;;  %v5215_v36 = vpop.f32.mrf.mxu2 }
 0x321   : > { %v5228_v50 = vpop.f32.mrf.mxu3 }
 0x322   : > { %v5240_v0 = vsel %vm5239_vm2, %v5234_v17, %v5238_v9 }
 0x323   : > { %5242 = vst [vmem:[%s231_s25] sm:$0xff] %v5240_v0 }
 0x324 PF: > { %s13_s14 = sadd.s32 1, %s8616_s14   ;;  %s10183_s12 = smov %s8612_s13 }
 0x325   : > { %p10_p6 = scmp.ge.s32.totalorder %s13_s14, 6   ;;  %s10184_s13 = smov %s10186_s15 }
 0x327   :  { %12 = sbr.rel (!%p10_p6) target bundleno = 2 (0x2), region = 69 }

// kernel: wave_discriminator_block.13
= control target key start
LH: loop header
LB: loop body
LE: loop exit
PB: predicated region body
PF: predicated region fallthrough
CT: control target
= control target key end

     0   :  { %s3555_s1 = inlined_call_operand.vmem [shape: bf16[1,3072,128], index: 1, kind: input, shape index: {}]   ;;  %s3556_s0 = inlined_call_operand.vmem [shape: bf16[1,4,3072], index: 0, kind: input, shape index: {}]   ;;  %s3557_s2 = inlined_call_operand.vmem [shape: f32[1,128], index: 2, kind: input, shape index: {}]   ;;  %s3558_s3 = inlined_call_operand.vmem [shape: f32[4,128], index: 3, kind: output, shape index: {}]  }
   0x1   :  { %v2713_v0 = vld [vmem:[%s3555_s1 + $0x38] sm:$0xff]  ;;  %v2712_v4 = vld [vmem:[%s3555_s1 + $0x30] sm:$0xff]  ;;  %v2711_v8 = vld [vmem:[%s3555_s1 + $0x28] sm:$0xff] }
   0x2   :  { %v2721_v1 = vld [vmem:[%s3555_s1 + $0x78] sm:$0xff]  ;;  %1621 = vmatpush.bf16.msra.mxu0 %v2713_v0  ;;  %v2720_v5 = vld [vmem:[%s3555_s1 + $0x70] sm:$0xff]  ;;  %v2719_v9 = vld [vmem:[%s3555_s1 + $0x68] sm:$0xff] }
   0x3   :  { %v2729_v2 = vld [vmem:[%s3555_s1 + $0xb8] sm:$0xff]  ;;  %1634 = vmatpush.bf16.msra.mxu1 %v2721_v1  ;;  %v2728_v6 = vld [vmem:[%s3555_s1 + $0xb0] sm:$0xff]  ;;  %v2727_v10 = vld [vmem:[%s3555_s1 + $0xa8] sm:$0xff] }
   0x4   :  { %v2737_v3 = vld [vmem:[%s3555_s1 + $0xf8] sm:$0xff]  ;;  %1647 = vmatpush.bf16.msra.mxu2 %v2729_v2  ;;  %v2736_v7 = vld [vmem:[%s3555_s1 + $0xf0] sm:$0xff]  ;;  %v2735_v11 = vld [vmem:[%s3555_s1 + $0xe8] sm:$0xff] }
   0x5   :  { %1660 = vmatpush.bf16.msra.mxu3 %v2737_v3  ;;  %v2710_v12 = vld [vmem:[%s3555_s1 + $0x20] sm:$0xff]  ;;  %v2709_v16 = vld [vmem:[%s3555_s1 + $0x18] sm:$0xff]  ;;  %v2708_v21 = vld [vmem:[%s3555_s1 + $0x10] sm:$0xff] }
   0x6   :  { %1622 = vmatpush.bf16.msra.mxu0 %v2712_v4  ;;  %v2718_v13 = vld [vmem:[%s3555_s1 + $0x60] sm:$0xff]  ;;  %v2717_v17 = vld [vmem:[%s3555_s1 + $0x58] sm:$0xff]  ;;  %v2716_v22 = vld [vmem:[%s3555_s1 + $0x50] sm:$0xff] }
   0x7   :  { %1635 = vmatpush.bf16.msra.mxu1 %v2720_v5  ;;  %v2726_v14 = vld [vmem:[%s3555_s1 + $0xa0] sm:$0xff]  ;;  %v2725_v18 = vld [vmem:[%s3555_s1 + $0x98] sm:$0xff]  ;;  %v2724_v23 = vld [vmem:[%s3555_s1 + $0x90] sm:$0xff] }
   0x8   :  { %1648 = vmatpush.bf16.msra.mxu2 %v2728_v6  ;;  %v2734_v15 = vld [vmem:[%s3555_s1 + $0xe0] sm:$0xff]  ;;  %v2733_v19 = vld [vmem:[%s3555_s1 + $0xd8] sm:$0xff]  ;;  %v2732_v24 = vld [vmem:[%s3555_s1 + $0xd0] sm:$0xff] }
   0x9   :  { %1661 = vmatpush.bf16.msra.mxu3 %v2736_v7  ;;  %v14_v20 = vld [vmem:[%s3556_s0] sm:$0xff]  ;;  %v2707_v25 = vld [vmem:[%s3555_s1 + $0x8] sm:$0xff]  ;;  %v16_v31 = vld [vmem:[%s3556_s0 + $0x10] sm:$0xff] }
   0xa   :  { %1623 = vmatpush.bf16.msra.mxu0 %v2711_v8  ;;  %409 = vst [vmem:[#allocation1] ss:$4 sm:$0xff] %v14_v20  ;;  %v2715_v26 = vld [vmem:[%s3555_s1 + $0x48] sm:$0xff]  ;;  %v2706_v29 = vld [vmem:[%s3555_s1] sm:$0xff]  ;;  %v2745_v38 = vld [vmem:[%s3555_s1 + $0x138] sm:$0xff] }
   0xb   :  { %1636 = vmatpush.bf16.msra.mxu1 %v2719_v9  ;;  %v2723_v27 = vld [vmem:[%s3555_s1 + $0x88] sm:$0xff]  ;;  %v2714_v30 = vld [vmem:[%s3555_s1 + $0x40] sm:$0xff]  ;;  %v2753_v39 = vld [vmem:[%s3555_s1 + $0x178] sm:$0xff] }
   0xc   :  { %1649 = vmatpush.bf16.msra.mxu2 %v2727_v10  ;;  %v2731_v28 = vld [vmem:[%s3555_s1 + $0xc8] sm:$0xff]  ;;  %v2722_v36 = vld [vmem:[%s3555_s1 + $0x80] sm:$0xff]  ;;  %v2761_v40 = vld [vmem:[%s3555_s1 + $0x1b8] sm:$0xff] }
   0xd   :  { %1662 = vmatpush.bf16.msra.mxu3 %v2735_v11  ;;  %v2730_v37 = vld [vmem:[%s3555_s1 + $0xc0] sm:$0xff]  ;;  %v2769_v41 = vld [vmem:[%s3555_s1 + $0x1f8] sm:$0xff]  ;;  %v15_v42 = vld [vmem:[%s3556_s0 + $0x8] sm:$0xff] }
   0xe   :  { %1624 = vmatpush.bf16.msra.mxu0 %v2710_v12  ;;  %412 = vst [vmem:[#allocation1 + $0x20] ss:$4 sm:$0xff] %v15_v42  ;;  %v2744_v43 = vld [vmem:[%s3555_s1 + $0x130] sm:$0xff]  ;;  %v2743_v47 = vld [vmem:[%s3555_s1 + $0x128] sm:$0xff]  ;;  %v17_v54 = vld [vmem:[%s3556_s0 + $0x18] sm:$0xff] }
   0xf   :  { %1637 = vmatpush.bf16.msra.mxu1 %v2718_v13  ;;  %v2752_v44 = vld [vmem:[%s3555_s1 + $0x170] sm:$0xff]  ;;  %v2751_v48 = vld [vmem:[%s3555_s1 + $0x168] sm:$0xff]  ;;  %v2742_v56 = vld [vmem:[%s3555_s1 + $0x120] sm:$0xff] }
  0x10   :  { %1650 = vmatpush.bf16.msra.mxu2 %v2726_v14  ;;  %v2760_v45 = vld [vmem:[%s3555_s1 + $0x1b0] sm:$0xff]  ;;  %v2759_v49 = vld [vmem:[%s3555_s1 + $0x1a8] sm:$0xff]  ;;  %v2750_v57 = vld [vmem:[%s3555_s1 + $0x160] sm:$0xff] }
  0x11   :  { %1663 = vmatpush.bf16.msra.mxu3 %v2734_v15  ;;  %v415_v32 = vld.sshfl [vmem:[#allocation1 + $0x10] sm:$0xff pattern:$0x73625140]  ;;  %v413_v33 = vld.sshfl [vmem:[#allocation1] sm:$0xff pattern:$0x73625140] }
  0x12   :  { %1625 = vmatpush.bf16.msra.mxu0 %v2709_v16  ;;  %v416_v34 = vld.sshfl [vmem:[#allocation1 + $0x18] sm:$0xff pattern:$0x73625140]  ;;  %v414_v35 = vld.sshfl [vmem:[#allocation1 + $0x8] sm:$0xff pattern:$0x73625140] }
  0x13   :  { %1638 = vmatpush.bf16.msra.mxu1 %v2717_v17  ;;  %422 = vst [vmem:[#allocation1] ss:$4 sm:$0xff] %v16_v31  ;;  %v2768_v46 = vld [vmem:[%s3555_s1 + $0x1f0] sm:$0xff]  ;;  %v2767_v50 = vld [vmem:[%s3555_s1 + $0x1e8] sm:$0xff]  ;;  %v2758_v58 = vld [vmem:[%s3555_s1 + $0x1a0] sm:$0xff] }
  0x14   :  { %1651 = vmatpush.bf16.msra.mxu2 %v2725_v18  ;;  %v2766_v59 = vld [vmem:[%s3555_s1 + $0x1e0] sm:$0xff]  ;;  %v2741_v60 = vld [vmem:[%s3555_s1 + $0x118] sm:$0xff]  ;;  %v2740_v0 = vld [vmem:[%s3555_s1 + $0x110] sm:$0xff] }
  0x15   :  { %1664 = vmatpush.bf16.msra.mxu3 %v2733_v19  ;;  %v3060_v51 = vld.sshfl [vmem:[#allocation1 + $0x30] sm:$0xff pattern:$0x73625140]  ;;  %v3062_v52 = vld.sshfl [vmem:[#allocation1 + $0x20] sm:$0xff pattern:$0x73625140] }
  0x16   :  { %1626 = vmatpush.bf16.msra.mxu0 %v2708_v21  ;;  %v3064_v53 = vld.sshfl [vmem:[#allocation1 + $0x38] sm:$0xff pattern:$0x73625140]  ;;  %v3069_v55 = vld.sshfl [vmem:[#allocation1 + $0x28] sm:$0xff pattern:$0x73625140] }
  0x17   :  { %1639 = vmatpush.bf16.msra.mxu1 %v2716_v22  ;;  %424 = vst [vmem:[#allocation1 + $0x20] ss:$4 sm:$0xff] %v17_v54  ;;  %v2749_v61 = vld [vmem:[%s3555_s1 + $0x158] sm:$0xff]  ;;  %v2748_v1 = vld [vmem:[%s3555_s1 + $0x150] sm:$0xff]  ;;  %v2739_v4 = vld [vmem:[%s3555_s1 + $0x108] sm:$0xff] }
  0x18   :  { %1652 = vmatpush.bf16.msra.mxu2 %v2724_v23  ;;  %v2757_v62 = vld [vmem:[%s3555_s1 + $0x198] sm:$0xff]  ;;  %v2756_v2 = vld [vmem:[%s3555_s1 + $0x190] sm:$0xff]  ;;  %v2747_v5 = vld [vmem:[%s3555_s1 + $0x148] sm:$0xff] }
  0x19   :  { %1665 = vmatpush.bf16.msra.mxu3 %v2732_v24  ;;  %v2765_v63 = vld [vmem:[%s3555_s1 + $0x1d8] sm:$0xff]  ;;  %v2764_v3 = vld [vmem:[%s3555_s1 + $0x1d0] sm:$0xff]  ;;  %v2755_v6 = vld [vmem:[%s3555_s1 + $0x188] sm:$0xff] }
  0x1a   :  { %1627 = vmatpush.bf16.msra.mxu0 %v2707_v25  ;;  %v2763_v7 = vld [vmem:[%s3555_s1 + $0x1c8] sm:$0xff]  ;;  %v2738_v8 = vld [vmem:[%s3555_s1 + $0x100] sm:$0xff]  ;;  %v2777_v12 = vld [vmem:[%s3555_s1 + $0x238] sm:$0xff] }
  0x1b   :  { %1640 = vmatpush.bf16.msra.mxu1 %v2715_v26  ;;  %v2746_v9 = vld [vmem:[%s3555_s1 + $0x140] sm:$0xff]  ;;  %v2785_v13 = vld [vmem:[%s3555_s1 + $0x278] sm:$0xff]  ;;  %v2776_v17 = vld [vmem:[%s3555_s1 + $0x230] sm:$0xff] }
  0x1c   :  { %1653 = vmatpush.bf16.msra.mxu2 %v2723_v27  ;;  %v2754_v10 = vld [vmem:[%s3555_s1 + $0x180] sm:$0xff]  ;;  %v2793_v14 = vld [vmem:[%s3555_s1 + $0x2b8] sm:$0xff]  ;;  %v2784_v18 = vld [vmem:[%s3555_s1 + $0x270] sm:$0xff] }
  0x1d   :  { %1666 = vmatpush.bf16.msra.mxu3 %v2731_v28  ;;  %v2762_v11 = vld [vmem:[%s3555_s1 + $0x1c0] sm:$0xff]  ;;  %v2801_v15 = vld [vmem:[%s3555_s1 + $0x2f8] sm:$0xff]  ;;  %v2792_v19 = vld [vmem:[%s3555_s1 + $0x2b0] sm:$0xff] }
  0x1e   :  { %1628 = vmatpush.bf16.msra.mxu0 %v2706_v29  ;;  %v18_v16 = vld [vmem:[%s3556_s0 + $0x20] sm:$0xff]  ;;  %v2800_v20 = vld [vmem:[%s3555_s1 + $0x2f0] sm:$0xff]  ;;  %v3162_v23 = vld.sshfl [vmem:[#allocation1 + $0x8] sm:$0xff pattern:$0x73625140] }
  0x1f   :  { %1641 = vmatpush.bf16.msra.mxu1 %v2714_v30  ;;  %v3158_v21 = vld.sshfl [vmem:[#allocation1] sm:$0xff pattern:$0x73625140]  ;;  %v3160_v22 = vld.sshfl [vmem:[#allocation1 + $0x10] sm:$0xff pattern:$0x73625140] }
  0x20   :  { %1654 = vmatpush.bf16.msra.mxu2 %v2722_v36  ;;  %v3164_v24 = vld.sshfl [vmem:[#allocation1 + $0x18] sm:$0xff pattern:$0x73625140]  ;;  %v2775_v25 = vld [vmem:[%s3555_s1 + $0x228] sm:$0xff]  ;;  %v2774_v29 = vld [vmem:[%s3555_s1 + $0x220] sm:$0xff] }
  0x21   :  { %1667 = vmatpush.bf16.msra.mxu3 %v2730_v37  ;;  %1629 = vmatmul.bf16.vlgmr.msra.gmra.mxu0 %v413_v33  ;;  %434 = vst [vmem:[#allocation1] ss:$4 sm:$0xff] %v18_v16  ;;  %v2783_v26 = vld [vmem:[%s3555_s1 + $0x268] sm:$0xff]  ;;  %v2782_v30 = vld [vmem:[%s3555_s1 + $0x260] sm:$0xff]  ;;  %v2773_v33 = vld [vmem:[%s3555_s1 + $0x218] sm:$0xff] }
  0x22   :  { %1673 = vmatpush.bf16.msrb.mxu0 %v2745_v38  ;;  %1642 = vmatmul.bf16.vlgmr.msra.gmra.mxu1 %v414_v35  ;;  %v2791_v27 = vld [vmem:[%s3555_s1 + $0x2a8] sm:$0xff]  ;;  %v2790_v31 = vld [vmem:[%s3555_s1 + $0x2a0] sm:$0xff]  ;;  %v2789_v35 = vld [vmem:[%s3555_s1 + $0x298] sm:$0xff] }
  0x23   :  { %1686 = vmatpush.bf16.msrb.mxu1 %v2753_v39  ;;  %1655 = vmatmul.bf16.vlgmr.msra.gmra.mxu2 %v415_v32  ;;  %v2799_v28 = vld [vmem:[%s3555_s1 + $0x2e8] sm:$0xff]  ;;  %v2798_v32 = vld [vmem:[%s3555_s1 + $0x2e0] sm:$0xff]  ;;  %v2797_v36 = vld [vmem:[%s3555_s1 + $0x2d8] sm:$0xff] }
  0x24   :  { %1699 = vmatpush.bf16.msrb.mxu2 %v2761_v40  ;;  %1668 = vmatmul.bf16.vlgmr.msra.gmra.mxu3 %v416_v34  ;;  %v2781_v34 = vld [vmem:[%s3555_s1 + $0x258] sm:$0xff]  ;;  %v2772_v37 = vld [vmem:[%s3555_s1 + $0x210] sm:$0xff]  ;;  %v2779_v42 = vld [vmem:[%s3555_s1 + $0x248] sm:$0xff] }
  0x25   :  { %1712 = vmatpush.bf16.msrb.mxu3 %v2769_v41  ;;  %v2780_v38 = vld [vmem:[%s3555_s1 + $0x250] sm:$0xff]  ;;  %v2771_v41 = vld [vmem:[%s3555_s1 + $0x208] sm:$0xff] }
  0x26   :  { %1674 = vmatpush.bf16.msrb.mxu0 %v2744_v43  ;;  %v2788_v39 = vld [vmem:[%s3555_s1 + $0x290] sm:$0xff]  ;;  %v2787_v43 = vld [vmem:[%s3555_s1 + $0x288] sm:$0xff] }
  0x27   :  { %1687 = vmatpush.bf16.msrb.mxu1 %v2752_v44  ;;  %v2796_v40 = vld [vmem:[%s3555_s1 + $0x2d0] sm:$0xff]  ;;  %v2795_v44 = vld [vmem:[%s3555_s1 + $0x2c8] sm:$0xff] }
  0x28   :  { %1700 = vmatpush.bf16.msrb.mxu2 %v2760_v45  ;;  %v2770_v45 = vld [vmem:[%s3555_s1 + $0x200] sm:$0xff]  ;;  %v2808_v54 = vld [vmem:[%s3555_s1 + $0x330] sm:$0xff]  ;;  %v2819_v16 = vld [vmem:[%s3555_s1 + $0x388] sm:$0xff] }
  0x29   :  { %1713 = vmatpush.bf16.msrb.mxu3 %v2768_v46  ;;  %v2778_v46 = vld [vmem:[%s3555_s1 + $0x240] sm:$0xff] }
  0x2a   :  { %1675 = vmatpush.bf16.msrb.mxu0 %v2743_v47  ;;  %v2786_v47 = vld [vmem:[%s3555_s1 + $0x280] sm:$0xff] }
  0x2b   :  { %1688 = vmatpush.bf16.msrb.mxu1 %v2751_v48  ;;  %v2794_v48 = vld [vmem:[%s3555_s1 + $0x2c0] sm:$0xff] }
  0x2c   :  { %1701 = vmatpush.bf16.msrb.mxu2 %v2759_v49  ;;  %v2809_v49 = vld [vmem:[%s3555_s1 + $0x338] sm:$0xff] }
  0x2d   :  { %1714 = vmatpush.bf16.msrb.mxu3 %v2767_v50  ;;  %v2817_v50 = vld [vmem:[%s3555_s1 + $0x378] sm:$0xff] }
  0x2e   :  { %1676 = vmatpush.bf16.msrb.mxu0 %v2742_v56  ;;  %v2824_v56 = vld [vmem:[%s3555_s1 + $0x3b0] sm:$0xff] }
  0x2f   :  { %1689 = vmatpush.bf16.msrb.mxu1 %v2750_v57  ;;  %v2832_v57 = vld [vmem:[%s3555_s1 + $0x3f0] sm:$0xff] }
  0x30   :  { %1702 = vmatpush.bf16.msrb.mxu2 %v2758_v58  ;;  %v3269_v58 = vld.sshfl [vmem:[#allocation1 + $0x20] sm:$0xff pattern:$0x73625140] }
  0x31   :  { %1715 = vmatpush.bf16.msrb.mxu3 %v2766_v59  ;;  %v3271_v59 = vld.sshfl [vmem:[#allocation1 + $0x30] sm:$0xff pattern:$0x73625140] }
  0x32   :  { %1677 = vmatpush.bf16.msrb.mxu0 %v2741_v60  ;;  %v3273_v60 = vld.sshfl [vmem:[#allocation1 + $0x28] sm:$0xff pattern:$0x73625140] }
  0x33   :  { %1690 = vmatpush.bf16.msrb.mxu1 %v2749_v61  ;;  %v3275_v61 = vld.sshfl [vmem:[#allocation1 + $0x38] sm:$0xff pattern:$0x73625140] }
  0x34   :  { %1703 = vmatpush.bf16.msrb.mxu2 %v2757_v62  ;;  %v2807_v62 = vld [vmem:[%s3555_s1 + $0x328] sm:$0xff] }
  0x35   :  { %1716 = vmatpush.bf16.msrb.mxu3 %v2765_v63  ;;  %v2815_v63 = vld [vmem:[%s3555_s1 + $0x368] sm:$0xff] }
  0x36   :  { %1678 = vmatpush.bf16.msrb.mxu0 %v2740_v0  ;;  %v2823_v0 = vld [vmem:[%s3555_s1 + $0x3a8] sm:$0xff] }
  0x37   :  { %1691 = vmatpush.bf16.msrb.mxu1 %v2748_v1  ;;  %v2831_v1 = vld [vmem:[%s3555_s1 + $0x3e8] sm:$0xff] }
  0x38   :  { %1704 = vmatpush.bf16.msrb.mxu2 %v2756_v2  ;;  %v2806_v2 = vld [vmem:[%s3555_s1 + $0x320] sm:$0xff] }
  0x39   :  { %1717 = vmatpush.bf16.msrb.mxu3 %v2764_v3  ;;  %v2814_v3 = vld [vmem:[%s3555_s1 + $0x360] sm:$0xff] }
  0x3a   :  { %1679 = vmatpush.bf16.msrb.mxu0 %v2739_v4  ;;  %v2822_v4 = vld [vmem:[%s3555_s1 + $0x3a0] sm:$0xff] }
  0x3b   :  { %1692 = vmatpush.bf16.msrb.mxu1 %v2747_v5  ;;  %v2830_v5 = vld [vmem:[%s3555_s1 + $0x3e0] sm:$0xff] }
  0x3c   :  { %1705 = vmatpush.bf16.msrb.mxu2 %v2755_v6  ;;  %v2805_v6 = vld [vmem:[%s3555_s1 + $0x318] sm:$0xff] }
  0x3d   :  { %1718 = vmatpush.bf16.msrb.mxu3 %v2763_v7  ;;  %v2813_v7 = vld [vmem:[%s3555_s1 + $0x358] sm:$0xff] }
  0x3e   :  { %1680 = vmatpush.bf16.msrb.mxu0 %v2738_v8  ;;  %v2821_v8 = vld [vmem:[%s3555_s1 + $0x398] sm:$0xff] }
  0x3f   :  { %1693 = vmatpush.bf16.msrb.mxu1 %v2746_v9  ;;  %v2829_v9 = vld [vmem:[%s3555_s1 + $0x3d8] sm:$0xff] }
  0x40   :  { %1706 = vmatpush.bf16.msrb.mxu2 %v2754_v10  ;;  %v2804_v10 = vld [vmem:[%s3555_s1 + $0x310] sm:$0xff] }
  0x41   :  { %1719 = vmatpush.bf16.msrb.mxu3 %v2762_v11  ;;  %1681 = vmatmul.bf16.vlgmr.msrb.gmra.mxu0 %v3062_v52  ;;  %v2833_v52 = vld [vmem:[%s3555_s1 + $0x3f8] sm:$0xff]  ;;  %v2812_v11 = vld [vmem:[%s3555_s1 + $0x350] sm:$0xff] }
  0x42   :  { %1725 = vmatpush.bf16.msra.mxu0 %v2777_v12  ;;  %1694 = vmatmul.bf16.vlgmr.msrb.gmra.mxu1 %v3069_v55  ;;  %v2816_v55 = vld [vmem:[%s3555_s1 + $0x370] sm:$0xff] }
  0x43   :  { %1738 = vmatpush.bf16.msra.mxu1 %v2785_v13  ;;  %1707 = vmatmul.bf16.vlgmr.msrb.gmra.mxu2 %v3060_v51  ;;  %v2825_v51 = vld [vmem:[%s3555_s1 + $0x3b8] sm:$0xff]  ;;  %v2820_v12 = vld [vmem:[%s3555_s1 + $0x390] sm:$0xff] }
  0x44   :  { %1751 = vmatpush.bf16.msra.mxu2 %v2793_v14  ;;  %1720 = vmatmul.bf16.vlgmr.msrb.gmra.mxu3 %v3064_v53  ;;  %v19_v53 = vld [vmem:[%s3556_s0 + $0x28] sm:$0xff]  ;;  %v2828_v13 = vld [vmem:[%s3555_s1 + $0x3d0] sm:$0xff] }
  0x45   :  { %1764 = vmatpush.bf16.msra.mxu3 %v2801_v15  ;;  %436 = vst [vmem:[#allocation1 + $0x20] ss:$4 sm:$0xff] %v19_v53  ;;  %v2803_v14 = vld [vmem:[%s3555_s1 + $0x308] sm:$0xff]  ;;  %v2858_v53 = vld [vmem:[%s3555_s1 + $0x4c0] sm:$0xff] }
  0x46   :  { %1726 = vmatpush.bf16.msra.mxu0 %v2776_v17  ;;  %v2811_v15 = vld [vmem:[%s3555_s1 + $0x348] sm:$0xff] }
  0x47   :  { %1739 = vmatpush.bf16.msra.mxu1 %v2784_v18  ;;  %v2827_v17 = vld [vmem:[%s3555_s1 + $0x3c8] sm:$0xff]  ;;  %v2802_v18 = vld [vmem:[%s3555_s1 + $0x300] sm:$0xff] }
  0x48   :  { %1752 = vmatpush.bf16.msra.mxu2 %v2792_v19  ;;  %v2810_v19 = vld [vmem:[%s3555_s1 + $0x340] sm:$0xff] }
  0x49   :  { %1765 = vmatpush.bf16.msra.mxu3 %v2800_v20  ;;  %v2818_v20 = vld [vmem:[%s3555_s1 + $0x380] sm:$0xff] }
  0x4a   :  { %1727 = vmatpush.bf16.msra.mxu0 %v2775_v25  ;;  %v2865_v25 = vld [vmem:[%s3555_s1 + $0x4f8] sm:$0xff] }
  0x4b   :  { %1740 = vmatpush.bf16.msra.mxu1 %v2783_v26  ;;  %v2840_v26 = vld [vmem:[%s3555_s1 + $0x430] sm:$0xff] }
  0x4c   :  { %1753 = vmatpush.bf16.msra.mxu2 %v2791_v27  ;;  %v2848_v27 = vld [vmem:[%s3555_s1 + $0x470] sm:$0xff] }
  0x4d   :  { %1766 = vmatpush.bf16.msra.mxu3 %v2799_v28  ;;  %v2856_v28 = vld [vmem:[%s3555_s1 + $0x4b0] sm:$0xff] }
  0x4e   :  { %1728 = vmatpush.bf16.msra.mxu0 %v2774_v29  ;;  %v2864_v29 = vld [vmem:[%s3555_s1 + $0x4f0] sm:$0xff] }
  0x4f   :  { %1741 = vmatpush.bf16.msra.mxu1 %v2782_v30  ;;  %v2839_v30 = vld [vmem:[%s3555_s1 + $0x428] sm:$0xff] }
  0x50   :  { %1754 = vmatpush.bf16.msra.mxu2 %v2790_v31  ;;  %v2847_v31 = vld [vmem:[%s3555_s1 + $0x468] sm:$0xff] }
  0x51   :  { %1767 = vmatpush.bf16.msra.mxu3 %v2798_v32  ;;  %v2855_v32 = vld [vmem:[%s3555_s1 + $0x4a8] sm:$0xff] }
  0x52   :  { %1729 = vmatpush.bf16.msra.mxu0 %v2773_v33  ;;  %v2863_v33 = vld [vmem:[%s3555_s1 + $0x4e8] sm:$0xff] }
  0x53   :  { %1742 = vmatpush.bf16.msra.mxu1 %v2781_v34  ;;  %v2838_v34 = vld [vmem:[%s3555_s1 + $0x420] sm:$0xff] }
  0x54   :  { %1755 = vmatpush.bf16.msra.mxu2 %v2789_v35  ;;  %v2846_v35 = vld [vmem:[%s3555_s1 + $0x460] sm:$0xff] }
  0x55   :  { %1768 = vmatpush.bf16.msra.mxu3 %v2797_v36  ;;  %v2854_v36 = vld [vmem:[%s3555_s1 + $0x4a0] sm:$0xff] }
  0x56   :  { %1730 = vmatpush.bf16.msra.mxu0 %v2772_v37  ;;  %v2862_v37 = vld [vmem:[%s3555_s1 + $0x4e0] sm:$0xff] }
  0x57   :  { %1743 = vmatpush.bf16.msra.mxu1 %v2780_v38  ;;  %v2837_v38 = vld [vmem:[%s3555_s1 + $0x418] sm:$0xff] }
  0x58   :  { %1756 = vmatpush.bf16.msra.mxu2 %v2788_v39  ;;  %v2845_v39 = vld [vmem:[%s3555_s1 + $0x458] sm:$0xff] }
  0x59   :  { %1769 = vmatpush.bf16.msra.mxu3 %v2796_v40  ;;  %v2853_v40 = vld [vmem:[%s3555_s1 + $0x498] sm:$0xff] }
  0x5a   :  { %1731 = vmatpush.bf16.msra.mxu0 %v2771_v41  ;;  %v2861_v41 = vld [vmem:[%s3555_s1 + $0x4d8] sm:$0xff] }
  0x5b   :  { %1744 = vmatpush.bf16.msra.mxu1 %v2779_v42  ;;  %v2836_v42 = vld [vmem:[%s3555_s1 + $0x410] sm:$0xff] }
  0x5c   :  { %1757 = vmatpush.bf16.msra.mxu2 %v2787_v43  ;;  %v2844_v43 = vld [vmem:[%s3555_s1 + $0x450] sm:$0xff] }
  0x5d   :  { %1770 = vmatpush.bf16.msra.mxu3 %v2795_v44  ;;  %v2852_v44 = vld [vmem:[%s3555_s1 + $0x490] sm:$0xff] }
  0x5e   :  { %1732 = vmatpush.bf16.msra.mxu0 %v2770_v45  ;;  %v2860_v45 = vld [vmem:[%s3555_s1 + $0x4d0] sm:$0xff] }
  0x5f   :  { %1745 = vmatpush.bf16.msra.mxu1 %v2778_v46  ;;  %v2835_v46 = vld [vmem:[%s3555_s1 + $0x408] sm:$0xff] }
  0x60   :  { %1758 = vmatpush.bf16.msra.mxu2 %v2786_v47  ;;  %v2843_v47 = vld [vmem:[%s3555_s1 + $0x448] sm:$0xff] }
  0x61   :  { %1771 = vmatpush.bf16.msra.mxu3 %v2794_v48  ;;  %1733 = vmatmul.bf16.vlgmr.msra.gmra.mxu0 %v3158_v21  ;;  %v2826_v21 = vld [vmem:[%s3555_s1 + $0x3c0] sm:$0xff]  ;;  %v2851_v48 = vld [vmem:[%s3555_s1 + $0x488] sm:$0xff] }
  0x62   :  { %1777 = vmatpush.bf16.msrb.mxu0 %v2809_v49  ;;  %1746 = vmatmul.bf16.vlgmr.msra.gmra.mxu1 %v3162_v23  ;;  %v2849_v23 = vld [vmem:[%s3555_s1 + $0x478] sm:$0xff]  ;;  %v2859_v49 = vld [vmem:[%s3555_s1 + $0x4c8] sm:$0xff] }
  0x63   :  { %1790 = vmatpush.bf16.msrb.mxu1 %v2817_v50  ;;  %1759 = vmatmul.bf16.vlgmr.msra.gmra.mxu2 %v3160_v22  ;;  %v2841_v22 = vld [vmem:[%s3555_s1 + $0x438] sm:$0xff]  ;;  %v2834_v50 = vld [vmem:[%s3555_s1 + $0x400] sm:$0xff] }
  0x64   :  { %1803 = vmatpush.bf16.msrb.mxu2 %v2825_v51  ;;  %1772 = vmatmul.bf16.vlgmr.msra.gmra.mxu3 %v3164_v24  ;;  %v2857_v24 = vld [vmem:[%s3555_s1 + $0x4b8] sm:$0xff]  ;;  %v2842_v51 = vld [vmem:[%s3555_s1 + $0x440] sm:$0xff] }
  0x65   :  { %1816 = vmatpush.bf16.msrb.mxu3 %v2833_v52  ;;  %v2850_v52 = vld [vmem:[%s3555_s1 + $0x480] sm:$0xff] }
  0x66   :  { %1778 = vmatpush.bf16.msrb.mxu0 %v2808_v54  ;;  %v2873_v54 = vld [vmem:[%s3555_s1 + $0x538] sm:$0xff] }
  0x67   :  { %1791 = vmatpush.bf16.msrb.mxu1 %v2816_v55  ;;  %v2881_v55 = vld [vmem:[%s3555_s1 + $0x578] sm:$0xff] }
  0x68   :  { %1804 = vmatpush.bf16.msrb.mxu2 %v2824_v56  ;;  %v2889_v56 = vld [vmem:[%s3555_s1 + $0x5b8] sm:$0xff] }
  0x69   :  { %1817 = vmatpush.bf16.msrb.mxu3 %v2832_v57  ;;  %v2897_v57 = vld [vmem:[%s3555_s1 + $0x5f8] sm:$0xff] }
  0x6a   :  { %1779 = vmatpush.bf16.msrb.mxu0 %v2807_v62  ;;  %v2872_v62 = vld [vmem:[%s3555_s1 + $0x530] sm:$0xff] }
  0x6b   :  { %1792 = vmatpush.bf16.msrb.mxu1 %v2815_v63  ;;  %v2880_v63 = vld [vmem:[%s3555_s1 + $0x570] sm:$0xff] }
  0x6c   :  { %1805 = vmatpush.bf16.msrb.mxu2 %v2823_v0  ;;  %v2888_v0 = vld [vmem:[%s3555_s1 + $0x5b0] sm:$0xff] }
  0x6d   :  { %1818 = vmatpush.bf16.msrb.mxu3 %v2831_v1  ;;  %v2896_v1 = vld [vmem:[%s3555_s1 + $0x5f0] sm:$0xff] }
  0x6e   :  { %1780 = vmatpush.bf16.msrb.mxu0 %v2806_v2  ;;  %v2871_v2 = vld [vmem:[%s3555_s1 + $0x528] sm:$0xff] }
  0x6f   :  { %1793 = vmatpush.bf16.msrb.mxu1 %v2814_v3  ;;  %v2879_v3 = vld [vmem:[%s3555_s1 + $0x568] sm:$0xff] }
  0x70   :  { %1806 = vmatpush.bf16.msrb.mxu2 %v2822_v4  ;;  %v2898_v4 = vld [vmem:[%s3557_s2] ss:$0 sm:$0xff] }
  0x71   :  { %1819 = vmatpush.bf16.msrb.mxu3 %v2830_v5  ;;  %v2887_v5 = vld [vmem:[%s3555_s1 + $0x5a8] sm:$0xff] }
  0x72   :  { %1781 = vmatpush.bf16.msrb.mxu0 %v2805_v6  ;;  %v2895_v6 = vld [vmem:[%s3555_s1 + $0x5e8] sm:$0xff] }
  0x73   :  { %1794 = vmatpush.bf16.msrb.mxu1 %v2813_v7 }
  0x74   :  { %1807 = vmatpush.bf16.msrb.mxu2 %v2821_v8  ;;  %v2870_v8 = vld [vmem:[%s3555_s1 + $0x520] sm:$0xff] }
  0x75   :  { %1820 = vmatpush.bf16.msrb.mxu3 %v2829_v9  ;;  %v2878_v9 = vld [vmem:[%s3555_s1 + $0x560] sm:$0xff] }
  0x76   :  { %1782 = vmatpush.bf16.msrb.mxu0 %v2804_v10 }
  0x77   :  { %1795 = vmatpush.bf16.msrb.mxu1 %v2812_v11 }
  0x78   :  { %1808 = vmatpush.bf16.msrb.mxu2 %v2820_v12  ;;  %v2886_v12 = vld [vmem:[%s3555_s1 + $0x5a0] sm:$0xff] }
  0x79   :  { %1821 = vmatpush.bf16.msrb.mxu3 %v2828_v13  ;;  %v2894_v13 = vld [vmem:[%s3555_s1 + $0x5e0] sm:$0xff] }
  0x7a   :  { %1783 = vmatpush.bf16.msrb.mxu0 %v2803_v14 }
  0x7b   :  { %1796 = vmatpush.bf16.msrb.mxu1 %v2811_v15  ;;  %v2869_v15 = vld [vmem:[%s3555_s1 + $0x518] sm:$0xff] }
  0x7c   :  { %1809 = vmatpush.bf16.msrb.mxu2 %v2819_v16  ;;  %v2877_v16 = vld [vmem:[%s3555_s1 + $0x558] sm:$0xff] }
  0x7d   :  { %1822 = vmatpush.bf16.msrb.mxu3 %v2827_v17  ;;  %v2885_v17 = vld [vmem:[%s3555_s1 + $0x598] sm:$0xff] }
  0x7e   :  { %1784 = vmatpush.bf16.msrb.mxu0 %v2802_v18  ;;  %v2893_v18 = vld [vmem:[%s3555_s1 + $0x5d8] sm:$0xff] }
  0x7f   :  { %1797 = vmatpush.bf16.msrb.mxu1 %v2810_v19 }
  0x80   :  { %1810 = vmatpush.bf16.msrb.mxu2 %v2818_v20 }
  0x81   :  { %1823 = vmatpush.bf16.msrb.mxu3 %v2826_v21  ;;  %1785 = vmatmul.bf16.vlgmr.msrb.gmra.mxu0 %v3269_v58  ;;  %v437_v58 = vld.sshfl [vmem:[#allocation1] sm:$0xff pattern:$0x73625140] }
  0x82   :  { %1829 = vmatpush.bf16.msra.mxu0 %v2841_v22  ;;  %1798 = vmatmul.bf16.vlgmr.msrb.gmra.mxu1 %v3273_v60  ;;  %v438_v60 = vld.sshfl [vmem:[#allocation1 + $0x8] sm:$0xff pattern:$0x73625140] }
  0x83   :  { %1842 = vmatpush.bf16.msra.mxu1 %v2849_v23  ;;  %1811 = vmatmul.bf16.vlgmr.msrb.gmra.mxu2 %v3271_v59  ;;  %v439_v59 = vld.sshfl [vmem:[#allocation1 + $0x10] sm:$0xff pattern:$0x73625140] }
  0x84   :  { %1855 = vmatpush.bf16.msra.mxu2 %v2857_v24  ;;  %1824 = vmatmul.bf16.vlgmr.msrb.gmra.mxu3 %v3275_v61  ;;  %v440_v61 = vld.sshfl [vmem:[#allocation1 + $0x18] sm:$0xff pattern:$0x73625140]  ;;  %v2868_v23 = vld [vmem:[%s3555_s1 + $0x510] sm:$0xff] }
  0x85   :  { %1868 = vmatpush.bf16.msra.mxu3 %v2865_v25  ;;  %v2876_v24 = vld [vmem:[%s3555_s1 + $0x550] sm:$0xff] }
  0x86   :  { %1830 = vmatpush.bf16.msra.mxu0 %v2840_v26 }
  0x87   :  { %1843 = vmatpush.bf16.msra.mxu1 %v2848_v27  ;;  %v2884_v27 = vld [vmem:[%s3555_s1 + $0x590] sm:$0xff] }
  0x88   :  { %1856 = vmatpush.bf16.msra.mxu2 %v2856_v28  ;;  %v2892_v28 = vld [vmem:[%s3555_s1 + $0x5d0] sm:$0xff] }
  0x89   :  { %1869 = vmatpush.bf16.msra.mxu3 %v2864_v29  ;;  %v2867_v29 = vld [vmem:[%s3555_s1 + $0x508] sm:$0xff] }
  0x8a   :  { %1831 = vmatpush.bf16.msra.mxu0 %v2839_v30  ;;  %v2875_v30 = vld [vmem:[%s3555_s1 + $0x548] sm:$0xff] }
  0x8b   :  { %1844 = vmatpush.bf16.msra.mxu1 %v2847_v31  ;;  %v2883_v31 = vld [vmem:[%s3555_s1 + $0x588] sm:$0xff] }
  0x8c   :  { %1857 = vmatpush.bf16.msra.mxu2 %v2855_v32  ;;  %v2891_v32 = vld [vmem:[%s3555_s1 + $0x5c8] sm:$0xff] }
  0x8d   :  { %1870 = vmatpush.bf16.msra.mxu3 %v2863_v33 }
  0x8e   :  { %1832 = vmatpush.bf16.msra.mxu0 %v2838_v34 }
  0x8f   :  { %1845 = vmatpush.bf16.msra.mxu1 %v2846_v35  ;;  %v2866_v35 = vld [vmem:[%s3555_s1 + $0x500] sm:$0xff] }
  0x90   :  { %1858 = vmatpush.bf16.msra.mxu2 %v2854_v36  ;;  %v2874_v36 = vld [vmem:[%s3555_s1 + $0x540] sm:$0xff] }
  0x91   :  { %1871 = vmatpush.bf16.msra.mxu3 %v2862_v37  ;;  %v2882_v37 = vld [vmem:[%s3555_s1 + $0x580] sm:$0xff] }
  0x92   :  { %1833 = vmatpush.bf16.msra.mxu0 %v2837_v38  ;;  %v2890_v38 = vld [vmem:[%s3555_s1 + $0x5c0] sm:$0xff] }
  0x93   :  { %1846 = vmatpush.bf16.msra.mxu1 %v2845_v39  ;;  %v441_v39 = vld.sshfl [vmem:[#allocation1 + $0x20] sm:$0xff pattern:$0x73625140] }
  0x94   :  { %1859 = vmatpush.bf16.msra.mxu2 %v2853_v40  ;;  %v442_v40 = vld.sshfl [vmem:[#allocation1 + $0x28] sm:$0xff pattern:$0x73625140] }
  0x95   :  { %1872 = vmatpush.bf16.msra.mxu3 %v2861_v41  ;;  %v443_v41 = vld.sshfl [vmem:[#allocation1 + $0x30] sm:$0xff pattern:$0x73625140] }
  0x96   :  { %1834 = vmatpush.bf16.msra.mxu0 %v2836_v42  ;;  %v444_v42 = vld.sshfl [vmem:[#allocation1 + $0x38] sm:$0xff pattern:$0x73625140] }
  0x97   :  { %1847 = vmatpush.bf16.msra.mxu1 %v2844_v43 }
  0x98   :  { %1860 = vmatpush.bf16.msra.mxu2 %v2852_v44 }
  0x99   :  { %1873 = vmatpush.bf16.msra.mxu3 %v2860_v45 }
  0x9a   :  { %1835 = vmatpush.bf16.msra.mxu0 %v2835_v46 }
  0x9b   :  { %1848 = vmatpush.bf16.msra.mxu1 %v2843_v47 }
  0x9c   :  { %1861 = vmatpush.bf16.msra.mxu2 %v2851_v48 }
  0x9d   :  { %1874 = vmatpush.bf16.msra.mxu3 %v2859_v49 }
  0x9e   :  { %1836 = vmatpush.bf16.msra.mxu0 %v2834_v50  ;;  %v1630_v7 = vpop.f32.mrf.mxu0 }
  0x9f   :  { %1849 = vmatpush.bf16.msra.mxu1 %v2842_v51  ;;  %v1631_v10 = vadd.f32 %v2898_v4, %v1630_v7  ;;  %v1643_v11 = vpop.f32.mrf.mxu1 }
  0xa0   :  { %1862 = vmatpush.bf16.msra.mxu2 %v2850_v52 }
  0xa1   :  { %1875 = vmatpush.bf16.msra.mxu3 %v2858_v53  ;;  %1837 = vmatmul.bf16.vlgmr.msra.gmra.mxu0 %v437_v58  ;;  %v1644_v14 = vadd.f32 %v1643_v11, %v1631_v10 }
  0xa2   :  { %1881 = vmatpush.bf16.msrb.mxu0 %v2873_v54  ;;  %1850 = vmatmul.bf16.vlgmr.msra.gmra.mxu1 %v438_v60 }
  0xa3   :  { %1894 = vmatpush.bf16.msrb.mxu1 %v2881_v55  ;;  %1863 = vmatmul.bf16.vlgmr.msra.gmra.mxu2 %v439_v59 }
  0xa4   :  { %1907 = vmatpush.bf16.msrb.mxu2 %v2889_v56  ;;  %1876 = vmatmul.bf16.vlgmr.msra.gmra.mxu3 %v440_v61 }
  0xa5   :  { %1920 = vmatpush.bf16.msrb.mxu3 %v2897_v57 }
  0xa6   :  { %1882 = vmatpush.bf16.msrb.mxu0 %v2872_v62  ;;  %v1656_v19 = vpop.f32.mrf.mxu2  ;;  %v1632_v22 = vpop.f32.mrf.mxu0 }
  0xa7   :  { %1895 = vmatpush.bf16.msrb.mxu1 %v2880_v63  ;;  %v1657_v20 = vadd.f32 %v1656_v19, %v1644_v14  ;;  %v1669_v21 = vpop.f32.mrf.mxu3  ;;  %v1645_v26 = vpop.f32.mrf.mxu1 }
  0xa8   :  { %1908 = vmatpush.bf16.msrb.mxu2 %v2888_v0 }
  0xa9   :  { %1921 = vmatpush.bf16.msrb.mxu3 %v2896_v1  ;;  %v1670_v25 = vadd.f32 %v1669_v21, %v1657_v20 }
  0xaa   :  { %1883 = vmatpush.bf16.msrb.mxu0 %v2871_v2 }
  0xab   :  { %1896 = vmatpush.bf16.msrb.mxu1 %v2879_v3 }
  0xac   :  { %1909 = vmatpush.bf16.msrb.mxu2 %v2887_v5 }
  0xad   :  { %1922 = vmatpush.bf16.msrb.mxu3 %v2895_v6 }
  0xae   :  { %1884 = vmatpush.bf16.msrb.mxu0 %v2870_v8  ;;  %v1658_v33 = vpop.f32.mrf.mxu2 }
  0xaf   :  { %1897 = vmatpush.bf16.msrb.mxu1 %v2878_v9  ;;  %v1671_v34 = vpop.f32.mrf.mxu3 }
  0xb0   :  { %1910 = vmatpush.bf16.msrb.mxu2 %v2886_v12 }
  0xb1   :  { %1923 = vmatpush.bf16.msrb.mxu3 %v2894_v13 }
  0xb2   :  { %1885 = vmatpush.bf16.msrb.mxu0 %v2869_v15 }
  0xb3   :  { %1898 = vmatpush.bf16.msrb.mxu1 %v2877_v16 }
  0xb4   :  { %1911 = vmatpush.bf16.msrb.mxu2 %v2885_v17 }
  0xb5   :  { %1924 = vmatpush.bf16.msrb.mxu3 %v2893_v18 }
  0xb6   :  { %1886 = vmatpush.bf16.msrb.mxu0 %v2868_v23 }
  0xb7   :  { %1899 = vmatpush.bf16.msrb.mxu1 %v2876_v24 }
  0xb8   :  { %1912 = vmatpush.bf16.msrb.mxu2 %v2884_v27 }
  0xb9   :  { %1925 = vmatpush.bf16.msrb.mxu3 %v2892_v28 }
  0xba   :  { %1887 = vmatpush.bf16.msrb.mxu0 %v2867_v29 }
  0xbb   :  { %1900 = vmatpush.bf16.msrb.mxu1 %v2875_v30 }
  0xbc   :  { %1913 = vmatpush.bf16.msrb.mxu2 %v2883_v31 }
  0xbd   :  { %1926 = vmatpush.bf16.msrb.mxu3 %v2891_v32 }
  0xbe   :  { %1888 = vmatpush.bf16.msrb.mxu0 %v2866_v35  ;;  %v1682_v43 = vpop.f32.mrf.mxu0 }
  0xbf   :  { %1901 = vmatpush.bf16.msrb.mxu1 %v2874_v36  ;;  %v1683_v44 = vadd.f32 %v1682_v43, %v1670_v25  ;;  %v1695_v45 = vpop.f32.mrf.mxu1 }
  0xc0   :  { %1914 = vmatpush.bf16.msrb.mxu2 %v2882_v37 }
  0xc1   :  { %1927 = vmatpush.bf16.msrb.mxu3 %v2890_v38  ;;  %1889 = vmatmul.bf16.vlgmr.msrb.gmra.mxu0 %v441_v39  ;;  %v1696_v46 = vadd.f32 %v1695_v45, %v1683_v44 }
  0xc2   :  { %1902 = vmatmul.bf16.vlgmr.msrb.gmra.mxu1 %v442_v40 }
  0xc3   :  { %1915 = vmatmul.bf16.vlgmr.msrb.gmra.mxu2 %v443_v41 }
  0xc4   :  { %1928 = vmatmul.bf16.vlgmr.msrb.gmra.mxu3 %v444_v42 }
  0xc6   :  { %v1708_v47 = vpop.f32.mrf.mxu2  ;;  %v1684_v50 = vpop.f32.mrf.mxu0 }
  0xc7   :  { %v1709_v48 = vadd.f32 %v1708_v47, %v1696_v46  ;;  %v1721_v49 = vpop.f32.mrf.mxu3  ;;  %v1697_v52 = vpop.f32.mrf.mxu1 }
  0xc9   :  { %v1722_v51 = vadd.f32 %v1721_v49, %v1709_v48 }
  0xce   :  { %v1710_v53 = vpop.f32.mrf.mxu2 }
  0xcf   :  { %v1723_v54 = vpop.f32.mrf.mxu3 }
  0xde   :  { %v1734_v55 = vpop.f32.mrf.mxu0 }
  0xdf   :  { %v1735_v56 = vadd.f32 %v1734_v55, %v1722_v51  ;;  %v1747_v57 = vpop.f32.mrf.mxu1 }
  0xe1   :  { %v1748_v58 = vadd.f32 %v1747_v57, %v1735_v56 }
  0xe6   :  { %v1760_v59 = vpop.f32.mrf.mxu2  ;;  %v1736_v62 = vpop.f32.mrf.mxu0 }
  0xe7   :  { %v1761_v60 = vadd.f32 %v1760_v59, %v1748_v58  ;;  %v1773_v61 = vpop.f32.mrf.mxu3  ;;  %v1749_v0 = vpop.f32.mrf.mxu1 }
  0xe9   :  { %v1774_v63 = vadd.f32 %v1773_v61, %v1761_v60 }
  0xee   :  { %v1762_v1 = vpop.f32.mrf.mxu2 }
  0xef   :  { %v1775_v2 = vpop.f32.mrf.mxu3 }
  0xfe   :  { %v1786_v3 = vpop.f32.mrf.mxu0 }
  0xff   :  { %v1799_v4 = vpop.f32.mrf.mxu1  ;;  %v1787_v14 = vadd.f32 %v1786_v3, %v1774_v63 }
 0x101   :  { %v1800_v18 = vadd.f32 %v1799_v4, %v1787_v14 }
 0x106   :  { %v1812_v5 = vpop.f32.mrf.mxu2  ;;  %v1788_v7 = vpop.f32.mrf.mxu0 }
 0x107   :  { %v1825_v6 = vpop.f32.mrf.mxu3  ;;  %v1801_v8 = vpop.f32.mrf.mxu1  ;;  %v1813_v19 = vadd.f32 %v1812_v5, %v1800_v18 }
 0x109   :  { %v1826_v22 = vadd.f32 %v1825_v6, %v1813_v19 }
 0x10e   :  { %v1814_v9 = vpop.f32.mrf.mxu2 }
 0x10f   :  { %v1827_v10 = vpop.f32.mrf.mxu3 }
 0x11e   :  { %v1838_v11 = vpop.f32.mrf.mxu0 }
 0x11f   :  { %v1851_v12 = vpop.f32.mrf.mxu1  ;;  %v1839_v23 = vadd.f32 %v1838_v11, %v1826_v22 }
 0x121   :  { %v1852_v24 = vadd.f32 %v1851_v12, %v1839_v23 }
 0x126   :  { %v1864_v13 = vpop.f32.mrf.mxu2  ;;  %v1840_v16 = vpop.f32.mrf.mxu0 }
 0x127   :  { %v1877_v15 = vpop.f32.mrf.mxu3  ;;  %v1853_v17 = vpop.f32.mrf.mxu1  ;;  %v1865_v25 = vadd.f32 %v1864_v13, %v1852_v24 }
 0x129   :  { %v1878_v26 = vadd.f32 %v1877_v15, %v1865_v25 }
 0x12e   :  { %v1866_v20 = vpop.f32.mrf.mxu2 }
 0x12f   :  { %v1879_v21 = vpop.f32.mrf.mxu3 }
 0x13e   :  { %v1890_v27 = vpop.f32.mrf.mxu0 }
 0x13f   :  { %v1903_v28 = vpop.f32.mrf.mxu1  ;;  %v1891_v29 = vadd.f32 %v1890_v27, %v1878_v26 }
 0x141   :  { %v1904_v30 = vadd.f32 %v1903_v28, %v1891_v29 }
 0x146   :  { %v1916_v31 = vpop.f32.mrf.mxu2  ;;  %v1892_v34 = vpop.f32.mrf.mxu0 }
 0x147   :  { %v1929_v32 = vpop.f32.mrf.mxu3  ;;  %v1917_v33 = vadd.f32 %v1916_v31, %v1904_v30  ;;  %v1905_v35 = vpop.f32.mrf.mxu1 }
 0x149   :  { %v1930_v36 = vadd.f32 %v1929_v32, %v1917_v33 }
 0x14b   :  { %1933 = vst [vmem:[%s3558_s3] sm:$0xf] %v1930_v36 }
 0x14e   :  { %v1918_v37 = vpop.f32.mrf.mxu2 }
 0x14f   :  { %v1931_v38 = vpop.f32.mrf.mxu3 }

</bundles_post_ra>
